<compile_context>
chip_gen: v7x
topology: tpu7x:2x2x1
jax: 0.10.0
libtpu: 0.0.40
codegen_flags: <defaults>
</compile_context>

<pallas_src>
import numpy as np
import jax
import jax.numpy as jnp
from jax import lax
from jax.experimental import pallas as pl
from jax.experimental.pallas import tpu as pltpu


# ----------------------------------------------------------------------------
# Fused kernel: conv1 -> pool -> conv2 -> pool -> fc1 -> relu -> fc2
# ----------------------------------------------------------------------------
def _fused_forward_kernel(x1_ref, m1_ref, b1_ref, m2_ref, b2_ref,
                          wcat_ref, bfc1_ref, ws_ref, wfc2_ref, bfc2_ref,
                          o_ref, lhs2_s, y2_s):
    f32 = jnp.float32
    bf16 = jnp.bfloat16
    bblk = o_ref.shape[0]                      # images in this batch block

    # 16x16 one-row shift matrices (exact 0/1; applied with tiny MXU dots so
    # no unaligned sublane loads/stores are needed for the conv2 borders).
    r16 = lax.broadcasted_iota(jnp.int32, (16, 16), 0)
    c16 = lax.broadcasted_iota(jnp.int32, (16, 16), 1)
    sdown = jnp.where(r16 == c16 + 1, 1.0, 0.0).astype(bf16)   # row i <- y[i-1]
    sup = jnp.where(c16 == r16 + 1, 1.0, 0.0).astype(bf16)     # row i <- y[i+1]

    # ---- conv1: one matmul for the whole batch block -----------------------
    # x1 rows (per image, 64): [even conv rows in pooled order; odd conv rows],
    # each row = [tap0 | tap1 | tap2], 256 lanes per tap.
    acc1 = jnp.dot(x1_ref[...], m1_ref[...], preferred_element_type=f32)
    b1 = b1_ref[...]                                            # (1, 512)

    for i in range(bblk):                                       # static unroll
        a = acc1[i * 64:(i + 1) * 64]                           # (64, 1024)
        pr = jnp.maximum(a[:32], a[32:])                        # row pool
        pc = jnp.maximum(pr[:, :512], pr[:, 512:])              # col pool
        y1 = jnp.maximum(pc + b1, 0.0).astype(bf16)             # (32, 512)
        y1e = y1[:16]                                           # pooled rows 0,2,..,30
        y1o = y1[16:]                                           # pooled rows 1,3,..,31
        sd_y1o = jnp.dot(sdown, y1o, preferred_element_type=f32).astype(bf16)
        su_y1e = jnp.dot(sup, y1e, preferred_element_type=f32).astype(bf16)
        # conv2 LHS for this image: even output rows then odd output rows,
        # each row = [tap0 | tap1 | tap2] of 512 lanes (all stores tile-aligned).
        b0 = i * 32
        lhs2_s[b0:b0 + 16, 0:512] = sd_y1o
        lhs2_s[b0:b0 + 16, 512:1024] = y1e
        lhs2_s[b0:b0 + 16, 1024:1536] = y1o
        lhs2_s[b0 + 16:b0 + 32, 0:512] = y1e
        lhs2_s[b0 + 16:b0 + 32, 512:1024] = y1o
        lhs2_s[b0 + 16:b0 + 32, 1024:1536] = su_y1e

    # ---- conv2: one matmul for the whole batch block -----------------------
    acc2 = jnp.dot(lhs2_s[...], m2_ref[...], preferred_element_type=f32)
    b2 = b2_ref[...]
    for i in range(bblk):
        a = acc2[i * 32:(i + 1) * 32]                           # (32, 1024)
        pr = jnp.maximum(a[:16], a[16:])
        pc = jnp.maximum(pr[:, :512], pr[:, 512:])
        y2 = jnp.maximum(pc + b2, 0.0).astype(bf16)             # (16, 512)
        y2_s[i * 16:(i + 1) * 16, :] = y2

    # ---- FC head (flatten folded into a block-diagonal matmul) -------------
    # Z[i*16+h, h*64+o] = y2_i[h, :] . wfc1_block_h[:, o]
    z = jnp.dot(y2_s[...], wcat_ref[...], preferred_element_type=f32)
    rows = lax.broadcasted_iota(jnp.int32, (bblk * 16, 1024), 0)
    lanes = lax.broadcasted_iota(jnp.int32, (bblk * 16, 1024), 1)
    zm = jnp.where(jnp.right_shift(lanes, 6) == jnp.bitwise_and(rows, 15),
                   z, 0.0)
    # Per-image sum over its 16 rows (segment-sum expressed as a tiny matmul).
    sr = lax.broadcasted_iota(jnp.int32, (bblk, bblk * 16), 0)
    sc = lax.broadcasted_iota(jnp.int32, (bblk, bblk * 16), 1)
    seg = jnp.where(jnp.right_shift(sc, 4) == sr, 1.0, 0.0)     # (bblk, bblk*16)
    v = jnp.dot(seg, zm, preferred_element_type=f32)            # (bblk, 1024)
    # Sum over the 16 lane groups with a 1024x128 selection matrix -> fc1.
    h1 = jnp.dot(v, ws_ref[...], preferred_element_type=f32) + bfc1_ref[...]
    h1 = jnp.maximum(h1, 0.0)                                   # (bblk, 128)
    out = jnp.dot(h1, wfc2_ref[...], preferred_element_type=f32) + bfc2_ref[...]
    o_ref[...] = out.astype(o_ref.dtype)                        # (bblk, 128)


# ----------------------------------------------------------------------------
# Wrapper
# ----------------------------------------------------------------------------
def _build_conv1_lhs(x_nchw):
    """(B,3,64,64) NCHW -> (B*64, 768) bf16 conv1 LHS.

    Per image, the 64 LHS rows are [even conv rows in pooled order
    0,2,..,30,1,3,..,31 ; the matching odd conv rows], and each row is
    [tap0 | tap1 | tap2] with every tap the zero-padded input row flattened
    width-major / channel-minor and lane-padded 192 -> 256.
    """
    B = x_nchw.shape[0]
    rows = jnp.transpose(x_nchw, (0, 2, 3, 1)).reshape(B, 64, 64 * 3)
    rows_p = jnp.pad(rows, ((0, 0), (1, 1), (0, 256 - 192)))    # (B, 66, 256)
    p_perm = np.concatenate([np.arange(0, 32, 2), np.arange(1, 32, 2)])
    conv_rows = np.concatenate([2 * p_perm, 2 * p_perm + 1])    # (64,)
    idx = conv_rows[:, None] + np.arange(3)[None, :]            # (64, 3)
    taps = rows_p[:, idx, :]                                    # (B, 64, 3, 256)
    return taps.reshape(B * 64, 3 * 256).astype(jnp.bfloat16)


def exercise1_cnn_forward(x_nchw, p):
    B = x_nchw.shape[0]
    bblk = B if B <= 8 else 8
    Bp = ((B + bblk - 1) // bblk) * bblk
    if Bp != B:
        x_nchw = jnp.pad(x_nchw, ((0, Bp - B), (0, 0), (0, 0), (0, 0)))
    nb = Bp // bblk

    x1 = _build_conv1_lhs(x_nchw)                               # (Bp*64, 768)

    const = lambda i: (0, 0)
    out = pl.pallas_call(
        _fused_forward_kernel,
        out_shape=jax.ShapeDtypeStruct((Bp, 128), jnp.float32),
        grid=(nb,),
        in_specs=[
            pl.BlockSpec((bblk * 64, 768), lambda i: (i, 0)),   # conv1 LHS
            pl.BlockSpec((768, 1024), const),                   # m1 (banded, flat)
            pl.BlockSpec((1, 512), const),                      # bias1 tile
            pl.BlockSpec((1536, 1024), const),                  # m2 (banded, flat)
            pl.BlockSpec((1, 512), const),                      # bias2 tile
            pl.BlockSpec((512, 1024), const),                   # wcat (fc1 blocks)
            pl.BlockSpec((1, 128), const),                      # bfc1 (padded)
            pl.BlockSpec((1024, 128), const),                   # lane-group selector
            pl.BlockSpec((128, 128), const),                    # wfc2 (padded)
            pl.BlockSpec((1, 128), const),                      # bfc2 (padded)
        ],
        out_specs=pl.BlockSpec((bblk, 128), lambda i: (i, 0)),
        scratch_shapes=[
            pltpu.VMEM((bblk * 32, 1536), jnp.bfloat16),        # conv2 LHS
            pltpu.VMEM((bblk * 16, 512), jnp.bfloat16),         # conv2 pooled out
        ],
        compiler_params=pltpu.CompilerParams(
            # Note: pltpu.CORE_PARALLEL would split batch blocks across v7x's
            # two TensorCores; "parallel" is kept for portability (at small B
            # the whole batch is a single grid step anyway).
            dimension_semantics=("parallel",),
            vmem_limit_bytes=32 * 1024 * 1024,  # actual need ~16 MiB + margin
        ),
    )(x1, p["m1"], p["b1"], p["m2"], p["b2"],
      p["wcat"], p["bfc1"], p["ws"], p["wfc2"], p["bfc2"])
    return out[:B, :2]


# ----------------------------------------------------------------------------
# One-time parameter repacking (outside jit)
# ----------------------------------------------------------------------------
def _banded_conv_weights(w_oihw, width):
    """Fold im2col + pool-friendly column order into the weights.

    Returns (3, Kp, N) f32 with
      input  lane k = w_in * Cin + ci,
      output lane n = s*(W/2*Cout) + w2*Cout + co   (w_out = 2*w2 + s),
    Kp = W*Cin rounded up to a multiple of 128.
    """
    Cout, Cin, _, _ = w_oihw.shape
    Wh = width // 2
    K = width * Cin
    N = width * Cout
    w_in = jnp.arange(width)
    w_out = jnp.arange(width)
    mats = []
    for dy in range(3):
        m = jnp.zeros((width, Cin, width, Cout), jnp.float32)
        for dx in range(3):
            sel = (w_in[:, None] == (w_out[None, :] + dx - 1)).astype(jnp.float32)
            blk = w_oihw[:, :, dy, dx].T                        # (Cin, Cout)
            m = m + sel[:, None, :, None] * blk[None, :, None, :]
        m = m.reshape(width, Cin, Wh, 2, Cout)
        m = jnp.transpose(m, (0, 1, 3, 2, 4)).reshape(K, N)
        mats.append(m)
    banded = jnp.stack(mats, axis=0)
    Kp = ((K + 127) // 128) * 128
    if Kp != K:
        banded = jnp.pad(banded, ((0, 0), (0, Kp - K), (0, 0)))
    return banded


def prepare_params(raw):
    """Repack PyTorch-layout params for the fused kernel (runs once)."""
    f32 = jnp.float32
    bf16 = jnp.bfloat16

    m1 = _banded_conv_weights(raw["w1"], 64)                    # (3, 256, 1024)
    m2 = _banded_conv_weights(raw["w2"], 32)                    # (3, 512, 1024)

    # fc1 rows: NCHW-flatten order -> NHWC-flatten order, then grouped so that
    # wcat[:, h*64+o] = wfc1_nhwc[h*512:(h+1)*512, o].
    wfc1 = raw["wfc1"].reshape(32, 16, 16, 64)                  # (C, H, W, out)
    wfc1 = jnp.transpose(wfc1, (1, 2, 0, 3)).reshape(16 * 16 * 32, 64)
    wcat = wfc1.reshape(16, 512, 64)
    wcat = jnp.transpose(wcat, (1, 0, 2)).reshape(512, 16 * 64)

    # 1024x128 selection matrix summing the 16 lane groups back to 64 lanes.
    ws = jnp.tile(jnp.eye(64, dtype=f32), (16, 1))              # (1024, 64)
    ws = jnp.pad(ws, ((0, 0), (0, 64)))                         # (1024, 128)

    wfc2p = jnp.zeros((128, 128), f32).at[:64, :2].set(raw["wfc2"])

    return {
        "m1": m1.reshape(3 * 256, 1024).astype(bf16),
        "b1": jnp.tile(raw["b1"], 32).reshape(1, 512).astype(f32),
        "m2": m2.reshape(3 * 512, 1024).astype(bf16),
        "b2": jnp.tile(raw["b2"], 16).reshape(1, 512).astype(f32),
        "wcat": wcat.astype(bf16),
        "bfc1": jnp.pad(raw["bfc1"], (0, 64)).reshape(1, 128).astype(f32),
        "ws": ws,
        "wfc2": wfc2p,
        "bfc2": jnp.pad(raw["bfc2"], (0, 126)).reshape(1, 128).astype(f32),
    }


# ----------------------------------------------------------------------------
# Plain-JAX f32 reference (PyTorch semantics) + synthetic init
# ----------------------------------------------------------------------------
def reference_forward(x_nchw, raw):
    def conv(x, w, b):
        y = lax.conv_general_dilated(
            x, w, window_strides=(1, 1), padding=((1, 1), (1, 1)),
            dimension_numbers=("NCHW", "OIHW", "NCHW"))
        return jnp.maximum(y + b[None, :, None, None], 0.0)

    def pool(y):
        B, C, H, W = y.shape
        return y.reshape(B, C, H // 2, 2, W // 2, 2).max(axis=(3, 5))

    y = pool(conv(x_nchw, raw["w1"], raw["b1"]))
    y = pool(conv(y, raw["w2"], raw["b2"]))
    flat = y.reshape(y.shape[0], -1)                            # NCHW flatten
    h = jnp.maximum(flat @ raw["wfc1"] + raw["bfc1"], 0.0)
    return h @ raw["wfc2"] + raw["bfc2"]


def init_params(key):
    """Deterministic synthetic init in PyTorch layouts/bounds."""
    ks = jax.random.split(key, 8)

    def u(k, shape, fan_in):
        bound = 1.0 / jnp.sqrt(jnp.float32(fan_in))
        return jax.random.uniform(k, shape, jnp.float32, -bound, bound)

    return {
        "w1": u(ks[0], (16, 3, 3, 3), 3 * 9),
        "b1": u(ks[1], (16,), 3 * 9),
        "w2": u(ks[2], (32, 16, 3, 3), 16 * 9),
        "b2": u(ks[3], (32,), 16 * 9),
        # Linear weights stored (in, out), rows in NCHW-flatten order.
        "wfc1": u(ks[4], (32 * 16 * 16, 64), 32 * 16 * 16),
        "bfc1": u(ks[5], (64,), 32 * 16 * 16),
        "wfc2": u(ks[6], (64, 2), 64),
        "bfc2": u(ks[7], (2,), 64),
    }


if __name__ == "__main__":
    key = jax.random.PRNGKey(0)
    kx, kp = jax.random.split(key)
    # The module's FC layer (32*16*16 inputs) implies a 3x64x64 input.
    x = jax.random.normal(kx, (2, 3, 64, 64), jnp.float32)
    raw = init_params(kp)
    params = prepare_params(raw)

    fwd = jax.jit(exercise1_cnn_forward)
    out = jax.block_until_ready(fwd(x, params))
    assert out.shape == (2, 2), out.shape
    assert out.dtype == jnp.float32

    # Loose check vs f32 reference (kernel path uses bf16 MXU operands).
    ref = reference_forward(x, raw)
    assert jnp.allclose(out, ref, rtol=1e-1, atol=5e-2)
    print("KERNEL_OK")
</pallas_src>

<mosaic_0001>
module attributes {stable_mosaic.version = 11 : i64} {
  func.func @_fused_forward_kernel(%arg0: i32, %arg1: memref<128x768xbf16, #tpu.memory_space<vmem>>, %arg2: memref<768x1024xbf16, #tpu.memory_space<vmem>>, %arg3: memref<1x512xf32, #tpu.memory_space<vmem>>, %arg4: memref<1536x1024xbf16, #tpu.memory_space<vmem>>, %arg5: memref<1x512xf32, #tpu.memory_space<vmem>>, %arg6: memref<512x1024xbf16, #tpu.memory_space<vmem>>, %arg7: memref<1x128xf32, #tpu.memory_space<vmem>>, %arg8: memref<1024x128xf32, #tpu.memory_space<vmem>>, %arg9: memref<128x128xf32, #tpu.memory_space<vmem>>, %arg10: memref<1x128xf32, #tpu.memory_space<vmem>>, %arg11: memref<2x128xf32, #tpu.memory_space<vmem>>, %arg12: memref<64x1536xbf16, #tpu.memory_space<vmem>>, %arg13: memref<32x512xbf16, #tpu.memory_space<vmem>>) attributes {dimension_semantics = [#tpu.dimension_semantics<parallel>], iteration_bounds = array<i64: 1>, scalar_prefetch = 0 : i64, scratch_operands = 2 : i64, tpu.core_type = #tpu.core_type<tc>, window_params = [{transform_indices = @transform_0, window_bounds = array<i64: 128, 768>}, {pipeline_mode = #tpu.pipeline_mode<synchronous>, transform_indices = @transform_1, window_bounds = array<i64: 768, 1024>}, {pipeline_mode = #tpu.pipeline_mode<synchronous>, transform_indices = @transform_2, window_bounds = array<i64: 1, 512>}, {pipeline_mode = #tpu.pipeline_mode<synchronous>, transform_indices = @transform_3, window_bounds = array<i64: 1536, 1024>}, {pipeline_mode = #tpu.pipeline_mode<synchronous>, transform_indices = @transform_4, window_bounds = array<i64: 1, 512>}, {pipeline_mode = #tpu.pipeline_mode<synchronous>, transform_indices = @transform_5, window_bounds = array<i64: 512, 1024>}, {pipeline_mode = #tpu.pipeline_mode<synchronous>, transform_indices = @transform_6, window_bounds = array<i64: 1, 128>}, {pipeline_mode = #tpu.pipeline_mode<synchronous>, transform_indices = @transform_7, window_bounds = array<i64: 1024, 128>}, {pipeline_mode = #tpu.pipeline_mode<synchronous>, transform_indices = @transform_8, window_bounds = array<i64: 128, 128>}, {pipeline_mode = #tpu.pipeline_mode<synchronous>, transform_indices = @transform_9, window_bounds = array<i64: 1, 128>}, {transform_indices = @transform_10, window_bounds = array<i64: 2, 128>}]} {
    %0 = tpu.iota {dimensions = array<i32: 0>} : vector<16x16xi32>
    %1 = tpu.iota {dimensions = array<i32: 1>} : vector<16x16xi32>
    %c1_i32 = arith.constant 1 : i32
    %2 = vector.broadcast %c1_i32 : i32 to vector<16x16xi32>
    %3 = arith.addi %1, %2 : vector<16x16xi32>
    %4 = arith.cmpi eq, %0, %3 : vector<16x16xi32>
    %cst = arith.constant 1.000000e+00 : f32
    %cst_0 = arith.constant 0.000000e+00 : f32
    %5 = vector.broadcast %cst : f32 to vector<16x16xf32>
    %6 = vector.broadcast %cst_0 : f32 to vector<16x16xf32>
    %7 = arith.select %4, %5, %6 : vector<16x16xi1>, vector<16x16xf32>
    %8 = arith.truncf %7 : vector<16x16xf32> to vector<16x16xbf16>
    %c1_i32_1 = arith.constant 1 : i32
    %9 = vector.broadcast %c1_i32_1 : i32 to vector<16x16xi32>
    %10 = arith.addi %0, %9 : vector<16x16xi32>
    %11 = arith.cmpi eq, %1, %10 : vector<16x16xi32>
    %cst_2 = arith.constant 1.000000e+00 : f32
    %cst_3 = arith.constant 0.000000e+00 : f32
    %12 = vector.broadcast %cst_2 : f32 to vector<16x16xf32>
    %13 = vector.broadcast %cst_3 : f32 to vector<16x16xf32>
    %14 = arith.select %11, %12, %13 : vector<16x16xi1>, vector<16x16xf32>
    %15 = arith.truncf %14 : vector<16x16xf32> to vector<16x16xbf16>
    %c0 = arith.constant 0 : index
    %c0_4 = arith.constant 0 : index
    %16 = vector.load %arg1[%c0, %c0_4] : memref<128x768xbf16, #tpu.memory_space<vmem>>, vector<128x768xbf16>
    %c0_5 = arith.constant 0 : index
    %c0_6 = arith.constant 0 : index
    %17 = vector.load %arg2[%c0_5, %c0_6] : memref<768x1024xbf16, #tpu.memory_space<vmem>>, vector<768x1024xbf16>
    %cst_7 = arith.constant dense<0.000000e+00> : vector<128x1024xf32>
    %18 = tpu.matmul %16, %17, %cst_7 {dimension_numbers = #tpu.dot_dimension_numbers<[1], [0], [0], [1], [0, 0, 1, 1], [], []>} : vector<128x768xbf16>, vector<768x1024xbf16>, vector<128x1024xf32> -> vector<128x1024xf32>
    %c0_8 = arith.constant 0 : index
    %c0_9 = arith.constant 0 : index
    %19 = vector.load %arg3[%c0_8, %c0_9] : memref<1x512xf32, #tpu.memory_space<vmem>>, vector<1x512xf32>
    %20 = vector.extract_strided_slice %18 {offsets = [0, 0], sizes = [64, 1024], strides = [1, 1]} : vector<128x1024xf32> to vector<64x1024xf32>
    %21 = vector.extract_strided_slice %20 {offsets = [0, 0], sizes = [32, 1024], strides = [1, 1]} : vector<64x1024xf32> to vector<32x1024xf32>
    %22 = vector.extract_strided_slice %20 {offsets = [32, 0], sizes = [32, 1024], strides = [1, 1]} : vector<64x1024xf32> to vector<32x1024xf32>
    %23 = arith.maximumf %21, %22 : vector<32x1024xf32>
    %24 = vector.extract_strided_slice %23 {offsets = [0, 0], sizes = [32, 512], strides = [1, 1]} : vector<32x1024xf32> to vector<32x512xf32>
    %25 = vector.extract_strided_slice %23 {offsets = [0, 512], sizes = [32, 512], strides = [1, 1]} : vector<32x1024xf32> to vector<32x512xf32>
    %26 = arith.maximumf %24, %25 : vector<32x512xf32>
    %27 = vector.broadcast %19 : vector<1x512xf32> to vector<32x512xf32>
    %28 = arith.addf %26, %27 : vector<32x512xf32>
    %cst_10 = arith.constant 0.000000e+00 : f32
    %29 = vector.broadcast %cst_10 : f32 to vector<32x512xf32>
    %30 = arith.maximumf %28, %29 : vector<32x512xf32>
    %31 = arith.truncf %30 : vector<32x512xf32> to vector<32x512xbf16>
    %32 = vector.extract_strided_slice %31 {offsets = [0, 0], sizes = [16, 512], strides = [1, 1]} : vector<32x512xbf16> to vector<16x512xbf16>
    %33 = vector.extract_strided_slice %31 {offsets = [16, 0], sizes = [16, 512], strides = [1, 1]} : vector<32x512xbf16> to vector<16x512xbf16>
    %cst_11 = arith.constant dense<0.000000e+00> : vector<16x512xf32>
    %34 = tpu.matmul %8, %33, %cst_11 {dimension_numbers = #tpu.dot_dimension_numbers<[1], [0], [0], [1], [0, 0, 1, 1], [], []>} : vector<16x16xbf16>, vector<16x512xbf16>, vector<16x512xf32> -> vector<16x512xf32>
    %35 = arith.truncf %34 : vector<16x512xf32> to vector<16x512xbf16>
    %cst_12 = arith.constant dense<0.000000e+00> : vector<16x512xf32>
    %36 = tpu.matmul %15, %32, %cst_12 {dimension_numbers = #tpu.dot_dimension_numbers<[1], [0], [0], [1], [0, 0, 1, 1], [], []>} : vector<16x16xbf16>, vector<16x512xbf16>, vector<16x512xf32> -> vector<16x512xf32>
    %37 = arith.truncf %36 : vector<16x512xf32> to vector<16x512xbf16>
    %c0_13 = arith.constant 0 : index
    %c0_14 = arith.constant 0 : index
    %38 = vector.load %arg12[%c0_13, %c0_14] : memref<64x1536xbf16, #tpu.memory_space<vmem>>, vector<16x512xbf16>
    tpu.vector_store %arg12[%c0_13, %c0_14], %35 {strides = array<i32>} : memref<64x1536xbf16, #tpu.memory_space<vmem>>, vector<16x512xbf16>,
    %c0_15 = arith.constant 0 : index
    %c512 = arith.constant 512 : index
    %39 = vector.load %arg12[%c0_15, %c512] : memref<64x1536xbf16, #tpu.memory_space<vmem>>, vector<16x512xbf16>
    tpu.vector_store %arg12[%c0_15, %c512], %32 {strides = array<i32>} : memref<64x1536xbf16, #tpu.memory_space<vmem>>, vector<16x512xbf16>,
    %c0_16 = arith.constant 0 : index
    %c1024 = arith.constant 1024 : index
    %40 = vector.load %arg12[%c0_16, %c1024] : memref<64x1536xbf16, #tpu.memory_space<vmem>>, vector<16x512xbf16>
    tpu.vector_store %arg12[%c0_16, %c1024], %33 {strides = array<i32>} : memref<64x1536xbf16, #tpu.memory_space<vmem>>, vector<16x512xbf16>,
    %c16 = arith.constant 16 : index
    %c0_17 = arith.constant 0 : index
    %41 = vector.load %arg12[%c16, %c0_17] : memref<64x1536xbf16, #tpu.memory_space<vmem>>, vector<16x512xbf16>
    tpu.vector_store %arg12[%c16, %c0_17], %32 {strides = array<i32>} : memref<64x1536xbf16, #tpu.memory_space<vmem>>, vector<16x512xbf16>,
    %c16_18 = arith.constant 16 : index
    %c512_19 = arith.constant 512 : index
    %42 = vector.load %arg12[%c16_18, %c512_19] : memref<64x1536xbf16, #tpu.memory_space<vmem>>, vector<16x512xbf16>
    tpu.vector_store %arg12[%c16_18, %c512_19], %33 {strides = array<i32>} : memref<64x1536xbf16, #tpu.memory_space<vmem>>, vector<16x512xbf16>,
    %c16_20 = arith.constant 16 : index
    %c1024_21 = arith.constant 1024 : index
    %43 = vector.load %arg12[%c16_20, %c1024_21] : memref<64x1536xbf16, #tpu.memory_space<vmem>>, vector<16x512xbf16>
    tpu.vector_store %arg12[%c16_20, %c1024_21], %37 {strides = array<i32>} : memref<64x1536xbf16, #tpu.memory_space<vmem>>, vector<16x512xbf16>,
    %44 = vector.extract_strided_slice %18 {offsets = [64, 0], sizes = [64, 1024], strides = [1, 1]} : vector<128x1024xf32> to vector<64x1024xf32>
    %45 = vector.extract_strided_slice %44 {offsets = [0, 0], sizes = [32, 1024], strides = [1, 1]} : vector<64x1024xf32> to vector<32x1024xf32>
    %46 = vector.extract_strided_slice %44 {offsets = [32, 0], sizes = [32, 1024], strides = [1, 1]} : vector<64x1024xf32> to vector<32x1024xf32>
    %47 = arith.maximumf %45, %46 : vector<32x1024xf32>
    %48 = vector.extract_strided_slice %47 {offsets = [0, 0], sizes = [32, 512], strides = [1, 1]} : vector<32x1024xf32> to vector<32x512xf32>
    %49 = vector.extract_strided_slice %47 {offsets = [0, 512], sizes = [32, 512], strides = [1, 1]} : vector<32x1024xf32> to vector<32x512xf32>
    %50 = arith.maximumf %48, %49 : vector<32x512xf32>
    %51 = vector.broadcast %19 : vector<1x512xf32> to vector<32x512xf32>
    %52 = arith.addf %50, %51 : vector<32x512xf32>
    %cst_22 = arith.constant 0.000000e+00 : f32
    %53 = vector.broadcast %cst_22 : f32 to vector<32x512xf32>
    %54 = arith.maximumf %52, %53 : vector<32x512xf32>
    %55 = arith.truncf %54 : vector<32x512xf32> to vector<32x512xbf16>
    %56 = vector.extract_strided_slice %55 {offsets = [0, 0], sizes = [16, 512], strides = [1, 1]} : vector<32x512xbf16> to vector<16x512xbf16>
    %57 = vector.extract_strided_slice %55 {offsets = [16, 0], sizes = [16, 512], strides = [1, 1]} : vector<32x512xbf16> to vector<16x512xbf16>
    %cst_23 = arith.constant dense<0.000000e+00> : vector<16x512xf32>
    %58 = tpu.matmul %8, %57, %cst_23 {dimension_numbers = #tpu.dot_dimension_numbers<[1], [0], [0], [1], [0, 0, 1, 1], [], []>} : vector<16x16xbf16>, vector<16x512xbf16>, vector<16x512xf32> -> vector<16x512xf32>
    %59 = arith.truncf %58 : vector<16x512xf32> to vector<16x512xbf16>
    %cst_24 = arith.constant dense<0.000000e+00> : vector<16x512xf32>
    %60 = tpu.matmul %15, %56, %cst_24 {dimension_numbers = #tpu.dot_dimension_numbers<[1], [0], [0], [1], [0, 0, 1, 1], [], []>} : vector<16x16xbf16>, vector<16x512xbf16>, vector<16x512xf32> -> vector<16x512xf32>
    %61 = arith.truncf %60 : vector<16x512xf32> to vector<16x512xbf16>
    %c32 = arith.constant 32 : index
    %c0_25 = arith.constant 0 : index
    %62 = vector.load %arg12[%c32, %c0_25] : memref<64x1536xbf16, #tpu.memory_space<vmem>>, vector<16x512xbf16>
    tpu.vector_store %arg12[%c32, %c0_25], %59 {strides = array<i32>} : memref<64x1536xbf16, #tpu.memory_space<vmem>>, vector<16x512xbf16>,
    %c32_26 = arith.constant 32 : index
    %c512_27 = arith.constant 512 : index
    %63 = vector.load %arg12[%c32_26, %c512_27] : memref<64x1536xbf16, #tpu.memory_space<vmem>>, vector<16x512xbf16>
    tpu.vector_store %arg12[%c32_26, %c512_27], %56 {strides = array<i32>} : memref<64x1536xbf16, #tpu.memory_space<vmem>>, vector<16x512xbf16>,
    %c32_28 = arith.constant 32 : index
    %c1024_29 = arith.constant 1024 : index
    %64 = vector.load %arg12[%c32_28, %c1024_29] : memref<64x1536xbf16, #tpu.memory_space<vmem>>, vector<16x512xbf16>
    tpu.vector_store %arg12[%c32_28, %c1024_29], %57 {strides = array<i32>} : memref<64x1536xbf16, #tpu.memory_space<vmem>>, vector<16x512xbf16>,
    %c48 = arith.constant 48 : index
    %c0_30 = arith.constant 0 : index
    %65 = vector.load %arg12[%c48, %c0_30] : memref<64x1536xbf16, #tpu.memory_space<vmem>>, vector<16x512xbf16>
    tpu.vector_store %arg12[%c48, %c0_30], %56 {strides = array<i32>} : memref<64x1536xbf16, #tpu.memory_space<vmem>>, vector<16x512xbf16>,
    %c48_31 = arith.constant 48 : index
    %c512_32 = arith.constant 512 : index
    %66 = vector.load %arg12[%c48_31, %c512_32] : memref<64x1536xbf16, #tpu.memory_space<vmem>>, vector<16x512xbf16>
    tpu.vector_store %arg12[%c48_31, %c512_32], %57 {strides = array<i32>} : memref<64x1536xbf16, #tpu.memory_space<vmem>>, vector<16x512xbf16>,
    %c48_33 = arith.constant 48 : index
    %c1024_34 = arith.constant 1024 : index
    %67 = vector.load %arg12[%c48_33, %c1024_34] : memref<64x1536xbf16, #tpu.memory_space<vmem>>, vector<16x512xbf16>
    tpu.vector_store %arg12[%c48_33, %c1024_34], %61 {strides = array<i32>} : memref<64x1536xbf16, #tpu.memory_space<vmem>>, vector<16x512xbf16>,
    %c0_35 = arith.constant 0 : index
    %c0_36 = arith.constant 0 : index
    %68 = vector.load %arg12[%c0_35, %c0_36] : memref<64x1536xbf16, #tpu.memory_space<vmem>>, vector<64x1536xbf16>
    %c0_37 = arith.constant 0 : index
    %c0_38 = arith.constant 0 : index
    %69 = vector.load %arg4[%c0_37, %c0_38] : memref<1536x1024xbf16, #tpu.memory_space<vmem>>, vector<1536x1024xbf16>
    %cst_39 = arith.constant dense<0.000000e+00> : vector<64x1024xf32>
    %70 = tpu.matmul %68, %69, %cst_39 {dimension_numbers = #tpu.dot_dimension_numbers<[1], [0], [0], [1], [0, 0, 1, 1], [], []>} : vector<64x1536xbf16>, vector<1536x1024xbf16>, vector<64x1024xf32> -> vector<64x1024xf32>
    %c0_40 = arith.constant 0 : index
    %c0_41 = arith.constant 0 : index
    %71 = vector.load %arg5[%c0_40, %c0_41] : memref<1x512xf32, #tpu.memory_space<vmem>>, vector<1x512xf32>
    %72 = vector.extract_strided_slice %70 {offsets = [0, 0], sizes = [32, 1024], strides = [1, 1]} : vector<64x1024xf32> to vector<32x1024xf32>
    %73 = vector.extract_strided_slice %72 {offsets = [0, 0], sizes = [16, 1024], strides = [1, 1]} : vector<32x1024xf32> to vector<16x1024xf32>
    %74 = vector.extract_strided_slice %72 {offsets = [16, 0], sizes = [16, 1024], strides = [1, 1]} : vector<32x1024xf32> to vector<16x1024xf32>
    %75 = arith.maximumf %73, %74 : vector<16x1024xf32>
    %76 = vector.extract_strided_slice %75 {offsets = [0, 0], sizes = [16, 512], strides = [1, 1]} : vector<16x1024xf32> to vector<16x512xf32>
    %77 = vector.extract_strided_slice %75 {offsets = [0, 512], sizes = [16, 512], strides = [1, 1]} : vector<16x1024xf32> to vector<16x512xf32>
    %78 = arith.maximumf %76, %77 : vector<16x512xf32>
    %79 = vector.broadcast %71 : vector<1x512xf32> to vector<16x512xf32>
    %80 = arith.addf %78, %79 : vector<16x512xf32>
    %cst_42 = arith.constant 0.000000e+00 : f32
    %81 = vector.broadcast %cst_42 : f32 to vector<16x512xf32>
    %82 = arith.maximumf %80, %81 : vector<16x512xf32>
    %83 = arith.truncf %82 : vector<16x512xf32> to vector<16x512xbf16>
    %c0_43 = arith.constant 0 : index
    %c0_44 = arith.constant 0 : index
    %84 = vector.load %arg13[%c0_43, %c0_44] : memref<32x512xbf16, #tpu.memory_space<vmem>>, vector<16x512xbf16>
    tpu.vector_store %arg13[%c0_43, %c0_44], %83 {strides = array<i32>} : memref<32x512xbf16, #tpu.memory_space<vmem>>, vector<16x512xbf16>,
    %85 = vector.extract_strided_slice %70 {offsets = [32, 0], sizes = [32, 1024], strides = [1, 1]} : vector<64x1024xf32> to vector<32x1024xf32>
    %86 = vector.extract_strided_slice %85 {offsets = [0, 0], sizes = [16, 1024], strides = [1, 1]} : vector<32x1024xf32> to vector<16x1024xf32>
    %87 = vector.extract_strided_slice %85 {offsets = [16, 0], sizes = [16, 1024], strides = [1, 1]} : vector<32x1024xf32> to vector<16x1024xf32>
    %88 = arith.maximumf %86, %87 : vector<16x1024xf32>
    %89 = vector.extract_strided_slice %88 {offsets = [0, 0], sizes = [16, 512], strides = [1, 1]} : vector<16x1024xf32> to vector<16x512xf32>
    %90 = vector.extract_strided_slice %88 {offsets = [0, 512], sizes = [16, 512], strides = [1, 1]} : vector<16x1024xf32> to vector<16x512xf32>
    %91 = arith.maximumf %89, %90 : vector<16x512xf32>
    %92 = vector.broadcast %71 : vector<1x512xf32> to vector<16x512xf32>
    %93 = arith.addf %91, %92 : vector<16x512xf32>
    %cst_45 = arith.constant 0.000000e+00 : f32
    %94 = vector.broadcast %cst_45 : f32 to vector<16x512xf32>
    %95 = arith.maximumf %93, %94 : vector<16x512xf32>
    %96 = arith.truncf %95 : vector<16x512xf32> to vector<16x512xbf16>
    %c16_46 = arith.constant 16 : index
    %c0_47 = arith.constant 0 : index
    %97 = vector.load %arg13[%c16_46, %c0_47] : memref<32x512xbf16, #tpu.memory_space<vmem>>, vector<16x512xbf16>
    tpu.vector_store %arg13[%c16_46, %c0_47], %96 {strides = array<i32>} : memref<32x512xbf16, #tpu.memory_space<vmem>>, vector<16x512xbf16>,
    %c0_48 = arith.constant 0 : index
    %c0_49 = arith.constant 0 : index
    %98 = vector.load %arg13[%c0_48, %c0_49] : memref<32x512xbf16, #tpu.memory_space<vmem>>, vector<32x512xbf16>
    %c0_50 = arith.constant 0 : index
    %c0_51 = arith.constant 0 : index
    %99 = vector.load %arg6[%c0_50, %c0_51] : memref<512x1024xbf16, #tpu.memory_space<vmem>>, vector<512x1024xbf16>
    %cst_52 = arith.constant dense<0.000000e+00> : vector<32x1024xf32>
    %100 = tpu.matmul %98, %99, %cst_52 {dimension_numbers = #tpu.dot_dimension_numbers<[1], [0], [0], [1], [0, 0, 1, 1], [], []>} : vector<32x512xbf16>, vector<512x1024xbf16>, vector<32x1024xf32> -> vector<32x1024xf32>
    %101 = tpu.iota {dimensions = array<i32: 0>} : vector<32x1024xi32>
    %102 = tpu.iota {dimensions = array<i32: 1>} : vector<32x1024xi32>
    %c6_i32 = arith.constant 6 : i32
    %103 = vector.broadcast %c6_i32 : i32 to vector<32x1024xi32>
    %104 = arith.shrsi %102, %103 : vector<32x1024xi32>
    %c15_i32 = arith.constant 15 : i32
    %105 = vector.broadcast %c15_i32 : i32 to vector<32x1024xi32>
    %106 = arith.andi %101, %105 : vector<32x1024xi32>
    %107 = arith.cmpi eq, %104, %106 : vector<32x1024xi32>
    %cst_53 = arith.constant 0.000000e+00 : f32
    %108 = vector.broadcast %cst_53 : f32 to vector<32x1024xf32>
    %109 = arith.select %107, %100, %108 : vector<32x1024xi1>, vector<32x1024xf32>
    %110 = tpu.iota {dimensions = array<i32: 0>} : vector<2x32xi32>
    %111 = tpu.iota {dimensions = array<i32: 1>} : vector<2x32xi32>
    %c4_i32 = arith.constant 4 : i32
    %112 = vector.broadcast %c4_i32 : i32 to vector<2x32xi32>
    %113 = arith.shrsi %111, %112 : vector<2x32xi32>
    %114 = arith.cmpi eq, %113, %110 : vector<2x32xi32>
    %cst_54 = arith.constant 1.000000e+00 : f32
    %cst_55 = arith.constant 0.000000e+00 : f32
    %115 = vector.broadcast %cst_54 : f32 to vector<2x32xf32>
    %116 = vector.broadcast %cst_55 : f32 to vector<2x32xf32>
    %117 = arith.select %114, %115, %116 : vector<2x32xi1>, vector<2x32xf32>
    %cst_56 = arith.constant dense<0.000000e+00> : vector<2x1024xf32>
    %118 = tpu.matmul %117, %109, %cst_56 {dimension_numbers = #tpu.dot_dimension_numbers<[1], [0], [0], [1], [0, 0, 1, 1], [], []>} : vector<2x32xf32>, vector<32x1024xf32>, vector<2x1024xf32> -> vector<2x1024xf32>
    %c0_57 = arith.constant 0 : index
    %c0_58 = arith.constant 0 : index
    %119 = vector.load %arg8[%c0_57, %c0_58] : memref<1024x128xf32, #tpu.memory_space<vmem>>, vector<1024x128xf32>
    %cst_59 = arith.constant dense<0.000000e+00> : vector<2x128xf32>
    %120 = tpu.matmul %118, %119, %cst_59 {dimension_numbers = #tpu.dot_dimension_numbers<[1], [0], [0], [1], [0, 0, 1, 1], [], []>} : vector<2x1024xf32>, vector<1024x128xf32>, vector<2x128xf32> -> vector<2x128xf32>
    %c0_60 = arith.constant 0 : index
    %c0_61 = arith.constant 0 : index
    %121 = vector.load %arg7[%c0_60, %c0_61] : memref<1x128xf32, #tpu.memory_space<vmem>>, vector<1x128xf32>
    %122 = vector.broadcast %121 : vector<1x128xf32> to vector<2x128xf32>
    %123 = arith.addf %120, %122 : vector<2x128xf32>
    %cst_62 = arith.constant 0.000000e+00 : f32
    %124 = vector.broadcast %cst_62 : f32 to vector<2x128xf32>
    %125 = arith.maximumf %123, %124 : vector<2x128xf32>
    %c0_63 = arith.constant 0 : index
    %c0_64 = arith.constant 0 : index
    %126 = vector.load %arg9[%c0_63, %c0_64] : memref<128x128xf32, #tpu.memory_space<vmem>>, vector<128x128xf32>
    %cst_65 = arith.constant dense<0.000000e+00> : vector<2x128xf32>
    %127 = tpu.matmul %125, %126, %cst_65 {dimension_numbers = #tpu.dot_dimension_numbers<[1], [0], [0], [1], [0, 0, 1, 1], [], []>} : vector<2x128xf32>, vector<128x128xf32>, vector<2x128xf32> -> vector<2x128xf32>
    %c0_66 = arith.constant 0 : index
    %c0_67 = arith.constant 0 : index
    %128 = vector.load %arg10[%c0_66, %c0_67] : memref<1x128xf32, #tpu.memory_space<vmem>>, vector<1x128xf32>
    %129 = vector.broadcast %128 : vector<1x128xf32> to vector<2x128xf32>
    %130 = arith.addf %127, %129 : vector<2x128xf32>
    %c0_68 = arith.constant 0 : index
    %c0_69 = arith.constant 0 : index
    %131 = vector.load %arg11[%c0_68, %c0_69] : memref<2x128xf32, #tpu.memory_space<vmem>>, vector<2x128xf32>
    tpu.vector_store %arg11[%c0_68, %c0_69], %130 {strides = array<i32>} : memref<2x128xf32, #tpu.memory_space<vmem>>, vector<2x128xf32>,
    return
  }
  func.func @transform_0(%arg0: i32) -> (i32, i32) {
    %c0_i32 = arith.constant 0 : i32
    %c0_i32_0 = arith.constant 0 : i32
    return %arg0, %c0_i32 : i32, i32
  }
  func.func @transform_1(%arg0: i32) -> (i32, i32) {
    %c0_i32 = arith.constant 0 : i32
    %c0_i32_0 = arith.constant 0 : i32
    %c0_i32_1 = arith.constant 0 : i32
    return %c0_i32, %c0_i32_0 : i32, i32
  }
  func.func @transform_2(%arg0: i32) -> (i32, i32) {
    %c0_i32 = arith.constant 0 : i32
    %c0_i32_0 = arith.constant 0 : i32
    %c0_i32_1 = arith.constant 0 : i32
    return %c0_i32, %c0_i32_0 : i32, i32
  }
  func.func @transform_3(%arg0: i32) -> (i32, i32) {
    %c0_i32 = arith.constant 0 : i32
    %c0_i32_0 = arith.constant 0 : i32
    %c0_i32_1 = arith.constant 0 : i32
    return %c0_i32, %c0_i32_0 : i32, i32
  }
  func.func @transform_4(%arg0: i32) -> (i32, i32) {
    %c0_i32 = arith.constant 0 : i32
    %c0_i32_0 = arith.constant 0 : i32
    %c0_i32_1 = arith.constant 0 : i32
    return %c0_i32, %c0_i32_0 : i32, i32
  }
  func.func @transform_5(%arg0: i32) -> (i32, i32) {
    %c0_i32 = arith.constant 0 : i32
    %c0_i32_0 = arith.constant 0 : i32
    %c0_i32_1 = arith.constant 0 : i32
    return %c0_i32, %c0_i32_0 : i32, i32
  }
  func.func @transform_6(%arg0: i32) -> (i32, i32) {
    %c0_i32 = arith.constant 0 : i32
    %c0_i32_0 = arith.constant 0 : i32
    %c0_i32_1 = arith.constant 0 : i32
    return %c0_i32, %c0_i32_0 : i32, i32
  }
  func.func @transform_7(%arg0: i32) -> (i32, i32) {
    %c0_i32 = arith.constant 0 : i32
    %c0_i32_0 = arith.constant 0 : i32
    %c0_i32_1 = arith.constant 0 : i32
    return %c0_i32, %c0_i32_0 : i32, i32
  }
  func.func @transform_8(%arg0: i32) -> (i32, i32) {
    %c0_i32 = arith.constant 0 : i32
    %c0_i32_0 = arith.constant 0 : i32
    %c0_i32_1 = arith.constant 0 : i32
    return %c0_i32, %c0_i32_0 : i32, i32
  }
  func.func @transform_9(%arg0: i32) -> (i32, i32) {
    %c0_i32 = arith.constant 0 : i32
    %c0_i32_0 = arith.constant 0 : i32
    %c0_i32_1 = arith.constant 0 : i32
    return %c0_i32, %c0_i32_0 : i32, i32
  }
  func.func @transform_10(%arg0: i32) -> (i32, i32) {
    %c0_i32 = arith.constant 0 : i32
    %c0_i32_0 = arith.constant 0 : i32
    return %arg0, %c0_i32 : i32, i32
  }
}

</mosaic_0001>

<bundles_post_ra>
// kernel: exercise1_cnn_forward.1
= control target key start
LH: loop header
LB: loop body
LE: loop exit
PB: predicated region body
PF: predicated region fallthrough
CT: control target
= control target key end

     0   :  { %15 = vsyncpa [#allocation5], 0  ;;  %s19722_s0 = inlined_call_operand.vmem [shape: bf16[128,768], index: 0, kind: input, shape index: {}]   ;;  %s19723_s1 = inlined_call_operand.vmem [shape: bf16[768,1024], index: 1, kind: input, shape index: {}]   ;;  %s19724_s2 = inlined_call_operand.hbm [shape: f32[1,512], index: 2, kind: input, shape index: {}]   ;;  %s19725_s3 = inlined_call_operand.hbm [shape: bf16[1536,1024], index: 3, kind: input, shape index: {}]   ;;  %s19726_s4 = inlined_call_operand.hbm [shape: f32[1,512], index: 4, kind: input, shape index: {}]   ;;  %s19727_s5 = inlined_call_operand.hbm [shape: bf16[512,1024], index: 5, kind: input, shape index: {}]   ;;  %s19728_s6 = inlined_call_operand.hbm [shape: f32[1,128], index: 6, kind: input, shape index: {}]   ;;  %s19729_s7 = inlined_call_operand.hbm [shape: f32[1024,128], index: 7, kind: input, shape index: {}]   ;;  %s19730_s8 = inlined_call_operand.hbm [shape: f32[128,128], index: 8, kind: input, shape index: {}]   ;;  %s19731_s9 = inlined_call_operand.hbm [shape: f32[1,128], index: 9, kind: input, shape index: {}]   ;;  %s19732_s10 = inlined_call_operand.hbm [shape: f32[2,128], index: 10, kind: output, shape index: {}]  }
   0x1   :  { %16 = vsyncpa [#allocation8], 0 }
   0x2   :  { %17 = vsyncpa [#allocation11], 0 }
   0x3   :  { %18 = vsyncpa [#allocation14], 0 }
   0x4   :  { %19 = vsyncpa [#allocation17], 0 }
   0x5   :  { %20 = vsyncpa [#allocation6], 0  ;;  %s16965_s13 = smov [#allocation7]   ;;  %s16755_s17 = scalar_lea.hbm %s19725_s3, 98304 }
   0x6   :  { %s40_s14 = sshll.u32 %s16965_s13, 4  ;;  %p16756_p0 = scmp.ne.s32.totalorder %s19725_s3, %s16755_s17  ;;  %s41_s14 = int_to_ptr.vmem [resolvable:$true] %s40_s14 }
   0x7   :  { %p16759_p1 = scmp.lt.u32.totalorder %s16755_s17, %s19725_s3 }
   0x9   :  { %p16761_p2 = pnand %p16759_p1, %p16756_p0 }
   0xb   :  { %16764 = shalt.err (!%p16761_p2)
}
   0xc   :  { %s16765_s22 = scalar_lea.vmem %s41_s14, 98304  ;;  %p16770_p4 = scmp.lt.s32.totalorder %s41_s14, %s41_s14 }
   0xd   :  { %p16766_p3 = scmp.ne.s32.totalorder %s41_s14, %s16765_s22  ;;  %p16771_p5 = scmp.lt.s32.totalorder %s16765_s22, %s16765_s22 }
   0xf   :  { %p16772_p6 = por %p16771_p5, %p16770_p4 }
  0x11   :  { %p16773_p7 = pnand %p16772_p6, %p16766_p3 }
  0x13   :  { %16776 = shalt.err (!%p16773_p7)
}
  0x14   :  { %s16966_s23 = smov 512   ;;  %s16967_s24 = smov 32  }
  0x15   :  { %46 = dma.hbm_to_vmem [thread:$0]  %s19725_s3, 98304, %s41_s14, [#allocation8], %s16966_s23, %s16966_s23, %s16967_s24  }
  0x16   :  { %s16968_s27 = smov [#allocation10]   ;;  %s16969_s29 = smov [#allocation13]  }
  0x17   :  { %s62_s28 = sshll.u32 %s16968_s27, 4  ;;  %s84_s30 = sshll.u32 %s16969_s29, 4  ;;  %s63_s28 = int_to_ptr.vmem [resolvable:$true] %s62_s28  ;;  %s85_s30 = int_to_ptr.vmem [resolvable:$true] %s84_s30 }
  0x18   :  { %s16777_s13 = scalar_lea.hbm %s19727_s5, 32768 }
  0x19   :  { %p16778_p8 = scmp.ne.s32.totalorder %s19727_s5, %s16777_s13  ;;  %p16781_p9 = scmp.lt.u32.totalorder %s16777_s13, %s19727_s5 }
  0x1b   :  { %p16783_p10 = pnand %p16781_p9, %p16778_p8 }
  0x1d   :  { %16786 = shalt.err (!%p16783_p10)
}
  0x1e   :  { %s16787_s3 = scalar_lea.vmem %s63_s28, 32768  ;;  %p16792_p12 = scmp.lt.s32.totalorder %s63_s28, %s63_s28 }
  0x1f   :  { %p16788_p11 = scmp.ne.s32.totalorder %s63_s28, %s16787_s3  ;;  %p16793_p13 = scmp.lt.s32.totalorder %s16787_s3, %s16787_s3 }
  0x21   :  { %p16794_p0 = por %p16793_p13, %p16792_p12 }
  0x23   :  { %p16795_p1 = pnand %p16794_p0, %p16788_p11 }
  0x25   :  { %16798 = shalt.err (!%p16795_p1)
}
  0x26   :  { %68 = dma.hbm_to_vmem [thread:$0]  %s19727_s5, 32768, %s63_s28, [#allocation11], %s16966_s23, %s16966_s23, %s16967_s24  }
  0x27   :  { %s16799_s22 = scalar_lea.hbm %s19729_s7, 16384 }
  0x28   :  { %p16800_p2 = scmp.ne.s32.totalorder %s19729_s7, %s16799_s22  ;;  %p16803_p3 = scmp.lt.u32.totalorder %s16799_s22, %s19729_s7 }
  0x2a   :  { %p16805_p4 = pnand %p16803_p3, %p16800_p2 }
  0x2c   :  { %16808 = shalt.err (!%p16805_p4)
}
  0x2d   :  { %s16809_s11 = scalar_lea.vmem %s85_s30, 16384  ;;  %p16814_p6 = scmp.lt.s32.totalorder %s85_s30, %s85_s30 }
  0x2e   :  { %p16810_p5 = scmp.ne.s32.totalorder %s85_s30, %s16809_s11  ;;  %p16815_p7 = scmp.lt.s32.totalorder %s16809_s11, %s16809_s11 }
  0x30   :  { %p16816_p8 = por %p16815_p7, %p16814_p6 }
  0x32   :  { %p16817_p9 = pnand %p16816_p8, %p16810_p5 }
  0x34   :  { %16820 = shalt.err (!%p16817_p9)
}
  0x35   :  { %s16970_s5 = smov 128   ;;  %s16971_s23 = smov 8  }
  0x36   :  { %90 = dma.hbm_to_vmem [thread:$0]  %s19729_s7, 16384, %s85_s30, [#allocation14], %s16970_s5, %s16970_s5, %s16971_s23  }
  0x37   :  { %s16972_s12 = smov [#allocation4]   ;;  %s16973_s15 = smov [#allocation9]  }
  0x38   :  { %s31_s13 = sshll.u32 %s16972_s12, 4  ;;  %s53_s16 = sshll.u32 %s16973_s15, 4  ;;  %s32_s13 = int_to_ptr.vmem [resolvable:$true] %s31_s13  ;;  %s54_s16 = int_to_ptr.vmem [resolvable:$true] %s53_s16 }
  0x39   :  { %s16821_s3 = scalar_lea.hbm %s19724_s2, 64 }
  0x3a   :  { %p16822_p10 = scmp.ne.s32.totalorder %s19724_s2, %s16821_s3  ;;  %p16825_p11 = scmp.lt.u32.totalorder %s16821_s3, %s19724_s2 }
  0x3c   :  { %p16827_p12 = pnand %p16825_p11, %p16822_p10 }
  0x3e   :  { %16830 = shalt.err (!%p16827_p12)
}
  0x3f   :  { %s16831_s7 = scalar_lea.vmem %s32_s13, 64  ;;  %p16836_p0 = scmp.lt.s32.totalorder %s32_s13, %s32_s13 }
  0x40   :  { %p16832_p13 = scmp.ne.s32.totalorder %s32_s13, %s16831_s7  ;;  %p16837_p1 = scmp.lt.s32.totalorder %s16831_s7, %s16831_s7 }
  0x42   :  { %p16838_p2 = por %p16837_p1, %p16836_p0 }
  0x44   :  { %p16839_p3 = pnand %p16838_p2, %p16832_p13 }
  0x46   :  { %16842 = shalt.err (!%p16839_p3)
}
  0x47   :  { %34 = dma.hbm_to_vmem [thread:$0]  %s19724_s2, 64, %s32_s13, [#allocation5]  }
  0x48   :  { %s16843_s27 = scalar_lea.hbm %s19726_s4, 64 }
  0x49   :  { %p16844_p4 = scmp.ne.s32.totalorder %s19726_s4, %s16843_s27  ;;  %p16847_p5 = scmp.lt.u32.totalorder %s16843_s27, %s19726_s4 }
  0x4b   :  { %p16849_p6 = pnand %p16847_p5, %p16844_p4 }
  0x4d   :  { %16852 = shalt.err (!%p16849_p6)
}
  0x4e   :  { %s16853_s12 = scalar_lea.vmem %s54_s16, 64  ;;  %p16858_p8 = scmp.lt.s32.totalorder %s54_s16, %s54_s16 }
  0x4f   :  { %p16854_p7 = scmp.ne.s32.totalorder %s54_s16, %s16853_s12  ;;  %p16859_p9 = scmp.lt.s32.totalorder %s16853_s12, %s16853_s12 }
  0x51   :  { %p16860_p10 = por %p16859_p9, %p16858_p8 }
  0x53   :  { %p16861_p11 = pnand %p16860_p10, %p16854_p7 }
  0x55   :  { %16864 = shalt.err (!%p16861_p11)
}
  0x56   :  { %56 = dma.hbm_to_vmem [thread:$0]  %s19726_s4, 64, %s54_s16, [#allocation8]  }
  0x57   :  { %s16974_s15 = smov [#allocation12]   ;;  %s16975_s18 = smov [#allocation15]  }
  0x58   :  { %s75_s17 = sshll.u32 %s16974_s15, 4  ;;  %s96_s3 = sshll.u32 %s16975_s18, 4  ;;  %s76_s17 = int_to_ptr.vmem [resolvable:$true] %s75_s17  ;;  %s97_s3 = int_to_ptr.vmem [resolvable:$true] %s96_s3 }
  0x59   :  { %s16865_s20 = scalar_lea.hbm %s19728_s6, 16 }
  0x5a   :  { %p16866_p12 = scmp.ne.s32.totalorder %s19728_s6, %s16865_s20  ;;  %p16869_p13 = scmp.lt.u32.totalorder %s16865_s20, %s19728_s6 }
  0x5c   :  { %p16871_p0 = pnand %p16869_p13, %p16866_p12 }
  0x5e   :  { %16874 = shalt.err (!%p16871_p0)
}
  0x5f   :  { %s16875_s4 = scalar_lea.vmem %s76_s17, 16  ;;  %s16879_s16 = scalar_lea.vmem %s76_s17, 32 }
  0x60   :  { %p16876_p1 = scmp.ne.s32.totalorder %s76_s17, %s16875_s4  ;;  %p16880_p2 = scmp.lt.s32.totalorder %s76_s17, %s76_s17 }
  0x61   :  { %p16881_p3 = scmp.lt.s32.totalorder %s16879_s16, %s16875_s4 }
  0x63   :  { %p16882_p4 = por %p16881_p3, %p16880_p2 }
  0x65   :  { %p16883_p5 = pnand %p16882_p4, %p16876_p1 }
  0x67   :  { %16886 = shalt.err (!%p16883_p5)
}
  0x68   :  { %78 = dma.hbm_to_vmem [thread:$0]  %s19728_s6, 16, %s76_s17, [#allocation11]  }
  0x69   :  { %s16887_s11 = scalar_lea.hbm %s19730_s8, 2048 }
  0x6a   :  { %p16888_p6 = scmp.ne.s32.totalorder %s19730_s8, %s16887_s11  ;;  %p16891_p7 = scmp.lt.u32.totalorder %s16887_s11, %s19730_s8 }
  0x6c   :  { %p16893_p8 = pnand %p16891_p7, %p16888_p6 }
  0x6e   :  { %16896 = shalt.err (!%p16893_p8)
}
  0x6f   :  { %s16897_s13 = scalar_lea.vmem %s97_s3, 2048  ;;  %p16902_p10 = scmp.lt.s32.totalorder %s97_s3, %s97_s3 }
  0x70   :  { %p16898_p9 = scmp.ne.s32.totalorder %s97_s3, %s16897_s13  ;;  %p16903_p11 = scmp.lt.s32.totalorder %s16897_s13, %s16897_s13 }
  0x72   :  { %p16904_p12 = por %p16903_p11, %p16902_p10 }
  0x74   :  { %p16905_p13 = pnand %p16904_p12, %p16898_p9 }
  0x76   :  { %16908 = shalt.err (!%p16905_p13)
}
  0x77   :  { %102 = dma.hbm_to_vmem [thread:$0]  %s19730_s8, 2048, %s97_s3, [#allocation14], %s16970_s5, %s16970_s5, %s16971_s23  }
  0x78   :  { %s16976_s17 = smov [#allocation16]   ;;  %s16909_s20 = scalar_lea.hbm %s19731_s9, 16 }
  0x79   :  { %s109_s18 = sshll.u32 %s16976_s17, 4  ;;  %p16910_p0 = scmp.ne.s32.totalorder %s19731_s9, %s16909_s20  ;;  %s110_s18 = int_to_ptr.vmem [resolvable:$true] %s109_s18 }
  0x7a   :  { %p16913_p1 = scmp.lt.u32.totalorder %s16909_s20, %s19731_s9 }
  0x7c   :  { %p16915_p2 = pnand %p16913_p1, %p16910_p0 }
  0x7e   :  { %16918 = shalt.err (!%p16915_p2)
}
  0x7f   :  { %s16919_s4 = scalar_lea.vmem %s110_s18, 16  ;;  %s16923_s8 = scalar_lea.vmem %s110_s18, 32 }
  0x80   :  { %p16920_p3 = scmp.ne.s32.totalorder %s110_s18, %s16919_s4  ;;  %p16924_p4 = scmp.lt.s32.totalorder %s110_s18, %s110_s18 }
  0x81   :  { %p16925_p5 = scmp.lt.s32.totalorder %s16923_s8, %s16919_s4 }
  0x83   :  { %p16926_p6 = por %p16925_p5, %p16924_p4 }
  0x85   :  { %p16927_p7 = pnand %p16926_p6, %p16920_p3 }
  0x87   :  { %16930 = shalt.err (!%p16927_p7)
}
  0x88   :  { %112 = dma.hbm_to_vmem [thread:$0]  %s19731_s9, 16, %s110_s18, [#allocation17]  }
  0x89   :  { %16953 = dma.done.wait [#allocation5], 64  }
  0x8a   :  { %16954 = vsyncadd [#allocation5], 4294967232 }
  0x8b   :  { %16955 = dma.done.wait [#allocation8], 98368  }
  0x8c   :  { %16956 = vsyncadd [#allocation8], 4294868928 }
  0x8d   :  { %16957 = dma.done.wait [#allocation11], 32784  }
  0x8e   :  { %16958 = vsyncadd [#allocation11], 4294934512 }
  0x8f   :  { %16959 = dma.done.wait [#allocation14], 18432  }
  0x90   :  { %16960 = vsyncadd [#allocation14], 4294948864 }
  0x91   :  { %16961 = dma.done.wait [#allocation17], 16  }
  0x92   :  { %16962 = vsyncadd [#allocation17], 4294967280  ;;  %v204_v0 = vld [vmem:[%s19723_s1] sm:$0xff]  ;;  %v205_v2 = vld [vmem:[%s19723_s1 + $0x8] sm:$0xff]  ;;  %vm4214_vm2 = vcmask 130048  }
  0x93   :  { %v208_v1 = vld [vmem:[%s19723_s1 + $0x20] sm:$0xff]  ;;  %v209_v4 = vld [vmem:[%s19723_s1 + $0x28] sm:$0xff] }
  0x94   :  { %v14165_v3 = vcombine.high %v204_v0, %v208_v1  ;;  %v14164_v5 = vcombine.low %v204_v0, %v208_v1  ;;  %v212_v6 = vld [vmem:[%s19723_s1 + $0x40] sm:$0xff]  ;;  %v14167_v8 = vcombine.high %v205_v2, %v209_v4  ;;  %v14166_v9 = vcombine.low %v205_v2, %v209_v4  ;;  %v213_v11 = vld [vmem:[%s19723_s1 + $0x48] sm:$0xff] }
  0x95   :  { %v216_v7 = vld [vmem:[%s19723_s1 + $0x60] sm:$0xff]  ;;  %v217_v12 = vld [vmem:[%s19723_s1 + $0x68] sm:$0xff] }
  0x96   :  { %v14173_v10 = vcombine.high %v212_v6, %v216_v7  ;;  %v220_v13 = vld [vmem:[%s19723_s1 + $0x80] sm:$0xff]  ;;  %2748 = vmatprep.subr.bf16.mxu0 %v14165_v3  ;;  %v14175_v14 = vcombine.high %v213_v11, %v217_v12  ;;  %v221_v16 = vld [vmem:[%s19723_s1 + $0x88] sm:$0xff]  ;;  %3087 = vmatprep.subr.bf16.mxu1 %v14167_v8  ;;  %v14172_v18 = vcombine.low %v212_v6, %v216_v7 }
  0x97   :  { %v224_v15 = vld [vmem:[%s19723_s1 + $0xa0] sm:$0xff]  ;;  %v225_v17 = vld [vmem:[%s19723_s1 + $0xa8] sm:$0xff]  ;;  %2749 = vmatpush1.bf16.msra.mxu0 %v14164_v5  ;;  %3088 = vmatpush1.bf16.msra.mxu1 %v14166_v9  ;;  %v14174_v19 = vcombine.low %v213_v11, %v217_v12 }
  0x98   :  { %2750 = vmatprep.subr.bf16.mxu0 %v14173_v10  ;;  %v14181_v20 = vcombine.high %v220_v13, %v224_v15  ;;  %3089 = vmatprep.subr.bf16.mxu1 %v14175_v14  ;;  %v14183_v21 = vcombine.high %v221_v16, %v225_v17  ;;  %v228_v22 = vld [vmem:[%s19723_s1 + $0xc0] sm:$0xff]  ;;  %v229_v24 = vld [vmem:[%s19723_s1 + $0xc8] sm:$0xff]  ;;  %v14180_v26 = vcombine.low %v220_v13, %v224_v15 }
  0x99   :  { %v232_v23 = vld [vmem:[%s19723_s1 + $0xe0] sm:$0xff]  ;;  %v233_v25 = vld [vmem:[%s19723_s1 + $0xe8] sm:$0xff]  ;;  %v14182_v27 = vcombine.low %v221_v16, %v225_v17 }
  0x9a   :  { %v14189_v28 = vcombine.high %v228_v22, %v232_v23  ;;  %v14191_v29 = vcombine.high %v229_v24, %v233_v25  ;;  %v236_v30 = vld [vmem:[%s19723_s1 + $0x100] sm:$0xff]  ;;  %v237_v32 = vld [vmem:[%s19723_s1 + $0x108] sm:$0xff]  ;;  %v14188_v34 = vcombine.low %v228_v22, %v232_v23  ;;  %v14190_v35 = vcombine.low %v229_v24, %v233_v25 }
  0x9b   :  { %2751 = vmatpush1.bf16.msra.mxu0 %v14172_v18  ;;  %3090 = vmatpush1.bf16.msra.mxu1 %v14174_v19  ;;  %v240_v31 = vld [vmem:[%s19723_s1 + $0x120] sm:$0xff]  ;;  %v241_v33 = vld [vmem:[%s19723_s1 + $0x128] sm:$0xff] }
  0x9c   :  { %2752 = vmatprep.subr.bf16.mxu0 %v14181_v20  ;;  %3091 = vmatprep.subr.bf16.mxu1 %v14183_v21  ;;  %v14197_v36 = vcombine.high %v236_v30, %v240_v31  ;;  %v14199_v37 = vcombine.high %v237_v32, %v241_v33  ;;  %v244_v38 = vld [vmem:[%s19723_s1 + $0x140] sm:$0xff]  ;;  %v245_v40 = vld [vmem:[%s19723_s1 + $0x148] sm:$0xff]  ;;  %v14196_v42 = vcombine.low %v236_v30, %v240_v31 }
  0x9d   :  { %v248_v39 = vld [vmem:[%s19723_s1 + $0x160] sm:$0xff]  ;;  %v249_v41 = vld [vmem:[%s19723_s1 + $0x168] sm:$0xff]  ;;  %v14198_v43 = vcombine.low %v237_v32, %v241_v33 }
  0x9e   :  { %v14205_v44 = vcombine.high %v244_v38, %v248_v39  ;;  %v14207_v45 = vcombine.high %v245_v40, %v249_v41  ;;  %v252_v46 = vld [vmem:[%s19723_s1 + $0x180] sm:$0xff]  ;;  %v253_v48 = vld [vmem:[%s19723_s1 + $0x188] sm:$0xff]  ;;  %v14204_v50 = vcombine.low %v244_v38, %v248_v39  ;;  %v14206_v51 = vcombine.low %v245_v40, %v249_v41 }
  0x9f   :  { %2753 = vmatpush1.bf16.msra.mxu0 %v14180_v26  ;;  %3092 = vmatpush1.bf16.msra.mxu1 %v14182_v27  ;;  %v256_v47 = vld [vmem:[%s19723_s1 + $0x1a0] sm:$0xff]  ;;  %v257_v49 = vld [vmem:[%s19723_s1 + $0x1a8] sm:$0xff] }
  0xa0   :  { %2754 = vmatprep.subr.bf16.mxu0 %v14189_v28  ;;  %3093 = vmatprep.subr.bf16.mxu1 %v14191_v29  ;;  %v14213_v52 = vcombine.high %v252_v46, %v256_v47  ;;  %v14215_v53 = vcombine.high %v253_v48, %v257_v49  ;;  %v260_v54 = vld [vmem:[%s19723_s1 + $0x1c0] sm:$0xff]  ;;  %v261_v57 = vld [vmem:[%s19723_s1 + $0x1c8] sm:$0xff]  ;;  %v14212_v59 = vcombine.low %v252_v46, %v256_v47 }
  0xa1   :  { %v264_v55 = vld [vmem:[%s19723_s1 + $0x1e0] sm:$0xff]  ;;  %v265_v58 = vld [vmem:[%s19723_s1 + $0x1e8] sm:$0xff]  ;;  %v14214_v60 = vcombine.low %v253_v48, %v257_v49 }
  0xa2   :  { %v16635_v56 = vld [vmem:[%s19722_s0 + $0x4] ss:$24 sps:$4 sm:$0xff]   ;;  %v14221_v61 = vcombine.high %v260_v54, %v264_v55  ;;  %v14223_v62 = vcombine.high %v261_v57, %v265_v58  ;;  %v269_v1 = vld [vmem:[%s19723_s1 + $0x208] sm:$0xff]  ;;  %v14220_v3 = vcombine.low %v260_v54, %v264_v55  ;;  %v14222_v4 = vcombine.low %v261_v57, %v265_v58 }
  0xa3   :  { %2755 = vmatpush1.bf16.msra.mxu0 %v14188_v34  ;;  %3094 = vmatpush1.bf16.msra.mxu1 %v14190_v35  ;;  %v268_v63 = vld [vmem:[%s19723_s1 + $0x200] sm:$0xff]  ;;  %v273_v2 = vld [vmem:[%s19723_s1 + $0x228] sm:$0xff] }
  0xa4   :  { %2756 = vmatprep.subr.bf16.mxu0 %v14197_v36  ;;  %3095 = vmatprep.subr.bf16.mxu1 %v14199_v37  ;;  %v272_v0 = vld [vmem:[%s19723_s1 + $0x220] sm:$0xff]  ;;  %v14231_v6 = vcombine.high %v269_v1, %v273_v2  ;;  %v277_v9 = vld [vmem:[%s19723_s1 + $0x248] sm:$0xff]  ;;  %v14230_v12 = vcombine.low %v269_v1, %v273_v2 }
  0xa5   :  { %2780 = vmatprep.mubr.bf16.mxu0 %v16635_v56  ;;  %3119 = vmatprep.mubr.bf16.mxu1 %v16635_v56  ;;  %v14229_v5 = vcombine.high %v268_v63, %v272_v0  ;;  %v276_v7 = vld [vmem:[%s19723_s1 + $0x240] sm:$0xff]  ;;  %v281_v10 = vld [vmem:[%s19723_s1 + $0x268] sm:$0xff]  ;;  %v14228_v11 = vcombine.low %v268_v63, %v272_v0 }
  0xa6   :  { %v280_v8 = vld [vmem:[%s19723_s1 + $0x260] sm:$0xff]  ;;  %v14239_v14 = vcombine.high %v277_v9, %v281_v10  ;;  %v285_v17 = vld [vmem:[%s19723_s1 + $0x288] sm:$0xff]  ;;  %v14238_v20 = vcombine.low %v277_v9, %v281_v10 }
  0xa7   :  { %2757 = vmatpush1.bf16.msra.mxu0 %v14196_v42  ;;  %3096 = vmatpush1.bf16.msra.mxu1 %v14198_v43  ;;  %v14237_v13 = vcombine.high %v276_v7, %v280_v8  ;;  %v284_v15 = vld [vmem:[%s19723_s1 + $0x280] sm:$0xff]  ;;  %v289_v18 = vld [vmem:[%s19723_s1 + $0x2a8] sm:$0xff]  ;;  %v14236_v19 = vcombine.low %v276_v7, %v280_v8 }
  0xa8   :  { %2758 = vmatprep.subr.bf16.mxu0 %v14205_v44  ;;  %3097 = vmatprep.subr.bf16.mxu1 %v14207_v45  ;;  %v288_v16 = vld [vmem:[%s19723_s1 + $0x2a0] sm:$0xff]  ;;  %v14247_v22 = vcombine.high %v285_v17, %v289_v18  ;;  %v293_v25 = vld [vmem:[%s19723_s1 + $0x2c8] sm:$0xff]  ;;  %v14246_v28 = vcombine.low %v285_v17, %v289_v18 }
  0xa9   :  { %v14245_v21 = vcombine.high %v284_v15, %v288_v16  ;;  %v292_v23 = vld [vmem:[%s19723_s1 + $0x2c0] sm:$0xff]  ;;  %v297_v26 = vld [vmem:[%s19723_s1 + $0x2e8] sm:$0xff]  ;;  %v14244_v27 = vcombine.low %v284_v15, %v288_v16 }
  0xaa   :  { %v296_v24 = vld [vmem:[%s19723_s1 + $0x2e0] sm:$0xff]  ;;  %v14255_v30 = vcombine.high %v293_v25, %v297_v26  ;;  %v301_v33 = vld [vmem:[%s19723_s1 + $0x308] sm:$0xff]  ;;  %v14254_v36 = vcombine.low %v293_v25, %v297_v26 }
  0xab   :  { %2759 = vmatpush1.bf16.msra.mxu0 %v14204_v50  ;;  %3098 = vmatpush1.bf16.msra.mxu1 %v14206_v51  ;;  %v14253_v29 = vcombine.high %v292_v23, %v296_v24  ;;  %v300_v31 = vld [vmem:[%s19723_s1 + $0x300] sm:$0xff]  ;;  %v305_v34 = vld [vmem:[%s19723_s1 + $0x328] sm:$0xff]  ;;  %v14252_v35 = vcombine.low %v292_v23, %v296_v24 }
  0xac   :  { %2760 = vmatprep.subr.bf16.mxu0 %v14213_v52  ;;  %3099 = vmatprep.subr.bf16.mxu1 %v14215_v53  ;;  %v304_v32 = vld [vmem:[%s19723_s1 + $0x320] sm:$0xff]  ;;  %v14263_v38 = vcombine.high %v301_v33, %v305_v34  ;;  %v309_v41 = vld [vmem:[%s19723_s1 + $0x348] sm:$0xff]  ;;  %v14262_v44 = vcombine.low %v301_v33, %v305_v34 }
  0xad   :  { %v14261_v37 = vcombine.high %v300_v31, %v304_v32  ;;  %v308_v39 = vld [vmem:[%s19723_s1 + $0x340] sm:$0xff]  ;;  %v313_v42 = vld [vmem:[%s19723_s1 + $0x368] sm:$0xff]  ;;  %v14260_v43 = vcombine.low %v300_v31, %v304_v32 }
  0xae   :  { %v312_v40 = vld [vmem:[%s19723_s1 + $0x360] sm:$0xff]  ;;  %v14271_v46 = vcombine.high %v309_v41, %v313_v42  ;;  %v317_v49 = vld [vmem:[%s19723_s1 + $0x388] sm:$0xff]  ;;  %v14270_v52 = vcombine.low %v309_v41, %v313_v42 }
  0xaf   :  { %2761 = vmatpush1.bf16.msra.mxu0 %v14212_v59  ;;  %3100 = vmatpush1.bf16.msra.mxu1 %v14214_v60  ;;  %v14269_v45 = vcombine.high %v308_v39, %v312_v40  ;;  %v316_v47 = vld [vmem:[%s19723_s1 + $0x380] sm:$0xff]  ;;  %v321_v50 = vld [vmem:[%s19723_s1 + $0x3a8] sm:$0xff]  ;;  %v14268_v51 = vcombine.low %v308_v39, %v312_v40 }
  0xb0   :  { %2762 = vmatprep.subr.bf16.mxu0 %v14221_v61  ;;  %3101 = vmatprep.subr.bf16.mxu1 %v14223_v62  ;;  %v320_v48 = vld [vmem:[%s19723_s1 + $0x3a0] sm:$0xff]  ;;  %v14279_v54 = vcombine.high %v317_v49, %v321_v50  ;;  %v325_v57 = vld [vmem:[%s19723_s1 + $0x3c8] sm:$0xff]  ;;  %v14278_v60 = vcombine.low %v317_v49, %v321_v50 }
  0xb1   :  { %v14277_v53 = vcombine.high %v316_v47, %v320_v48  ;;  %v324_v55 = vld [vmem:[%s19723_s1 + $0x3c0] sm:$0xff]  ;;  %v329_v58 = vld [vmem:[%s19723_s1 + $0x3e8] sm:$0xff]  ;;  %v14276_v59 = vcombine.low %v316_v47, %v320_v48 }
  0xb2   :  { %v328_v56 = vld [vmem:[%s19723_s1 + $0x3e0] sm:$0xff]  ;;  %v14287_v62 = vcombine.high %v325_v57, %v329_v58  ;;  %v333_v1 = vld [vmem:[%s19723_s1 + $0x408] sm:$0xff] }
  0xb3   :  { %2763 = vmatpush1.bf16.msra.mxu0 %v14220_v3  ;;  %3102 = vmatpush1.bf16.msra.mxu1 %v14222_v4  ;;  %v14285_v61 = vcombine.high %v324_v55, %v328_v56  ;;  %v332_v63 = vld [vmem:[%s19723_s1 + $0x400] sm:$0xff]  ;;  %v337_v2 = vld [vmem:[%s19723_s1 + $0x428] sm:$0xff]  ;;  %v14284_v3 = vcombine.low %v324_v55, %v328_v56  ;;  %v14286_v4 = vcombine.low %v325_v57, %v329_v58 }
  0xb4   :  { %2764 = vmatprep.subr.bf16.mxu0 %v14229_v5  ;;  %3103 = vmatprep.subr.bf16.mxu1 %v14231_v6  ;;  %v336_v0 = vld [vmem:[%s19723_s1 + $0x420] sm:$0xff]  ;;  %v14295_v6 = vcombine.high %v333_v1, %v337_v2  ;;  %v341_v10 = vld [vmem:[%s19723_s1 + $0x448] sm:$0xff] }
  0xb5   :  { %v14293_v5 = vcombine.high %v332_v63, %v336_v0  ;;  %v340_v7 = vld [vmem:[%s19723_s1 + $0x440] sm:$0xff]  ;;  %v16638_v16 = vld [vmem:[%s19722_s0 + $0x34] ss:$24 sps:$4 sm:$0xff]  }
  0xb6   :  { %v344_v8 = vld [vmem:[%s19723_s1 + $0x460] sm:$0xff]  ;;  %v377_v47 = vld [vmem:[%s19723_s1 + $0x568] sm:$0xff] }
  0xb7   :  { %2765 = vmatpush1.bf16.msra.mxu0 %v14228_v11  ;;  %3104 = vmatpush1.bf16.msra.mxu1 %v14230_v12  ;;  %v16637_v9 = vld [vmem:[%s19722_s0] ss:$24 sps:$4 sm:$0xff]   ;;  %v345_v11 = vld [vmem:[%s19723_s1 + $0x468] sm:$0xff]  ;;  %v14292_v12 = vcombine.low %v332_v63, %v336_v0  ;;  %v16641_v34 = vld [vmem:[%s19722_s0 + $0x64] ss:$24 sps:$4 sm:$0xff]  }
  0xb8   :  { %2766 = vmatprep.subr.bf16.mxu0 %v14237_v13  ;;  %3105 = vmatprep.subr.bf16.mxu1 %v14239_v14  ;;  %v14294_v13 = vcombine.low %v333_v1, %v337_v2  ;;  %v14301_v14 = vcombine.high %v340_v7, %v344_v8  ;;  %v14303_v15 = vcombine.high %v341_v10, %v345_v11  ;;  %v348_v17 = vld [vmem:[%s19723_s1 + $0x480] sm:$0xff]  ;;  %v381_v55 = vld [vmem:[%s19723_s1 + $0x588] sm:$0xff] }
  0xb9   :  { %v352_v18 = vld [vmem:[%s19723_s1 + $0x4a0] sm:$0xff]  ;;  %v385_v56 = vld [vmem:[%s19723_s1 + $0x5a8] sm:$0xff] }
  0xba   :  { %v14309_v23 = vcombine.high %v348_v17, %v352_v18  ;;  %v356_v25 = vld [vmem:[%s19723_s1 + $0x4c0] sm:$0xff]  ;;  %v16646_v63 = vld [vmem:[%s19722_s0 + $0x90] ss:$24 sps:$4 sm:$0xff]  }
  0xbb   :  { %2767 = vmatpush1.bf16.msra.mxu0 %v14236_v19  ;;  %3106 = vmatpush1.bf16.msra.mxu1 %v14238_v20  ;;  %v349_v19 = vld [vmem:[%s19723_s1 + $0x488] sm:$0xff]  ;;  %v360_v26 = vld [vmem:[%s19723_s1 + $0x4e0] sm:$0xff] }
  0xbc   :  { %2768 = vmatprep.subr.bf16.mxu0 %v14245_v21  ;;  %3107 = vmatprep.subr.bf16.mxu1 %v14247_v22  ;;  %v353_v20 = vld [vmem:[%s19723_s1 + $0x4a8] sm:$0xff]  ;;  %v14300_v21 = vcombine.low %v340_v7, %v344_v8  ;;  %v14302_v22 = vcombine.low %v341_v10, %v345_v11  ;;  %v14317_v32 = vcombine.high %v356_v25, %v360_v26  ;;  %v396_v7 = vld [vmem:[%s19723_s1 + $0x600] sm:$0xff] }
  0xbd   :  { %v14311_v24 = vcombine.high %v349_v19, %v353_v20  ;;  %v14310_v31 = vcombine.low %v349_v19, %v353_v20  ;;  %v14316_v39 = vcombine.low %v356_v25, %v360_v26  ;;  %v389_v0 = vld [vmem:[%s19723_s1 + $0x5c8] sm:$0xff]  ;;  %v400_v8 = vld [vmem:[%s19723_s1 + $0x620] sm:$0xff] }
  0xbe   :  { %v393_v1 = vld [vmem:[%s19723_s1 + $0x5e8] sm:$0xff]  ;;  %v14356_v20 = vcombine.low %v396_v7, %v400_v8  ;;  %v412_v25 = vld [vmem:[%s19723_s1 + $0x680] sm:$0xff] }
  0xbf   :  { %2769 = vmatpush1.bf16.msra.mxu0 %v14244_v27  ;;  %3108 = vmatpush1.bf16.msra.mxu1 %v14246_v28  ;;  %v16640_v27 = vld [vmem:[%s19722_s0 + $0x30] ss:$24 sps:$4 sm:$0xff]   ;;  %v416_v26 = vld [vmem:[%s19723_s1 + $0x6a0] sm:$0xff] }
  0xc0   :  { %2770 = vmatprep.subr.bf16.mxu0 %v14253_v29  ;;  %3109 = vmatprep.subr.bf16.mxu1 %v14255_v30  ;;  %v357_v28 = vld [vmem:[%s19723_s1 + $0x4c8] sm:$0xff]  ;;  %v14308_v30 = vcombine.low %v348_v17, %v352_v18  ;;  %v16649_v17 = vld [vmem:[%s19722_s0 + $0xc0] ss:$24 sps:$4 sm:$0xff]  }
  0xc1   :  { %v361_v29 = vld [vmem:[%s19723_s1 + $0x4e8] sm:$0xff] }
  0xc2   :  { %v14319_v33 = vcombine.high %v357_v28, %v361_v29  ;;  %v14318_v40 = vcombine.low %v357_v28, %v361_v29  ;;  %v401_v10 = vld [vmem:[%s19723_s1 + $0x628] sm:$0xff] }
  0xc3   :  { %2771 = vmatpush1.bf16.msra.mxu0 %v14252_v35  ;;  %3110 = vmatpush1.bf16.msra.mxu1 %v14254_v36  ;;  %v364_v35 = vld [vmem:[%s19723_s1 + $0x500] sm:$0xff]  ;;  %v405_v18 = vld [vmem:[%s19723_s1 + $0x648] sm:$0xff] }
  0xc4   :  { %2772 = vmatprep.subr.bf16.mxu0 %v14261_v37  ;;  %3111 = vmatprep.subr.bf16.mxu1 %v14263_v38  ;;  %v368_v36 = vld [vmem:[%s19723_s1 + $0x520] sm:$0xff]  ;;  %v365_v37 = vld [vmem:[%s19723_s1 + $0x508] sm:$0xff] }
  0xc5   :  { %v369_v38 = vld [vmem:[%s19723_s1 + $0x528] sm:$0xff]  ;;  %v14325_v41 = vcombine.high %v364_v35, %v368_v36  ;;  %v14324_v48 = vcombine.low %v364_v35, %v368_v36 }
  0xc6   :  { %v14327_v42 = vcombine.high %v365_v37, %v369_v38  ;;  %v14326_v49 = vcombine.low %v365_v37, %v369_v38  ;;  %v409_v19 = vld [vmem:[%s19723_s1 + $0x668] sm:$0xff]  ;;  %v14372_v38 = vcombine.low %v412_v25, %v416_v26 }
  0xc7   :  { %2773 = vmatpush1.bf16.msra.mxu0 %v14260_v43  ;;  %3112 = vmatpush1.bf16.msra.mxu1 %v14262_v44  ;;  %v372_v43 = vld [vmem:[%s19723_s1 + $0x540] sm:$0xff]  ;;  %v417_v28 = vld [vmem:[%s19723_s1 + $0x6a8] sm:$0xff] }
  0xc8   :  { %2774 = vmatprep.subr.bf16.mxu0 %v14269_v45  ;;  %3113 = vmatprep.subr.bf16.mxu1 %v14271_v46  ;;  %v376_v44 = vld [vmem:[%s19723_s1 + $0x560] sm:$0xff]  ;;  %v373_v46 = vld [vmem:[%s19723_s1 + $0x548] sm:$0xff] }
  0xc9   :  { %v16643_v45 = vld [vmem:[%s19722_s0 + $0x60] ss:$24 sps:$4 sm:$0xff]   ;;  %v14333_v50 = vcombine.high %v372_v43, %v376_v44  ;;  %v14332_v57 = vcombine.low %v372_v43, %v376_v44  ;;  %v14334_v58 = vcombine.low %v373_v46, %v377_v47  ;;  %v16652_v35 = vld [vmem:[%s19722_s0 + $0xf0] ss:$24 sps:$4 sm:$0xff]  }
  0xca   :  { %v421_v36 = vld [vmem:[%s19723_s1 + $0x6c8] sm:$0xff]  ;;  %v428_v43 = vld [vmem:[%s19723_s1 + $0x700] sm:$0xff] }
  0xcb   :  { %2775 = vmatpush1.bf16.msra.mxu0 %v14268_v51  ;;  %3114 = vmatpush1.bf16.msra.mxu1 %v14270_v52  ;;  %v14335_v51 = vcombine.high %v373_v46, %v377_v47  ;;  %v16644_v52 = vld [vmem:[%s19722_s0 + $0x94] ss:$24 sps:$4 sm:$0xff]   ;;  %v432_v44 = vld [vmem:[%s19723_s1 + $0x720] sm:$0xff] }
  0xcc   :  { %2776 = vmatprep.subr.bf16.mxu0 %v14277_v53  ;;  %3115 = vmatprep.subr.bf16.mxu1 %v14279_v54  ;;  %v380_v53 = vld [vmem:[%s19723_s1 + $0x580] sm:$0xff]  ;;  %v425_v37 = vld [vmem:[%s19723_s1 + $0x6e8] sm:$0xff] }
  0xcd   :  { %v384_v54 = vld [vmem:[%s19723_s1 + $0x5a0] sm:$0xff]  ;;  %v433_v46 = vld [vmem:[%s19723_s1 + $0x728] sm:$0xff] }
  0xce   :  { %v14340_v2 = vcombine.low %v380_v53, %v384_v54 }
  0xcf   :  { %2777 = vmatpush1.bf16.msra.mxu0 %v14276_v59  ;;  %3116 = vmatpush1.bf16.msra.mxu1 %v14278_v60  ;;  %v14341_v59 = vcombine.high %v380_v53, %v384_v54  ;;  %v14343_v60 = vcombine.high %v381_v55, %v385_v56  ;;  %v16655_v53 = vld [vmem:[%s19722_s0 + $0x120] ss:$24 sps:$4 sm:$0xff]   ;;  %v437_v54 = vld [vmem:[%s19723_s1 + $0x748] sm:$0xff] }
  0xd0   :  { %2778 = vmatprep.subr.bf16.mxu0 %v14285_v61  ;;  %3117 = vmatprep.subr.bf16.mxu1 %v14287_v62  ;;  %v388_v61 = vld [vmem:[%s19723_s1 + $0x5c0] sm:$0xff] }
  0xd1   :  { %v392_v62 = vld [vmem:[%s19723_s1 + $0x5e0] sm:$0xff] }
  0xd2   :  { %v14348_v11 = vcombine.low %v388_v61, %v392_v62 }
  0xd3   :  { %2779 = vmatpush1.bf16.msra.mxu0 %v14284_v3  ;;  %3118 = vmatpush1.bf16.msra.mxu1 %v14286_v4  ;;  %v14342_v3 = vcombine.low %v381_v55, %v385_v56  ;;  %v14349_v4 = vcombine.high %v388_v61, %v392_v62  ;;  %v441_v55 = vld [vmem:[%s19723_s1 + $0x768] sm:$0xff]  ;;  %v14388_v56 = vcombine.low %v428_v43, %v432_v44  ;;  %v444_v61 = vld [vmem:[%s19723_s1 + $0x780] sm:$0xff] }
  0xd4   :  { %2861 = vmatprep.subr.bf16.mxu0 %v14293_v5  ;;  %3200 = vmatprep.subr.bf16.mxu1 %v14295_v6  ;;  %v14351_v5 = vcombine.high %v389_v0, %v393_v1  ;;  %v16647_v6 = vld [vmem:[%s19722_s0 + $0xc4] ss:$24 sps:$4 sm:$0xff]  }
  0xd5   :  { %v448_v62 = vld [vmem:[%s19723_s1 + $0x7a0] sm:$0xff] }
  0xd6   :  { %2781 = vmatmul.mubr.bf16.vlgmr.msra.gmra.mrb[0].mxu0 %v16637_v9  ;;  %3120 = vmatmul.mubr.bf16.vlgmr.msra.gmra.mrb[0].mxu1 %v16637_v9  ;;  %v397_v9 = vld [vmem:[%s19723_s1 + $0x608] sm:$0xff] }
  0xd7   :  { %2862 = vmatpush1.bf16.msra.mxu0 %v14292_v12  ;;  %3201 = vmatpush1.bf16.msra.mxu1 %v14294_v13  ;;  %v14350_v12 = vcombine.low %v389_v0, %v393_v1  ;;  %v14357_v13 = vcombine.high %v396_v7, %v400_v8  ;;  %v449_v0 = vld [vmem:[%s19723_s1 + $0x7a8] sm:$0xff] }
  0xd8   :  { %2863 = vmatprep.subr.bf16.mxu0 %v14301_v14  ;;  %3202 = vmatprep.subr.bf16.mxu1 %v14303_v15  ;;  %v14359_v14 = vcombine.high %v397_v9, %v401_v10  ;;  %v404_v15 = vld [vmem:[%s19723_s1 + $0x640] sm:$0xff]  ;;  %v16658_v7 = vld [vmem:[%s19722_s0 + $0x150] ss:$24 sps:$4 sm:$0xff]  }
  0xd9   :  { %2790 = vmatprep.mubr.bf16.mxu0 %v16638_v16  ;;  %3129 = vmatprep.mubr.bf16.mxu1 %v16638_v16  ;;  %v408_v16 = vld [vmem:[%s19723_s1 + $0x660] sm:$0xff]  ;;  %v453_v8 = vld [vmem:[%s19723_s1 + $0x7c8] sm:$0xff] }
  0xda   :  { %v14364_v29 = vcombine.low %v404_v15, %v408_v16 }
  0xdb   :  { %2864 = vmatpush1.bf16.msra.mxu0 %v14300_v21  ;;  %3203 = vmatpush1.bf16.msra.mxu1 %v14302_v22  ;;  %v14358_v21 = vcombine.low %v397_v9, %v401_v10  ;;  %v14365_v22 = vcombine.high %v404_v15, %v408_v16  ;;  %v457_v9 = vld [vmem:[%s19723_s1 + $0x7e8] sm:$0xff]  ;;  %v14404_v10 = vcombine.low %v444_v61, %v448_v62  ;;  %v460_v15 = vld [vmem:[%s19723_s1 + $0x800] sm:$0xff] }
  0xdc   :  { %2865 = vmatprep.subr.bf16.mxu0 %v14309_v23  ;;  %3204 = vmatprep.subr.bf16.mxu1 %v14311_v24  ;;  %v14367_v23 = vcombine.high %v405_v18, %v409_v19  ;;  %v16650_v24 = vld [vmem:[%s19722_s0 + $0xf4] ss:$24 sps:$4 sm:$0xff]   ;;  %v464_v16 = vld [vmem:[%s19723_s1 + $0x820] sm:$0xff] }
  0xde   :  { %2791 = vmatmul.mubr.bf16.gmra.mrb[4].mxu0 %v16640_v27  ;;  %3130 = vmatmul.mubr.bf16.gmra.mrb[4].mxu1 %v16640_v27  ;;  %v413_v27 = vld [vmem:[%s19723_s1 + $0x688] sm:$0xff] }
  0xdf   :  { %2866 = vmatpush1.bf16.msra.mxu0 %v14308_v30  ;;  %3205 = vmatpush1.bf16.msra.mxu1 %v14310_v31  ;;  %v14366_v30 = vcombine.low %v405_v18, %v409_v19  ;;  %v14373_v31 = vcombine.high %v412_v25, %v416_v26  ;;  %v465_v18 = vld [vmem:[%s19723_s1 + $0x828] sm:$0xff] }
  0xe0   :  { %2867 = vmatprep.subr.bf16.mxu0 %v14317_v32  ;;  %3206 = vmatprep.subr.bf16.mxu1 %v14319_v33  ;;  %v14375_v32 = vcombine.high %v413_v27, %v417_v28  ;;  %v420_v33 = vld [vmem:[%s19723_s1 + $0x6c0] sm:$0xff]  ;;  %v469_v26 = vld [vmem:[%s19723_s1 + $0x848] sm:$0xff] }
  0xe1   :  { %2800 = vmatprep.mubr.bf16.mxu0 %v16641_v34  ;;  %3139 = vmatprep.mubr.bf16.mxu1 %v16641_v34  ;;  %v424_v34 = vld [vmem:[%s19723_s1 + $0x6e0] sm:$0xff] }
  0xe2   :  { %v14380_v47 = vcombine.low %v420_v33, %v424_v34  ;;  %v16659_v25 = vld [vmem:[%s19722_s0 + $0x8] ss:$24 sps:$4 sm:$0xff]  }
  0xe3   :  { %2868 = vmatpush1.bf16.msra.mxu0 %v14316_v39  ;;  %3207 = vmatpush1.bf16.msra.mxu1 %v14318_v40  ;;  %v14374_v39 = vcombine.low %v413_v27, %v417_v28  ;;  %v14381_v40 = vcombine.high %v420_v33, %v424_v34  ;;  %v473_v27 = vld [vmem:[%s19723_s1 + $0x868] sm:$0xff]  ;;  %v14420_v28 = vcombine.low %v460_v15, %v464_v16  ;;  %v476_v33 = vld [vmem:[%s19723_s1 + $0x880] sm:$0xff] }
  0xe4   :  { %2869 = vmatprep.subr.bf16.mxu0 %v14325_v41  ;;  %3208 = vmatprep.subr.bf16.mxu1 %v14327_v42  ;;  %v14383_v41 = vcombine.high %v421_v36, %v425_v37  ;;  %v16653_v42 = vld [vmem:[%s19722_s0 + $0x124] ss:$24 sps:$4 sm:$0xff]  }
  0xe5   :  { %v480_v34 = vld [vmem:[%s19723_s1 + $0x8a0] sm:$0xff] }
  0xe6   :  { %2801 = vmatmul.mubr.bf16.gmra.mrb[8].mxu0 %v16643_v45  ;;  %3140 = vmatmul.mubr.bf16.gmra.mrb[8].mxu1 %v16643_v45  ;;  %v429_v45 = vld [vmem:[%s19723_s1 + $0x708] sm:$0xff] }
  0xe7   :  { %2870 = vmatpush1.bf16.msra.mxu0 %v14324_v48  ;;  %3209 = vmatpush1.bf16.msra.mxu1 %v14326_v49  ;;  %v14382_v48 = vcombine.low %v421_v36, %v425_v37  ;;  %v14389_v49 = vcombine.high %v428_v43, %v432_v44  ;;  %v481_v36 = vld [vmem:[%s19723_s1 + $0x8a8] sm:$0xff]  ;;  %v16664_v43 = vld [vmem:[%s19722_s0 + $0x38] ss:$24 sps:$4 sm:$0xff]  }
  0xe8   :  { %2871 = vmatprep.subr.bf16.mxu0 %v14333_v50  ;;  %3210 = vmatprep.subr.bf16.mxu1 %v14335_v51  ;;  %v14391_v50 = vcombine.high %v429_v45, %v433_v46  ;;  %v436_v51 = vld [vmem:[%s19723_s1 + $0x740] sm:$0xff]  ;;  %v485_v44 = vld [vmem:[%s19723_s1 + $0x8c8] sm:$0xff] }
  0xe9   :  { %2810 = vmatprep.mubr.bf16.mxu0 %v16644_v52  ;;  %3149 = vmatprep.mubr.bf16.mxu1 %v16644_v52  ;;  %v440_v52 = vld [vmem:[%s19723_s1 + $0x760] sm:$0xff] }
  0xea   :  { %v14396_v1 = vcombine.low %v436_v51, %v440_v52 }
  0xeb   :  { %2872 = vmatpush1.bf16.msra.mxu0 %v14332_v57  ;;  %3211 = vmatpush1.bf16.msra.mxu1 %v14334_v58  ;;  %v14390_v57 = vcombine.low %v429_v45, %v433_v46  ;;  %v14397_v58 = vcombine.high %v436_v51, %v440_v52  ;;  %v489_v45 = vld [vmem:[%s19723_s1 + $0x8e8] sm:$0xff]  ;;  %v14436_v46 = vcombine.low %v476_v33, %v480_v34  ;;  %v492_v51 = vld [vmem:[%s19723_s1 + $0x900] sm:$0xff] }
  0xec   :  { %2873 = vmatprep.subr.bf16.mxu0 %v14341_v59  ;;  %3212 = vmatprep.subr.bf16.mxu1 %v14343_v60  ;;  %v14399_v59 = vcombine.high %v437_v54, %v441_v55  ;;  %v16656_v60 = vld [vmem:[%s19722_s0 + $0x154] ss:$24 sps:$4 sm:$0xff]   ;;  %v496_v52 = vld [vmem:[%s19723_s1 + $0x920] sm:$0xff] }
  0xee   :  { %2811 = vmatmul.mubr.bf16.gmra.mrb[12].mxu0 %v16646_v63  ;;  %3150 = vmatmul.mubr.bf16.gmra.mrb[12].mxu1 %v16646_v63  ;;  %v445_v63 = vld [vmem:[%s19723_s1 + $0x788] sm:$0xff] }
  0xef   :  { %2874 = vmatpush1.bf16.msra.mxu0 %v14340_v2  ;;  %3213 = vmatpush1.bf16.msra.mxu1 %v14342_v3  ;;  %v14398_v2 = vcombine.low %v437_v54, %v441_v55  ;;  %v14405_v3 = vcombine.high %v444_v61, %v448_v62  ;;  %v497_v54 = vld [vmem:[%s19723_s1 + $0x928] sm:$0xff] }
  0xf0   :  { %2875 = vmatprep.subr.bf16.mxu0 %v14349_v4  ;;  %3214 = vmatprep.subr.bf16.mxu1 %v14351_v5  ;;  %v14407_v4 = vcombine.high %v445_v63, %v449_v0  ;;  %v452_v5 = vld [vmem:[%s19723_s1 + $0x7c0] sm:$0xff]  ;;  %v501_v62 = vld [vmem:[%s19723_s1 + $0x948] sm:$0xff] }
  0xf1   :  { %2820 = vmatprep.mubr.bf16.mxu0 %v16647_v6  ;;  %3159 = vmatprep.mubr.bf16.mxu1 %v16647_v6  ;;  %v456_v6 = vld [vmem:[%s19723_s1 + $0x7e0] sm:$0xff] }
  0xf2   :  { %v14412_v19 = vcombine.low %v452_v5, %v456_v6  ;;  %v16667_v61 = vld [vmem:[%s19722_s0 + $0x68] ss:$24 sps:$4 sm:$0xff]  }
  0xf3   :  { %2876 = vmatpush1.bf16.msra.mxu0 %v14348_v11  ;;  %3215 = vmatpush1.bf16.msra.mxu1 %v14350_v12  ;;  %v14406_v11 = vcombine.low %v445_v63, %v449_v0  ;;  %v14413_v12 = vcombine.high %v452_v5, %v456_v6  ;;  %v505_v63 = vld [vmem:[%s19723_s1 + $0x968] sm:$0xff]  ;;  %v14452_v0 = vcombine.low %v492_v51, %v496_v52  ;;  %v508_v5 = vld [vmem:[%s19723_s1 + $0x980] sm:$0xff] }
  0xf4   :  { %2877 = vmatprep.subr.bf16.mxu0 %v14357_v13  ;;  %3216 = vmatprep.subr.bf16.mxu1 %v14359_v14  ;;  %v14415_v13 = vcombine.high %v453_v8, %v457_v9  ;;  %v16661_v14 = vld [vmem:[%s19722_s0 + $0xc] ss:$24 sps:$4 sm:$0xff]  }
  0xf5   :  { %v512_v6 = vld [vmem:[%s19723_s1 + $0x9a0] sm:$0xff] }
  0xf6   :  { %2821 = vmatmul.mubr.bf16.gmra.mrb[16].mxu0 %v16649_v17  ;;  %3160 = vmatmul.mubr.bf16.gmra.mrb[16].mxu1 %v16649_v17  ;;  %v461_v17 = vld [vmem:[%s19723_s1 + $0x808] sm:$0xff] }
  0xf7   :  { %2878 = vmatpush1.bf16.msra.mxu0 %v14356_v20  ;;  %3217 = vmatpush1.bf16.msra.mxu1 %v14358_v21  ;;  %v14414_v20 = vcombine.low %v453_v8, %v457_v9  ;;  %v14421_v21 = vcombine.high %v460_v15, %v464_v16  ;;  %v513_v8 = vld [vmem:[%s19723_s1 + $0x9a8] sm:$0xff]  ;;  %v16670_v15 = vld [vmem:[%s19722_s0 + $0x98] ss:$24 sps:$4 sm:$0xff]  }
  0xf8   :  { %2879 = vmatprep.subr.bf16.mxu0 %v14365_v22  ;;  %3218 = vmatprep.subr.bf16.mxu1 %v14367_v23  ;;  %v14423_v22 = vcombine.high %v461_v17, %v465_v18  ;;  %v468_v23 = vld [vmem:[%s19723_s1 + $0x840] sm:$0xff]  ;;  %v517_v16 = vld [vmem:[%s19723_s1 + $0x9c8] sm:$0xff] }
  0xf9   :  { %2830 = vmatprep.mubr.bf16.mxu0 %v16650_v24  ;;  %3169 = vmatprep.mubr.bf16.mxu1 %v16650_v24  ;;  %v472_v24 = vld [vmem:[%s19723_s1 + $0x860] sm:$0xff] }
  0xfa   :  { %v14428_v37 = vcombine.low %v468_v23, %v472_v24 }
  0xfb   :  { %2880 = vmatpush1.bf16.msra.mxu0 %v14364_v29  ;;  %3219 = vmatpush1.bf16.msra.mxu1 %v14366_v30  ;;  %v14422_v29 = vcombine.low %v461_v17, %v465_v18  ;;  %v14429_v30 = vcombine.high %v468_v23, %v472_v24  ;;  %v521_v17 = vld [vmem:[%s19723_s1 + $0x9e8] sm:$0xff]  ;;  %v14468_v18 = vcombine.low %v508_v5, %v512_v6  ;;  %v524_v23 = vld [vmem:[%s19723_s1 + $0xa00] sm:$0xff] }
  0xfc   :  { %2881 = vmatprep.subr.bf16.mxu0 %v14373_v31  ;;  %3220 = vmatprep.subr.bf16.mxu1 %v14375_v32  ;;  %v14431_v31 = vcombine.high %v469_v26, %v473_v27  ;;  %v16662_v32 = vld [vmem:[%s19722_s0 + $0x3c] ss:$24 sps:$4 sm:$0xff]   ;;  %v528_v24 = vld [vmem:[%s19723_s1 + $0xa20] sm:$0xff] }
  0xfe   :  { %2831 = vmatmul.mubr.bf16.gmra.mrb[20].mxu0 %v16652_v35  ;;  %3170 = vmatmul.mubr.bf16.gmra.mrb[20].mxu1 %v16652_v35  ;;  %v477_v35 = vld [vmem:[%s19723_s1 + $0x888] sm:$0xff] }
  0xff   :  { %2882 = vmatpush1.bf16.msra.mxu0 %v14372_v38  ;;  %3221 = vmatpush1.bf16.msra.mxu1 %v14374_v39  ;;  %v14430_v38 = vcombine.low %v469_v26, %v473_v27  ;;  %v14437_v39 = vcombine.high %v476_v33, %v480_v34  ;;  %v529_v26 = vld [vmem:[%s19723_s1 + $0xa28] sm:$0xff] }
 0x100   :  { %2883 = vmatprep.subr.bf16.mxu0 %v14381_v40  ;;  %3222 = vmatprep.subr.bf16.mxu1 %v14383_v41  ;;  %v14439_v40 = vcombine.high %v477_v35, %v481_v36  ;;  %v484_v41 = vld [vmem:[%s19723_s1 + $0x8c0] sm:$0xff]  ;;  %v533_v34 = vld [vmem:[%s19723_s1 + $0xa48] sm:$0xff] }
 0x101   :  { %2840 = vmatprep.mubr.bf16.mxu0 %v16653_v42  ;;  %3179 = vmatprep.mubr.bf16.mxu1 %v16653_v42  ;;  %v488_v42 = vld [vmem:[%s19723_s1 + $0x8e0] sm:$0xff] }
 0x102   :  { %v14444_v55 = vcombine.low %v484_v41, %v488_v42  ;;  %v16673_v33 = vld [vmem:[%s19722_s0 + $0xc8] ss:$24 sps:$4 sm:$0xff]  }
 0x103   :  { %2884 = vmatpush1.bf16.msra.mxu0 %v14380_v47  ;;  %3223 = vmatpush1.bf16.msra.mxu1 %v14382_v48  ;;  %v14438_v47 = vcombine.low %v477_v35, %v481_v36  ;;  %v14445_v48 = vcombine.high %v484_v41, %v488_v42  ;;  %v537_v35 = vld [vmem:[%s19723_s1 + $0xa68] sm:$0xff]  ;;  %v14484_v36 = vcombine.low %v524_v23, %v528_v24  ;;  %v540_v41 = vld [vmem:[%s19723_s1 + $0xa80] sm:$0xff] }
 0x104   :  { %2885 = vmatprep.subr.bf16.mxu0 %v14389_v49  ;;  %3224 = vmatprep.subr.bf16.mxu1 %v14391_v50  ;;  %v14447_v49 = vcombine.high %v485_v44, %v489_v45  ;;  %v16665_v50 = vld [vmem:[%s19722_s0 + $0x6c] ss:$24 sps:$4 sm:$0xff]  }
 0x105   :  { %v544_v42 = vld [vmem:[%s19723_s1 + $0xaa0] sm:$0xff] }
 0x106   :  { %2841 = vmatmul.mubr.bf16.gmra.mrb[24].mxu0 %v16655_v53  ;;  %3180 = vmatmul.mubr.bf16.gmra.mrb[24].mxu1 %v16655_v53  ;;  %v493_v53 = vld [vmem:[%s19723_s1 + $0x908] sm:$0xff] }
 0x107   :  { %2886 = vmatpush1.bf16.msra.mxu0 %v14388_v56  ;;  %3225 = vmatpush1.bf16.msra.mxu1 %v14390_v57  ;;  %v14446_v56 = vcombine.low %v485_v44, %v489_v45  ;;  %v14453_v57 = vcombine.high %v492_v51, %v496_v52  ;;  %v545_v44 = vld [vmem:[%s19723_s1 + $0xaa8] sm:$0xff]  ;;  %v16676_v51 = vld [vmem:[%s19722_s0 + $0xf8] ss:$24 sps:$4 sm:$0xff]  }
 0x108   :  { %2887 = vmatprep.subr.bf16.mxu0 %v14397_v58  ;;  %3226 = vmatprep.subr.bf16.mxu1 %v14399_v59  ;;  %v14455_v58 = vcombine.high %v493_v53, %v497_v54  ;;  %v500_v59 = vld [vmem:[%s19723_s1 + $0x940] sm:$0xff]  ;;  %v549_v52 = vld [vmem:[%s19723_s1 + $0xac8] sm:$0xff] }
 0x109   :  { %2850 = vmatprep.mubr.bf16.mxu0 %v16656_v60  ;;  %3189 = vmatprep.mubr.bf16.mxu1 %v16656_v60  ;;  %v504_v60 = vld [vmem:[%s19723_s1 + $0x960] sm:$0xff] }
 0x10a   :  { %v14460_v9 = vcombine.low %v500_v59, %v504_v60 }
 0x10b   :  { %2888 = vmatpush1.bf16.msra.mxu0 %v14396_v1  ;;  %3227 = vmatpush1.bf16.msra.mxu1 %v14398_v2  ;;  %v14454_v1 = vcombine.low %v493_v53, %v497_v54  ;;  %v14461_v2 = vcombine.high %v500_v59, %v504_v60  ;;  %v553_v53 = vld [vmem:[%s19723_s1 + $0xae8] sm:$0xff]  ;;  %v14500_v54 = vcombine.low %v540_v41, %v544_v42  ;;  %v556_v59 = vld [vmem:[%s19723_s1 + $0xb00] sm:$0xff] }
 0x10c   :  { %2889 = vmatprep.subr.bf16.mxu0 %v14405_v3  ;;  %3228 = vmatprep.subr.bf16.mxu1 %v14407_v4  ;;  %v14463_v3 = vcombine.high %v501_v62, %v505_v63  ;;  %v16668_v4 = vld [vmem:[%s19722_s0 + $0x9c] ss:$24 sps:$4 sm:$0xff]   ;;  %v560_v60 = vld [vmem:[%s19723_s1 + $0xb20] sm:$0xff] }
 0x10e   :  { %2851 = vmatmul.mubr.bf16.gmra.mrb[28].mxu0 %v16658_v7  ;;  %3190 = vmatmul.mubr.bf16.gmra.mrb[28].mxu1 %v16658_v7  ;;  %v509_v7 = vld [vmem:[%s19723_s1 + $0x988] sm:$0xff] }
 0x10f   :  { %2890 = vmatpush1.bf16.msra.mxu0 %v14404_v10  ;;  %3229 = vmatpush1.bf16.msra.mxu1 %v14406_v11  ;;  %v14462_v10 = vcombine.low %v501_v62, %v505_v63  ;;  %v14469_v11 = vcombine.high %v508_v5, %v512_v6  ;;  %v561_v62 = vld [vmem:[%s19723_s1 + $0xb28] sm:$0xff] }
 0x110   :  { %2891 = vmatprep.subr.bf16.mxu0 %v14413_v12  ;;  %3230 = vmatprep.subr.bf16.mxu1 %v14415_v13  ;;  %v14471_v12 = vcombine.high %v509_v7, %v513_v8  ;;  %v516_v13 = vld [vmem:[%s19723_s1 + $0x9c0] sm:$0xff]  ;;  %v565_v6 = vld [vmem:[%s19723_s1 + $0xb48] sm:$0xff] }
 0x111   :  { %2893 = vmatprep.mubr.bf16.mxu0 %v16661_v14  ;;  %3232 = vmatprep.mubr.bf16.mxu1 %v16661_v14  ;;  %v520_v14 = vld [vmem:[%s19723_s1 + $0x9e0] sm:$0xff] }
 0x112   :  { %v14476_v27 = vcombine.low %v516_v13, %v520_v14  ;;  %v16679_v5 = vld [vmem:[%s19722_s0 + $0x128] ss:$24 sps:$4 sm:$0xff]  }
 0x113   :  { %2892 = vmatpush1.bf16.msra.mxu0 %v14412_v19  ;;  %3231 = vmatpush1.bf16.msra.mxu1 %v14414_v20  ;;  %v14470_v19 = vcombine.low %v509_v7, %v513_v8  ;;  %v14477_v20 = vcombine.high %v516_v13, %v520_v14  ;;  %v569_v7 = vld [vmem:[%s19723_s1 + $0xb68] sm:$0xff]  ;;  %v14516_v8 = vcombine.low %v556_v59, %v560_v60  ;;  %v572_v13 = vld [vmem:[%s19723_s1 + $0xb80] sm:$0xff] }
 0x114   :  { %2974 = vmatprep.subr.bf16.mxu0 %v14421_v21  ;;  %3313 = vmatprep.subr.bf16.mxu1 %v14423_v22  ;;  %v14479_v21 = vcombine.high %v517_v16, %v521_v17  ;;  %v16671_v22 = vld [vmem:[%s19722_s0 + $0xcc] ss:$24 sps:$4 sm:$0xff]  }
 0x115   :  { %v576_v14 = vld [vmem:[%s19723_s1 + $0xba0] sm:$0xff] }
 0x116   :  { %2894 = vmatmul.mubr.bf16.vlgmr.msra.gmra.mrb[0].mxu0 %v16659_v25  ;;  %3233 = vmatmul.mubr.bf16.vlgmr.msra.gmra.mrb[0].mxu1 %v16659_v25  ;;  %v525_v25 = vld [vmem:[%s19723_s1 + $0xa08] sm:$0xff] }
 0x117   :  { %2975 = vmatpush1.bf16.msra.mxu0 %v14420_v28  ;;  %3314 = vmatpush1.bf16.msra.mxu1 %v14422_v29  ;;  %v14478_v28 = vcombine.low %v517_v16, %v521_v17  ;;  %v14485_v29 = vcombine.high %v524_v23, %v528_v24  ;;  %v577_v16 = vld [vmem:[%s19723_s1 + $0xba8] sm:$0xff]  ;;  %v16682_v23 = vld [vmem:[%s19722_s0 + $0x158] ss:$24 sps:$4 sm:$0xff]  }
 0x118   :  { %2976 = vmatprep.subr.bf16.mxu0 %v14429_v30  ;;  %3315 = vmatprep.subr.bf16.mxu1 %v14431_v31  ;;  %v14487_v30 = vcombine.high %v525_v25, %v529_v26  ;;  %v532_v31 = vld [vmem:[%s19723_s1 + $0xa40] sm:$0xff]  ;;  %v581_v24 = vld [vmem:[%s19723_s1 + $0xbc8] sm:$0xff] }
 0x119   :  { %2903 = vmatprep.mubr.bf16.mxu0 %v16662_v32  ;;  %3242 = vmatprep.mubr.bf16.mxu1 %v16662_v32  ;;  %v536_v32 = vld [vmem:[%s19723_s1 + $0xa60] sm:$0xff] }
 0x11a   :  { %v14492_v45 = vcombine.low %v532_v31, %v536_v32 }
 0x11b   :  { %2977 = vmatpush1.bf16.msra.mxu0 %v14428_v37  ;;  %3316 = vmatpush1.bf16.msra.mxu1 %v14430_v38  ;;  %v14486_v37 = vcombine.low %v525_v25, %v529_v26  ;;  %v14493_v38 = vcombine.high %v532_v31, %v536_v32  ;;  %v585_v25 = vld [vmem:[%s19723_s1 + $0xbe8] sm:$0xff]  ;;  %v14532_v26 = vcombine.low %v572_v13, %v576_v14  ;;  %v206_v31 = vld [vmem:[%s19723_s1 + $0x10] sm:$0xff] }
 0x11c   :  { %2978 = vmatprep.subr.bf16.mxu0 %v14437_v39  ;;  %3317 = vmatprep.subr.bf16.mxu1 %v14439_v40  ;;  %v14495_v39 = vcombine.high %v533_v34, %v537_v35  ;;  %v16674_v40 = vld [vmem:[%s19722_s0 + $0xfc] ss:$24 sps:$4 sm:$0xff]  }
 0x11d   :  { %v210_v32 = vld [vmem:[%s19723_s1 + $0x30] sm:$0xff] }
 0x11e   :  { %2904 = vmatmul.mubr.bf16.gmra.mrb[4].mxu0 %v16664_v43  ;;  %3243 = vmatmul.mubr.bf16.gmra.mrb[4].mxu1 %v16664_v43  ;;  %v541_v43 = vld [vmem:[%s19723_s1 + $0xa88] sm:$0xff] }
 0x11f   :  { %2979 = vmatpush1.bf16.msra.mxu0 %v14436_v46  ;;  %3318 = vmatpush1.bf16.msra.mxu1 %v14438_v47  ;;  %v14494_v46 = vcombine.low %v533_v34, %v537_v35  ;;  %v14501_v47 = vcombine.high %v540_v41, %v544_v42  ;;  %v211_v34 = vld [vmem:[%s19723_s1 + $0x38] sm:$0xff]  ;;  %v16683_v41 = vld [vmem:[%s19722_s0 + $0x10] ss:$24 sps:$4 sm:$0xff]  }
 0x120   :  { %2980 = vmatprep.subr.bf16.mxu0 %v14445_v48  ;;  %3319 = vmatprep.subr.bf16.mxu1 %v14447_v49  ;;  %v14503_v48 = vcombine.high %v541_v43, %v545_v44  ;;  %v548_v49 = vld [vmem:[%s19723_s1 + $0xac0] sm:$0xff]  ;;  %v215_v42 = vld [vmem:[%s19723_s1 + $0x58] sm:$0xff] }
 0x121   :  { %2913 = vmatprep.mubr.bf16.mxu0 %v16665_v50  ;;  %3252 = vmatprep.mubr.bf16.mxu1 %v16665_v50  ;;  %v552_v50 = vld [vmem:[%s19723_s1 + $0xae0] sm:$0xff] }
 0x122   :  { %v14508_v63 = vcombine.low %v548_v49, %v552_v50 }
 0x123   :  { %2981 = vmatpush1.bf16.msra.mxu0 %v14444_v55  ;;  %3320 = vmatpush1.bf16.msra.mxu1 %v14446_v56  ;;  %v14502_v55 = vcombine.low %v541_v43, %v545_v44  ;;  %v14509_v56 = vcombine.high %v548_v49, %v552_v50  ;;  %v219_v43 = vld [vmem:[%s19723_s1 + $0x78] sm:$0xff]  ;;  %v14168_v44 = vcombine.low %v206_v31, %v210_v32  ;;  %v222_v49 = vld [vmem:[%s19723_s1 + $0x90] sm:$0xff] }
 0x124   :  { %2982 = vmatprep.subr.bf16.mxu0 %v14453_v57  ;;  %3321 = vmatprep.subr.bf16.mxu1 %v14455_v58  ;;  %v14511_v57 = vcombine.high %v549_v52, %v553_v53  ;;  %v16677_v58 = vld [vmem:[%s19722_s0 + $0x12c] ss:$24 sps:$4 sm:$0xff]   ;;  %v226_v50 = vld [vmem:[%s19723_s1 + $0xb0] sm:$0xff] }
 0x126   :  { %2914 = vmatmul.mubr.bf16.gmra.mrb[8].mxu0 %v16667_v61  ;;  %3253 = vmatmul.mubr.bf16.gmra.mrb[8].mxu1 %v16667_v61  ;;  %v557_v61 = vld [vmem:[%s19723_s1 + $0xb08] sm:$0xff] }
 0x127   :  { %2983 = vmatpush1.bf16.msra.mxu0 %v14452_v0  ;;  %3322 = vmatpush1.bf16.msra.mxu1 %v14454_v1  ;;  %v14510_v0 = vcombine.low %v549_v52, %v553_v53  ;;  %v14517_v1 = vcombine.high %v556_v59, %v560_v60  ;;  %v227_v52 = vld [vmem:[%s19723_s1 + $0xb8] sm:$0xff] }
 0x128   :  { %2984 = vmatprep.subr.bf16.mxu0 %v14461_v2  ;;  %3323 = vmatprep.subr.bf16.mxu1 %v14463_v3  ;;  %v14519_v2 = vcombine.high %v557_v61, %v561_v62  ;;  %v564_v3 = vld [vmem:[%s19723_s1 + $0xb40] sm:$0xff]  ;;  %v231_v60 = vld [vmem:[%s19723_s1 + $0xd8] sm:$0xff] }
 0x129   :  { %2923 = vmatprep.mubr.bf16.mxu0 %v16668_v4  ;;  %3262 = vmatprep.mubr.bf16.mxu1 %v16668_v4  ;;  %v568_v4 = vld [vmem:[%s19723_s1 + $0xb60] sm:$0xff] }
 0x12a   :  { %v14524_v17 = vcombine.low %v564_v3, %v568_v4  ;;  %v16688_v59 = vld [vmem:[%s19722_s0 + $0x40] ss:$24 sps:$4 sm:$0xff]  }
 0x12b   :  { %2985 = vmatpush1.bf16.msra.mxu0 %v14460_v9  ;;  %3324 = vmatpush1.bf16.msra.mxu1 %v14462_v10  ;;  %v14518_v9 = vcombine.low %v557_v61, %v561_v62  ;;  %v14525_v10 = vcombine.high %v564_v3, %v568_v4  ;;  %v235_v61 = vld [vmem:[%s19723_s1 + $0xf8] sm:$0xff]  ;;  %v14184_v62 = vcombine.low %v222_v49, %v226_v50  ;;  %v238_v3 = vld [vmem:[%s19723_s1 + $0x110] sm:$0xff] }
 0x12c   :  { %2986 = vmatprep.subr.bf16.mxu0 %v14469_v11  ;;  %3325 = vmatprep.subr.bf16.mxu1 %v14471_v12  ;;  %v14527_v11 = vcombine.high %v565_v6, %v569_v7  ;;  %v16680_v12 = vld [vmem:[%s19722_s0 + $0x15c] ss:$24 sps:$4 sm:$0xff]  }
 0x12d   :  { %v242_v4 = vld [vmem:[%s19723_s1 + $0x130] sm:$0xff] }
 0x12e   :  { %2924 = vmatmul.mubr.bf16.gmra.mrb[12].mxu0 %v16670_v15  ;;  %3263 = vmatmul.mubr.bf16.gmra.mrb[12].mxu1 %v16670_v15  ;;  %v573_v15 = vld [vmem:[%s19723_s1 + $0xb88] sm:$0xff] }
 0x12f   :  { %2987 = vmatpush1.bf16.msra.mxu0 %v14468_v18  ;;  %3326 = vmatpush1.bf16.msra.mxu1 %v14470_v19  ;;  %v14526_v18 = vcombine.low %v565_v6, %v569_v7  ;;  %v14533_v19 = vcombine.high %v572_v13, %v576_v14  ;;  %v243_v6 = vld [vmem:[%s19723_s1 + $0x138] sm:$0xff]  ;;  %v16691_v13 = vld [vmem:[%s19722_s0 + $0x70] ss:$24 sps:$4 sm:$0xff]  }
 0x130   :  { %2988 = vmatprep.subr.bf16.mxu0 %v14477_v20  ;;  %3327 = vmatprep.subr.bf16.mxu1 %v14479_v21  ;;  %v14535_v20 = vcombine.high %v573_v15, %v577_v16  ;;  %v580_v21 = vld [vmem:[%s19723_s1 + $0xbc0] sm:$0xff]  ;;  %v247_v14 = vld [vmem:[%s19723_s1 + $0x158] sm:$0xff] }
 0x131   :  { %2933 = vmatprep.mubr.bf16.mxu0 %v16671_v22  ;;  %3272 = vmatprep.mubr.bf16.mxu1 %v16671_v22  ;;  %v584_v22 = vld [vmem:[%s19723_s1 + $0xbe0] sm:$0xff] }
 0x132   :  { %v14540_v35 = vcombine.low %v580_v21, %v584_v22 }
 0x133   :  { %2989 = vmatpush1.bf16.msra.mxu0 %v14476_v27  ;;  %3328 = vmatpush1.bf16.msra.mxu1 %v14478_v28  ;;  %v14534_v27 = vcombine.low %v573_v15, %v577_v16  ;;  %v14541_v28 = vcombine.high %v580_v21, %v584_v22  ;;  %v251_v15 = vld [vmem:[%s19723_s1 + $0x178] sm:$0xff]  ;;  %v14200_v16 = vcombine.low %v238_v3, %v242_v4  ;;  %v254_v21 = vld [vmem:[%s19723_s1 + $0x190] sm:$0xff] }
 0x134   :  { %2990 = vmatprep.subr.bf16.mxu0 %v14485_v29  ;;  %3329 = vmatprep.subr.bf16.mxu1 %v14487_v30  ;;  %v14543_v29 = vcombine.high %v581_v24, %v585_v25  ;;  %v16685_v30 = vld [vmem:[%s19722_s0 + $0x14] ss:$24 sps:$4 sm:$0xff]  }
 0x135   :  { %v258_v22 = vld [vmem:[%s19723_s1 + $0x1b0] sm:$0xff] }
 0x136   :  { %2934 = vmatmul.mubr.bf16.gmra.mrb[16].mxu0 %v16673_v33  ;;  %3273 = vmatmul.mubr.bf16.gmra.mrb[16].mxu1 %v16673_v33  ;;  %v207_v33 = vld [vmem:[%s19723_s1 + $0x18] sm:$0xff] }
 0x137   :  { %2991 = vmatpush1.bf16.msra.mxu0 %v14484_v36  ;;  %3330 = vmatpush1.bf16.msra.mxu1 %v14486_v37  ;;  %v14542_v36 = vcombine.low %v581_v24, %v585_v25  ;;  %v14169_v37 = vcombine.high %v206_v31, %v210_v32  ;;  %v259_v24 = vld [vmem:[%s19723_s1 + $0x1b8] sm:$0xff] }
 0x138   :  { %2992 = vmatprep.subr.bf16.mxu0 %v14493_v38  ;;  %3331 = vmatprep.subr.bf16.mxu1 %v14495_v39  ;;  %v14171_v38 = vcombine.high %v207_v33, %v211_v34  ;;  %v214_v39 = vld [vmem:[%s19723_s1 + $0x50] sm:$0xff]  ;;  %v16694_v31 = vld [vmem:[%s19722_s0 + $0xa0] ss:$24 sps:$4 sm:$0xff]  }
 0x139   :  { %2943 = vmatprep.mubr.bf16.mxu0 %v16674_v40  ;;  %3282 = vmatprep.mubr.bf16.mxu1 %v16674_v40  ;;  %v218_v40 = vld [vmem:[%s19723_s1 + $0x70] sm:$0xff]  ;;  %v263_v32 = vld [vmem:[%s19723_s1 + $0x1d8] sm:$0xff] }
 0x13a   :  { %v14176_v53 = vcombine.low %v214_v39, %v218_v40 }
 0x13b   :  { %2993 = vmatpush1.bf16.msra.mxu0 %v14492_v45  ;;  %3332 = vmatpush1.bf16.msra.mxu1 %v14494_v46  ;;  %v14170_v45 = vcombine.low %v207_v33, %v211_v34  ;;  %v14177_v46 = vcombine.high %v214_v39, %v218_v40  ;;  %v267_v33 = vld [vmem:[%s19723_s1 + $0x1f8] sm:$0xff]  ;;  %v14216_v34 = vcombine.low %v254_v21, %v258_v22  ;;  %v270_v39 = vld [vmem:[%s19723_s1 + $0x210] sm:$0xff] }
 0x13c   :  { %2994 = vmatprep.subr.bf16.mxu0 %v14501_v47  ;;  %3333 = vmatprep.subr.bf16.mxu1 %v14503_v48  ;;  %v14179_v47 = vcombine.high %v215_v42, %v219_v43  ;;  %v16686_v48 = vld [vmem:[%s19722_s0 + $0x44] ss:$24 sps:$4 sm:$0xff]   ;;  %v274_v40 = vld [vmem:[%s19723_s1 + $0x230] sm:$0xff] }
 0x13e   :  { %2944 = vmatmul.mubr.bf16.gmra.mrb[20].mxu0 %v16676_v51  ;;  %3283 = vmatmul.mubr.bf16.gmra.mrb[20].mxu1 %v16676_v51  ;;  %v223_v51 = vld [vmem:[%s19723_s1 + $0x98] sm:$0xff] }
 0x13f   :  { %2995 = vmatpush1.bf16.msra.mxu0 %v14500_v54  ;;  %3334 = vmatpush1.bf16.msra.mxu1 %v14502_v55  ;;  %v14178_v54 = vcombine.low %v215_v42, %v219_v43  ;;  %v14185_v55 = vcombine.high %v222_v49, %v226_v50  ;;  %v275_v42 = vld [vmem:[%s19723_s1 + $0x238] sm:$0xff]  ;;  %v16697_v49 = vld [vmem:[%s19722_s0 + $0xd0] ss:$24 sps:$4 sm:$0xff]  }
 0x140   :  { %2996 = vmatprep.subr.bf16.mxu0 %v14509_v56  ;;  %3335 = vmatprep.subr.bf16.mxu1 %v14511_v57  ;;  %v14187_v56 = vcombine.high %v223_v51, %v227_v52  ;;  %v230_v57 = vld [vmem:[%s19723_s1 + $0xd0] sm:$0xff]  ;;  %v279_v50 = vld [vmem:[%s19723_s1 + $0x258] sm:$0xff] }
 0x141   :  { %2953 = vmatprep.mubr.bf16.mxu0 %v16677_v58  ;;  %3292 = vmatprep.mubr.bf16.mxu1 %v16677_v58  ;;  %v234_v58 = vld [vmem:[%s19723_s1 + $0xf0] sm:$0xff] }
 0x142   :  { %v14192_v7 = vcombine.low %v230_v57, %v234_v58 }
 0x143   :  { %2997 = vmatpush1.bf16.msra.mxu0 %v14508_v63  ;;  %3336 = vmatpush1.bf16.msra.mxu1 %v14510_v0  ;;  %v14186_v63 = vcombine.low %v223_v51, %v227_v52  ;;  %v14193_v0 = vcombine.high %v230_v57, %v234_v58  ;;  %v283_v51 = vld [vmem:[%s19723_s1 + $0x278] sm:$0xff]  ;;  %v14232_v52 = vcombine.low %v270_v39, %v274_v40  ;;  %v286_v57 = vld [vmem:[%s19723_s1 + $0x290] sm:$0xff] }
 0x144   :  { %2998 = vmatprep.subr.bf16.mxu0 %v14517_v1  ;;  %3337 = vmatprep.subr.bf16.mxu1 %v14519_v2  ;;  %v14195_v1 = vcombine.high %v231_v60, %v235_v61  ;;  %v16689_v2 = vld [vmem:[%s19722_s0 + $0x74] ss:$24 sps:$4 sm:$0xff]  }
 0x145   :  { %v290_v58 = vld [vmem:[%s19723_s1 + $0x2b0] sm:$0xff] }
 0x146   :  { %2954 = vmatmul.mubr.bf16.gmra.mrb[24].mxu0 %v16679_v5  ;;  %3293 = vmatmul.mubr.bf16.gmra.mrb[24].mxu1 %v16679_v5  ;;  %v239_v5 = vld [vmem:[%s19723_s1 + $0x118] sm:$0xff] }
 0x147   :  { %2999 = vmatpush1.bf16.msra.mxu0 %v14516_v8  ;;  %3338 = vmatpush1.bf16.msra.mxu1 %v14518_v9  ;;  %v14194_v8 = vcombine.low %v231_v60, %v235_v61  ;;  %v14201_v9 = vcombine.high %v238_v3, %v242_v4  ;;  %v291_v60 = vld [vmem:[%s19723_s1 + $0x2b8] sm:$0xff] }
 0x148   :  { %3000 = vmatprep.subr.bf16.mxu0 %v14525_v10  ;;  %3339 = vmatprep.subr.bf16.mxu1 %v14527_v11  ;;  %v14203_v10 = vcombine.high %v239_v5, %v243_v6  ;;  %v246_v11 = vld [vmem:[%s19723_s1 + $0x150] sm:$0xff]  ;;  %v16700_v3 = vld [vmem:[%s19722_s0 + $0x100] ss:$24 sps:$4 sm:$0xff]  }
 0x149   :  { %2963 = vmatprep.mubr.bf16.mxu0 %v16680_v12  ;;  %3302 = vmatprep.mubr.bf16.mxu1 %v16680_v12  ;;  %v250_v12 = vld [vmem:[%s19723_s1 + $0x170] sm:$0xff]  ;;  %v295_v4 = vld [vmem:[%s19723_s1 + $0x2d8] sm:$0xff] }
 0x14a   :  { %v14208_v25 = vcombine.low %v246_v11, %v250_v12 }
 0x14b   :  { %3001 = vmatpush1.bf16.msra.mxu0 %v14524_v17  ;;  %3340 = vmatpush1.bf16.msra.mxu1 %v14526_v18  ;;  %v14202_v17 = vcombine.low %v239_v5, %v243_v6  ;;  %v14209_v18 = vcombine.high %v246_v11, %v250_v12  ;;  %v299_v5 = vld [vmem:[%s19723_s1 + $0x2f8] sm:$0xff]  ;;  %v14248_v6 = vcombine.low %v286_v57, %v290_v58  ;;  %v302_v11 = vld [vmem:[%s19723_s1 + $0x310] sm:$0xff] }
 0x14c   :  { %3002 = vmatprep.subr.bf16.mxu0 %v14533_v19  ;;  %3341 = vmatprep.subr.bf16.mxu1 %v14535_v20  ;;  %v14211_v19 = vcombine.high %v247_v14, %v251_v15  ;;  %v16692_v20 = vld [vmem:[%s19722_s0 + $0xa4] ss:$24 sps:$4 sm:$0xff]   ;;  %v306_v12 = vld [vmem:[%s19723_s1 + $0x330] sm:$0xff] }
 0x14e   :  { %2964 = vmatmul.mubr.bf16.gmra.mrb[28].mxu0 %v16682_v23  ;;  %3303 = vmatmul.mubr.bf16.gmra.mrb[28].mxu1 %v16682_v23  ;;  %v255_v23 = vld [vmem:[%s19723_s1 + $0x198] sm:$0xff] }
 0x14f   :  { %3003 = vmatpush1.bf16.msra.mxu0 %v14532_v26  ;;  %3342 = vmatpush1.bf16.msra.mxu1 %v14534_v27  ;;  %v14210_v26 = vcombine.low %v247_v14, %v251_v15  ;;  %v14217_v27 = vcombine.high %v254_v21, %v258_v22  ;;  %v307_v14 = vld [vmem:[%s19723_s1 + $0x338] sm:$0xff]  ;;  %v16703_v21 = vld [vmem:[%s19722_s0 + $0x130] ss:$24 sps:$4 sm:$0xff]  }
 0x150   :  { %3004 = vmatprep.subr.bf16.mxu0 %v14541_v28  ;;  %3343 = vmatprep.subr.bf16.mxu1 %v14543_v29  ;;  %v14219_v28 = vcombine.high %v255_v23, %v259_v24  ;;  %v262_v29 = vld [vmem:[%s19723_s1 + $0x1d0] sm:$0xff]  ;;  %v311_v22 = vld [vmem:[%s19723_s1 + $0x358] sm:$0xff] }
 0x151   :  { %3006 = vmatprep.mubr.bf16.mxu0 %v16685_v30  ;;  %3345 = vmatprep.mubr.bf16.mxu1 %v16685_v30  ;;  %v266_v30 = vld [vmem:[%s19723_s1 + $0x1f0] sm:$0xff] }
 0x152   :  { %v14224_v43 = vcombine.low %v262_v29, %v266_v30 }
 0x153   :  { %3005 = vmatpush1.bf16.msra.mxu0 %v14540_v35  ;;  %3344 = vmatpush1.bf16.msra.mxu1 %v14542_v36  ;;  %v14218_v35 = vcombine.low %v255_v23, %v259_v24  ;;  %v14225_v36 = vcombine.high %v262_v29, %v266_v30  ;;  %v315_v23 = vld [vmem:[%s19723_s1 + $0x378] sm:$0xff]  ;;  %v14264_v24 = vcombine.low %v302_v11, %v306_v12  ;;  %v318_v29 = vld [vmem:[%s19723_s1 + $0x390] sm:$0xff] }
 0x154   :  { %3426 = vmatprep.subr.bf16.mxu0 %v14169_v37  ;;  %3765 = vmatprep.subr.bf16.mxu1 %v14171_v38  ;;  %v14227_v37 = vcombine.high %v263_v32, %v267_v33  ;;  %v16695_v38 = vld [vmem:[%s19722_s0 + $0xd4] ss:$24 sps:$4 sm:$0xff]  }
 0x155   :  { %v322_v30 = vld [vmem:[%s19723_s1 + $0x3b0] sm:$0xff] }
 0x156   :  { %3007 = vmatmul.mubr.bf16.vlgmr.msra.gmra.mrb[0].mxu0 %v16683_v41  ;;  %3346 = vmatmul.mubr.bf16.vlgmr.msra.gmra.mrb[0].mxu1 %v16683_v41  ;;  %v271_v41 = vld [vmem:[%s19723_s1 + $0x218] sm:$0xff] }
 0x157   :  { %3427 = vmatpush1.bf16.msra.mxu0 %v14168_v44  ;;  %3766 = vmatpush1.bf16.msra.mxu1 %v14170_v45  ;;  %v14226_v44 = vcombine.low %v263_v32, %v267_v33  ;;  %v14233_v45 = vcombine.high %v270_v39, %v274_v40  ;;  %v323_v32 = vld [vmem:[%s19723_s1 + $0x3b8] sm:$0xff] }
 0x158   :  { %3428 = vmatprep.subr.bf16.mxu0 %v14177_v46  ;;  %3767 = vmatprep.subr.bf16.mxu1 %v14179_v47  ;;  %v14235_v46 = vcombine.high %v271_v41, %v275_v42  ;;  %v278_v47 = vld [vmem:[%s19723_s1 + $0x250] sm:$0xff]  ;;  %v16706_v39 = vld [vmem:[%s19722_s0 + $0x160] ss:$24 sps:$4 sm:$0xff]  }
 0x159   :  { %3016 = vmatprep.mubr.bf16.mxu0 %v16686_v48  ;;  %3355 = vmatprep.mubr.bf16.mxu1 %v16686_v48  ;;  %v282_v48 = vld [vmem:[%s19723_s1 + $0x270] sm:$0xff]  ;;  %v327_v40 = vld [vmem:[%s19723_s1 + $0x3d8] sm:$0xff] }
 0x15a   :  { %v14240_v61 = vcombine.low %v278_v47, %v282_v48 }
 0x15b   :  { %3429 = vmatpush1.bf16.msra.mxu0 %v14176_v53  ;;  %3768 = vmatpush1.bf16.msra.mxu1 %v14178_v54  ;;  %v14234_v53 = vcombine.low %v271_v41, %v275_v42  ;;  %v14241_v54 = vcombine.high %v278_v47, %v282_v48  ;;  %v331_v41 = vld [vmem:[%s19723_s1 + $0x3f8] sm:$0xff]  ;;  %v14280_v42 = vcombine.low %v318_v29, %v322_v30  ;;  %v338_v47 = vld [vmem:[%s19723_s1 + $0x430] sm:$0xff] }
 0x15c   :  { %3430 = vmatprep.subr.bf16.mxu0 %v14185_v55  ;;  %3769 = vmatprep.subr.bf16.mxu1 %v14187_v56  ;;  %v14243_v55 = vcombine.high %v279_v50, %v283_v51  ;;  %v16698_v56 = vld [vmem:[%s19722_s0 + $0x104] ss:$24 sps:$4 sm:$0xff]  }
 0x15d   :  { %v335_v48 = vld [vmem:[%s19723_s1 + $0x418] sm:$0xff] }
 0x15e   :  { %3017 = vmatmul.mubr.bf16.gmra.mrb[4].mxu0 %v16688_v59  ;;  %3356 = vmatmul.mubr.bf16.gmra.mrb[4].mxu1 %v16688_v59  ;;  %v287_v59 = vld [vmem:[%s19723_s1 + $0x298] sm:$0xff] }
 0x15f   :  { %3431 = vmatpush1.bf16.msra.mxu0 %v14184_v62  ;;  %3770 = vmatpush1.bf16.msra.mxu1 %v14186_v63  ;;  %v14242_v62 = vcombine.low %v279_v50, %v283_v51  ;;  %v14249_v63 = vcombine.high %v286_v57, %v290_v58  ;;  %v14290_v51 = vcombine.low %v327_v40, %v331_v41  ;;  %v343_v57 = vld [vmem:[%s19723_s1 + $0x458] sm:$0xff] }
 0x160   :  { %3432 = vmatprep.subr.bf16.mxu0 %v14193_v0  ;;  %3771 = vmatprep.subr.bf16.mxu1 %v14195_v1  ;;  %v14251_v0 = vcombine.high %v287_v59, %v291_v60  ;;  %v294_v1 = vld [vmem:[%s19723_s1 + $0x2d0] sm:$0xff]  ;;  %v347_v58 = vld [vmem:[%s19723_s1 + $0x478] sm:$0xff] }
 0x161   :  { %3026 = vmatprep.mubr.bf16.mxu0 %v16689_v2  ;;  %3365 = vmatprep.mubr.bf16.mxu1 %v16689_v2  ;;  %v298_v2 = vld [vmem:[%s19723_s1 + $0x2f0] sm:$0xff] }
 0x162   :  { %v14256_v15 = vcombine.low %v294_v1, %v298_v2 }
 0x163   :  { %3433 = vmatpush1.bf16.msra.mxu0 %v14192_v7  ;;  %3772 = vmatpush1.bf16.msra.mxu1 %v14194_v8  ;;  %v14250_v7 = vcombine.low %v287_v59, %v291_v60  ;;  %v14257_v8 = vcombine.high %v294_v1, %v298_v2  ;;  %v16708_v1 = vld [vmem:[%s19722_s0] ss:$24 sps:$4 sm:$0xff]  }
 0x164   :  { %3434 = vmatprep.subr.bf16.mxu0 %v14201_v9  ;;  %3773 = vmatprep.subr.bf16.mxu1 %v14203_v10  ;;  %v14259_v9 = vcombine.high %v295_v4, %v299_v5  ;;  %v16701_v10 = vld [vmem:[%s19722_s0 + $0x134] ss:$24 sps:$4 sm:$0xff]   ;;  %v351_v2 = vld [vmem:[%s19723_s1 + $0x498] sm:$0xff] }
 0x166   :  { %3027 = vmatmul.mubr.bf16.gmra.mrb[8].mxu0 %v16691_v13  ;;  %3366 = vmatmul.mubr.bf16.gmra.mrb[8].mxu1 %v16691_v13  ;;  %v303_v13 = vld [vmem:[%s19723_s1 + $0x318] sm:$0xff] }
 0x167   :  { %3435 = vmatpush1.bf16.msra.mxu0 %v14200_v16  ;;  %3774 = vmatpush1.bf16.msra.mxu1 %v14202_v17  ;;  %v14258_v16 = vcombine.low %v295_v4, %v299_v5  ;;  %v14265_v17 = vcombine.high %v302_v11, %v306_v12  ;;  %v14306_v5 = vcombine.low %v343_v57, %v347_v58  ;;  %v359_v11 = vld [vmem:[%s19723_s1 + $0x4d8] sm:$0xff] }
 0x168   :  { %3436 = vmatprep.subr.bf16.mxu0 %v14209_v18  ;;  %3775 = vmatprep.subr.bf16.mxu1 %v14211_v19  ;;  %v14267_v18 = vcombine.high %v303_v13, %v307_v14  ;;  %v310_v19 = vld [vmem:[%s19723_s1 + $0x350] sm:$0xff]  ;;  %v363_v12 = vld [vmem:[%s19723_s1 + $0x4f8] sm:$0xff] }
 0x169   :  { %3036 = vmatprep.mubr.bf16.mxu0 %v16692_v20  ;;  %3375 = vmatprep.mubr.bf16.mxu1 %v16692_v20  ;;  %v314_v20 = vld [vmem:[%s19723_s1 + $0x370] sm:$0xff] }
 0x16a   :  { %v14272_v33 = vcombine.low %v310_v19, %v314_v20 }
 0x16b   :  { %3437 = vmatpush1.bf16.msra.mxu0 %v14208_v25  ;;  %3776 = vmatpush1.bf16.msra.mxu1 %v14210_v26  ;;  %v14266_v25 = vcombine.low %v303_v13, %v307_v14  ;;  %v14273_v26 = vcombine.high %v310_v19, %v314_v20  ;;  %v16710_v19 = vld [vmem:[%s19722_s0 + $0x30] ss:$24 sps:$4 sm:$0xff]   ;;  %v367_v20 = vld [vmem:[%s19723_s1 + $0x518] sm:$0xff] }
 0x16c   :  { %3438 = vmatprep.subr.bf16.mxu0 %v14217_v27  ;;  %3777 = vmatprep.subr.bf16.mxu1 %v14219_v28  ;;  %v14275_v27 = vcombine.high %v311_v22, %v315_v23  ;;  %v16704_v28 = vld [vmem:[%s19722_s0 + $0x164] ss:$24 sps:$4 sm:$0xff]  }
 0x16e   :  { %3037 = vmatmul.mubr.bf16.gmra.mrb[12].mxu0 %v16694_v31  ;;  %3376 = vmatmul.mubr.bf16.gmra.mrb[12].mxu1 %v16694_v31  ;;  %v319_v31 = vld [vmem:[%s19723_s1 + $0x398] sm:$0xff] }
 0x16f   :  { %3439 = vmatpush1.bf16.msra.mxu0 %v14216_v34  ;;  %3778 = vmatpush1.bf16.msra.mxu1 %v14218_v35  ;;  %v14274_v34 = vcombine.low %v311_v22, %v315_v23  ;;  %v14281_v35 = vcombine.high %v318_v29, %v322_v30  ;;  %v14322_v23 = vcombine.low %v359_v11, %v363_v12  ;;  %v375_v29 = vld [vmem:[%s19723_s1 + $0x558] sm:$0xff] }
 0x170   :  { %3440 = vmatprep.subr.bf16.mxu0 %v14225_v36  ;;  %3779 = vmatprep.subr.bf16.mxu1 %v14227_v37  ;;  %v14283_v36 = vcombine.high %v319_v31, %v323_v32  ;;  %v326_v37 = vld [vmem:[%s19723_s1 + $0x3d0] sm:$0xff]  ;;  %v379_v30 = vld [vmem:[%s19723_s1 + $0x578] sm:$0xff] }
 0x171   :  { %3046 = vmatprep.mubr.bf16.mxu0 %v16695_v38  ;;  %3385 = vmatprep.mubr.bf16.mxu1 %v16695_v38  ;;  %v330_v38 = vld [vmem:[%s19723_s1 + $0x3f0] sm:$0xff] }
 0x172   :  { %v14288_v50 = vcombine.low %v326_v37, %v330_v38 }
 0x173   :  { %3441 = vmatpush1.bf16.msra.mxu0 %v14224_v43  ;;  %3780 = vmatpush1.bf16.msra.mxu1 %v14226_v44  ;;  %v14282_v43 = vcombine.low %v319_v31, %v323_v32  ;;  %v14289_v44 = vcombine.high %v326_v37, %v330_v38  ;;  %v16712_v37 = vld [vmem:[%s19722_s0 + $0x60] ss:$24 sps:$4 sm:$0xff]  }
 0x174   :  { %3442 = vmatprep.subr.bf16.mxu0 %v14233_v45  ;;  %3781 = vmatprep.subr.bf16.mxu1 %v14235_v46  ;;  %v14291_v45 = vcombine.high %v327_v40, %v331_v41  ;;  %v334_v46 = vld [vmem:[%s19723_s1 + $0x410] sm:$0xff]  ;;  %v383_v38 = vld [vmem:[%s19723_s1 + $0x598] sm:$0xff]  ;;  %v14338_v41 = vcombine.low %v375_v29, %v379_v30 }
 0x175   :  { %v14296_v59 = vcombine.low %v334_v46, %v338_v47 }
 0x176   :  { %3047 = vmatmul.mubr.bf16.gmra.mrb[16].mxu0 %v16697_v49  ;;  %3386 = vmatmul.mubr.bf16.gmra.mrb[16].mxu1 %v16697_v49  ;;  %v339_v49 = vld [vmem:[%s19723_s1 + $0x438] sm:$0xff] }
 0x177   :  { %3443 = vmatpush1.bf16.msra.mxu0 %v14232_v52  ;;  %3782 = vmatpush1.bf16.msra.mxu1 %v14234_v53  ;;  %v14297_v52 = vcombine.high %v334_v46, %v338_v47  ;;  %v16707_v53 = vld [vmem:[%s19722_s0 + $0x4] ss:$24 sps:$4 sm:$0xff]   ;;  %v14298_v60 = vcombine.low %v335_v48, %v339_v49  ;;  %v394_v46 = vld [vmem:[%s19723_s1 + $0x5f0] sm:$0xff] }
 0x178   :  { %3444 = vmatprep.subr.bf16.mxu0 %v14241_v54  ;;  %3783 = vmatprep.subr.bf16.mxu1 %v14243_v55  ;;  %v14299_v54 = vcombine.high %v335_v48, %v339_v49  ;;  %v342_v55 = vld [vmem:[%s19723_s1 + $0x450] sm:$0xff]  ;;  %v391_v47 = vld [vmem:[%s19723_s1 + $0x5d8] sm:$0xff] }
 0x179   :  { %3056 = vmatprep.mubr.bf16.mxu0 %v16698_v56  ;;  %3395 = vmatprep.mubr.bf16.mxu1 %v16698_v56  ;;  %v346_v56 = vld [vmem:[%s19723_s1 + $0x470] sm:$0xff]  ;;  %v395_v48 = vld [vmem:[%s19723_s1 + $0x5f8] sm:$0xff] }
 0x17a   :  { %v14304_v4 = vcombine.low %v342_v55, %v346_v56 }
 0x17b   :  { %3445 = vmatpush1.bf16.msra.mxu0 %v14240_v61  ;;  %3784 = vmatpush1.bf16.msra.mxu1 %v14242_v62  ;;  %v14305_v61 = vcombine.high %v342_v55, %v346_v56  ;;  %v14307_v62 = vcombine.high %v343_v57, %v347_v58  ;;  %v16714_v55 = vld [vmem:[%s19722_s0 + $0x90] ss:$24 sps:$4 sm:$0xff]   ;;  %v399_v56 = vld [vmem:[%s19723_s1 + $0x618] sm:$0xff] }
 0x17c   :  { %3446 = vmatprep.subr.bf16.mxu0 %v14249_v63  ;;  %3785 = vmatprep.subr.bf16.mxu1 %v14251_v0  ;;  %v350_v63 = vld [vmem:[%s19723_s1 + $0x490] sm:$0xff]  ;;  %v403_v57 = vld [vmem:[%s19723_s1 + $0x638] sm:$0xff] }
 0x17d   :  { %v354_v0 = vld [vmem:[%s19723_s1 + $0x4b0] sm:$0xff] }
 0x17e   :  { %3057 = vmatmul.mubr.bf16.gmra.mrb[20].mxu0 %v16700_v3  ;;  %3396 = vmatmul.mubr.bf16.gmra.mrb[20].mxu1 %v16700_v3  ;;  %v355_v3 = vld [vmem:[%s19723_s1 + $0x4b8] sm:$0xff]  ;;  %v14312_v13 = vcombine.low %v350_v63, %v354_v0 }
 0x17f   :  { %3447 = vmatpush1.bf16.msra.mxu0 %v14248_v6  ;;  %3786 = vmatpush1.bf16.msra.mxu1 %v14250_v7  ;;  %v14313_v6 = vcombine.high %v350_v63, %v354_v0  ;;  %v16709_v7 = vld [vmem:[%s19722_s0 + $0x34] ss:$24 sps:$4 sm:$0xff]   ;;  %v14314_v14 = vcombine.low %v351_v2, %v355_v3 }
 0x180   :  { %3448 = vmatprep.subr.bf16.mxu0 %v14257_v8  ;;  %3787 = vmatprep.subr.bf16.mxu1 %v14259_v9  ;;  %v14315_v8 = vcombine.high %v351_v2, %v355_v3  ;;  %v358_v9 = vld [vmem:[%s19723_s1 + $0x4d0] sm:$0xff]  ;;  %v411_v2 = vld [vmem:[%s19723_s1 + $0x678] sm:$0xff] }
 0x181   :  { %3066 = vmatprep.mubr.bf16.mxu0 %v16701_v10  ;;  %3405 = vmatprep.mubr.bf16.mxu1 %v16701_v10  ;;  %v362_v10 = vld [vmem:[%s19723_s1 + $0x4f0] sm:$0xff] }
 0x182   :  { %v14320_v22 = vcombine.low %v358_v9, %v362_v10  ;;  %v406_v63 = vld [vmem:[%s19723_s1 + $0x650] sm:$0xff] }
 0x183   :  { %3449 = vmatpush1.bf16.msra.mxu0 %v14256_v15  ;;  %3788 = vmatpush1.bf16.msra.mxu1 %v14258_v16  ;;  %v14321_v15 = vcombine.high %v358_v9, %v362_v10  ;;  %v14323_v16 = vcombine.high %v359_v11, %v363_v12  ;;  %v410_v0 = vld [vmem:[%s19723_s1 + $0x670] sm:$0xff]  ;;  %v16716_v9 = vld [vmem:[%s19722_s0 + $0xc0] ss:$24 sps:$4 sm:$0xff]  }
 0x184   :  { %3450 = vmatprep.subr.bf16.mxu0 %v14265_v17  ;;  %3789 = vmatprep.subr.bf16.mxu1 %v14267_v18  ;;  %v366_v17 = vld [vmem:[%s19723_s1 + $0x510] sm:$0xff]  ;;  %v415_v10 = vld [vmem:[%s19723_s1 + $0x698] sm:$0xff]  ;;  %v14368_v12 = vcombine.low %v406_v63, %v410_v0 }
 0x185   :  { %v370_v18 = vld [vmem:[%s19723_s1 + $0x530] sm:$0xff]  ;;  %v419_v11 = vld [vmem:[%s19723_s1 + $0x6b8] sm:$0xff] }
 0x186   :  { %3067 = vmatmul.mubr.bf16.gmra.mrb[24].mxu0 %v16703_v21  ;;  %3406 = vmatmul.mubr.bf16.gmra.mrb[24].mxu1 %v16703_v21  ;;  %v371_v21 = vld [vmem:[%s19723_s1 + $0x538] sm:$0xff]  ;;  %v14328_v31 = vcombine.low %v366_v17, %v370_v18 }
 0x187   :  { %3451 = vmatpush1.bf16.msra.mxu0 %v14264_v24  ;;  %3790 = vmatpush1.bf16.msra.mxu1 %v14266_v25  ;;  %v14329_v24 = vcombine.high %v366_v17, %v370_v18  ;;  %v16711_v25 = vld [vmem:[%s19722_s0 + $0x64] ss:$24 sps:$4 sm:$0xff]   ;;  %v14330_v32 = vcombine.low %v367_v20, %v371_v21  ;;  %v422_v17 = vld [vmem:[%s19723_s1 + $0x6d0] sm:$0xff] }
 0x188   :  { %3452 = vmatprep.subr.bf16.mxu0 %v14273_v26  ;;  %3791 = vmatprep.subr.bf16.mxu1 %v14275_v27  ;;  %v14331_v26 = vcombine.high %v367_v20, %v371_v21  ;;  %v374_v27 = vld [vmem:[%s19723_s1 + $0x550] sm:$0xff]  ;;  %v427_v20 = vld [vmem:[%s19723_s1 + $0x6f8] sm:$0xff] }
 0x189   :  { %3076 = vmatprep.mubr.bf16.mxu0 %v16704_v28  ;;  %3415 = vmatprep.mubr.bf16.mxu1 %v16704_v28  ;;  %v378_v28 = vld [vmem:[%s19723_s1 + $0x570] sm:$0xff] }
 0x18a   :  { %v14336_v40 = vcombine.low %v374_v27, %v378_v28  ;;  %v426_v18 = vld [vmem:[%s19723_s1 + $0x6f0] sm:$0xff] }
 0x18b   :  { %3453 = vmatpush1.bf16.msra.mxu0 %v14272_v33  ;;  %3792 = vmatpush1.bf16.msra.mxu1 %v14274_v34  ;;  %v14337_v33 = vcombine.high %v374_v27, %v378_v28  ;;  %v14339_v34 = vcombine.high %v375_v29, %v379_v30  ;;  %v16718_v27 = vld [vmem:[%s19722_s0 + $0xf0] ss:$24 sps:$4 sm:$0xff]   ;;  %v431_v28 = vld [vmem:[%s19723_s1 + $0x718] sm:$0xff]  ;;  %v14384_v30 = vcombine.low %v422_v17, %v426_v18 }
 0x18c   :  { %3454 = vmatprep.subr.bf16.mxu0 %v14281_v35  ;;  %3793 = vmatprep.subr.bf16.mxu1 %v14283_v36  ;;  %v382_v35 = vld [vmem:[%s19723_s1 + $0x590] sm:$0xff]  ;;  %v435_v29 = vld [vmem:[%s19723_s1 + $0x738] sm:$0xff] }
 0x18d   :  { %v386_v36 = vld [vmem:[%s19723_s1 + $0x5b0] sm:$0xff] }
 0x18e   :  { %3077 = vmatmul.mubr.bf16.gmra.mrb[28].mxu0 %v16706_v39  ;;  %3416 = vmatmul.mubr.bf16.gmra.mrb[28].mxu1 %v16706_v39  ;;  %v387_v39 = vld [vmem:[%s19723_s1 + $0x5b8] sm:$0xff]  ;;  %v14344_v49 = vcombine.low %v382_v35, %v386_v36 }
 0x18f   :  { %3455 = vmatpush1.bf16.msra.mxu0 %v14280_v42  ;;  %3794 = vmatpush1.bf16.msra.mxu1 %v14282_v43  ;;  %v14345_v42 = vcombine.high %v382_v35, %v386_v36  ;;  %v16713_v43 = vld [vmem:[%s19722_s0 + $0x94] ss:$24 sps:$4 sm:$0xff]  }
 0x190   :  { %3456 = vmatprep.subr.bf16.mxu0 %v14289_v44  ;;  %3795 = vmatprep.subr.bf16.mxu1 %v14291_v45  ;;  %v14347_v44 = vcombine.high %v383_v38, %v387_v39  ;;  %v390_v45 = vld [vmem:[%s19723_s1 + $0x5d0] sm:$0xff] }
 0x191   :  { %3458 = vmatprep.mubr.bf16.mxu0 %v16707_v53  ;;  %3797 = vmatprep.mubr.bf16.mxu1 %v16707_v53  ;;  %v398_v53 = vld [vmem:[%s19723_s1 + $0x610] sm:$0xff]  ;;  %v14352_v58 = vcombine.low %v390_v45, %v394_v46 }
 0x192   :  { %v438_v35 = vld [vmem:[%s19723_s1 + $0x750] sm:$0xff] }
 0x193   :  { %3457 = vmatpush1.bf16.msra.mxu0 %v14288_v50  ;;  %3796 = vmatpush1.bf16.msra.mxu1 %v14290_v51  ;;  %v14346_v50 = vcombine.low %v383_v38, %v387_v39  ;;  %v14353_v51 = vcombine.high %v390_v45, %v394_v46  ;;  %v442_v36 = vld [vmem:[%s19723_s1 + $0x770] sm:$0xff]  ;;  %v443_v38 = vld [vmem:[%s19723_s1 + $0x778] sm:$0xff] }
 0x194   :  { %3539 = vmatprep.subr.bf16.mxu0 %v14297_v52  ;;  %3878 = vmatprep.subr.bf16.mxu1 %v14299_v54  ;;  %v14355_v52 = vcombine.high %v391_v47, %v395_v48  ;;  %v402_v54 = vld [vmem:[%s19723_s1 + $0x630] sm:$0xff]  ;;  %v16720_v45 = vld [vmem:[%s19722_s0 + $0x120] ss:$24 sps:$4 sm:$0xff]  }
 0x195   :  { %v14360_v3 = vcombine.low %v398_v53, %v402_v54  ;;  %v447_v46 = vld [vmem:[%s19723_s1 + $0x798] sm:$0xff] }
 0x196   :  { %3459 = vmatmul.mubr.bf16.vlgmr.msra.gmra.mrb[32].mxu0 %v16708_v1  ;;  %3798 = vmatmul.mubr.bf16.vlgmr.msra.gmra.mrb[32].mxu1 %v16708_v1  ;;  %v407_v1 = vld [vmem:[%s19723_s1 + $0x658] sm:$0xff] }
 0x197   :  { %3540 = vmatpush1.bf16.msra.mxu0 %v14296_v59  ;;  %3879 = vmatpush1.bf16.msra.mxu1 %v14298_v60  ;;  %v14354_v59 = vcombine.low %v391_v47, %v395_v48  ;;  %v14361_v60 = vcombine.high %v398_v53, %v402_v54  ;;  %v451_v47 = vld [vmem:[%s19723_s1 + $0x7b8] sm:$0xff]  ;;  %v14400_v48 = vcombine.low %v438_v35, %v442_v36  ;;  %v454_v53 = vld [vmem:[%s19723_s1 + $0x7d0] sm:$0xff] }
 0x198   :  { %3541 = vmatprep.subr.bf16.mxu0 %v14305_v61  ;;  %3880 = vmatprep.subr.bf16.mxu1 %v14307_v62  ;;  %v16715_v61 = vld [vmem:[%s19722_s0 + $0xc4] ss:$24 sps:$4 sm:$0xff]   ;;  %v14363_v62 = vcombine.high %v399_v56, %v403_v57  ;;  %v458_v54 = vld [vmem:[%s19723_s1 + $0x7f0] sm:$0xff] }
 0x199   :  { %3468 = vmatprep.mubr.bf16.mxu0 %v16709_v7  ;;  %3807 = vmatprep.mubr.bf16.mxu1 %v16709_v7  ;;  %v414_v7 = vld [vmem:[%s19723_s1 + $0x690] sm:$0xff] }
 0x19b   :  { %3542 = vmatpush1.bf16.msra.mxu0 %v14304_v4  ;;  %3881 = vmatpush1.bf16.msra.mxu1 %v14306_v5  ;;  %v14362_v4 = vcombine.low %v399_v56, %v403_v57  ;;  %v14369_v5 = vcombine.high %v406_v63, %v410_v0  ;;  %v459_v56 = vld [vmem:[%s19723_s1 + $0x7f8] sm:$0xff]  ;;  %v16722_v63 = vld [vmem:[%s19722_s0 + $0x150] ss:$24 sps:$4 sm:$0xff]  }
 0x19c   :  { %3543 = vmatprep.subr.bf16.mxu0 %v14313_v6  ;;  %3882 = vmatprep.subr.bf16.mxu1 %v14315_v8  ;;  %v14371_v6 = vcombine.high %v407_v1, %v411_v2  ;;  %v418_v8 = vld [vmem:[%s19723_s1 + $0x6b0] sm:$0xff]  ;;  %v463_v0 = vld [vmem:[%s19723_s1 + $0x818] sm:$0xff] }
 0x19d   :  { %v14376_v21 = vcombine.low %v414_v7, %v418_v8 }
 0x19e   :  { %3469 = vmatmul.mubr.bf16.gmra.mrb[36].mxu0 %v16710_v19  ;;  %3808 = vmatmul.mubr.bf16.gmra.mrb[36].mxu1 %v16710_v19  ;;  %v423_v19 = vld [vmem:[%s19723_s1 + $0x6d8] sm:$0xff] }
 0x19f   :  { %3544 = vmatpush1.bf16.msra.mxu0 %v14312_v13  ;;  %3883 = vmatpush1.bf16.msra.mxu1 %v14314_v14  ;;  %v14370_v13 = vcombine.low %v407_v1, %v411_v2  ;;  %v14377_v14 = vcombine.high %v414_v7, %v418_v8  ;;  %v467_v1 = vld [vmem:[%s19723_s1 + $0x838] sm:$0xff]  ;;  %v14416_v2 = vcombine.low %v454_v53, %v458_v54  ;;  %v470_v7 = vld [vmem:[%s19723_s1 + $0x850] sm:$0xff] }
 0x1a0   :  { %3545 = vmatprep.subr.bf16.mxu0 %v14321_v15  ;;  %3884 = vmatprep.subr.bf16.mxu1 %v14323_v16  ;;  %v16717_v15 = vld [vmem:[%s19722_s0 + $0xf4] ss:$24 sps:$4 sm:$0xff]   ;;  %v14379_v16 = vcombine.high %v415_v10, %v419_v11 }
 0x1a1   :  { %3478 = vmatprep.mubr.bf16.mxu0 %v16711_v25  ;;  %3817 = vmatprep.mubr.bf16.mxu1 %v16711_v25  ;;  %v430_v25 = vld [vmem:[%s19723_s1 + $0x710] sm:$0xff] }
 0x1a2   :  { %v474_v8 = vld [vmem:[%s19723_s1 + $0x870] sm:$0xff] }
 0x1a3   :  { %3546 = vmatpush1.bf16.msra.mxu0 %v14320_v22  ;;  %3885 = vmatpush1.bf16.msra.mxu1 %v14322_v23  ;;  %v14378_v22 = vcombine.low %v415_v10, %v419_v11  ;;  %v14385_v23 = vcombine.high %v422_v17, %v426_v18  ;;  %v475_v10 = vld [vmem:[%s19723_s1 + $0x878] sm:$0xff]  ;;  %v16724_v17 = vld [vmem:[%s19722_s0 + $0x8] ss:$24 sps:$4 sm:$0xff]  }
 0x1a4   :  { %3547 = vmatprep.subr.bf16.mxu0 %v14329_v24  ;;  %3886 = vmatprep.subr.bf16.mxu1 %v14331_v26  ;;  %v14387_v24 = vcombine.high %v423_v19, %v427_v20  ;;  %v434_v26 = vld [vmem:[%s19723_s1 + $0x730] sm:$0xff]  ;;  %v479_v18 = vld [vmem:[%s19723_s1 + $0x898] sm:$0xff] }
 0x1a5   :  { %v14392_v39 = vcombine.low %v430_v25, %v434_v26 }
 0x1a6   :  { %3479 = vmatmul.mubr.bf16.gmra.mrb[40].mxu0 %v16712_v37  ;;  %3818 = vmatmul.mubr.bf16.gmra.mrb[40].mxu1 %v16712_v37  ;;  %v439_v37 = vld [vmem:[%s19723_s1 + $0x758] sm:$0xff] }
 0x1a7   :  { %3548 = vmatpush1.bf16.msra.mxu0 %v14328_v31  ;;  %3887 = vmatpush1.bf16.msra.mxu1 %v14330_v32  ;;  %v14386_v31 = vcombine.low %v423_v19, %v427_v20  ;;  %v14393_v32 = vcombine.high %v430_v25, %v434_v26  ;;  %v483_v19 = vld [vmem:[%s19723_s1 + $0x8b8] sm:$0xff]  ;;  %v14432_v20 = vcombine.low %v470_v7, %v474_v8  ;;  %v486_v25 = vld [vmem:[%s19723_s1 + $0x8d0] sm:$0xff] }
 0x1a8   :  { %3549 = vmatprep.subr.bf16.mxu0 %v14337_v33  ;;  %3888 = vmatprep.subr.bf16.mxu1 %v14339_v34  ;;  %v16719_v33 = vld [vmem:[%s19722_s0 + $0x124] ss:$24 sps:$4 sm:$0xff]   ;;  %v14395_v34 = vcombine.high %v431_v28, %v435_v29  ;;  %v490_v26 = vld [vmem:[%s19723_s1 + $0x8f0] sm:$0xff] }
 0x1a9   :  { %3488 = vmatprep.mubr.bf16.mxu0 %v16713_v43  ;;  %3827 = vmatprep.mubr.bf16.mxu1 %v16713_v43  ;;  %v446_v43 = vld [vmem:[%s19723_s1 + $0x790] sm:$0xff] }
 0x1ab   :  { %3550 = vmatpush1.bf16.msra.mxu0 %v14336_v40  ;;  %3889 = vmatpush1.bf16.msra.mxu1 %v14338_v41  ;;  %v14394_v40 = vcombine.low %v431_v28, %v435_v29  ;;  %v14401_v41 = vcombine.high %v438_v35, %v442_v36  ;;  %v491_v28 = vld [vmem:[%s19723_s1 + $0x8f8] sm:$0xff] }
 0x1ac   :  { %3551 = vmatprep.subr.bf16.mxu0 %v14345_v42  ;;  %3890 = vmatprep.subr.bf16.mxu1 %v14347_v44  ;;  %v14403_v42 = vcombine.high %v439_v37, %v443_v38  ;;  %v450_v44 = vld [vmem:[%s19723_s1 + $0x7b0] sm:$0xff]  ;;  %v495_v36 = vld [vmem:[%s19723_s1 + $0x918] sm:$0xff] }
 0x1ad   :  { %v14408_v57 = vcombine.low %v446_v43, %v450_v44  ;;  %v16726_v35 = vld [vmem:[%s19722_s0 + $0x38] ss:$24 sps:$4 sm:$0xff]  }
 0x1ae   :  { %3489 = vmatmul.mubr.bf16.gmra.mrb[44].mxu0 %v16714_v55  ;;  %3828 = vmatmul.mubr.bf16.gmra.mrb[44].mxu1 %v16714_v55  ;;  %v455_v55 = vld [vmem:[%s19723_s1 + $0x7d8] sm:$0xff] }
 0x1af   :  { %3552 = vmatpush1.bf16.msra.mxu0 %v14344_v49  ;;  %3891 = vmatpush1.bf16.msra.mxu1 %v14346_v50  ;;  %v14402_v49 = vcombine.low %v439_v37, %v443_v38  ;;  %v14409_v50 = vcombine.high %v446_v43, %v450_v44  ;;  %v499_v37 = vld [vmem:[%s19723_s1 + $0x938] sm:$0xff]  ;;  %v14448_v38 = vcombine.low %v486_v25, %v490_v26  ;;  %v502_v43 = vld [vmem:[%s19723_s1 + $0x950] sm:$0xff] }
 0x1b0   :  { %3553 = vmatprep.subr.bf16.mxu0 %v14353_v51  ;;  %3892 = vmatprep.subr.bf16.mxu1 %v14355_v52  ;;  %v16721_v51 = vld [vmem:[%s19722_s0 + $0x154] ss:$24 sps:$4 sm:$0xff]   ;;  %v14411_v52 = vcombine.high %v447_v46, %v451_v47 }
 0x1b1   :  { %3498 = vmatprep.mubr.bf16.mxu0 %v16715_v61  ;;  %3837 = vmatprep.mubr.bf16.mxu1 %v16715_v61  ;;  %v462_v61 = vld [vmem:[%s19723_s1 + $0x810] sm:$0xff] }
 0x1b2   :  { %v506_v44 = vld [vmem:[%s19723_s1 + $0x970] sm:$0xff] }
 0x1b3   :  { %3554 = vmatpush1.bf16.msra.mxu0 %v14352_v58  ;;  %3893 = vmatpush1.bf16.msra.mxu1 %v14354_v59  ;;  %v14410_v58 = vcombine.low %v447_v46, %v451_v47  ;;  %v14417_v59 = vcombine.high %v454_v53, %v458_v54  ;;  %v507_v46 = vld [vmem:[%s19723_s1 + $0x978] sm:$0xff]  ;;  %v16728_v53 = vld [vmem:[%s19722_s0 + $0x68] ss:$24 sps:$4 sm:$0xff]  }
 0x1b4   :  { %3555 = vmatprep.subr.bf16.mxu0 %v14361_v60  ;;  %3894 = vmatprep.subr.bf16.mxu1 %v14363_v62  ;;  %v14419_v60 = vcombine.high %v455_v55, %v459_v56  ;;  %v466_v62 = vld [vmem:[%s19723_s1 + $0x830] sm:$0xff]  ;;  %v511_v54 = vld [vmem:[%s19723_s1 + $0x998] sm:$0xff] }
 0x1b5   :  { %v14424_v11 = vcombine.low %v462_v61, %v466_v62 }
 0x1b6   :  { %3499 = vmatmul.mubr.bf16.gmra.mrb[48].mxu0 %v16716_v9  ;;  %3838 = vmatmul.mubr.bf16.gmra.mrb[48].mxu1 %v16716_v9  ;;  %v471_v9 = vld [vmem:[%s19723_s1 + $0x858] sm:$0xff] }
 0x1b7   :  { %3556 = vmatpush1.bf16.msra.mxu0 %v14360_v3  ;;  %3895 = vmatpush1.bf16.msra.mxu1 %v14362_v4  ;;  %v14418_v3 = vcombine.low %v455_v55, %v459_v56  ;;  %v14425_v4 = vcombine.high %v462_v61, %v466_v62  ;;  %v515_v55 = vld [vmem:[%s19723_s1 + $0x9b8] sm:$0xff]  ;;  %v14464_v56 = vcombine.low %v502_v43, %v506_v44  ;;  %v518_v61 = vld [vmem:[%s19723_s1 + $0x9d0] sm:$0xff] }
 0x1b8   :  { %3557 = vmatprep.subr.bf16.mxu0 %v14369_v5  ;;  %3896 = vmatprep.subr.bf16.mxu1 %v14371_v6  ;;  %v16723_v5 = vld [vmem:[%s19722_s0 + $0xc] ss:$24 sps:$4 sm:$0xff]   ;;  %v14427_v6 = vcombine.high %v463_v0, %v467_v1  ;;  %v522_v62 = vld [vmem:[%s19723_s1 + $0x9f0] sm:$0xff] }
 0x1b9   :  { %3508 = vmatprep.mubr.bf16.mxu0 %v16717_v15  ;;  %3847 = vmatprep.mubr.bf16.mxu1 %v16717_v15  ;;  %v478_v15 = vld [vmem:[%s19723_s1 + $0x890] sm:$0xff] }
 0x1bb   :  { %3558 = vmatpush1.bf16.msra.mxu0 %v14368_v12  ;;  %3897 = vmatpush1.bf16.msra.mxu1 %v14370_v13  ;;  %v14426_v12 = vcombine.low %v463_v0, %v467_v1  ;;  %v14433_v13 = vcombine.high %v470_v7, %v474_v8  ;;  %v523_v0 = vld [vmem:[%s19723_s1 + $0x9f8] sm:$0xff] }
 0x1bc   :  { %3559 = vmatprep.subr.bf16.mxu0 %v14377_v14  ;;  %3898 = vmatprep.subr.bf16.mxu1 %v14379_v16  ;;  %v14435_v14 = vcombine.high %v471_v9, %v475_v10  ;;  %v482_v16 = vld [vmem:[%s19723_s1 + $0x8b0] sm:$0xff]  ;;  %v527_v8 = vld [vmem:[%s19723_s1 + $0xa18] sm:$0xff] }
 0x1bd   :  { %v14440_v29 = vcombine.low %v478_v15, %v482_v16  ;;  %v16730_v7 = vld [vmem:[%s19722_s0 + $0x98] ss:$24 sps:$4 sm:$0xff]  }
 0x1be   :  { %3509 = vmatmul.mubr.bf16.gmra.mrb[52].mxu0 %v16718_v27  ;;  %3848 = vmatmul.mubr.bf16.gmra.mrb[52].mxu1 %v16718_v27  ;;  %v487_v27 = vld [vmem:[%s19723_s1 + $0x8d8] sm:$0xff] }
 0x1bf   :  { %3560 = vmatpush1.bf16.msra.mxu0 %v14376_v21  ;;  %3899 = vmatpush1.bf16.msra.mxu1 %v14378_v22  ;;  %v14434_v21 = vcombine.low %v471_v9, %v475_v10  ;;  %v14441_v22 = vcombine.high %v478_v15, %v482_v16  ;;  %v531_v9 = vld [vmem:[%s19723_s1 + $0xa38] sm:$0xff]  ;;  %v14480_v10 = vcombine.low %v518_v61, %v522_v62  ;;  %v534_v15 = vld [vmem:[%s19723_s1 + $0xa50] sm:$0xff] }
 0x1c0   :  { %3561 = vmatprep.subr.bf16.mxu0 %v14385_v23  ;;  %3900 = vmatprep.subr.bf16.mxu1 %v14387_v24  ;;  %v16725_v23 = vld [vmem:[%s19722_s0 + $0x3c] ss:$24 sps:$4 sm:$0xff]   ;;  %v14443_v24 = vcombine.high %v479_v18, %v483_v19 }
 0x1c1   :  { %3518 = vmatprep.mubr.bf16.mxu0 %v16719_v33  ;;  %3857 = vmatprep.mubr.bf16.mxu1 %v16719_v33  ;;  %v494_v33 = vld [vmem:[%s19723_s1 + $0x910] sm:$0xff] }
 0x1c2   :  { %v538_v16 = vld [vmem:[%s19723_s1 + $0xa70] sm:$0xff] }
 0x1c3   :  { %3562 = vmatpush1.bf16.msra.mxu0 %v14384_v30  ;;  %3901 = vmatpush1.bf16.msra.mxu1 %v14386_v31  ;;  %v14442_v30 = vcombine.low %v479_v18, %v483_v19  ;;  %v14449_v31 = vcombine.high %v486_v25, %v490_v26  ;;  %v539_v18 = vld [vmem:[%s19723_s1 + $0xa78] sm:$0xff]  ;;  %v16732_v25 = vld [vmem:[%s19722_s0 + $0xc8] ss:$24 sps:$4 sm:$0xff]  }
 0x1c4   :  { %3563 = vmatprep.subr.bf16.mxu0 %v14393_v32  ;;  %3902 = vmatprep.subr.bf16.mxu1 %v14395_v34  ;;  %v14451_v32 = vcombine.high %v487_v27, %v491_v28  ;;  %v498_v34 = vld [vmem:[%s19723_s1 + $0x930] sm:$0xff]  ;;  %v543_v26 = vld [vmem:[%s19723_s1 + $0xa98] sm:$0xff] }
 0x1c5   :  { %v14456_v47 = vcombine.low %v494_v33, %v498_v34 }
 0x1c6   :  { %3519 = vmatmul.mubr.bf16.gmra.mrb[56].mxu0 %v16720_v45  ;;  %3858 = vmatmul.mubr.bf16.gmra.mrb[56].mxu1 %v16720_v45  ;;  %v503_v45 = vld [vmem:[%s19723_s1 + $0x958] sm:$0xff] }
 0x1c7   :  { %3564 = vmatpush1.bf16.msra.mxu0 %v14392_v39  ;;  %3903 = vmatpush1.bf16.msra.mxu1 %v14394_v40  ;;  %v14450_v39 = vcombine.low %v487_v27, %v491_v28  ;;  %v14457_v40 = vcombine.high %v494_v33, %v498_v34  ;;  %v547_v27 = vld [vmem:[%s19723_s1 + $0xab8] sm:$0xff]  ;;  %v14496_v28 = vcombine.low %v534_v15, %v538_v16  ;;  %v550_v33 = vld [vmem:[%s19723_s1 + $0xad0] sm:$0xff] }
 0x1c8   :  { %3565 = vmatprep.subr.bf16.mxu0 %v14401_v41  ;;  %3904 = vmatprep.subr.bf16.mxu1 %v14403_v42  ;;  %v16727_v41 = vld [vmem:[%s19722_s0 + $0x6c] ss:$24 sps:$4 sm:$0xff]   ;;  %v14459_v42 = vcombine.high %v495_v36, %v499_v37  ;;  %v554_v34 = vld [vmem:[%s19723_s1 + $0xaf0] sm:$0xff] }
 0x1c9   :  { %3528 = vmatprep.mubr.bf16.mxu0 %v16721_v51  ;;  %3867 = vmatprep.mubr.bf16.mxu1 %v16721_v51  ;;  %v510_v51 = vld [vmem:[%s19723_s1 + $0x990] sm:$0xff] }
 0x1cb   :  { %3566 = vmatpush1.bf16.msra.mxu0 %v14400_v48  ;;  %3905 = vmatpush1.bf16.msra.mxu1 %v14402_v49  ;;  %v14458_v48 = vcombine.low %v495_v36, %v499_v37  ;;  %v14465_v49 = vcombine.high %v502_v43, %v506_v44  ;;  %v555_v36 = vld [vmem:[%s19723_s1 + $0xaf8] sm:$0xff] }
 0x1cc   :  { %3567 = vmatprep.subr.bf16.mxu0 %v14409_v50  ;;  %3906 = vmatprep.subr.bf16.mxu1 %v14411_v52  ;;  %v14467_v50 = vcombine.high %v503_v45, %v507_v46  ;;  %v514_v52 = vld [vmem:[%s19723_s1 + $0x9b0] sm:$0xff]  ;;  %v559_v44 = vld [vmem:[%s19723_s1 + $0xb18] sm:$0xff] }
 0x1cd   :  { %v14472_v1 = vcombine.low %v510_v51, %v514_v52  ;;  %v16734_v43 = vld [vmem:[%s19722_s0 + $0xf8] ss:$24 sps:$4 sm:$0xff]  }
 0x1ce   :  { %3529 = vmatmul.mubr.bf16.gmra.mrb[60].mxu0 %v16722_v63  ;;  %3868 = vmatmul.mubr.bf16.gmra.mrb[60].mxu1 %v16722_v63  ;;  %v519_v63 = vld [vmem:[%s19723_s1 + $0x9d8] sm:$0xff] }
 0x1cf   :  { %3568 = vmatpush1.bf16.msra.mxu0 %v14408_v57  ;;  %3907 = vmatpush1.bf16.msra.mxu1 %v14410_v58  ;;  %v14466_v57 = vcombine.low %v503_v45, %v507_v46  ;;  %v14473_v58 = vcombine.high %v510_v51, %v514_v52  ;;  %v563_v45 = vld [vmem:[%s19723_s1 + $0xb38] sm:$0xff]  ;;  %v14512_v46 = vcombine.low %v550_v33, %v554_v34  ;;  %v566_v51 = vld [vmem:[%s19723_s1 + $0xb50] sm:$0xff] }
 0x1d0   :  { %3569 = vmatprep.subr.bf16.mxu0 %v14417_v59  ;;  %3908 = vmatprep.subr.bf16.mxu1 %v14419_v60  ;;  %v16729_v59 = vld [vmem:[%s19722_s0 + $0x9c] ss:$24 sps:$4 sm:$0xff]   ;;  %v14475_v60 = vcombine.high %v511_v54, %v515_v55 }
 0x1d1   :  { %3571 = vmatprep.mubr.bf16.mxu0 %v16723_v5  ;;  %3910 = vmatprep.mubr.bf16.mxu1 %v16723_v5  ;;  %v526_v5 = vld [vmem:[%s19723_s1 + $0xa10] sm:$0xff] }
 0x1d2   :  { %v570_v52 = vld [vmem:[%s19723_s1 + $0xb70] sm:$0xff] }
 0x1d3   :  { %3570 = vmatpush1.bf16.msra.mxu0 %v14416_v2  ;;  %3909 = vmatpush1.bf16.msra.mxu1 %v14418_v3  ;;  %v14474_v2 = vcombine.low %v511_v54, %v515_v55  ;;  %v14481_v3 = vcombine.high %v518_v61, %v522_v62  ;;  %v571_v54 = vld [vmem:[%s19723_s1 + $0xb78] sm:$0xff]  ;;  %v16736_v61 = vld [vmem:[%s19722_s0 + $0x128] ss:$24 sps:$4 sm:$0xff]  }
 0x1d4   :  { %3652 = vmatprep.subr.bf16.mxu0 %v14425_v4  ;;  %3991 = vmatprep.subr.bf16.mxu1 %v14427_v6  ;;  %v14483_v4 = vcombine.high %v519_v63, %v523_v0  ;;  %v530_v6 = vld [vmem:[%s19723_s1 + $0xa30] sm:$0xff]  ;;  %v575_v62 = vld [vmem:[%s19723_s1 + $0xb98] sm:$0xff] }
 0x1d5   :  { %v14488_v19 = vcombine.low %v526_v5, %v530_v6 }
 0x1d6   :  { %3572 = vmatmul.mubr.bf16.vlgmr.msra.gmra.mrb[32].mxu0 %v16724_v17  ;;  %3911 = vmatmul.mubr.bf16.vlgmr.msra.gmra.mrb[32].mxu1 %v16724_v17  ;;  %v535_v17 = vld [vmem:[%s19723_s1 + $0xa58] sm:$0xff] }
 0x1d7   :  { %3653 = vmatpush1.bf16.msra.mxu0 %v14424_v11  ;;  %3992 = vmatpush1.bf16.msra.mxu1 %v14426_v12  ;;  %v14482_v11 = vcombine.low %v519_v63, %v523_v0  ;;  %v14489_v12 = vcombine.high %v526_v5, %v530_v6  ;;  %v579_v63 = vld [vmem:[%s19723_s1 + $0xbb8] sm:$0xff]  ;;  %v14528_v0 = vcombine.low %v566_v51, %v570_v52  ;;  %v582_v5 = vld [vmem:[%s19723_s1 + $0xbd0] sm:$0xff] }
 0x1d8   :  { %3654 = vmatprep.subr.bf16.mxu0 %v14433_v13  ;;  %3993 = vmatprep.subr.bf16.mxu1 %v14435_v14  ;;  %v16731_v13 = vld [vmem:[%s19722_s0 + $0xcc] ss:$24 sps:$4 sm:$0xff]   ;;  %v14491_v14 = vcombine.high %v527_v8, %v531_v9  ;;  %v586_v6 = vld [vmem:[%s19723_s1 + $0xbf0] sm:$0xff] }
 0x1d9   :  { %3581 = vmatprep.mubr.bf16.mxu0 %v16725_v23  ;;  %3920 = vmatprep.mubr.bf16.mxu1 %v16725_v23  ;;  %v542_v23 = vld [vmem:[%s19723_s1 + $0xa90] sm:$0xff] }
 0x1db   :  { %3655 = vmatpush1.bf16.msra.mxu0 %v14432_v20  ;;  %3994 = vmatpush1.bf16.msra.mxu1 %v14434_v21  ;;  %v14490_v20 = vcombine.low %v527_v8, %v531_v9  ;;  %v14497_v21 = vcombine.high %v534_v15, %v538_v16  ;;  %v587_v8 = vld [vmem:[%s19723_s1 + $0xbf8] sm:$0xff]  ;;  %v16739_v16 = vld [vmem:[%s19722_s0 + $0x14] ss:$24 sps:$4 sm:$0xff]  }
 0x1dc   :  { %3656 = vmatprep.subr.bf16.mxu0 %v14441_v22  ;;  %3995 = vmatprep.subr.bf16.mxu1 %v14443_v24  ;;  %v14499_v22 = vcombine.high %v535_v17, %v539_v18  ;;  %v546_v24 = vld [vmem:[%s19723_s1 + $0xab0] sm:$0xff] }
 0x1dd   :  { %v14504_v37 = vcombine.low %v542_v23, %v546_v24 }
 0x1de   :  { %3582 = vmatmul.mubr.bf16.gmra.mrb[36].mxu0 %v16726_v35  ;;  %3921 = vmatmul.mubr.bf16.gmra.mrb[36].mxu1 %v16726_v35  ;;  %v551_v35 = vld [vmem:[%s19723_s1 + $0xad8] sm:$0xff] }
 0x1df   :  { %3657 = vmatpush1.bf16.msra.mxu0 %v14440_v29  ;;  %3996 = vmatpush1.bf16.msra.mxu1 %v14442_v30  ;;  %v14498_v29 = vcombine.low %v535_v17, %v539_v18  ;;  %v14505_v30 = vcombine.high %v542_v23, %v546_v24  ;;  %v16740_v17 = vld [vmem:[%s19722_s0 + $0x10] ss:$24 sps:$4 sm:$0xff]   ;;  %v16741_v18 = vld [vmem:[%s19722_s0 + $0x44] ss:$24 sps:$4 sm:$0xff]  }
 0x1e0   :  { %3658 = vmatprep.subr.bf16.mxu0 %v14449_v31  ;;  %3997 = vmatprep.subr.bf16.mxu1 %v14451_v32  ;;  %v16733_v31 = vld [vmem:[%s19722_s0 + $0xfc] ss:$24 sps:$4 sm:$0xff]   ;;  %v14507_v32 = vcombine.high %v543_v26, %v547_v27 }
 0x1e1   :  { %3591 = vmatprep.mubr.bf16.mxu0 %v16727_v41  ;;  %3930 = vmatprep.mubr.bf16.mxu1 %v16727_v41  ;;  %v558_v41 = vld [vmem:[%s19723_s1 + $0xb10] sm:$0xff] }
 0x1e3   :  { %3659 = vmatpush1.bf16.msra.mxu0 %v14448_v38  ;;  %3998 = vmatpush1.bf16.msra.mxu1 %v14450_v39  ;;  %v14506_v38 = vcombine.low %v543_v26, %v547_v27  ;;  %v14513_v39 = vcombine.high %v550_v33, %v554_v34 }
 0x1e4   :  { %3660 = vmatprep.subr.bf16.mxu0 %v14457_v40  ;;  %3999 = vmatprep.subr.bf16.mxu1 %v14459_v42  ;;  %v14515_v40 = vcombine.high %v551_v35, %v555_v36  ;;  %v562_v42 = vld [vmem:[%s19723_s1 + $0xb30] sm:$0xff] }
 0x1e5   :  { %v14520_v55 = vcombine.low %v558_v41, %v562_v42 }
 0x1e6   :  { %3592 = vmatmul.mubr.bf16.gmra.mrb[40].mxu0 %v16728_v53  ;;  %3931 = vmatmul.mubr.bf16.gmra.mrb[40].mxu1 %v16728_v53  ;;  %v567_v53 = vld [vmem:[%s19723_s1 + $0xb58] sm:$0xff] }
 0x1e7   :  { %3661 = vmatpush1.bf16.msra.mxu0 %v14456_v47  ;;  %4000 = vmatpush1.bf16.msra.mxu1 %v14458_v48  ;;  %v14514_v47 = vcombine.low %v551_v35, %v555_v36  ;;  %v14521_v48 = vcombine.high %v558_v41, %v562_v42  ;;  %v16748_v41 = vld [vmem:[%s19722_s0 + $0xd0] ss:$24 sps:$4 sm:$0xff]   ;;  %v16749_v42 = vld [vmem:[%s19722_s0 + $0x104] ss:$24 sps:$4 sm:$0xff]  }
 0x1e8   :  { %3662 = vmatprep.subr.bf16.mxu0 %v14465_v49  ;;  %4001 = vmatprep.subr.bf16.mxu1 %v14467_v50  ;;  %v16735_v49 = vld [vmem:[%s19722_s0 + $0x12c] ss:$24 sps:$4 sm:$0xff]   ;;  %v14523_v50 = vcombine.high %v559_v44, %v563_v45 }
 0x1e9   :  { %3601 = vmatprep.mubr.bf16.mxu0 %v16729_v59  ;;  %3940 = vmatprep.mubr.bf16.mxu1 %v16729_v59  ;;  %v574_v59 = vld [vmem:[%s19723_s1 + $0xb90] sm:$0xff] }
 0x1eb   :  { %3663 = vmatpush1.bf16.msra.mxu0 %v14464_v56  ;;  %4002 = vmatpush1.bf16.msra.mxu1 %v14466_v57  ;;  %v14522_v56 = vcombine.low %v559_v44, %v563_v45  ;;  %v14529_v57 = vcombine.high %v566_v51, %v570_v52 }
 0x1ec   :  { %3664 = vmatprep.subr.bf16.mxu0 %v14473_v58  ;;  %4003 = vmatprep.subr.bf16.mxu1 %v14475_v60  ;;  %v14531_v58 = vcombine.high %v567_v53, %v571_v54  ;;  %v578_v60 = vld [vmem:[%s19723_s1 + $0xbb0] sm:$0xff] }
 0x1ed   :  { %v14536_v9 = vcombine.low %v574_v59, %v578_v60 }
 0x1ee   :  { %3602 = vmatmul.mubr.bf16.gmra.mrb[44].mxu0 %v16730_v7  ;;  %3941 = vmatmul.mubr.bf16.gmra.mrb[44].mxu1 %v16730_v7  ;;  %v583_v7 = vld [vmem:[%s19723_s1 + $0xbd8] sm:$0xff] }
 0x1ef   :  { %3665 = vmatpush1.bf16.msra.mxu0 %v14472_v1  ;;  %4004 = vmatpush1.bf16.msra.mxu1 %v14474_v2  ;;  %v14530_v1 = vcombine.low %v567_v53, %v571_v54  ;;  %v14537_v2 = vcombine.high %v574_v59, %v578_v60  ;;  %v14546_v15 = vcombine.low %v583_v7, %v587_v8  ;;  %v16750_v59 = vld [vmem:[%s19722_s0 + $0x100] ss:$24 sps:$4 sm:$0xff]   ;;  %v16751_v60 = vld [vmem:[%s19722_s0 + $0x134] ss:$24 sps:$4 sm:$0xff]  }
 0x1f0   :  { %3666 = vmatprep.subr.bf16.mxu0 %v14481_v3  ;;  %4005 = vmatprep.subr.bf16.mxu1 %v14483_v4  ;;  %v16737_v3 = vld [vmem:[%s19722_s0 + $0x15c] ss:$24 sps:$4 sm:$0xff]   ;;  %v14539_v4 = vcombine.high %v575_v62, %v579_v63 }
 0x1f1   :  { %3611 = vmatprep.mubr.bf16.mxu0 %v16731_v13  ;;  %3950 = vmatprep.mubr.bf16.mxu1 %v16731_v13  ;;  %v16738_v13 = vld [vmem:[%s19722_s0 + $0x158] ss:$24 sps:$4 sm:$0xff]  }
 0x1f3   :  { %3667 = vmatpush1.bf16.msra.mxu0 %v14480_v10  ;;  %4006 = vmatpush1.bf16.msra.mxu1 %v14482_v11  ;;  %v14538_v10 = vcombine.low %v575_v62, %v579_v63  ;;  %v14545_v11 = vcombine.high %v582_v5, %v586_v6 }
 0x1f4   :  { %3668 = vmatprep.subr.bf16.mxu0 %v14489_v12  ;;  %4007 = vmatprep.subr.bf16.mxu1 %v14491_v14  ;;  %v14547_v12 = vcombine.high %v583_v7, %v587_v8  ;;  %v14544_v14 = vcombine.low %v582_v5, %v586_v6 }
 0x1f6   :  { %3612 = vmatmul.mubr.bf16.gmra.mrb[48].mxu0 %v16732_v25  ;;  %3951 = vmatmul.mubr.bf16.gmra.mrb[48].mxu1 %v16732_v25 }
 0x1f7   :  { %3669 = vmatpush1.bf16.msra.mxu0 %v14488_v19  ;;  %4008 = vmatpush1.bf16.msra.mxu1 %v14490_v20  ;;  %v16742_v19 = vld [vmem:[%s19722_s0 + $0x40] ss:$24 sps:$4 sm:$0xff]   ;;  %v16743_v20 = vld [vmem:[%s19722_s0 + $0x74] ss:$24 sps:$4 sm:$0xff]  }
 0x1f8   :  { %3670 = vmatprep.subr.bf16.mxu0 %v14497_v21  ;;  %4009 = vmatprep.subr.bf16.mxu1 %v14499_v22  ;;  %v16744_v21 = vld [vmem:[%s19722_s0 + $0x70] ss:$24 sps:$4 sm:$0xff]   ;;  %v16745_v22 = vld [vmem:[%s19722_s0 + $0xa4] ss:$24 sps:$4 sm:$0xff]  }
 0x1f9   :  { %3621 = vmatprep.mubr.bf16.mxu0 %v16733_v31  ;;  %3960 = vmatprep.mubr.bf16.mxu1 %v16733_v31  ;;  %v16746_v31 = vld [vmem:[%s19722_s0 + $0xa0] ss:$24 sps:$4 sm:$0xff]  }
 0x1fb   :  { %3671 = vmatpush1.bf16.msra.mxu0 %v14496_v28  ;;  %4010 = vmatpush1.bf16.msra.mxu1 %v14498_v29 }
 0x1fc   :  { %3672 = vmatprep.subr.bf16.mxu0 %v14505_v30  ;;  %4011 = vmatprep.subr.bf16.mxu1 %v14507_v32  ;;  %v16747_v32 = vld [vmem:[%s19722_s0 + $0xd4] ss:$24 sps:$4 sm:$0xff]  }
 0x1fe   :  { %3622 = vmatmul.mubr.bf16.gmra.mrb[52].mxu0 %v16734_v43  ;;  %3961 = vmatmul.mubr.bf16.gmra.mrb[52].mxu1 %v16734_v43 }
 0x1ff   :  { %3673 = vmatpush1.bf16.msra.mxu0 %v14504_v37  ;;  %4012 = vmatpush1.bf16.msra.mxu1 %v14506_v38 }
 0x200   :  { %3674 = vmatprep.subr.bf16.mxu0 %v14513_v39  ;;  %4013 = vmatprep.subr.bf16.mxu1 %v14515_v40 }
 0x201   :  { %3631 = vmatprep.mubr.bf16.mxu0 %v16735_v49  ;;  %3970 = vmatprep.mubr.bf16.mxu1 %v16735_v49 }
 0x203   :  { %3675 = vmatpush1.bf16.msra.mxu0 %v14512_v46  ;;  %4014 = vmatpush1.bf16.msra.mxu1 %v14514_v47 }
 0x204   :  { %3676 = vmatprep.subr.bf16.mxu0 %v14521_v48  ;;  %4015 = vmatprep.subr.bf16.mxu1 %v14523_v50 }
 0x206   :  { %3632 = vmatmul.mubr.bf16.gmra.mrb[56].mxu0 %v16736_v61  ;;  %3971 = vmatmul.mubr.bf16.gmra.mrb[56].mxu1 %v16736_v61 }
 0x207   :  { %3677 = vmatpush1.bf16.msra.mxu0 %v14520_v55  ;;  %4016 = vmatpush1.bf16.msra.mxu1 %v14522_v56 }
 0x208   :  { %3678 = vmatprep.subr.bf16.mxu0 %v14529_v57  ;;  %4017 = vmatprep.subr.bf16.mxu1 %v14531_v58 }
 0x209   :  { %3641 = vmatprep.mubr.bf16.mxu0 %v16737_v3  ;;  %3980 = vmatprep.mubr.bf16.mxu1 %v16737_v3 }
 0x20b   :  { %3679 = vmatpush1.bf16.msra.mxu0 %v14528_v0  ;;  %4018 = vmatpush1.bf16.msra.mxu1 %v14530_v1 }
 0x20c   :  { %3680 = vmatprep.subr.bf16.mxu0 %v14537_v2  ;;  %4019 = vmatprep.subr.bf16.mxu1 %v14539_v4 }
 0x20e   :  { %3642 = vmatmul.mubr.bf16.gmra.mrb[60].mxu0 %v16738_v13  ;;  %3981 = vmatmul.mubr.bf16.gmra.mrb[60].mxu1 %v16738_v13  ;;  %v16752_v13 = vld [vmem:[%s19722_s0 + $0x130] ss:$24 sps:$4 sm:$0xff]  }
 0x20f   :  { %3681 = vmatpush1.bf16.msra.mxu0 %v14536_v9  ;;  %4020 = vmatpush1.bf16.msra.mxu1 %v14538_v10 }
 0x210   :  { %3682 = vmatprep.subr.bf16.mxu0 %v14545_v11  ;;  %4021 = vmatprep.subr.bf16.mxu1 %v14547_v12 }
 0x211   :  { %3684 = vmatprep.mubr.bf16.mxu0 %v16739_v16  ;;  %4023 = vmatprep.mubr.bf16.mxu1 %v16739_v16 }
 0x213   :  { %3683 = vmatpush1.bf16.msra.mxu0 %v14544_v14  ;;  %4022 = vmatpush1.bf16.msra.mxu1 %v14546_v15  ;;  %v16753_v14 = vld [vmem:[%s19722_s0 + $0x164] ss:$24 sps:$4 sm:$0xff]  }
 0x216   :  { %3685 = vmatmul.mubr.bf16.vlgmr.msra.gmra.mrb[32].mxu0 %v16740_v17  ;;  %4024 = vmatmul.mubr.bf16.vlgmr.msra.gmra.mrb[32].mxu1 %v16740_v17 }
 0x217   :  { %3694 = vmatprep.mubr.bf16.mxu0 %v16741_v18  ;;  %4033 = vmatprep.mubr.bf16.mxu1 %v16741_v18 }
 0x21e   :  { %3695 = vmatmul.mubr.bf16.gmra.mrb[36].mxu0 %v16742_v19  ;;  %4034 = vmatmul.mubr.bf16.gmra.mrb[36].mxu1 %v16742_v19 }
 0x21f   :  { %3704 = vmatprep.mubr.bf16.mxu0 %v16743_v20  ;;  %4043 = vmatprep.mubr.bf16.mxu1 %v16743_v20 }
 0x226   :  { %3705 = vmatmul.mubr.bf16.gmra.mrb[40].mxu0 %v16744_v21  ;;  %4044 = vmatmul.mubr.bf16.gmra.mrb[40].mxu1 %v16744_v21 }
 0x227   :  { %3714 = vmatprep.mubr.bf16.mxu0 %v16745_v22  ;;  %4053 = vmatprep.mubr.bf16.mxu1 %v16745_v22 }
 0x229   :  { %v18552_v23 = vpop.f32.mrb[0].mxu0  ;;  %v18554_v24 = vpop.f32.mrb[0].mxu1 }
 0x22a   :  { %v18556_v25 = vpop.f32.mrb[1].mxu0  ;;  %v18558_v26 = vpop.f32.mrb[1].mxu1 }
 0x22b   :  { %v18560_v27 = vpop.f32.mrb[2].mxu0  ;;  %v18562_v28 = vpop.f32.mrb[2].mxu1 }
 0x22c   :  { %v18564_v29 = vpop.f32.mrb[3].mxu0  ;;  %v18566_v30 = vpop.f32.mrb[3].mxu1 }
 0x22e   :  { %3715 = vmatmul.mubr.bf16.gmra.mrb[44].mxu0 %v16746_v31  ;;  %4054 = vmatmul.mubr.bf16.gmra.mrb[44].mxu1 %v16746_v31  ;;  %v16754_v31 = vld [vmem:[%s19722_s0 + $0x160] ss:$24 sps:$4 sm:$0xff]   ;;  %s16981_s0 = smov [#allocation18]  }
 0x22f   :  { %3724 = vmatprep.mubr.bf16.mxu0 %v16747_v32  ;;  %4063 = vmatprep.mubr.bf16.mxu1 %v16747_v32  ;;  %s14103_s29 = sshll.u32 %s16981_s0, 4  ;;  %s14104_s29 = int_to_ptr.vmem [resolvable:$true] %s14103_s29 }
 0x230   :  { %s16931_s11 = scalar_lea.vmem %s14104_s29, 32  ;;  %p16936_p9 = scmp.lt.s32.totalorder %s14104_s29, %s14104_s29 }
 0x231   :  { %v18574_v33 = vpop.f32.mrb[4].mxu0  ;;  %v18576_v34 = vpop.f32.mrb[4].mxu1  ;;  %p16932_p8 = scmp.ne.s32.totalorder %s14104_s29, %s16931_s11  ;;  %p16937_p10 = scmp.lt.s32.totalorder %s16931_s11, %s16931_s11 }
 0x232   :  { %v18578_v35 = vpop.f32.mrb[5].mxu0  ;;  %v18580_v36 = vpop.f32.mrb[5].mxu1 }
 0x233   :  { %v18582_v37 = vpop.f32.mrb[6].mxu0  ;;  %v18584_v38 = vpop.f32.mrb[6].mxu1  ;;  %p16938_p11 = por %p16937_p10, %p16936_p9 }
 0x234   :  { %19794 = vst [vmem:[#allocation25_spill] sm:$0xff] %v18584_v38  ;;  %v18586_v39 = vpop.f32.mrb[7].mxu0  ;;  %v18588_v40 = vpop.f32.mrb[7].mxu1 }
 0x235   :  { %19795 = vst [vmem:[#allocation26_spill] sm:$0xff] %v18586_v39  ;;  %19796 = vst [vmem:[#allocation27_spill] sm:$0xff] %v18588_v40  ;;  %p16939_p12 = pnand %p16938_p11, %p16932_p8 }
 0x236   :  { %3725 = vmatmul.mubr.bf16.gmra.mrb[48].mxu0 %v16748_v41  ;;  %4064 = vmatmul.mubr.bf16.gmra.mrb[48].mxu1 %v16748_v41 }
 0x237   :  { %3734 = vmatprep.mubr.bf16.mxu0 %v16749_v42  ;;  %4073 = vmatprep.mubr.bf16.mxu1 %v16749_v42 }
 0x239   :  { %v18596_v43 = vpop.f32.mrb[8].mxu0  ;;  %v18600_v45 = vpop.f32.mrb[8].mxu1 }
 0x23a   :  { %v18602_v46 = vpop.f32.mrb[9].mxu0  ;;  %v18608_v49 = vpop.f32.mrb[9].mxu1 }
 0x23b   :  { %v18610_v50 = vpop.f32.mrb[10].mxu0  ;;  %v18616_v53 = vpop.f32.mrb[10].mxu1 }
 0x23c   :  { %v18618_v54 = vpop.f32.mrb[11].mxu0  ;;  %v18624_v57 = vpop.f32.mrb[11].mxu1 }
 0x23e   :  { %3735 = vmatmul.mubr.bf16.gmra.mrb[52].mxu0 %v16750_v59  ;;  %4074 = vmatmul.mubr.bf16.gmra.mrb[52].mxu1 %v16750_v59 }
 0x23f   :  { %3744 = vmatprep.mubr.bf16.mxu0 %v16751_v60  ;;  %4083 = vmatprep.mubr.bf16.mxu1 %v16751_v60 }
 0x241   :  { %v18634_v61 = vpop.f32.mrb[12].mxu0  ;;  %v18638_v63 = vpop.f32.mrb[12].mxu1 }
 0x242   :  { %v18640_v0 = vpop.f32.mrb[13].mxu0  ;;  %v18646_v3 = vpop.f32.mrb[13].mxu1 }
 0x243   :  { %v18648_v4 = vpop.f32.mrb[14].mxu0  ;;  %v18654_v7 = vpop.f32.mrb[14].mxu1 }
 0x244   :  { %19797 = vst [vmem:[#allocation28_spill] sm:$0xff] %v18654_v7  ;;  %v18656_v8 = vpop.f32.mrb[15].mxu0  ;;  %v18662_v11 = vpop.f32.mrb[15].mxu1 }
 0x245   :  { %19798 = vst [vmem:[#allocation29_spill] sm:$0xff] %v18656_v8  ;;  %19799 = vst [vmem:[#allocation30_spill] sm:$0xff] %v18662_v11 }
 0x246   :  { %3745 = vmatmul.mubr.bf16.gmra.mrb[56].mxu0 %v16752_v13  ;;  %4084 = vmatmul.mubr.bf16.gmra.mrb[56].mxu1 %v16752_v13 }
 0x247   :  { %3754 = vmatprep.mubr.bf16.mxu0 %v16753_v14  ;;  %4093 = vmatprep.mubr.bf16.mxu1 %v16753_v14 }
 0x249   :  { %v18672_v15 = vpop.f32.mrb[16].mxu0  ;;  %v18674_v16 = vpop.f32.mrb[16].mxu1 }
 0x24a   :  { %19800 = vst [vmem:[#allocation31_spill] sm:$0xff] %v18672_v15  ;;  %19801 = vst [vmem:[#allocation32_spill] sm:$0xff] %v18674_v16  ;;  %v18676_v17 = vpop.f32.mrb[17].mxu0  ;;  %v18678_v18 = vpop.f32.mrb[17].mxu1 }
 0x24b   :  { %19802 = vst [vmem:[#allocation33_spill] sm:$0xff] %v18676_v17  ;;  %19803 = vst [vmem:[#allocation34_spill] sm:$0xff] %v18678_v18  ;;  %v18680_v19 = vpop.f32.mrb[18].mxu0  ;;  %v18682_v20 = vpop.f32.mrb[18].mxu1 }
 0x24c   :  { %19804 = vst [vmem:[#allocation35_spill] sm:$0xff] %v18680_v19  ;;  %19805 = vst [vmem:[#allocation36_spill] sm:$0xff] %v18682_v20  ;;  %v18684_v21 = vpop.f32.mrb[19].mxu0  ;;  %v18686_v22 = vpop.f32.mrb[19].mxu1 }
 0x24d   :  { %19806 = vst [vmem:[#allocation37_spill] sm:$0xff] %v18684_v21  ;;  %19807 = vst [vmem:[#allocation38_spill] sm:$0xff] %v18686_v22 }
 0x24e   :  { %3755 = vmatmul.mubr.bf16.gmra.mrb[60].mxu0 %v16754_v31  ;;  %4094 = vmatmul.mubr.bf16.gmra.mrb[60].mxu1 %v16754_v31 }
 0x251   :  { %v18691_v32 = vpop.f32.mrb[20].mxu0  ;;  %v18693_v41 = vpop.f32.mrb[20].mxu1 }
 0x252   :  { %19808 = vst [vmem:[#allocation39_spill] sm:$0xff] %v18691_v32  ;;  %19809 = vst [vmem:[#allocation40_spill] sm:$0xff] %v18693_v41  ;;  %v18695_v42 = vpop.f32.mrb[21].mxu0  ;;  %v18697_v59 = vpop.f32.mrb[21].mxu1 }
 0x253   :  { %19810 = vst [vmem:[#allocation41_spill] sm:$0xff] %v18695_v42  ;;  %19811 = vst [vmem:[#allocation42_spill] sm:$0xff] %v18697_v59  ;;  %v18699_v60 = vpop.f32.mrb[22].mxu0  ;;  %v18701_v13 = vpop.f32.mrb[22].mxu1 }
 0x254   :  { %19812 = vst [vmem:[#allocation43_spill] sm:$0xff] %v18699_v60  ;;  %19813 = vst [vmem:[#allocation44_spill] sm:$0xff] %v18701_v13  ;;  %v18703_v14 = vpop.f32.mrb[23].mxu0  ;;  %v18705_v12 = vpop.f32.mrb[23].mxu1  ;;  %v138_v13 = vlaneseq }
 0x255   :  { %19814 = vst [vmem:[#allocation45_spill] sm:$0xff] %v18703_v14  ;;  %19815 = vst [vmem:[#allocation46_spill] sm:$0xff] %v18705_v12 }
 0x256   :  { %v18779_v42 = vshrl.u32 %v138_v13, 7  ;;  %v18795_v19 = vand.u32 127, %v138_v13 }
 0x258   :  { %v19768_v22 = vsub.s32 0, %v18779_v42  ;;  %v19771_v21 = vsub.s32 2, %v18779_v42  ;;  %v19775_v20 = vsub.s32 1, %v18779_v42  ;;  %19832 = vst [vmem:[#allocation63_spill] sm:$0xff] %v18795_v19 }
 0x259   :  { %v18707_v10 = vpop.f32.mrb[24].mxu0  ;;  %v18711_v9 = vpop.f32.mrb[24].mxu1 }
 0x25a   :  { %19816 = vst [vmem:[#allocation47_spill] sm:$0xff] %v18707_v10  ;;  %19817 = vst [vmem:[#allocation48_spill] sm:$0xff] %v18711_v9  ;;  %v18713_v6 = vpop.f32.mrb[25].mxu0  ;;  %v18719_v1 = vpop.f32.mrb[25].mxu1 }
 0x25b   :  { %19818 = vst [vmem:[#allocation49_spill] sm:$0xff] %v18713_v6  ;;  %19819 = vst [vmem:[#allocation50_spill] sm:$0xff] %v18719_v1  ;;  %v18721_v62 = vpop.f32.mrb[26].mxu0  ;;  %v18727_v56 = vpop.f32.mrb[26].mxu1 }
 0x25c   :  { %19820 = vst [vmem:[#allocation51_spill] sm:$0xff] %v18721_v62  ;;  %19821 = vst [vmem:[#allocation52_spill] sm:$0xff] %v18727_v56  ;;  %v18729_v55 = vpop.f32.mrb[27].mxu0  ;;  %v18735_v52 = vpop.f32.mrb[27].mxu1  ;;  %v4104_v56 = vld [vmem:[#allocation4] sm:$0xf] }
 0x25d   :  { %19822 = vst [vmem:[#allocation53_spill] sm:$0xff] %v18729_v55  ;;  %19823 = vst [vmem:[#allocation54_spill] sm:$0xff] %v18735_v52  ;;  %v19774_v62 = vsub.s32 3, %v18779_v42  ;;  %v18799_v6 = vrot.slane %v4104_v56, %v19768_v22  ;;  %v18803_v9 = vrot.slane %v4104_v56, %v19771_v21  ;;  %v18807_v11 = vrot.slane %v4104_v56, %v19775_v20 }
 0x25e   :  { %v19833_v22 = vmax.f32 %v18552_v23, %v18596_v43  ;;  %v19836_v43 = vmax.f32 %v18558_v26, %v18608_v49 }
 0x261   :  { %v18739_v48 = vpop.f32.mrb[28].mxu0  ;;  %v18743_v58 = vpop.f32.mrb[28].mxu1 }
 0x262   :  { %19824 = vst [vmem:[#allocation55_spill] sm:$0xff] %v18739_v48  ;;  %19825 = vst [vmem:[#allocation56_spill] sm:$0xff] %v18743_v58  ;;  %v18745_v47 = vpop.f32.mrb[29].mxu0  ;;  %v18751_v44 = vpop.f32.mrb[29].mxu1  ;;  %v19748_v58 = vmov 0  }
 0x263   :  { %19826 = vst [vmem:[#allocation57_spill] sm:$0xff] %v18745_v47  ;;  %19827 = vst [vmem:[#allocation58_spill] sm:$0xff] %v18751_v44  ;;  %v18753_v55 = vpop.f32.mrb[30].mxu0  ;;  %v18759_v48 = vpop.f32.mrb[30].mxu1  ;;  %4250 = vmatprep.mubr.bf16.mxu1 %v19748_v58  ;;  %4545 = vmatprep.mubr.bf16.mxu0 %v19748_v58 }
 0x264   :  { %19828 = vst [vmem:[#allocation59_spill] sm:$0xff] %v18753_v55  ;;  %19829 = vst [vmem:[#allocation60_spill] sm:$0xff] %v18759_v48  ;;  %v18761_v32 = vpop.f32.mrb[31].mxu0  ;;  %v18767_v47 = vpop.f32.mrb[31].mxu1 }
 0x265   :  { %19830 = vst [vmem:[#allocation61_spill] sm:$0xff] %v18761_v32  ;;  %19831 = vst [vmem:[#allocation62_spill] sm:$0xff] %v18767_v47 }
 0x2e9   :  { %v3686_v31 = vpop.f32.mrb[32].mxu0  ;;  %v4025_v51 = vpop.f32.mrb[32].mxu1 }
 0x2ea   :  { %v3688_v55 = vpop.f32.mrb[33].mxu0  ;;  %v4027_v60 = vpop.f32.mrb[33].mxu1 }
 0x2eb   :  { %v3690_v44 = vpop.f32.mrb[34].mxu0  ;;  %v4029_v59 = vpop.f32.mrb[34].mxu1 }
 0x2ec   :  { %v3692_v5 = vpop.f32.mrb[35].mxu0  ;;  %v4031_v48 = vpop.f32.mrb[35].mxu1 }
 0x2f1   :  { %v18773_v2 = vpop.f32.mrb[36].mxu0  ;;  %v18775_v32 = vpop.f32.mrb[36].mxu1 }
 0x2f2   :  { %v18777_v14 = vpop.f32.mrb[37].mxu0  ;;  %v18781_v47 = vpop.f32.mrb[37].mxu1 }
 0x2f3   :  { %v18783_v58 = vpop.f32.mrb[38].mxu0  ;;  %v18785_v12 = vpop.f32.mrb[38].mxu1 }
 0x2f4   :  { %v18787_v41 = vpop.f32.mrb[39].mxu0  ;;  %v18789_v52 = vpop.f32.mrb[39].mxu1 }
 0x2f9   :  { %v3706_v1 = vpop.f32.mrb[40].mxu0  ;;  %v4045_v17 = vpop.f32.mrb[40].mxu1 }
 0x2fa   :  { %v4109_v18 = vmax.f32 %v3686_v31, %v3706_v1  ;;  %v3708_v16 = vpop.f32.mrb[41].mxu0  ;;  %v4111_v10 = vmax.f32 %v4025_v51, %v4045_v17  ;;  %v4047_v13 = vpop.f32.mrb[41].mxu1  ;;  %v18811_v1 = vrot.slane %v4104_v56, %v19774_v62  ;;  %v18817_v51 = vadd.s32 1, %v18795_v19 }
 0x2fb   :  { %v4110_v15 = vmax.f32 %v3688_v55, %v3708_v16  ;;  %v3710_v31 = vpop.f32.mrb[42].mxu0  ;;  %v4112_v8 = vmax.f32 %v4027_v60, %v4047_v13  ;;  %v4049_v39 = vpop.f32.mrb[42].mxu1  ;;  %v19834_v55 = vmax.f32 %v18554_v24, %v18600_v45  ;;  %v19835_v56 = vmax.f32 %v18556_v25, %v18602_v46 }
 0x2fc   :  { %v4137_v40 = vmax.f32 %v19833_v22, %v4109_v18  ;;  %v4117_v21 = vmax.f32 %v3690_v44, %v3710_v31  ;;  %v3712_v7 = vpop.f32.mrb[43].mxu0  ;;  %v4119_v62 = vmax.f32 %v4029_v59, %v4049_v39  ;;  %v4051_v38 = vpop.f32.mrb[43].mxu1  ;;  %v19837_v18 = vmax.f32 %v18560_v27, %v18610_v50 }
 0x2fd   :  { %v4139_v16 = vmax.f32 %v19834_v55, %v4111_v10  ;;  %v4138_v17 = vmax.f32 %v19835_v56, %v4110_v15  ;;  %v4118_v20 = vmax.f32 %v3692_v5, %v3712_v7  ;;  %v4140_v44 = vmax.f32 %v19836_v43, %v4112_v8 }
 0x2fe   :  { %v4174_v23 = vadd.f32 %v18799_v6, %v4137_v40  ;;  %v4141_v22 = vmax.f32 %v19837_v18, %v4117_v21  ;;  %v4120_v60 = vmax.f32 %v4031_v48, %v4051_v38  ;;  %v19838_v25 = vmax.f32 %v18562_v28, %v18616_v53 }
 0x2ff   :  { %v4176_v24 = vadd.f32 %v18803_v9, %v4139_v16  ;;  %v4175_v45 = vadd.f32 %v18807_v11, %v4138_v17  ;;  %v19839_v40 = vmax.f32 %v18564_v29, %v18618_v54  ;;  %v4177_v26 = vadd.f32 %v18811_v1, %v4140_v44 }
 0x300   :  { %v4143_v39 = vmax.f32 %v19838_v25, %v4119_v62  ;;  %v4190_v5 = vmax.f32 %v4174_v23, 0.0  ;;  %v4178_v49 = vadd.f32 %v18799_v6, %v4141_v22  ;;  %v19840_v27 = vmax.f32 %v18566_v30, %v18624_v57 }
 0x301   :  { %v4142_v46 = vmax.f32 %v19839_v40, %v4118_v20  ;;  %v4192_v48 = vmax.f32 %v4176_v24, 0.0  ;;  %v4191_v50 = vmax.f32 %v4175_v45, 0.0  ;;  %v3716_v53 = vpop.f32.mrb[44].mxu0  ;;  %v4193_v62 = vmax.f32 %v4177_v26, 0.0  ;;  %v4055_v10 = vpop.f32.mrb[44].mxu1 }
 0x302   :  { %v4144_v38 = vmax.f32 %v19840_v27, %v4120_v60  ;;  %v4180_v7 = vadd.f32 %v18803_v9, %v4143_v39  ;;  %v4194_v8 = vmax.f32 %v4178_v49, 0.0  ;;  %v4125_v54 = vmax.f32 %v18773_v2, %v3716_v53  ;;  %v3718_v15 = vpop.f32.mrb[45].mxu0  ;;  %v4057_v59 = vpop.f32.mrb[45].mxu1 }
 0x303   :  { %v4179_v28 = vadd.f32 %v18807_v11, %v4142_v46  ;;  %v4127_v30 = vmax.f32 %v18775_v32, %v4055_v10  ;;  %v4126_v57 = vmax.f32 %v18777_v14, %v3718_v15  ;;  %v3720_v13 = vpop.f32.mrb[46].mxu0  ;;  %v19841_v16 = vmax.f32 %v18574_v33, %v18634_v61  ;;  %v4059_v2 = vpop.f32.mrb[46].mxu1  ;;  %v19850_v46 = vld [vmem:[#allocation26_spill] sm:$0xff] }
 0x304   :  { %v4181_v29 = vadd.f32 %v18811_v1, %v4144_v38  ;;  %v4196_v20 = vmax.f32 %v4180_v7, 0.0  ;;  %v18851_v31 = vpack.c.bf16 %v4194_v8, %v4190_v5  ;;  %v4128_v17 = vmax.f32 %v18781_v47, %v4057_v59  ;;  %v3722_v23 = vpop.f32.mrb[47].mxu0  ;;  %v4061_v60 = vpop.f32.mrb[47].mxu1  ;;  %v19851_v5 = vld [vmem:[#allocation29_spill] sm:$0xff] }
 0x305   :  { %v4195_v21 = vmax.f32 %v4179_v28, 0.0  ;;  %v4145_v56 = vmax.f32 %v19841_v16, %v4125_v54  ;;  %v19842_v32 = vmax.f32 %v18576_v34, %v18638_v63  ;;  %v19843_v18 = vmax.f32 %v18578_v35, %v18640_v0 }
 0x306   :  { %v4197_v55 = vmax.f32 %v4181_v29, 0.0  ;;  %v18857_v43 = vpack.c.bf16 %v4196_v20, %v4192_v48  ;;  %v19844_v33 = vmax.f32 %v18580_v36, %v18646_v3  ;;  %v4133_v61 = vmax.f32 %v18783_v58, %v3720_v13  ;;  %v19854_v48 = vld [vmem:[#allocation30_spill] sm:$0xff] }
 0x307   :  { %v18859_v44 = vpack.c.bf16 %v4195_v21, %v4191_v50  ;;  %v4147_v14 = vmax.f32 %v19842_v32, %v4127_v30  ;;  %v4146_v22 = vmax.f32 %v19843_v18, %v4126_v57  ;;  %v4135_v45 = vmax.f32 %v18785_v12, %v4059_v2  ;;  %v19847_v12 = vld [vmem:[#allocation25_spill] sm:$0xff] }
 0x308   :  { %v18867_v24 = vpack.c.bf16 %v4197_v55, %v4193_v62  ;;  %v4148_v47 = vmax.f32 %v19844_v33, %v4128_v17  ;;  %v4134_v25 = vmax.f32 %v18787_v41, %v3722_v23  ;;  %v18876_v34 = vadd.s32 8, %v18779_v42  ;;  %v19848_v41 = vld [vmem:[#allocation28_spill] sm:$0xff] }
 0x309   :  { %vm144_vm0 = vcmp.eq.s32.totalorder %v18779_v42, %v18817_v51  ;;  %v4182_v35 = vadd.f32 %v18799_v6, %v4145_v56  ;;  %v19846_v63 = vmax.f32 %v18582_v37, %v18648_v4  ;;  %v4136_v36 = vmax.f32 %v18789_v52, %v4061_v60  ;;  %v3726_v27 = vpop.f32.mrb[48].mxu0  ;;  %v19853_v4 = vld [vmem:[#allocation27_spill] sm:$0xff]  ;;  %v18898_v7 = vpop.f32.mrb[48].mxu1 }
 0x30a   :  { %19845 = vst [vmem:[#allocation64_spill] sm:$0xff] %v18876_v34  ;;  %v4184_v58 = vadd.f32 %v18803_v9, %v4147_v14  ;;  %v4183_v3 = vadd.f32 %v18807_v11, %v4146_v22  ;;  %v19849_v39 = vmax.f32 %v19847_v12, %v19848_v41  ;;  %v19852_v26 = vmax.f32 %v19850_v46, %v19851_v5  ;;  %v18900_v28 = vpop.f32.mrb[49].mxu0  ;;  %v18904_v8 = vpop.f32.mrb[49].mxu1 }
 0x30b   :  { %v4149_v0 = vmax.f32 %v19846_v63, %v4133_v61  ;;  %v4185_v38 = vadd.f32 %v18811_v1, %v4148_v47  ;;  %v19855_v52 = vmax.f32 %v19853_v4, %v19854_v48  ;;  %v18906_v29 = vpop.f32.mrb[50].mxu0  ;;  %vm145_vm1 = vcmp.eq.s32.totalorder %v18876_v34, %v18817_v51  ;;  %v18911_v20 = vpop.f32.mrb[50].mxu1  ;;  %v19858_v4 = vld [vmem:[#allocation47_spill] sm:$0xff] }
 0x30c   :  { %v4151_v40 = vmax.f32 %v19849_v39, %v4135_v45  ;;  %v4150_v49 = vmax.f32 %v19852_v26, %v4134_v25  ;;  %v4198_v54 = vmax.f32 %v4182_v35, 0.0  ;;  %v18913_v21 = vpop.f32.mrb[51].mxu0  ;;  %v19777_v30 = vmov 0.0   ;;  %v18919_v56 = vpop.f32.mrb[51].mxu1 }
 0x30d   :  { %v4186_v37 = vadd.f32 %v18799_v6, %v4149_v0  ;;  %v4152_v50 = vmax.f32 %v19855_v52, %v4136_v36  ;;  %v146_v57 = vsel %vm144_vm0, 1.0, %v19777_v30  ;;  %v4200_v59 = vmax.f32 %v4184_v58, 0.0 }
 0x30e   :  { %v4188_v53 = vadd.f32 %v18803_v9, %v4151_v40  ;;  %v4187_v62 = vadd.f32 %v18807_v11, %v4150_v49  ;;  %v4199_v13 = vmax.f32 %v4183_v3, 0.0  ;;  %v4201_v17 = vmax.f32 %v4185_v38, 0.0 }
 0x30f   :  { %v4202_v10 = vmax.f32 %v4186_v37, 0.0  ;;  %v4189_v15 = vadd.f32 %v18811_v1, %v4152_v50  ;;  %v147_v32 = vsel %vm145_vm1, 1.0, %v19777_v30  ;;  %v149_v51 = vadd.s32 1, %v18779_v42  ;;  %v19857_v37 = vld [vmem:[#allocation31_spill] sm:$0xff] }
 0x310   :  { %v4204_v55 = vmax.f32 %v4188_v53, 0.0  ;;  %v4203_v16 = vmax.f32 %v4187_v62, 0.0  ;;  %v18936_v33 = vpack.c.bf16 %v147_v32, %v146_v57  ;;  %v150_v45 = vadd.s32 1, %v18876_v34  ;;  %v19867_v32 = vld [vmem:[#allocation50_spill] sm:$0xff] }
 0x311   :  { %v18921_v2 = vpack.c.bf16 %v4202_v10, %v4198_v54  ;;  %v4205_v23 = vmax.f32 %v4189_v15, 0.0  ;;  %v18934_v60 = vpop.f32.mrb[52].mxu0  ;;  %v18939_v47 = vpop.f32.mrb[52].mxu1  ;;  %v19856_v58 = vmov 0   ;;  %vm151_vm3 = vcmp.eq.s32.totalorder %v18795_v19, %v149_v51  ;;  %v19861_v15 = vld [vmem:[#allocation48_spill] sm:$0xff]  ;;  %v5244_v34 = vld [vmem:[#allocation7 + $0xef8] sm:$0xff] }
 0x312   :  { %v18927_v14 = vpack.c.bf16 %v4204_v55, %v4200_v59  ;;  %v18929_v18 = vpack.c.bf16 %v4203_v16, %v4199_v13  ;;  %v18941_v61 = vpop.f32.mrb[53].mxu0  ;;  %v18946_v25 = vpop.f32.mrb[53].mxu1  ;;  %vm152_vm4 = vcmp.eq.s32.totalorder %v18795_v19, %v150_v45  ;;  %v153_v12 = vsel %vm151_vm3, 1.0, %v19777_v30  ;;  %v19863_v59 = vld [vmem:[#allocation33_spill] sm:$0xff] }
 0x313   :  { %v18931_v22 = vpack.c.bf16 %v4205_v23, %v4201_v17  ;;  %v18948_v35 = vpop.f32.mrb[54].mxu0  ;;  %v18950_v63 = vpop.f32.mrb[54].mxu1  ;;  %v154_v41 = vsel %vm152_vm4, 1.0, %v19777_v30  ;;  %v19859_v48 = vmax.f32 %v19857_v37, %v19858_v4  ;;  %v19866_v23 = vld [vmem:[#allocation34_spill] sm:$0xff]  ;;  %v19876_v37 = vld [vmem:[#allocation53_spill] sm:$0xff] }
 0x314   :  { %4218 = vmatprep.subr.bf16.mxu1 %v18929_v18  ;;  %v18952_v0 = vpop.f32.mrb[55].mxu0  ;;  %v18956_v36 = vpop.f32.mrb[55].mxu1  ;;  %v18972_v10 = vpack.c.bf16 %v154_v41, %v153_v12  ;;  %v19868_v51 = vmax.f32 %v19866_v23, %v19867_v32  ;;  %v19870_v12 = vld [vmem:[#allocation51_spill] sm:$0xff]  ;;  %v5231_v30 = vld [vmem:[#allocation7 + $0xe90] sm:$0xff] }
 0x315   :  { %4219 = vmatpush1.bf16.msra.mxu1 %v18921_v2  ;;  %v5251_v19 = vld [vmem:[#allocation7 + $0xf30] sm:$0xff] }
 0x316   :  { %4261 = vmatprep.subr.bf16.mxu1 %v18931_v22 }
 0x318   :  { %14548 = vmatmul.mubr.msk.bf16.vlgmr.msra.gmra.mrb[64].mxu1 %vm4214_vm2, %v18936_v33 }
 0x319   :  { %4262 = vmatpush1.bf16.msra.mxu1 %v18927_v14  ;;  %4293 = vmatprep.mubr.bf16.mxu1 %v19856_v58  ;;  %v3746_v3 = vpop.f32.mrb[56].mxu0  ;;  %v4085_v40 = vpop.f32.mrb[56].mxu1 }
 0x31a   :  { %4311 = vmatprep.subr.bf16.mxu1 %v18859_v44  ;;  %v4429_v39 = vmax.f32 %v3726_v27, %v3746_v3  ;;  %v3748_v46 = vpop.f32.mrb[57].mxu0  ;;  %v4431_v5 = vmax.f32 %v18898_v7, %v4085_v40  ;;  %v4087_v49 = vpop.f32.mrb[57].mxu1  ;;  %v19860_v27 = vld [vmem:[#allocation32_spill] sm:$0xff]  ;;  %v19869_v3 = vld [vmem:[#allocation35_spill] sm:$0xff] }
 0x31b   :  { %v4430_v26 = vmax.f32 %v18900_v28, %v3748_v46  ;;  %v3750_v38 = vpop.f32.mrb[58].mxu0  ;;  %v4432_v50 = vmax.f32 %v18904_v8, %v4087_v49  ;;  %v4089_v62 = vpop.f32.mrb[58].mxu1  ;;  %v19862_v57 = vmax.f32 %v19860_v27, %v19861_v15  ;;  %v19864_v28 = vld [vmem:[#allocation49_spill] sm:$0xff]  ;;  %v19871_v41 = vmax.f32 %v19869_v3, %v19870_v12 }
 0x31c   :  { %v4457_v52 = vmax.f32 %v19859_v48, %v4429_v39  ;;  %v4437_v53 = vmax.f32 %v18906_v29, %v3750_v38  ;;  %v3752_v54 = vpop.f32.mrb[59].mxu0  ;;  %v19865_v13 = vmax.f32 %v19863_v59, %v19864_v28  ;;  %v4439_v16 = vmax.f32 %v18911_v20, %v4089_v62  ;;  %v4091_v29 = vpop.f32.mrb[59].mxu1  ;;  %v19875_v38 = vld [vmem:[#allocation37_spill] sm:$0xff]  ;;  %v19879_v62 = vld [vmem:[#allocation54_spill] sm:$0xff] }
 0x31d   :  { %v4459_v7 = vmax.f32 %v19862_v57, %v4431_v5  ;;  %v4438_v8 = vmax.f32 %v18913_v21, %v3752_v54  ;;  %v4460_v45 = vmax.f32 %v19868_v51, %v4432_v50  ;;  %v4440_v20 = vmax.f32 %v18919_v56, %v4091_v29  ;;  %v19872_v21 = vld [vmem:[#allocation36_spill] sm:$0xff]  ;;  %v19878_v56 = vld [vmem:[#allocation38_spill] sm:$0xff] }
 0x31e   :  { %v4458_v55 = vmax.f32 %v19865_v13, %v4430_v26  ;;  %v4473_v17 = vadd.f32 %v4457_v52, %v18799_v6  ;;  %v4461_v39 = vmax.f32 %v19871_v41, %v4437_v53  ;;  %v19873_v5 = vld [vmem:[#allocation52_spill] sm:$0xff]  ;;  %v19877_v4 = vmax.f32 %v19875_v38, %v19876_v37 }
 0x31f   :  { %v4475_v40 = vadd.f32 %v4459_v7, %v18803_v9  ;;  %v19874_v26 = vmax.f32 %v19872_v21, %v19873_v5  ;;  %v4476_v50 = vadd.f32 %v4460_v45, %v18811_v1  ;;  %v19880_v54 = vmax.f32 %v19878_v56, %v19879_v62  ;;  %v19885_v37 = vld [vmem:[#allocation56_spill] sm:$0xff] }
 0x320   :  { %14549 = vmatmul.mubr.msk.bf16.vlgmr.msra.gmra.mrb[68].mxu1 %vm4214_vm2, %v18936_v33  ;;  %v4474_v46 = vadd.f32 %v4458_v55, %v18807_v11  ;;  %v4462_v48 = vmax.f32 %v19877_v4, %v4438_v8  ;;  %v4489_v52 = vmax.f32 %v4473_v17, 0.0  ;;  %v4477_v53 = vadd.f32 %v4461_v39, %v18799_v6 }
 0x321   :  { %4312 = vmatpush1.bf16.msra.mxu1 %v18851_v31  ;;  %v4463_v49 = vmax.f32 %v19874_v26, %v4439_v16  ;;  %v4464_v27 = vmax.f32 %v19880_v54, %v4440_v20  ;;  %4343 = vmatprep.mubr.bf16.mxu1 %v19856_v58  ;;  %v4491_v15 = vmax.f32 %v4475_v40, 0.0  ;;  %v3756_v28 = vpop.f32.mrb[60].mxu0  ;;  %v4492_v13 = vmax.f32 %v4476_v50, 0.0  ;;  %v4095_v29 = vpop.f32.mrb[60].mxu1  ;;  %v19881_v20 = vld [vmem:[#allocation39_spill] sm:$0xff]  ;;  %v19891_v54 = vld [vmem:[#allocation58_spill] sm:$0xff] }
 0x322   :  { %4354 = vmatprep.subr.bf16.mxu1 %v18867_v24  ;;  %v4490_v57 = vmax.f32 %v4474_v46, 0.0  ;;  %v4478_v59 = vadd.f32 %v4462_v48, %v18807_v11  ;;  %v4493_v55 = vmax.f32 %v4477_v53, 0.0  ;;  %v4445_v8 = vmax.f32 %v18934_v60, %v3756_v28  ;;  %v3758_v17 = vpop.f32.mrb[61].mxu0  ;;  %v4097_v3 = vpop.f32.mrb[61].mxu1  ;;  %v19882_v40 = vld [vmem:[#allocation55_spill] sm:$0xff]  ;;  %v19887_v48 = vld [vmem:[#allocation41_spill] sm:$0xff] }
 0x323   :  { %v4479_v7 = vadd.f32 %v4463_v49, %v18803_v9  ;;  %v4480_v16 = vadd.f32 %v4464_v27, %v18811_v1  ;;  %v4447_v51 = vmax.f32 %v18939_v47, %v4095_v29  ;;  %v4446_v45 = vmax.f32 %v18941_v61, %v3758_v17  ;;  %v3760_v12 = vpop.f32.mrb[62].mxu0  ;;  %v4099_v60 = vpop.f32.mrb[62].mxu1  ;;  %v19884_v47 = vld [vmem:[#allocation40_spill] sm:$0xff] }
 0x324   :  { %v4494_v32 = vmax.f32 %v4478_v59, 0.0  ;;  %v19014_v41 = vpack.c.bf16 %v4493_v55, %v4489_v52  ;;  %v19883_v46 = vmax.f32 %v19881_v20, %v19882_v40  ;;  %v4448_v5 = vmax.f32 %v18946_v25, %v4097_v3  ;;  %v3762_v26 = vpop.f32.mrb[63].mxu0  ;;  %v19888_v52 = vld [vmem:[#allocation57_spill] sm:$0xff]  ;;  %v4101_v56 = vpop.f32.mrb[63].mxu1  ;;  %v19890_v25 = vld [vmem:[#allocation42_spill] sm:$0xff]  ;;  %v19893_v55 = vld [vmem:[#allocation43_spill] sm:$0xff] }
 0x325   :  { %v4495_v23 = vmax.f32 %v4479_v7, 0.0  ;;  %v4496_v39 = vmax.f32 %v4480_v16, 0.0  ;;  %v19886_v61 = vmax.f32 %v19884_v47, %v19885_v37  ;;  %v19889_v50 = vmax.f32 %v19887_v48, %v19888_v52  ;;  %v19894_v16 = vld [vmem:[#allocation59_spill] sm:$0xff]  ;;  %v19902_v40 = vld [vmem:[#allocation46_spill] sm:$0xff] }
 0x326   :  { %v4465_v21 = vmax.f32 %v19883_v46, %v4445_v8  ;;  %v19022_v38 = vpack.c.bf16 %v4494_v32, %v4490_v57  ;;  %v19892_v27 = vmax.f32 %v19890_v25, %v19891_v54  ;;  %v4453_v57 = vmax.f32 %v18948_v35, %v3760_v12  ;;  %v19897_v32 = vld [vmem:[#allocation60_spill] sm:$0xff]  ;;  %v19903_v46 = vld [vmem:[#allocation62_spill] sm:$0xff] }
 0x327   :  { %v19020_v49 = vpack.c.bf16 %v4495_v23, %v4491_v15  ;;  %v4467_v4 = vmax.f32 %v19886_v61, %v4447_v51  ;;  %v4466_v53 = vmax.f32 %v19889_v50, %v4446_v45  ;;  %v19032_v62 = vpack.c.bf16 %v4496_v39, %v4492_v13  ;;  %v19896_v23 = vld [vmem:[#allocation44_spill] sm:$0xff]  ;;  %v19899_v45 = vld [vmem:[#allocation45_spill] sm:$0xff] }
 0x328   :  { %14550 = vmatmul.mubr.msk.bf16.vlgmr.msra.gmra.mrb[72].mxu1 %vm4214_vm2, %v18972_v10  ;;  %v4468_v15 = vmax.f32 %v19892_v27, %v4448_v5  ;;  %v4455_v7 = vmax.f32 %v18950_v63, %v4099_v60  ;;  %v4454_v59 = vmax.f32 %v18952_v0, %v3762_v26  ;;  %v4481_v28 = vadd.f32 %v4465_v21, %v18799_v6  ;;  %v19900_v0 = vld [vmem:[#allocation61_spill] sm:$0xff]  ;;  %v4769_v25 = vld [vmem:[#allocation7 + $0x20] sm:$0xff] }
 0x329   :  { %4355 = vmatpush1.bf16.msra.mxu1 %v18857_v43  ;;  %4386 = vmatprep.mubr.bf16.mxu1 %v19856_v58  ;;  %v19895_v13 = vmax.f32 %v19893_v55, %v19894_v16  ;;  %v4456_v29 = vmax.f32 %v18956_v36, %v4101_v56  ;;  %v4483_v17 = vadd.f32 %v4467_v4, %v18803_v9  ;;  %v4766_v54 = vld [vmem:[#allocation7 + $0x8] sm:$0xff] }
 0x32a   :  { %v4482_v35 = vadd.f32 %v4466_v53, %v18807_v11  ;;  %v19898_v51 = vmax.f32 %v19896_v23, %v19897_v32  ;;  %v19901_v3 = vmax.f32 %v19899_v45, %v19900_v0  ;;  %v4484_v39 = vadd.f32 %v4468_v15, %v18811_v1  ;;  %v4770_v27 = vld [vmem:[#allocation7 + $0x28] sm:$0xff]  ;;  %v4789_v45 = vld [vmem:[#allocation7 + $0xc0] sm:$0xff] }
 0x32b   :  { %v4469_v8 = vmax.f32 %v19895_v13, %v4453_v57  ;;  %v19904_v21 = vmax.f32 %v19902_v40, %v19903_v46  ;;  %v4497_v26 = vmax.f32 %v4481_v28, 0.0  ;;  %v4499_v61 = vmax.f32 %v4483_v17, 0.0  ;;  %v4774_v28 = vld [vmem:[#allocation7 + $0x48] sm:$0xff]  ;;  %v4781_v17 = vld [vmem:[#allocation7 + $0x80] sm:$0xff] }
 0x32c   :  { %v4471_v63 = vmax.f32 %v19898_v51, %v4455_v7  ;;  %v4470_v12 = vmax.f32 %v19901_v3, %v4454_v59  ;;  %v4498_v4 = vmax.f32 %v4482_v35, 0.0  ;;  %v14559_v57 = vcombine.high %v4766_v54, %v4770_v27  ;;  %v4773_v7 = vld [vmem:[#allocation7 + $0x40] sm:$0xff]  ;;  %v4778_v55 = vld [vmem:[#allocation7 + $0x68] sm:$0xff] }
 0x32d   :  { %v4485_v20 = vadd.f32 %v4469_v8, %v18799_v6  ;;  %v4472_v36 = vmax.f32 %v19904_v21, %v4456_v29  ;;  %v4500_v6 = vmax.f32 %v4484_v39, 0.0  ;;  %v4777_v59 = vld [vmem:[#allocation7 + $0x60] sm:$0xff]  ;;  %v14558_v13 = vcombine.low %v4766_v54, %v4770_v27  ;;  %v4782_v35 = vld [vmem:[#allocation7 + $0x88] sm:$0xff] }
 0x32e   :  { %v4487_v5 = vadd.f32 %v4471_v63, %v18803_v9  ;;  %v4486_v60 = vadd.f32 %v4470_v12, %v18807_v11  ;;  %v14565_v8 = vcombine.high %v4773_v7, %v4777_v59  ;;  %v14567_v29 = vcombine.high %v4774_v28, %v4778_v55  ;;  %v4786_v23 = vld [vmem:[#allocation7 + $0xa8] sm:$0xff]  ;;  %v4793_v0 = vld [vmem:[#allocation7 + $0xe0] sm:$0xff] }
 0x32f   :  { %v4501_v47 = vmax.f32 %v4485_v20, 0.0  ;;  %v4488_v37 = vadd.f32 %v4472_v36, %v18811_v1  ;;  %v4765_v1 = vld [vmem:[#allocation7] sm:$0xff]  ;;  %v14566_v32 = vcombine.low %v4774_v28, %v4778_v55  ;;  %v14575_v63 = vcombine.high %v4782_v35, %v4786_v23  ;;  %v4790_v3 = vld [vmem:[#allocation7 + $0xc8] sm:$0xff] }
 0x330   :  { %v4503_v48 = vmax.f32 %v4487_v5, 0.0  ;;  %v4502_v52 = vmax.f32 %v4486_v60, 0.0  ;;  %14551 = vmatmul.mubr.msk.bf16.vlgmr.msra.gmra.mrb[76].mxu1 %vm4214_vm2, %v18972_v10  ;;  %v14557_v15 = vcombine.high %v4765_v1, %v4769_v25  ;;  %v14556_v16 = vcombine.low %v4765_v1, %v4769_v25  ;;  %v4794_v12 = vld [vmem:[#allocation7 + $0xe8] sm:$0xff]  ;;  %v4797_v46 = vld [vmem:[#allocation7 + $0x100] sm:$0xff] }
 0x331   :  { %v19065_v50 = vpack.c.bf16 %v4501_v47, %v4497_v26  ;;  %v4504_v53 = vmax.f32 %v4488_v37, 0.0  ;;  %4588 = vmatprep.mubr.bf16.mxu1 %v19856_v58  ;;  %v14574_v20 = vcombine.low %v4782_v35, %v4786_v23  ;;  %v14581_v40 = vcombine.high %v4789_v45, %v4793_v0  ;;  %v4801_v21 = vld [vmem:[#allocation7 + $0x120] sm:$0xff]  ;;  %v4798_v36 = vld [vmem:[#allocation7 + $0x108] sm:$0xff] }
 0x332   :  { %v19068_v9 = vpack.c.bf16 %v4503_v48, %v4499_v61  ;;  %v19070_v11 = vpack.c.bf16 %v4502_v52, %v4498_v4  ;;  %v4802_v5 = vld [vmem:[#allocation7 + $0x128] sm:$0xff]  ;;  %v14580_v60 = vcombine.low %v4789_v45, %v4793_v0  ;;  %v14582_v26 = vcombine.low %v4790_v3, %v4794_v12  ;;  %v4805_v61 = vld [vmem:[#allocation7 + $0x140] sm:$0xff] }
 0x333   :  { %v19072_v56 = vpack.c.bf16 %v4504_v53, %v4500_v6  ;;  %v14589_v47 = vcombine.high %v4797_v46, %v4801_v21  ;;  %v14591_v37 = vcombine.high %v4798_v36, %v4802_v5  ;;  %v4809_v4 = vld [vmem:[#allocation7 + $0x160] sm:$0xff]  ;;  %v4806_v48 = vld [vmem:[#allocation7 + $0x148] sm:$0xff]  ;;  %v14588_v6 = vcombine.low %v4797_v46, %v4801_v21 }
 0x334   :  { %4513 = vmatprep.subr.bf16.mxu0 %v19070_v11  ;;  %v4810_v52 = vld [vmem:[#allocation7 + $0x168] sm:$0xff]  ;;  %v14590_v53 = vcombine.low %v4798_v36, %v4802_v5  ;;  %v14597_v1 = vcombine.high %v4805_v61, %v4809_v4  ;;  %v4813_v54 = vld [vmem:[#allocation7 + $0x180] sm:$0xff] }
 0x335   :  { %4556 = vmatprep.subr.bf16.mxu1 %v19072_v56  ;;  %4514 = vmatpush1.bf16.msra.mxu0 %v19065_v50  ;;  %v14599_v25 = vcombine.high %v4806_v48, %v4810_v52  ;;  %v4817_v27 = vld [vmem:[#allocation7 + $0x1a0] sm:$0xff] }
 0x336   :  { %4557 = vmatpush1.bf16.msra.mxu1 %v19068_v9  ;;  %4603 = vmatprep.subr.bf16.mxu0 %v19022_v38  ;;  %v14605_v28 = vcombine.high %v4813_v54, %v4817_v27 }
 0x337   :  { %4646 = vmatprep.subr.bf16.mxu1 %v19032_v62 }
 0x338   :  { %14552 = vmatmul.mubr.msk.bf16.vlgmr.msra.gmra.mrb[64].mxu0 %vm4214_vm2, %v18936_v33 }
 0x339   :  { %14553 = vmatmul.mubr.msk.bf16.vlgmr.msra.gmra.mrb[80].mxu1 %vm4214_vm2, %v18936_v33  ;;  %4604 = vmatpush1.bf16.msra.mxu0 %v19014_v41  ;;  %v4785_v33 = vld [vmem:[#allocation7 + $0xa0] sm:$0xff] }
 0x33a   :  { %4647 = vmatpush1.bf16.msra.mxu1 %v19020_v49  ;;  %4635 = vmatprep.mubr.bf16.mxu0 %v19856_v58  ;;  %v14573_v51 = vcombine.high %v4781_v17, %v4785_v33  ;;  %v14572_v39 = vcombine.low %v4781_v17, %v4785_v33  ;;  %v14604_v17 = vcombine.low %v4813_v54, %v4817_v27 }
 0x33b   :  { %4678 = vmatprep.mubr.bf16.mxu1 %v19856_v58  ;;  %9373 = vmatprep.subr.bf16.mxu0 %v14557_v15  ;;  %v14564_v58 = vcombine.low %v4773_v7, %v4777_v59  ;;  %v4814_v15 = vld [vmem:[#allocation7 + $0x188] sm:$0xff]  ;;  %v14596_v7 = vcombine.low %v4805_v61, %v4809_v4  ;;  %v14598_v59 = vcombine.low %v4806_v48, %v4810_v52 }
 0x33c   :  { %9811 = vmatprep.subr.bf16.mxu1 %v14559_v57  ;;  %v4818_v57 = vld [vmem:[#allocation7 + $0x1a8] sm:$0xff] }
 0x33d   :  { %v14607_v55 = vcombine.high %v4814_v15, %v4818_v57  ;;  %v14606_v33 = vcombine.low %v4814_v15, %v4818_v57 }
 0x340   :  { %14554 = vmatmul.mubr.msk.bf16.vlgmr.msra.gmra.mrb[68].mxu0 %vm4214_vm2, %v18972_v10 }
 0x341   :  { %14555 = vmatmul.mubr.msk.bf16.vlgmr.msra.gmra.mrb[84].mxu1 %vm4214_vm2, %v18972_v10  ;;  %9374 = vmatpush1.bf16.msra.mxu0 %v14556_v16  ;;  %v14583_v10 = vcombine.high %v4790_v3, %v4794_v12  ;;  %v4821_v16 = vld [vmem:[#allocation7 + $0x1c0] sm:$0xff] }
 0x342   :  { %9812 = vmatpush1.bf16.msra.mxu1 %v14558_v13  ;;  %9375 = vmatprep.subr.bf16.mxu0 %v14565_v8  ;;  %v4825_v13 = vld [vmem:[#allocation7 + $0x1e0] sm:$0xff]  ;;  %v4822_v8 = vld [vmem:[#allocation7 + $0x1c8] sm:$0xff] }
 0x343   :  { %9813 = vmatprep.subr.bf16.mxu1 %v14567_v29  ;;  %v4826_v29 = vld [vmem:[#allocation7 + $0x1e8] sm:$0xff]  ;;  %v14613_v35 = vcombine.high %v4821_v16, %v4825_v13  ;;  %v14612_v45 = vcombine.low %v4821_v16, %v4825_v13 }
 0x344   :  { %v14615_v23 = vcombine.high %v4822_v8, %v4826_v29  ;;  %v14614_v0 = vcombine.low %v4822_v8, %v4826_v29 }
 0x345   :  { %9376 = vmatpush1.bf16.msra.mxu0 %v14564_v58  ;;  %v4829_v58 = vld [vmem:[#allocation7 + $0x200] sm:$0xff] }
 0x346   :  { %9814 = vmatpush1.bf16.msra.mxu1 %v14566_v32  ;;  %9377 = vmatprep.subr.bf16.mxu0 %v14573_v51  ;;  %v4833_v32 = vld [vmem:[#allocation7 + $0x220] sm:$0xff]  ;;  %v4830_v51 = vld [vmem:[#allocation7 + $0x208] sm:$0xff] }
 0x347   :  { %9815 = vmatprep.subr.bf16.mxu1 %v14575_v63  ;;  %v4834_v63 = vld [vmem:[#allocation7 + $0x228] sm:$0xff]  ;;  %v14621_v3 = vcombine.high %v4829_v58, %v4833_v32  ;;  %v14620_v46 = vcombine.low %v4829_v58, %v4833_v32 }
 0x348   :  { %v14623_v12 = vcombine.high %v4830_v51, %v4834_v63  ;;  %v14622_v21 = vcombine.low %v4830_v51, %v4834_v63  ;;  %v4877_v63 = vld [vmem:[#allocation7 + $0x380] sm:$0xff] }
 0x349   :  { %9378 = vmatpush1.bf16.msra.mxu0 %v14572_v39  ;;  %v4837_v39 = vld [vmem:[#allocation7 + $0x240] sm:$0xff] }
 0x34a   :  { %9816 = vmatpush1.bf16.msra.mxu1 %v14574_v20  ;;  %9379 = vmatprep.subr.bf16.mxu0 %v14581_v40  ;;  %v4841_v20 = vld [vmem:[#allocation7 + $0x260] sm:$0xff]  ;;  %v4838_v40 = vld [vmem:[#allocation7 + $0x248] sm:$0xff] }
 0x34b   :  { %9817 = vmatprep.subr.bf16.mxu1 %v14583_v10  ;;  %v4842_v10 = vld [vmem:[#allocation7 + $0x268] sm:$0xff]  ;;  %v14629_v36 = vcombine.high %v4837_v39, %v4841_v20  ;;  %v14628_v61 = vcombine.low %v4837_v39, %v4841_v20 }
 0x34c   :  { %v14631_v5 = vcombine.high %v4838_v40, %v4842_v10  ;;  %v14630_v4 = vcombine.low %v4838_v40, %v4842_v10  ;;  %v4894_v39 = vld [vmem:[#allocation7 + $0x408] sm:$0xff] }
 0x34d   :  { %9380 = vmatpush1.bf16.msra.mxu0 %v14580_v60  ;;  %v4845_v60 = vld [vmem:[#allocation7 + $0x280] sm:$0xff]  ;;  %v4878_v20 = vld [vmem:[#allocation7 + $0x388] sm:$0xff] }
 0x34e   :  { %9818 = vmatpush1.bf16.msra.mxu1 %v14582_v26  ;;  %9381 = vmatprep.subr.bf16.mxu0 %v14589_v47  ;;  %v4849_v26 = vld [vmem:[#allocation7 + $0x2a0] sm:$0xff]  ;;  %v4846_v47 = vld [vmem:[#allocation7 + $0x288] sm:$0xff] }
 0x34f   :  { %9819 = vmatprep.subr.bf16.mxu1 %v14591_v37  ;;  %v4850_v37 = vld [vmem:[#allocation7 + $0x2a8] sm:$0xff]  ;;  %v14637_v48 = vcombine.high %v4845_v60, %v4849_v26  ;;  %v14636_v54 = vcombine.low %v4845_v60, %v4849_v26 }
 0x350   :  { %v14639_v52 = vcombine.high %v4846_v47, %v4850_v37  ;;  %v14638_v27 = vcombine.low %v4846_v47, %v4850_v37  ;;  %v4882_v40 = vld [vmem:[#allocation7 + $0x3a8] sm:$0xff]  ;;  %v4885_v47 = vld [vmem:[#allocation7 + $0x3c0] sm:$0xff] }
 0x351   :  { %9382 = vmatpush1.bf16.msra.mxu0 %v14588_v6  ;;  %v4853_v6 = vld [vmem:[#allocation7 + $0x2c0] sm:$0xff]  ;;  %v4898_v10 = vld [vmem:[#allocation7 + $0x428] sm:$0xff]  ;;  %v14671_v26 = vcombine.high %v4878_v20, %v4882_v40 }
 0x352   :  { %9820 = vmatpush1.bf16.msra.mxu1 %v14590_v53  ;;  %9383 = vmatprep.subr.bf16.mxu0 %v14597_v1  ;;  %v4857_v53 = vld [vmem:[#allocation7 + $0x2e0] sm:$0xff]  ;;  %v4854_v1 = vld [vmem:[#allocation7 + $0x2c8] sm:$0xff] }
 0x353   :  { %9821 = vmatprep.subr.bf16.mxu1 %v14599_v25  ;;  %v4858_v25 = vld [vmem:[#allocation7 + $0x2e8] sm:$0xff]  ;;  %v14645_v15 = vcombine.high %v4853_v6, %v4857_v53  ;;  %v14644_v16 = vcombine.low %v4853_v6, %v4857_v53  ;;  %v4889_v37 = vld [vmem:[#allocation7 + $0x3e0] sm:$0xff] }
 0x354   :  { %v14647_v57 = vcombine.high %v4854_v1, %v4858_v25  ;;  %v14646_v13 = vcombine.low %v4854_v1, %v4858_v25  ;;  %v14677_v6 = vcombine.high %v4885_v47, %v4889_v37  ;;  %v14676_v1 = vcombine.low %v4885_v47, %v4889_v37 }
 0x355   :  { %9384 = vmatpush1.bf16.msra.mxu0 %v14596_v7  ;;  %v4861_v7 = vld [vmem:[#allocation7 + $0x300] sm:$0xff] }
 0x356   :  { %9822 = vmatpush1.bf16.msra.mxu1 %v14598_v59  ;;  %9385 = vmatprep.subr.bf16.mxu0 %v14605_v28  ;;  %v4865_v59 = vld [vmem:[#allocation7 + $0x320] sm:$0xff]  ;;  %v4862_v28 = vld [vmem:[#allocation7 + $0x308] sm:$0xff] }
 0x357   :  { %9823 = vmatprep.subr.bf16.mxu1 %v14607_v55  ;;  %v4866_v55 = vld [vmem:[#allocation7 + $0x328] sm:$0xff]  ;;  %v14653_v8 = vcombine.high %v4861_v7, %v4865_v59  ;;  %v14652_v58 = vcombine.low %v4861_v7, %v4865_v59  ;;  %v4901_v59 = vld [vmem:[#allocation7 + $0x440] sm:$0xff] }
 0x358   :  { %v14655_v29 = vcombine.high %v4862_v28, %v4866_v55  ;;  %v14654_v32 = vcombine.low %v4862_v28, %v4866_v55 }
 0x359   :  { %9386 = vmatpush1.bf16.msra.mxu0 %v14604_v17  ;;  %v4869_v17 = vld [vmem:[#allocation7 + $0x340] sm:$0xff] }
 0x35a   :  { %9824 = vmatpush1.bf16.msra.mxu1 %v14606_v33  ;;  %9387 = vmatprep.subr.bf16.mxu0 %v14613_v35  ;;  %v4873_v33 = vld [vmem:[#allocation7 + $0x360] sm:$0xff]  ;;  %v4870_v35 = vld [vmem:[#allocation7 + $0x348] sm:$0xff] }
 0x35b   :  { %9825 = vmatprep.subr.bf16.mxu1 %v14615_v23  ;;  %v4874_v23 = vld [vmem:[#allocation7 + $0x368] sm:$0xff]  ;;  %v14661_v51 = vcombine.high %v4869_v17, %v4873_v33 }
 0x35d   :  { %9388 = vmatpush1.bf16.msra.mxu0 %v14612_v45  ;;  %v4881_v45 = vld [vmem:[#allocation7 + $0x3a0] sm:$0xff] }
 0x35e   :  { %9826 = vmatpush1.bf16.msra.mxu1 %v14614_v0  ;;  %9389 = vmatprep.subr.bf16.mxu0 %v14621_v3  ;;  %v14663_v0 = vcombine.high %v4870_v35, %v4874_v23  ;;  %v4893_v3 = vld [vmem:[#allocation7 + $0x400] sm:$0xff]  ;;  %v14669_v60 = vcombine.high %v4877_v63, %v4881_v45 }
 0x35f   :  { %9827 = vmatprep.subr.bf16.mxu1 %v14623_v12  ;;  %v4897_v12 = vld [vmem:[#allocation7 + $0x420] sm:$0xff] }
 0x361   :  { %9390 = vmatpush1.bf16.msra.mxu0 %v14620_v46  ;;  %v14660_v46 = vcombine.low %v4869_v17, %v4873_v33  ;;  %v4909_v17 = vld [vmem:[#allocation7 + $0x480] sm:$0xff] }
 0x362   :  { %9828 = vmatpush1.bf16.msra.mxu1 %v14622_v21  ;;  %9391 = vmatprep.subr.bf16.mxu0 %v14629_v36  ;;  %v14684_v21 = vcombine.low %v4893_v3, %v4897_v12  ;;  %v14686_v36 = vcombine.low %v4894_v39, %v4898_v10 }
 0x363   :  { %9829 = vmatprep.subr.bf16.mxu1 %v14631_v5  ;;  %v14662_v5 = vcombine.low %v4870_v35, %v4874_v23  ;;  %v4913_v23 = vld [vmem:[#allocation7 + $0x4a0] sm:$0xff] }
 0x365   :  { %9392 = vmatpush1.bf16.msra.mxu0 %v14628_v61  ;;  %v4886_v61 = vld [vmem:[#allocation7 + $0x3c8] sm:$0xff] }
 0x366   :  { %9830 = vmatpush1.bf16.msra.mxu1 %v14630_v4  ;;  %9393 = vmatprep.subr.bf16.mxu0 %v14637_v48  ;;  %v4890_v4 = vld [vmem:[#allocation7 + $0x3e8] sm:$0xff]  ;;  %v14668_v48 = vcombine.low %v4877_v63, %v4881_v45 }
 0x367   :  { %9831 = vmatprep.subr.bf16.mxu1 %v14639_v52  ;;  %v14670_v52 = vcombine.low %v4878_v20, %v4882_v40  ;;  %v14679_v53 = vcombine.high %v4886_v61, %v4890_v4  ;;  %v14678_v25 = vcombine.low %v4886_v61, %v4890_v4  ;;  %v4921_v20 = vld [vmem:[#allocation7 + $0x4e0] sm:$0xff]  ;;  %v4918_v40 = vld [vmem:[#allocation7 + $0x4c8] sm:$0xff] }
 0x368   :  { %v4925_v61 = vld [vmem:[#allocation7 + $0x500] sm:$0xff] }
 0x369   :  { %9394 = vmatpush1.bf16.msra.mxu0 %v14636_v54  ;;  %v14685_v54 = vcombine.high %v4893_v3, %v4897_v12  ;;  %v4917_v12 = vld [vmem:[#allocation7 + $0x4c0] sm:$0xff] }
 0x36a   :  { %9832 = vmatpush1.bf16.msra.mxu1 %v14638_v27  ;;  %9395 = vmatprep.subr.bf16.mxu0 %v14645_v15  ;;  %v14687_v27 = vcombine.high %v4894_v39, %v4898_v10  ;;  %v4922_v10 = vld [vmem:[#allocation7 + $0x4e8] sm:$0xff]  ;;  %v14709_v47 = vcombine.high %v4917_v12, %v4921_v20  ;;  %v4929_v4 = vld [vmem:[#allocation7 + $0x520] sm:$0xff] }
 0x36b   :  { %9833 = vmatprep.subr.bf16.mxu1 %v14647_v57  ;;  %v14711_v37 = vcombine.high %v4918_v40, %v4922_v10 }
 0x36d   :  { %9396 = vmatpush1.bf16.msra.mxu0 %v14644_v16  ;;  %v4905_v16 = vld [vmem:[#allocation7 + $0x460] sm:$0xff] }
 0x36e   :  { %9834 = vmatpush1.bf16.msra.mxu1 %v14646_v13  ;;  %9397 = vmatprep.subr.bf16.mxu0 %v14653_v8  ;;  %v4902_v13 = vld [vmem:[#allocation7 + $0x448] sm:$0xff]  ;;  %v14693_v33 = vcombine.high %v4901_v59, %v4905_v16 }
 0x36f   :  { %9835 = vmatprep.subr.bf16.mxu1 %v14655_v29  ;;  %v4906_v8 = vld [vmem:[#allocation7 + $0x468] sm:$0xff] }
 0x370   :  { %v14695_v35 = vcombine.high %v4902_v13, %v4906_v8  ;;  %v14694_v63 = vcombine.low %v4902_v13, %v4906_v8  ;;  %v14716_v8 = vcombine.low %v4925_v61, %v4929_v4 }
 0x371   :  { %9398 = vmatpush1.bf16.msra.mxu0 %v14652_v58  ;;  %v4910_v58 = vld [vmem:[#allocation7 + $0x488] sm:$0xff] }
 0x372   :  { %9836 = vmatpush1.bf16.msra.mxu1 %v14654_v32  ;;  %9399 = vmatprep.subr.bf16.mxu0 %v14661_v51  ;;  %v4914_v32 = vld [vmem:[#allocation7 + $0x4a8] sm:$0xff]  ;;  %v14692_v51 = vcombine.low %v4901_v59, %v4905_v16 }
 0x373   :  { %9837 = vmatprep.subr.bf16.mxu1 %v14663_v0  ;;  %v14701_v0 = vcombine.high %v4909_v17, %v4913_v23  ;;  %v14703_v3 = vcombine.high %v4910_v58, %v4914_v32  ;;  %v4938_v59 = vld [vmem:[#allocation7 + $0x568] sm:$0xff] }
 0x375   :  { %9400 = vmatpush1.bf16.msra.mxu0 %v14660_v46 }
 0x376   :  { %9838 = vmatpush1.bf16.msra.mxu1 %v14662_v5  ;;  %9401 = vmatprep.subr.bf16.mxu0 %v14669_v60  ;;  %v14702_v60 = vcombine.low %v4910_v58, %v4914_v32  ;;  %v4941_v58 = vld [vmem:[#allocation7 + $0x580] sm:$0xff] }
 0x377   :  { %9839 = vmatprep.subr.bf16.mxu1 %v14671_v26  ;;  %v4945_v32 = vld [vmem:[#allocation7 + $0x5a0] sm:$0xff] }
 0x379   :  { %9402 = vmatpush1.bf16.msra.mxu0 %v14668_v48  ;;  %v4926_v48 = vld [vmem:[#allocation7 + $0x508] sm:$0xff] }
 0x37a   :  { %9840 = vmatpush1.bf16.msra.mxu1 %v14670_v52  ;;  %9403 = vmatprep.subr.bf16.mxu0 %v14677_v6  ;;  %v4930_v52 = vld [vmem:[#allocation7 + $0x528] sm:$0xff]  ;;  %v14708_v6 = vcombine.low %v4917_v12, %v4921_v20  ;;  %v14733_v12 = vcombine.high %v4941_v58, %v4945_v32  ;;  %v4949_v20 = vld [vmem:[#allocation7 + $0x5c0] sm:$0xff] }
 0x37b   :  { %9841 = vmatprep.subr.bf16.mxu1 %v14679_v53  ;;  %v14710_v53 = vcombine.low %v4918_v40, %v4922_v10  ;;  %v4953_v10 = vld [vmem:[#allocation7 + $0x5e0] sm:$0xff] }
 0x37d   :  { %9404 = vmatpush1.bf16.msra.mxu0 %v14676_v1 }
 0x37e   :  { %9842 = vmatpush1.bf16.msra.mxu1 %v14678_v25  ;;  %9446 = vmatprep.subr.bf16.mxu0 %v14685_v54  ;;  %v14717_v25 = vcombine.high %v4925_v61, %v4929_v4  ;;  %v14719_v54 = vcombine.high %v4926_v48, %v4930_v52 }
 0x37f   :  { %9884 = vmatprep.subr.bf16.mxu1 %v14687_v27  ;;  %v4933_v27 = vld [vmem:[#allocation7 + $0x540] sm:$0xff] }
 0x3eb   :  { %v4252_v15 = vpop.f32.mrb[64].mxu1 }
 0x3ec   :  { %v4254_v57 = vpop.f32.mrb[65].mxu1 }
 0x3ed   :  { %v4256_v7 = vpop.f32.mrb[66].mxu1 }
 0x3ee   :  { %v19092_v28 = vpack.c.bf16 %v4256_v7, %v4252_v15  ;;  %v4258_v55 = vpop.f32.mrb[67].mxu1  ;;  %v4934_v7 = vld [vmem:[#allocation7 + $0x548] sm:$0xff] }
 0x3ef   :  { %v19094_v29 = vpack.c.bf16 %v4258_v55, %v4254_v57  ;;  %v4937_v57 = vld [vmem:[#allocation7 + $0x560] sm:$0xff] }
 0x3f1   :  { %9405 = vmatprep.mubr.bf16.mxu0 %v19094_v29  ;;  %9843 = vmatprep.mubr.bf16.mxu1 %v19094_v29 }
 0x3f2   :  { %9406 = vmatmul.mubr.bf16.vlgmr.msra.gmra.mrb[72].mxu0 %v19092_v28  ;;  %9844 = vmatmul.mubr.bf16.vlgmr.msra.gmra.mrb[88].mxu1 %v19092_v28 }
 0x3f3   :  { %9447 = vmatpush1.bf16.msra.mxu0 %v14684_v21  ;;  %9885 = vmatpush1.bf16.msra.mxu1 %v14686_v36  ;;  %v4295_v45 = vpop.f32.mrb[68].mxu1  ;;  %v14700_v36 = vcombine.low %v4909_v17, %v4913_v23  ;;  %v14718_v17 = vcombine.low %v4926_v48, %v4930_v52  ;;  %v14727_v23 = vcombine.high %v4934_v7, %v4938_v59 }
 0x3f4   :  { %9415 = vmatprep.mubr.bf16.mxu0 %v18859_v44  ;;  %9853 = vmatprep.mubr.bf16.mxu1 %v18859_v44  ;;  %v4297_v39 = vpop.f32.mrb[69].mxu1  ;;  %v14741_v48 = vcombine.high %v4949_v20, %v4953_v10 }
 0x3f5   :  { %9448 = vmatprep.subr.bf16.mxu0 %v14693_v33  ;;  %9886 = vmatprep.subr.bf16.mxu1 %v14695_v35  ;;  %v4299_v46 = vpop.f32.mrb[70].mxu1  ;;  %v14725_v35 = vcombine.high %v4933_v27, %v4937_v57 }
 0x3f6   :  { %v19102_v5 = vpack.c.bf16 %v4299_v46, %v4295_v45  ;;  %v4301_v21 = vpop.f32.mrb[71].mxu1  ;;  %v14724_v45 = vcombine.low %v4933_v27, %v4937_v57  ;;  %v4950_v46 = vld [vmem:[#allocation7 + $0x5c8] sm:$0xff]  ;;  %v14740_v27 = vcombine.low %v4949_v20, %v4953_v10  ;;  %v4973_v20 = vld [vmem:[#allocation7 + $0x680] sm:$0xff] }
 0x3f7   :  { %9449 = vmatpush1.bf16.msra.mxu0 %v14692_v51  ;;  %9887 = vmatpush1.bf16.msra.mxu1 %v14694_v63  ;;  %v19104_v26 = vpack.c.bf16 %v4301_v21, %v4297_v39  ;;  %v4942_v51 = vld [vmem:[#allocation7 + $0x588] sm:$0xff] }
 0x3f8   :  { %9450 = vmatprep.subr.bf16.mxu0 %v14701_v0  ;;  %9888 = vmatprep.subr.bf16.mxu1 %v14703_v3  ;;  %v4946_v63 = vld [vmem:[#allocation7 + $0x5a8] sm:$0xff]  ;;  %v14726_v0 = vcombine.low %v4934_v7, %v4938_v59 }
 0x3f9   :  { %v14735_v39 = vcombine.high %v4942_v51, %v4946_v63  ;;  %v4954_v21 = vld [vmem:[#allocation7 + $0x5e8] sm:$0xff]  ;;  %v14734_v61 = vcombine.low %v4942_v51, %v4946_v63 }
 0x3fa   :  { %9416 = vmatmul.mubr.bf16.gmra.mrb[76].mxu0 %v18851_v31  ;;  %9854 = vmatmul.mubr.bf16.gmra.mrb[92].mxu1 %v18851_v31  ;;  %v14743_v52 = vcombine.high %v4950_v46, %v4954_v21  ;;  %v4966_v51 = vld [vmem:[#allocation7 + $0x648] sm:$0xff] }
 0x3fb   :  { %9451 = vmatpush1.bf16.msra.mxu0 %v14700_v36  ;;  %9889 = vmatpush1.bf16.msra.mxu1 %v14702_v60  ;;  %v4345_v1 = vpop.f32.mrb[72].mxu1  ;;  %v4970_v63 = vld [vmem:[#allocation7 + $0x668] sm:$0xff] }
 0x3fc   :  { %9452 = vmatprep.subr.bf16.mxu0 %v14709_v47  ;;  %9890 = vmatprep.subr.bf16.mxu1 %v14711_v37  ;;  %v4347_v15 = vpop.f32.mrb[73].mxu1  ;;  %v14732_v37 = vcombine.low %v4941_v58, %v4945_v32  ;;  %v4969_v32 = vld [vmem:[#allocation7 + $0x660] sm:$0xff] }
 0x3fd   :  { %v4349_v55 = vpop.f32.mrb[74].mxu1 }
 0x3fe   :  { %v19108_v16 = vpack.c.bf16 %v4349_v55, %v4345_v1  ;;  %v4351_v13 = vpop.f32.mrb[75].mxu1  ;;  %v4958_v1 = vld [vmem:[#allocation7 + $0x608] sm:$0xff] }
 0x3ff   :  { %9453 = vmatpush1.bf16.msra.mxu0 %v14708_v6  ;;  %9891 = vmatpush1.bf16.msra.mxu1 %v14710_v53  ;;  %v19110_v33 = vpack.c.bf16 %v4351_v13, %v4347_v15  ;;  %v4957_v6 = vld [vmem:[#allocation7 + $0x600] sm:$0xff]  ;;  %v14742_v15 = vcombine.low %v4950_v46, %v4954_v21  ;;  %v14759_v46 = vcombine.high %v4966_v51, %v4970_v63 }
 0x400   :  { %9454 = vmatprep.subr.bf16.mxu0 %v14717_v25  ;;  %9892 = vmatprep.subr.bf16.mxu1 %v14719_v54  ;;  %v4961_v53 = vld [vmem:[#allocation7 + $0x620] sm:$0xff]  ;;  %v4962_v25 = vld [vmem:[#allocation7 + $0x628] sm:$0xff] }
 0x401   :  { %v14749_v7 = vcombine.high %v4957_v6, %v4961_v53  ;;  %v14751_v59 = vcombine.high %v4958_v1, %v4962_v25  ;;  %v14748_v58 = vcombine.low %v4957_v6, %v4961_v53  ;;  %v4977_v21 = vld [vmem:[#allocation7 + $0x6a0] sm:$0xff] }
 0x402   :  { %v4981_v53 = vld [vmem:[#allocation7 + $0x6c0] sm:$0xff] }
 0x403   :  { %9455 = vmatpush1.bf16.msra.mxu0 %v14716_v8  ;;  %9893 = vmatpush1.bf16.msra.mxu1 %v14718_v17  ;;  %v4388_v3 = vpop.f32.mrb[76].mxu1  ;;  %v4965_v8 = vld [vmem:[#allocation7 + $0x640] sm:$0xff] }
 0x404   :  { %9456 = vmatprep.subr.bf16.mxu0 %v14725_v35  ;;  %9894 = vmatprep.subr.bf16.mxu1 %v14727_v23  ;;  %v4390_v40 = vpop.f32.mrb[77].mxu1  ;;  %v14757_v10 = vcombine.high %v4965_v8, %v4969_v32 }
 0x405   :  { %v4392_v36 = vpop.f32.mrb[78].mxu1 }
 0x406   :  { %v19112_v60 = vpack.c.bf16 %v4392_v36, %v4388_v3  ;;  %v4394_v47 = vpop.f32.mrb[79].mxu1  ;;  %v14750_v3 = vcombine.low %v4958_v1, %v4962_v25  ;;  %v4974_v36 = vld [vmem:[#allocation7 + $0x688] sm:$0xff]  ;;  %v4985_v25 = vld [vmem:[#allocation7 + $0x6e0] sm:$0xff] }
 0x407   :  { %9457 = vmatpush1.bf16.msra.mxu0 %v14724_v45  ;;  %9895 = vmatpush1.bf16.msra.mxu1 %v14726_v0  ;;  %v19114_v4 = vpack.c.bf16 %v4394_v47, %v4390_v40  ;;  %v4978_v47 = vld [vmem:[#allocation7 + $0x6a8] sm:$0xff] }
 0x408   :  { %9458 = vmatprep.subr.bf16.mxu0 %v14733_v12  ;;  %9896 = vmatprep.subr.bf16.mxu1 %v14735_v39  ;;  %v14767_v6 = vcombine.high %v4974_v36, %v4978_v47 }
 0x40b   :  { %9459 = vmatpush1.bf16.msra.mxu0 %v14732_v37  ;;  %9897 = vmatpush1.bf16.msra.mxu1 %v14734_v61  ;;  %v4547_v54 = vpop.f32.mrb[64].mxu0  ;;  %v14756_v37 = vcombine.low %v4965_v8, %v4969_v32  ;;  %v14758_v61 = vcombine.low %v4966_v51, %v4970_v63  ;;  %v14773_v8 = vcombine.high %v4981_v53, %v4985_v25  ;;  %v4990_v32 = vld [vmem:[#allocation7 + $0x708] sm:$0xff] }
 0x40c   :  { %v4549_v57 = vpop.f32.mrb[65].mxu0  ;;  %9460 = vmatprep.subr.bf16.mxu0 %v14741_v48  ;;  %9898 = vmatprep.subr.bf16.mxu1 %v14743_v52  ;;  %v4590_v55 = vpop.f32.mrb[80].mxu1  ;;  %v14765_v52 = vcombine.high %v4973_v20, %v4977_v21  ;;  %v4994_v51 = vld [vmem:[#allocation7 + $0x728] sm:$0xff]  ;;  %v14772_v63 = vcombine.low %v4981_v53, %v4985_v25 }
 0x40d   :  { %v4551_v13 = vpop.f32.mrb[66].mxu0  ;;  %v4592_v17 = vpop.f32.mrb[81].mxu1  ;;  %v5010_v53 = vld [vmem:[#allocation7 + $0x7a8] sm:$0xff] }
 0x40e   :  { %v19116_v35 = vpack.c.bf16 %v4551_v13, %v4547_v54  ;;  %v4553_v23 = vpop.f32.mrb[67].mxu0  ;;  %v4594_v45 = vpop.f32.mrb[82].mxu1  ;;  %v4982_v54 = vld [vmem:[#allocation7 + $0x6c8] sm:$0xff] }
 0x40f   :  { %v19118_v0 = vpack.c.bf16 %v4553_v23, %v4549_v57  ;;  %9461 = vmatpush1.bf16.msra.mxu0 %v14740_v27  ;;  %9899 = vmatpush1.bf16.msra.mxu1 %v14742_v15  ;;  %v19120_v12 = vpack.c.bf16 %v4594_v45, %v4590_v55  ;;  %v4596_v39 = vpop.f32.mrb[83].mxu1  ;;  %v4986_v27 = vld [vmem:[#allocation7 + $0x6e8] sm:$0xff]  ;;  %v14766_v55 = vcombine.low %v4974_v36, %v4978_v47  ;;  %v4989_v23 = vld [vmem:[#allocation7 + $0x700] sm:$0xff] }
 0x410   :  { %9462 = vmatprep.subr.bf16.mxu0 %v14749_v7  ;;  %9900 = vmatprep.subr.bf16.mxu1 %v14751_v59  ;;  %v19122_v40 = vpack.c.bf16 %v4596_v39, %v4592_v17  ;;  %v14764_v59 = vcombine.low %v4973_v20, %v4977_v21  ;;  %v14775_v17 = vcombine.high %v4982_v54, %v4986_v27  ;;  %v4997_v20 = vld [vmem:[#allocation7 + $0x740] sm:$0xff]  ;;  %v5002_v21 = vld [vmem:[#allocation7 + $0x768] sm:$0xff] }
 0x411   :  { %9425 = vmatprep.mubr.bf16.mxu0 %v19118_v0  ;;  %9863 = vmatprep.mubr.bf16.mxu1 %v19118_v0  ;;  %v14774_v45 = vcombine.low %v4982_v54, %v4986_v27  ;;  %v14783_v39 = vcombine.high %v4990_v32, %v4994_v51  ;;  %v14782_v47 = vcombine.low %v4990_v32, %v4994_v51  ;;  %v5021_v32 = vld [vmem:[#allocation7 + $0x800] sm:$0xff] }
 0x412   :  { %9426 = vmatmul.mubr.bf16.gmra.mrb[80].mxu0 %v19116_v35  ;;  %9864 = vmatmul.mubr.bf16.gmra.mrb[96].mxu1 %v19116_v35  ;;  %v5025_v51 = vld [vmem:[#allocation7 + $0x820] sm:$0xff] }
 0x413   :  { %9463 = vmatpush1.bf16.msra.mxu0 %v14748_v58  ;;  %9901 = vmatpush1.bf16.msra.mxu1 %v14750_v3  ;;  %v4637_v48 = vpop.f32.mrb[68].mxu0  ;;  %v4993_v58 = vld [vmem:[#allocation7 + $0x720] sm:$0xff] }
 0x414   :  { %9435 = vmatprep.mubr.bf16.mxu0 %v19022_v38  ;;  %9873 = vmatprep.mubr.bf16.mxu1 %v19022_v38  ;;  %v4639_v1 = vpop.f32.mrb[69].mxu0  ;;  %v14781_v3 = vcombine.high %v4989_v23, %v4993_v58  ;;  %v14780_v36 = vcombine.low %v4989_v23, %v4993_v58 }
 0x415   :  { %9464 = vmatprep.subr.bf16.mxu0 %v14757_v10  ;;  %9902 = vmatprep.subr.bf16.mxu1 %v14759_v46  ;;  %v4641_v15 = vpop.f32.mrb[70].mxu0  ;;  %v5001_v10 = vld [vmem:[#allocation7 + $0x760] sm:$0xff]  ;;  %v4998_v46 = vld [vmem:[#allocation7 + $0x748] sm:$0xff] }
 0x416   :  { %v19130_v57 = vpack.c.bf16 %v4641_v15, %v4637_v48  ;;  %v4643_v7 = vpop.f32.mrb[71].mxu0  ;;  %v5005_v48 = vld [vmem:[#allocation7 + $0x780] sm:$0xff]  ;;  %v14790_v25 = vcombine.low %v4998_v46, %v5002_v21 }
 0x417   :  { %9465 = vmatpush1.bf16.msra.mxu0 %v14756_v37  ;;  %9903 = vmatpush1.bf16.msra.mxu1 %v14758_v61  ;;  %v19132_v13 = vpack.c.bf16 %v4643_v7, %v4639_v1  ;;  %v14789_v37 = vcombine.high %v4997_v20, %v5001_v10  ;;  %v14791_v61 = vcombine.high %v4998_v46, %v5002_v21  ;;  %v5013_v15 = vld [vmem:[#allocation7 + $0x7c0] sm:$0xff] }
 0x418   :  { %9466 = vmatprep.subr.bf16.mxu0 %v14765_v52  ;;  %9904 = vmatprep.subr.bf16.mxu1 %v14767_v6  ;;  %v5009_v52 = vld [vmem:[#allocation7 + $0x7a0] sm:$0xff]  ;;  %v5006_v6 = vld [vmem:[#allocation7 + $0x788] sm:$0xff]  ;;  %v14788_v1 = vcombine.low %v4997_v20, %v5001_v10  ;;  %v14813_v20 = vcombine.high %v5021_v32, %v5025_v51 }
 0x419   :  { %v14797_v54 = vcombine.high %v5005_v48, %v5009_v52  ;;  %v14799_v27 = vcombine.high %v5006_v6, %v5010_v53  ;;  %v5017_v7 = vld [vmem:[#allocation7 + $0x7e0] sm:$0xff] }
 0x41a   :  { %9436 = vmatmul.mubr.bf16.gmra.mrb[84].mxu0 %v19014_v41  ;;  %9874 = vmatmul.mubr.bf16.gmra.mrb[100].mxu1 %v19014_v41  ;;  %v14805_v23 = vcombine.high %v5013_v15, %v5017_v7  ;;  %v5029_v46 = vld [vmem:[#allocation7 + $0x840] sm:$0xff] }
 0x41b   :  { %9467 = vmatpush1.bf16.msra.mxu0 %v14764_v59  ;;  %9905 = vmatpush1.bf16.msra.mxu1 %v14766_v55  ;;  %v5014_v59 = vld [vmem:[#allocation7 + $0x7c8] sm:$0xff]  ;;  %v5033_v21 = vld [vmem:[#allocation7 + $0x860] sm:$0xff] }
 0x41c   :  { %9468 = vmatprep.subr.bf16.mxu0 %v14773_v8  ;;  %9906 = vmatprep.subr.bf16.mxu1 %v14775_v17  ;;  %v5018_v55 = vld [vmem:[#allocation7 + $0x7e8] sm:$0xff]  ;;  %v14796_v8 = vcombine.low %v5005_v48, %v5009_v52  ;;  %v14798_v17 = vcombine.low %v5006_v6, %v5010_v53  ;;  %v14821_v48 = vcombine.high %v5029_v46, %v5033_v21  ;;  %v5037_v6 = vld [vmem:[#allocation7 + $0x880] sm:$0xff] }
 0x41d   :  { %9478 = vmatprep.mubr.bf16.mxu0 %v19104_v26  ;;  %9916 = vmatprep.mubr.bf16.mxu1 %v19104_v26  ;;  %v14807_v58 = vcombine.high %v5014_v59, %v5018_v55  ;;  %v5041_v53 = vld [vmem:[#allocation7 + $0x8a0] sm:$0xff] }
 0x41f   :  { %9469 = vmatpush1.bf16.msra.mxu0 %v14772_v63  ;;  %9907 = vmatpush1.bf16.msra.mxu1 %v14774_v45  ;;  %v5022_v63 = vld [vmem:[#allocation7 + $0x808] sm:$0xff] }
 0x420   :  { %9470 = vmatprep.subr.bf16.mxu0 %v14781_v3  ;;  %9908 = vmatprep.subr.bf16.mxu1 %v14783_v39  ;;  %v5026_v45 = vld [vmem:[#allocation7 + $0x828] sm:$0xff]  ;;  %v14804_v3 = vcombine.low %v5013_v15, %v5017_v7  ;;  %v14806_v39 = vcombine.low %v5014_v59, %v5018_v55  ;;  %v14829_v15 = vcombine.high %v5037_v6, %v5041_v53  ;;  %v5045_v59 = vld [vmem:[#allocation7 + $0x8c0] sm:$0xff] }
 0x421   :  { %v14815_v10 = vcombine.high %v5022_v63, %v5026_v45  ;;  %v5049_v55 = vld [vmem:[#allocation7 + $0x8e0] sm:$0xff] }
 0x423   :  { %9471 = vmatpush1.bf16.msra.mxu0 %v14780_v36  ;;  %9909 = vmatpush1.bf16.msra.mxu1 %v14782_v47  ;;  %v5030_v36 = vld [vmem:[#allocation7 + $0x848] sm:$0xff] }
 0x424   :  { %9472 = vmatprep.subr.bf16.mxu0 %v14789_v37  ;;  %9910 = vmatprep.subr.bf16.mxu1 %v14791_v61  ;;  %v5034_v47 = vld [vmem:[#allocation7 + $0x868] sm:$0xff]  ;;  %v14812_v37 = vcombine.low %v5021_v32, %v5025_v51  ;;  %v14814_v61 = vcombine.low %v5022_v63, %v5026_v45  ;;  %v14837_v32 = vcombine.high %v5045_v59, %v5049_v55  ;;  %v5053_v63 = vld [vmem:[#allocation7 + $0x900] sm:$0xff] }
 0x425   :  { %v14823_v52 = vcombine.high %v5030_v36, %v5034_v47  ;;  %v5057_v45 = vld [vmem:[#allocation7 + $0x920] sm:$0xff] }
 0x427   :  { %9473 = vmatpush1.bf16.msra.mxu0 %v14788_v1  ;;  %9911 = vmatpush1.bf16.msra.mxu1 %v14790_v25  ;;  %v5038_v1 = vld [vmem:[#allocation7 + $0x888] sm:$0xff] }
 0x428   :  { %9474 = vmatprep.subr.bf16.mxu0 %v14797_v54  ;;  %9912 = vmatprep.subr.bf16.mxu1 %v14799_v27  ;;  %v5042_v25 = vld [vmem:[#allocation7 + $0x8a8] sm:$0xff]  ;;  %v14820_v54 = vcombine.low %v5029_v46, %v5033_v21  ;;  %v14822_v27 = vcombine.low %v5030_v36, %v5034_v47  ;;  %v14845_v46 = vcombine.high %v5053_v63, %v5057_v45  ;;  %v5061_v36 = vld [vmem:[#allocation7 + $0x940] sm:$0xff] }
 0x429   :  { %v14831_v7 = vcombine.high %v5038_v1, %v5042_v25  ;;  %v5065_v47 = vld [vmem:[#allocation7 + $0x960] sm:$0xff] }
 0x42b   :  { %9475 = vmatpush1.bf16.msra.mxu0 %v14796_v8  ;;  %9913 = vmatpush1.bf16.msra.mxu1 %v14798_v17  ;;  %v5046_v8 = vld [vmem:[#allocation7 + $0x8c8] sm:$0xff] }
 0x42c   :  { %9476 = vmatprep.subr.bf16.mxu0 %v14805_v23  ;;  %9914 = vmatprep.subr.bf16.mxu1 %v14807_v58  ;;  %v5050_v17 = vld [vmem:[#allocation7 + $0x8e8] sm:$0xff]  ;;  %v14828_v23 = vcombine.low %v5037_v6, %v5041_v53  ;;  %v14830_v58 = vcombine.low %v5038_v1, %v5042_v25  ;;  %v14853_v6 = vcombine.high %v5061_v36, %v5065_v47  ;;  %v5069_v1 = vld [vmem:[#allocation7 + $0x980] sm:$0xff] }
 0x42d   :  { %v14839_v51 = vcombine.high %v5046_v8, %v5050_v17  ;;  %v5073_v25 = vld [vmem:[#allocation7 + $0x9a0] sm:$0xff] }
 0x42f   :  { %9477 = vmatpush1.bf16.msra.mxu0 %v14804_v3  ;;  %9915 = vmatpush1.bf16.msra.mxu1 %v14806_v39  ;;  %v5054_v3 = vld [vmem:[#allocation7 + $0x908] sm:$0xff] }
 0x430   :  { %9519 = vmatprep.subr.bf16.mxu0 %v14813_v20  ;;  %9957 = vmatprep.subr.bf16.mxu1 %v14815_v10  ;;  %v5058_v39 = vld [vmem:[#allocation7 + $0x928] sm:$0xff]  ;;  %v14836_v20 = vcombine.low %v5045_v59, %v5049_v55  ;;  %v14838_v10 = vcombine.low %v5046_v8, %v5050_v17  ;;  %v14861_v59 = vcombine.high %v5069_v1, %v5073_v25  ;;  %v5077_v8 = vld [vmem:[#allocation7 + $0x9c0] sm:$0xff] }
 0x431   :  { %v14847_v21 = vcombine.high %v5054_v3, %v5058_v39  ;;  %v5081_v17 = vld [vmem:[#allocation7 + $0x9e0] sm:$0xff] }
 0x432   :  { %9479 = vmatmul.mubr.bf16.vlgmr.msra.gmra.mrb[72].mxu0 %v19102_v5  ;;  %9917 = vmatmul.mubr.bf16.vlgmr.msra.gmra.mrb[88].mxu1 %v19102_v5 }
 0x433   :  { %9488 = vmatprep.mubr.bf16.mxu0 %v18867_v24  ;;  %9520 = vmatpush1.bf16.msra.mxu0 %v14812_v37  ;;  %v5062_v37 = vld [vmem:[#allocation7 + $0x948] sm:$0xff] }
 0x434   :  { %9926 = vmatprep.mubr.bf16.mxu1 %v18867_v24  ;;  %9958 = vmatpush1.bf16.msra.mxu1 %v14814_v61  ;;  %v5066_v61 = vld [vmem:[#allocation7 + $0x968] sm:$0xff] }
 0x435   :  { %9521 = vmatprep.subr.bf16.mxu0 %v14821_v48  ;;  %9959 = vmatprep.subr.bf16.mxu1 %v14823_v52  ;;  %v14844_v48 = vcombine.low %v5053_v63, %v5057_v45  ;;  %v14846_v52 = vcombine.low %v5054_v3, %v5058_v39  ;;  %v14855_v53 = vcombine.high %v5062_v37, %v5066_v61 }
 0x436   :  { %v14869_v3 = vcombine.high %v5077_v8, %v5081_v17 }
 0x437   :  { %9522 = vmatpush1.bf16.msra.mxu0 %v14820_v54  ;;  %v5070_v54 = vld [vmem:[#allocation7 + $0x988] sm:$0xff] }
 0x438   :  { %9960 = vmatpush1.bf16.msra.mxu1 %v14822_v27  ;;  %9523 = vmatprep.subr.bf16.mxu0 %v14829_v15  ;;  %v5074_v27 = vld [vmem:[#allocation7 + $0x9a8] sm:$0xff]  ;;  %v14852_v15 = vcombine.low %v5061_v36, %v5065_v47 }
 0x439   :  { %9961 = vmatprep.subr.bf16.mxu1 %v14831_v7  ;;  %v14854_v7 = vcombine.low %v5062_v37, %v5066_v61  ;;  %v14863_v55 = vcombine.high %v5070_v54, %v5074_v27  ;;  %v14862_v63 = vcombine.low %v5070_v54, %v5074_v27  ;;  %v5090_v36 = vld [vmem:[#allocation7 + $0xa28] sm:$0xff]  ;;  %v14868_v37 = vcombine.low %v5077_v8, %v5081_v17  ;;  %v5101_v8 = vld [vmem:[#allocation7 + $0xa80] sm:$0xff] }
 0x43a   :  { %9489 = vmatmul.mubr.bf16.gmra.mrb[76].mxu0 %v18857_v43  ;;  %9927 = vmatmul.mubr.bf16.gmra.mrb[92].mxu1 %v18857_v43  ;;  %v5094_v54 = vld [vmem:[#allocation7 + $0xa48] sm:$0xff]  ;;  %v5105_v17 = vld [vmem:[#allocation7 + $0xaa0] sm:$0xff] }
 0x43b   :  { %9524 = vmatpush1.bf16.msra.mxu0 %v14828_v23  ;;  %9498 = vmatprep.mubr.bf16.mxu0 %v19122_v40  ;;  %v5078_v23 = vld [vmem:[#allocation7 + $0x9c8] sm:$0xff] }
 0x43c   :  { %9962 = vmatpush1.bf16.msra.mxu1 %v14830_v58  ;;  %9525 = vmatprep.subr.bf16.mxu0 %v14837_v32  ;;  %v5082_v58 = vld [vmem:[#allocation7 + $0x9e8] sm:$0xff]  ;;  %v14860_v32 = vcombine.low %v5069_v1, %v5073_v25  ;;  %v5093_v1 = vld [vmem:[#allocation7 + $0xa40] sm:$0xff] }
 0x43d   :  { %9963 = vmatprep.subr.bf16.mxu1 %v14839_v51  ;;  %9936 = vmatprep.mubr.bf16.mxu1 %v19122_v40  ;;  %v4680_v51 = vpop.f32.mrb[84].mxu1  ;;  %v14871_v39 = vcombine.high %v5078_v23, %v5082_v58  ;;  %v5097_v25 = vld [vmem:[#allocation7 + $0xa60] sm:$0xff]  ;;  %v5098_v27 = vld [vmem:[#allocation7 + $0xa68] sm:$0xff] }
 0x43e   :  { %v4682_v45 = vpop.f32.mrb[85].mxu1 }
 0x43f   :  { %9526 = vmatpush1.bf16.msra.mxu0 %v14836_v20  ;;  %v5085_v20 = vld [vmem:[#allocation7 + $0xa00] sm:$0xff] }
 0x440   :  { %9964 = vmatpush1.bf16.msra.mxu1 %v14838_v10  ;;  %9527 = vmatprep.subr.bf16.mxu0 %v14845_v46  ;;  %v5089_v10 = vld [vmem:[#allocation7 + $0xa20] sm:$0xff]  ;;  %v4684_v46 = vpop.f32.mrb[86].mxu1 }
 0x441   :  { %9965 = vmatprep.subr.bf16.mxu1 %v14847_v21  ;;  %v5086_v21 = vld [vmem:[#allocation7 + $0xa08] sm:$0xff]  ;;  %v4686_v47 = vpop.f32.mrb[87].mxu1  ;;  %v19153_v61 = vpack.c.bf16 %v4684_v46, %v4680_v51  ;;  %v14886_v51 = vcombine.low %v5094_v54, %v5098_v27  ;;  %v14892_v46 = vcombine.low %v5101_v8, %v5105_v17 }
 0x442   :  { %9499 = vmatmul.mubr.bf16.gmra.mrb[80].mxu0 %v19120_v12  ;;  %9937 = vmatmul.mubr.bf16.gmra.mrb[96].mxu1 %v19120_v12 }
 0x443   :  { %9508 = vmatprep.mubr.bf16.mxu0 %v19032_v62  ;;  %9528 = vmatpush1.bf16.msra.mxu0 %v14844_v48  ;;  %v14870_v48 = vcombine.low %v5078_v23, %v5082_v58  ;;  %v5102_v23 = vld [vmem:[#allocation7 + $0xa88] sm:$0xff] }
 0x444   :  { %9946 = vmatprep.mubr.bf16.mxu1 %v19032_v62  ;;  %9966 = vmatpush1.bf16.msra.mxu1 %v14846_v52  ;;  %v14877_v52 = vcombine.high %v5085_v20, %v5089_v10  ;;  %v5106_v58 = vld [vmem:[#allocation7 + $0xaa8] sm:$0xff] }
 0x445   :  { %9529 = vmatprep.subr.bf16.mxu0 %v14853_v6  ;;  %9967 = vmatprep.subr.bf16.mxu1 %v14855_v53  ;;  %v19156_v6 = vpack.c.bf16 %v4686_v47, %v4682_v45  ;;  %v14879_v53 = vcombine.high %v5086_v21, %v5090_v36  ;;  %v14895_v45 = vcombine.high %v5102_v23, %v5106_v58 }
 0x447   :  { %9530 = vmatpush1.bf16.msra.mxu0 %v14852_v15  ;;  %v14876_v15 = vcombine.low %v5085_v20, %v5089_v10  ;;  %v5110_v20 = vld [vmem:[#allocation7 + $0xac8] sm:$0xff] }
 0x448   :  { %9968 = vmatpush1.bf16.msra.mxu1 %v14854_v7  ;;  %9531 = vmatprep.subr.bf16.mxu0 %v14861_v59  ;;  %v14878_v7 = vcombine.low %v5086_v21, %v5090_v36  ;;  %v14885_v59 = vcombine.high %v5093_v1, %v5097_v25  ;;  %v5114_v10 = vld [vmem:[#allocation7 + $0xae8] sm:$0xff]  ;;  %v14894_v21 = vcombine.low %v5102_v23, %v5106_v58 }
 0x449   :  { %9969 = vmatprep.subr.bf16.mxu1 %v14863_v55  ;;  %v14887_v55 = vcombine.high %v5094_v54, %v5098_v27  ;;  %v14903_v47 = vcombine.high %v5110_v20, %v5114_v10 }
 0x44a   :  { %9509 = vmatmul.mubr.bf16.gmra.mrb[84].mxu0 %v19020_v49  ;;  %9947 = vmatmul.mubr.bf16.gmra.mrb[100].mxu1 %v19020_v49 }
 0x44b   :  { %9532 = vmatpush1.bf16.msra.mxu0 %v14860_v32  ;;  %9551 = vmatprep.mubr.bf16.mxu0 %v18859_v44  ;;  %v14884_v32 = vcombine.low %v5093_v1, %v5097_v25  ;;  %v14902_v25 = vcombine.low %v5110_v20, %v5114_v10 }
 0x44c   :  { %9970 = vmatpush1.bf16.msra.mxu1 %v14862_v63  ;;  %9989 = vmatprep.mubr.bf16.mxu1 %v18859_v44  ;;  %v14893_v63 = vcombine.high %v5101_v8, %v5105_v17 }
 0x44d   :  { %9533 = vmatprep.subr.bf16.mxu0 %v14869_v3  ;;  %9971 = vmatprep.subr.bf16.mxu1 %v14871_v39  ;;  %v5109_v3 = vld [vmem:[#allocation7 + $0xac0] sm:$0xff] }
 0x44e   :  { %v5113_v39 = vld [vmem:[#allocation7 + $0xae0] sm:$0xff] }
 0x44f   :  { %9534 = vmatpush1.bf16.msra.mxu0 %v14868_v37  ;;  %v14901_v36 = vcombine.high %v5109_v3, %v5113_v39  ;;  %v5117_v37 = vld [vmem:[#allocation7 + $0xb00] sm:$0xff]  ;;  %v14900_v1 = vcombine.low %v5109_v3, %v5113_v39 }
 0x450   :  { %9972 = vmatpush1.bf16.msra.mxu1 %v14870_v48  ;;  %9535 = vmatprep.subr.bf16.mxu0 %v14877_v52  ;;  %v5121_v48 = vld [vmem:[#allocation7 + $0xb20] sm:$0xff]  ;;  %v5118_v52 = vld [vmem:[#allocation7 + $0xb08] sm:$0xff] }
 0x451   :  { %9973 = vmatprep.subr.bf16.mxu1 %v14879_v53  ;;  %v5122_v53 = vld [vmem:[#allocation7 + $0xb28] sm:$0xff]  ;;  %v14909_v54 = vcombine.high %v5117_v37, %v5121_v48  ;;  %v14908_v8 = vcombine.low %v5117_v37, %v5121_v48 }
 0x452   :  { %v14911_v27 = vcombine.high %v5118_v52, %v5122_v53  ;;  %v14910_v17 = vcombine.low %v5118_v52, %v5122_v53 }
 0x453   :  { %9536 = vmatpush1.bf16.msra.mxu0 %v14876_v15  ;;  %v5125_v15 = vld [vmem:[#allocation7 + $0xb40] sm:$0xff] }
 0x454   :  { %9974 = vmatpush1.bf16.msra.mxu1 %v14878_v7  ;;  %9537 = vmatprep.subr.bf16.mxu0 %v14885_v59  ;;  %v5129_v7 = vld [vmem:[#allocation7 + $0xb60] sm:$0xff]  ;;  %v5126_v59 = vld [vmem:[#allocation7 + $0xb48] sm:$0xff] }
 0x455   :  { %9975 = vmatprep.subr.bf16.mxu1 %v14887_v55  ;;  %v5130_v55 = vld [vmem:[#allocation7 + $0xb68] sm:$0xff]  ;;  %v14917_v23 = vcombine.high %v5125_v15, %v5129_v7  ;;  %v14916_v3 = vcombine.low %v5125_v15, %v5129_v7 }
 0x456   :  { %v14919_v58 = vcombine.high %v5126_v59, %v5130_v55  ;;  %v14918_v39 = vcombine.low %v5126_v59, %v5130_v55 }
 0x457   :  { %9538 = vmatpush1.bf16.msra.mxu0 %v14884_v32  ;;  %v5133_v32 = vld [vmem:[#allocation7 + $0xb80] sm:$0xff] }
 0x458   :  { %9976 = vmatpush1.bf16.msra.mxu1 %v14886_v51  ;;  %9539 = vmatprep.subr.bf16.mxu0 %v14893_v63  ;;  %v5137_v51 = vld [vmem:[#allocation7 + $0xba0] sm:$0xff]  ;;  %v5134_v63 = vld [vmem:[#allocation7 + $0xb88] sm:$0xff] }
 0x459   :  { %9977 = vmatprep.subr.bf16.mxu1 %v14895_v45  ;;  %v5138_v45 = vld [vmem:[#allocation7 + $0xba8] sm:$0xff]  ;;  %v14925_v20 = vcombine.high %v5133_v32, %v5137_v51  ;;  %v14924_v37 = vcombine.low %v5133_v32, %v5137_v51 }
 0x45a   :  { %v14927_v10 = vcombine.high %v5134_v63, %v5138_v45  ;;  %v14926_v48 = vcombine.low %v5134_v63, %v5138_v45 }
 0x45b   :  { %9540 = vmatpush1.bf16.msra.mxu0 %v14892_v46  ;;  %v5141_v46 = vld [vmem:[#allocation7 + $0xbc0] sm:$0xff] }
 0x45c   :  { %9978 = vmatpush1.bf16.msra.mxu1 %v14894_v21  ;;  %9541 = vmatprep.subr.bf16.mxu0 %v14901_v36  ;;  %v5145_v21 = vld [vmem:[#allocation7 + $0xbe0] sm:$0xff]  ;;  %v5142_v36 = vld [vmem:[#allocation7 + $0xbc8] sm:$0xff] }
 0x45d   :  { %9979 = vmatprep.subr.bf16.mxu1 %v14903_v47  ;;  %v5146_v47 = vld [vmem:[#allocation7 + $0xbe8] sm:$0xff]  ;;  %v14933_v52 = vcombine.high %v5141_v46, %v5145_v21  ;;  %v14932_v15 = vcombine.low %v5141_v46, %v5145_v21 }
 0x45e   :  { %v14935_v53 = vcombine.high %v5142_v36, %v5146_v47  ;;  %v14934_v7 = vcombine.low %v5142_v36, %v5146_v47 }
 0x45f   :  { %9542 = vmatpush1.bf16.msra.mxu0 %v14900_v1  ;;  %v5149_v1 = vld [vmem:[#allocation7 + $0xc00] sm:$0xff] }
 0x460   :  { %9980 = vmatpush1.bf16.msra.mxu1 %v14902_v25  ;;  %9543 = vmatprep.subr.bf16.mxu0 %v14909_v54  ;;  %v5153_v25 = vld [vmem:[#allocation7 + $0xc20] sm:$0xff]  ;;  %v5150_v54 = vld [vmem:[#allocation7 + $0xc08] sm:$0xff] }
 0x461   :  { %9981 = vmatprep.subr.bf16.mxu1 %v14911_v27  ;;  %v5154_v27 = vld [vmem:[#allocation7 + $0xc28] sm:$0xff]  ;;  %v14941_v59 = vcombine.high %v5149_v1, %v5153_v25  ;;  %v14940_v32 = vcombine.low %v5149_v1, %v5153_v25 }
 0x462   :  { %v14943_v55 = vcombine.high %v5150_v54, %v5154_v27  ;;  %v14942_v51 = vcombine.low %v5150_v54, %v5154_v27 }
 0x463   :  { %9544 = vmatpush1.bf16.msra.mxu0 %v14908_v8  ;;  %v5157_v8 = vld [vmem:[#allocation7 + $0xc40] sm:$0xff] }
 0x464   :  { %9982 = vmatpush1.bf16.msra.mxu1 %v14910_v17  ;;  %9545 = vmatprep.subr.bf16.mxu0 %v14917_v23  ;;  %v5161_v17 = vld [vmem:[#allocation7 + $0xc60] sm:$0xff]  ;;  %v5158_v23 = vld [vmem:[#allocation7 + $0xc48] sm:$0xff] }
 0x465   :  { %9983 = vmatprep.subr.bf16.mxu1 %v14919_v58  ;;  %v5162_v58 = vld [vmem:[#allocation7 + $0xc68] sm:$0xff]  ;;  %v14949_v63 = vcombine.high %v5157_v8, %v5161_v17  ;;  %v14948_v46 = vcombine.low %v5157_v8, %v5161_v17 }
 0x466   :  { %v14951_v45 = vcombine.high %v5158_v23, %v5162_v58  ;;  %v14950_v21 = vcombine.low %v5158_v23, %v5162_v58 }
 0x467   :  { %9546 = vmatpush1.bf16.msra.mxu0 %v14916_v3  ;;  %v5165_v3 = vld [vmem:[#allocation7 + $0xc80] sm:$0xff] }
 0x468   :  { %9984 = vmatpush1.bf16.msra.mxu1 %v14918_v39  ;;  %9547 = vmatprep.subr.bf16.mxu0 %v14925_v20  ;;  %v5169_v39 = vld [vmem:[#allocation7 + $0xca0] sm:$0xff]  ;;  %v5166_v20 = vld [vmem:[#allocation7 + $0xc88] sm:$0xff] }
 0x469   :  { %9985 = vmatprep.subr.bf16.mxu1 %v14927_v10  ;;  %v5170_v10 = vld [vmem:[#allocation7 + $0xca8] sm:$0xff]  ;;  %v14957_v36 = vcombine.high %v5165_v3, %v5169_v39  ;;  %v14956_v1 = vcombine.low %v5165_v3, %v5169_v39 }
 0x46a   :  { %v14959_v47 = vcombine.high %v5166_v20, %v5170_v10  ;;  %v14958_v25 = vcombine.low %v5166_v20, %v5170_v10 }
 0x46b   :  { %9548 = vmatpush1.bf16.msra.mxu0 %v14924_v37  ;;  %v5173_v37 = vld [vmem:[#allocation7 + $0xcc0] sm:$0xff] }
 0x46c   :  { %9986 = vmatpush1.bf16.msra.mxu1 %v14926_v48  ;;  %9549 = vmatprep.subr.bf16.mxu0 %v14933_v52  ;;  %v5177_v48 = vld [vmem:[#allocation7 + $0xce0] sm:$0xff]  ;;  %v5174_v52 = vld [vmem:[#allocation7 + $0xcc8] sm:$0xff] }
 0x46d   :  { %9987 = vmatprep.subr.bf16.mxu1 %v14935_v53  ;;  %v5178_v53 = vld [vmem:[#allocation7 + $0xce8] sm:$0xff]  ;;  %v14965_v54 = vcombine.high %v5173_v37, %v5177_v48  ;;  %v14964_v8 = vcombine.low %v5173_v37, %v5177_v48 }
 0x46e   :  { %v14967_v27 = vcombine.high %v5174_v52, %v5178_v53  ;;  %v14966_v17 = vcombine.low %v5174_v52, %v5178_v53 }
 0x46f   :  { %9550 = vmatpush1.bf16.msra.mxu0 %v14932_v15  ;;  %v5181_v15 = vld [vmem:[#allocation7 + $0xd00] sm:$0xff] }
 0x470   :  { %9988 = vmatpush1.bf16.msra.mxu1 %v14934_v7  ;;  %9592 = vmatprep.subr.bf16.mxu0 %v14941_v59  ;;  %v5185_v7 = vld [vmem:[#allocation7 + $0xd20] sm:$0xff]  ;;  %v5182_v59 = vld [vmem:[#allocation7 + $0xd08] sm:$0xff] }
 0x471   :  { %10030 = vmatprep.subr.bf16.mxu1 %v14943_v55  ;;  %v5186_v55 = vld [vmem:[#allocation7 + $0xd28] sm:$0xff]  ;;  %v14973_v23 = vcombine.high %v5181_v15, %v5185_v7  ;;  %v14972_v3 = vcombine.low %v5181_v15, %v5185_v7 }
 0x472   :  { %9552 = vmatmul.mubr.bf16.vlgmr.msra.gmra.mrb[72].mxu0 %v18851_v31  ;;  %v14975_v58 = vcombine.high %v5182_v59, %v5186_v55  ;;  %v14974_v39 = vcombine.low %v5182_v59, %v5186_v55 }
 0x473   :  { %9990 = vmatmul.mubr.bf16.vlgmr.msra.gmra.mrb[88].mxu1 %v18851_v31  ;;  %9561 = vmatprep.mubr.bf16.mxu0 %v18929_v18 }
 0x474   :  { %9593 = vmatpush1.bf16.msra.mxu0 %v14940_v32  ;;  %9999 = vmatprep.mubr.bf16.mxu1 %v18929_v18  ;;  %v5189_v32 = vld [vmem:[#allocation7 + $0xd40] sm:$0xff] }
 0x475   :  { %10031 = vmatpush1.bf16.msra.mxu1 %v14942_v51  ;;  %9594 = vmatprep.subr.bf16.mxu0 %v14949_v63  ;;  %v5193_v51 = vld [vmem:[#allocation7 + $0xd60] sm:$0xff]  ;;  %v5190_v63 = vld [vmem:[#allocation7 + $0xd48] sm:$0xff] }
 0x476   :  { %10032 = vmatprep.subr.bf16.mxu1 %v14951_v45  ;;  %v5194_v45 = vld [vmem:[#allocation7 + $0xd68] sm:$0xff]  ;;  %v14981_v20 = vcombine.high %v5189_v32, %v5193_v51  ;;  %v14980_v37 = vcombine.low %v5189_v32, %v5193_v51 }
 0x477   :  { %v14983_v10 = vcombine.high %v5190_v63, %v5194_v45  ;;  %v14982_v48 = vcombine.low %v5190_v63, %v5194_v45 }
 0x478   :  { %9595 = vmatpush1.bf16.msra.mxu0 %v14948_v46  ;;  %v5197_v46 = vld [vmem:[#allocation7 + $0xd80] sm:$0xff] }
 0x479   :  { %10033 = vmatpush1.bf16.msra.mxu1 %v14950_v21  ;;  %9596 = vmatprep.subr.bf16.mxu0 %v14957_v36  ;;  %v5201_v21 = vld [vmem:[#allocation7 + $0xda0] sm:$0xff]  ;;  %v5198_v36 = vld [vmem:[#allocation7 + $0xd88] sm:$0xff] }
 0x47a   :  { %9562 = vmatmul.mubr.bf16.gmra.mrb[76].mxu0 %v18921_v2  ;;  %10034 = vmatprep.subr.bf16.mxu1 %v14959_v47  ;;  %v5202_v47 = vld [vmem:[#allocation7 + $0xda8] sm:$0xff]  ;;  %v14989_v52 = vcombine.high %v5197_v46, %v5201_v21  ;;  %v14988_v15 = vcombine.low %v5197_v46, %v5201_v21 }
 0x47b   :  { %10000 = vmatmul.mubr.bf16.gmra.mrb[92].mxu1 %v18921_v2  ;;  %9571 = vmatprep.mubr.bf16.mxu0 %v19022_v38  ;;  %v14991_v53 = vcombine.high %v5198_v36, %v5202_v47  ;;  %v14990_v7 = vcombine.low %v5198_v36, %v5202_v47 }
 0x47c   :  { %9597 = vmatpush1.bf16.msra.mxu0 %v14956_v1  ;;  %10009 = vmatprep.mubr.bf16.mxu1 %v19022_v38  ;;  %v5205_v1 = vld [vmem:[#allocation7 + $0xdc0] sm:$0xff] }
 0x47d   :  { %10035 = vmatpush1.bf16.msra.mxu1 %v14958_v25  ;;  %9598 = vmatprep.subr.bf16.mxu0 %v14965_v54  ;;  %v5209_v25 = vld [vmem:[#allocation7 + $0xde0] sm:$0xff]  ;;  %v5206_v54 = vld [vmem:[#allocation7 + $0xdc8] sm:$0xff] }
 0x47e   :  { %10036 = vmatprep.subr.bf16.mxu1 %v14967_v27  ;;  %v5210_v27 = vld [vmem:[#allocation7 + $0xde8] sm:$0xff]  ;;  %v14997_v59 = vcombine.high %v5205_v1, %v5209_v25  ;;  %v14996_v32 = vcombine.low %v5205_v1, %v5209_v25 }
 0x47f   :  { %v14999_v55 = vcombine.high %v5206_v54, %v5210_v27  ;;  %v14998_v51 = vcombine.low %v5206_v54, %v5210_v27 }
 0x480   :  { %9599 = vmatpush1.bf16.msra.mxu0 %v14964_v8  ;;  %v5213_v8 = vld [vmem:[#allocation7 + $0xe00] sm:$0xff] }
 0x481   :  { %10037 = vmatpush1.bf16.msra.mxu1 %v14966_v17  ;;  %9600 = vmatprep.subr.bf16.mxu0 %v14973_v23  ;;  %v5217_v17 = vld [vmem:[#allocation7 + $0xe20] sm:$0xff]  ;;  %v5214_v23 = vld [vmem:[#allocation7 + $0xe08] sm:$0xff] }
 0x482   :  { %9572 = vmatmul.mubr.bf16.gmra.mrb[80].mxu0 %v19014_v41  ;;  %10038 = vmatprep.subr.bf16.mxu1 %v14975_v58  ;;  %v5218_v58 = vld [vmem:[#allocation7 + $0xe28] sm:$0xff]  ;;  %v15005_v63 = vcombine.high %v5213_v8, %v5217_v17  ;;  %v15004_v46 = vcombine.low %v5213_v8, %v5217_v17 }
 0x483   :  { %10010 = vmatmul.mubr.bf16.gmra.mrb[96].mxu1 %v19014_v41  ;;  %9581 = vmatprep.mubr.bf16.mxu0 %v19070_v11  ;;  %v15007_v45 = vcombine.high %v5214_v23, %v5218_v58  ;;  %v15006_v21 = vcombine.low %v5214_v23, %v5218_v58 }
 0x484   :  { %9601 = vmatpush1.bf16.msra.mxu0 %v14972_v3  ;;  %10019 = vmatprep.mubr.bf16.mxu1 %v19070_v11  ;;  %v5221_v3 = vld [vmem:[#allocation7 + $0xe40] sm:$0xff] }
 0x485   :  { %10039 = vmatpush1.bf16.msra.mxu1 %v14974_v39  ;;  %9602 = vmatprep.subr.bf16.mxu0 %v14981_v20  ;;  %v5225_v39 = vld [vmem:[#allocation7 + $0xe60] sm:$0xff]  ;;  %v5222_v20 = vld [vmem:[#allocation7 + $0xe48] sm:$0xff] }
 0x486   :  { %10040 = vmatprep.subr.bf16.mxu1 %v14983_v10  ;;  %v5226_v10 = vld [vmem:[#allocation7 + $0xe68] sm:$0xff]  ;;  %v15013_v36 = vcombine.high %v5221_v3, %v5225_v39  ;;  %v15012_v1 = vcombine.low %v5221_v3, %v5225_v39 }
 0x487   :  { %v15015_v47 = vcombine.high %v5222_v20, %v5226_v10  ;;  %v15014_v25 = vcombine.low %v5222_v20, %v5226_v10 }
 0x488   :  { %9603 = vmatpush1.bf16.msra.mxu0 %v14980_v37  ;;  %v5229_v37 = vld [vmem:[#allocation7 + $0xe80] sm:$0xff] }
 0x489   :  { %10041 = vmatpush1.bf16.msra.mxu1 %v14982_v48  ;;  %9604 = vmatprep.subr.bf16.mxu0 %v14989_v52  ;;  %v5233_v48 = vld [vmem:[#allocation7 + $0xea0] sm:$0xff]  ;;  %v5230_v52 = vld [vmem:[#allocation7 + $0xe88] sm:$0xff] }
 0x48a   :  { %9582 = vmatmul.mubr.bf16.gmra.mrb[84].mxu0 %v19065_v50  ;;  %10042 = vmatprep.subr.bf16.mxu1 %v14991_v53  ;;  %v5234_v53 = vld [vmem:[#allocation7 + $0xea8] sm:$0xff]  ;;  %v15021_v54 = vcombine.high %v5229_v37, %v5233_v48  ;;  %v15020_v8 = vcombine.low %v5229_v37, %v5233_v48 }
 0x48b   :  { %10020 = vmatmul.mubr.bf16.gmra.mrb[100].mxu1 %v19065_v50  ;;  %9624 = vmatprep.mubr.bf16.mxu0 %v18867_v24  ;;  %v15023_v27 = vcombine.high %v5230_v52, %v5234_v53  ;;  %v15022_v17 = vcombine.low %v5230_v52, %v5234_v53 }
 0x48c   :  { %9605 = vmatpush1.bf16.msra.mxu0 %v14988_v15  ;;  %10062 = vmatprep.mubr.bf16.mxu1 %v18867_v24  ;;  %v5237_v15 = vld [vmem:[#allocation7 + $0xec0] sm:$0xff] }
 0x48d   :  { %10043 = vmatpush1.bf16.msra.mxu1 %v14990_v7  ;;  %9606 = vmatprep.subr.bf16.mxu0 %v14997_v59  ;;  %v5241_v7 = vld [vmem:[#allocation7 + $0xee0] sm:$0xff]  ;;  %v5238_v59 = vld [vmem:[#allocation7 + $0xec8] sm:$0xff] }
 0x48e   :  { %10044 = vmatprep.subr.bf16.mxu1 %v14999_v55  ;;  %v5242_v55 = vld [vmem:[#allocation7 + $0xee8] sm:$0xff]  ;;  %v15029_v23 = vcombine.high %v5237_v15, %v5241_v7  ;;  %v15028_v3 = vcombine.low %v5237_v15, %v5241_v7 }
 0x48f   :  { %v15031_v58 = vcombine.high %v5238_v59, %v5242_v55  ;;  %v15030_v39 = vcombine.low %v5238_v59, %v5242_v55 }
 0x490   :  { %9607 = vmatpush1.bf16.msra.mxu0 %v14996_v32  ;;  %v5245_v32 = vld [vmem:[#allocation7 + $0xf00] sm:$0xff] }
 0x491   :  { %10045 = vmatpush1.bf16.msra.mxu1 %v14998_v51  ;;  %9608 = vmatprep.subr.bf16.mxu0 %v15005_v63  ;;  %v5249_v51 = vld [vmem:[#allocation7 + $0xf20] sm:$0xff]  ;;  %v5246_v63 = vld [vmem:[#allocation7 + $0xf08] sm:$0xff] }
 0x492   :  { %10046 = vmatprep.subr.bf16.mxu1 %v15007_v45  ;;  %v5250_v45 = vld [vmem:[#allocation7 + $0xf28] sm:$0xff]  ;;  %v15037_v20 = vcombine.high %v5245_v32, %v5249_v51  ;;  %v15036_v37 = vcombine.low %v5245_v32, %v5249_v51 }
 0x493   :  { %v15039_v10 = vcombine.high %v5246_v63, %v5250_v45  ;;  %v15038_v48 = vcombine.low %v5246_v63, %v5250_v45 }
 0x494   :  { %9609 = vmatpush1.bf16.msra.mxu0 %v15004_v46  ;;  %v5253_v46 = vld [vmem:[#allocation7 + $0xf40] sm:$0xff] }
 0x495   :  { %10047 = vmatpush1.bf16.msra.mxu1 %v15006_v21  ;;  %9610 = vmatprep.subr.bf16.mxu0 %v15013_v36  ;;  %v5257_v21 = vld [vmem:[#allocation7 + $0xf60] sm:$0xff]  ;;  %v5254_v36 = vld [vmem:[#allocation7 + $0xf48] sm:$0xff] }
 0x496   :  { %10048 = vmatprep.subr.bf16.mxu1 %v15015_v47  ;;  %v5258_v47 = vld [vmem:[#allocation7 + $0xf68] sm:$0xff]  ;;  %v15045_v52 = vcombine.high %v5253_v46, %v5257_v21  ;;  %v15044_v15 = vcombine.low %v5253_v46, %v5257_v21 }
 0x497   :  { %v15047_v53 = vcombine.high %v5254_v36, %v5258_v47  ;;  %v15046_v7 = vcombine.low %v5254_v36, %v5258_v47 }
 0x498   :  { %9611 = vmatpush1.bf16.msra.mxu0 %v15012_v1  ;;  %v5261_v1 = vld [vmem:[#allocation7 + $0xf80] sm:$0xff] }
 0x499   :  { %10049 = vmatpush1.bf16.msra.mxu1 %v15014_v25  ;;  %9612 = vmatprep.subr.bf16.mxu0 %v15021_v54  ;;  %v5265_v25 = vld [vmem:[#allocation7 + $0xfa0] sm:$0xff]  ;;  %v5262_v54 = vld [vmem:[#allocation7 + $0xf88] sm:$0xff] }
 0x49a   :  { %10050 = vmatprep.subr.bf16.mxu1 %v15023_v27  ;;  %v5266_v27 = vld [vmem:[#allocation7 + $0xfa8] sm:$0xff]  ;;  %v15053_v59 = vcombine.high %v5261_v1, %v5265_v25  ;;  %v15052_v32 = vcombine.low %v5261_v1, %v5265_v25 }
 0x49b   :  { %v15055_v55 = vcombine.high %v5262_v54, %v5266_v27  ;;  %v15054_v51 = vcombine.low %v5262_v54, %v5266_v27 }
 0x49c   :  { %9613 = vmatpush1.bf16.msra.mxu0 %v15020_v8  ;;  %v5269_v8 = vld [vmem:[#allocation7 + $0xfc0] sm:$0xff] }
 0x49d   :  { %10051 = vmatpush1.bf16.msra.mxu1 %v15022_v17  ;;  %9614 = vmatprep.subr.bf16.mxu0 %v15029_v23  ;;  %v5273_v17 = vld [vmem:[#allocation7 + $0xfe0] sm:$0xff]  ;;  %v5270_v23 = vld [vmem:[#allocation7 + $0xfc8] sm:$0xff] }
 0x49e   :  { %10052 = vmatprep.subr.bf16.mxu1 %v15031_v58  ;;  %v5274_v58 = vld [vmem:[#allocation7 + $0xfe8] sm:$0xff]  ;;  %v15061_v63 = vcombine.high %v5269_v8, %v5273_v17  ;;  %v15060_v46 = vcombine.low %v5269_v8, %v5273_v17 }
 0x49f   :  { %v15063_v45 = vcombine.high %v5270_v23, %v5274_v58  ;;  %v15062_v21 = vcombine.low %v5270_v23, %v5274_v58 }
 0x4a0   :  { %9615 = vmatpush1.bf16.msra.mxu0 %v15028_v3  ;;  %v5277_v3 = vld [vmem:[#allocation7 + $0x1000] sm:$0xff] }
 0x4a1   :  { %10053 = vmatpush1.bf16.msra.mxu1 %v15030_v39  ;;  %9616 = vmatprep.subr.bf16.mxu0 %v15037_v20  ;;  %v5281_v39 = vld [vmem:[#allocation7 + $0x1020] sm:$0xff]  ;;  %v5278_v20 = vld [vmem:[#allocation7 + $0x1008] sm:$0xff] }
 0x4a2   :  { %10054 = vmatprep.subr.bf16.mxu1 %v15039_v10  ;;  %v5282_v10 = vld [vmem:[#allocation7 + $0x1028] sm:$0xff]  ;;  %v15069_v36 = vcombine.high %v5277_v3, %v5281_v39  ;;  %v15068_v1 = vcombine.low %v5277_v3, %v5281_v39 }
 0x4a3   :  { %v15071_v47 = vcombine.high %v5278_v20, %v5282_v10  ;;  %v15070_v25 = vcombine.low %v5278_v20, %v5282_v10 }
 0x4a4   :  { %9617 = vmatpush1.bf16.msra.mxu0 %v15036_v37  ;;  %v5285_v37 = vld [vmem:[#allocation7 + $0x1040] sm:$0xff] }
 0x4a5   :  { %10055 = vmatpush1.bf16.msra.mxu1 %v15038_v48  ;;  %9618 = vmatprep.subr.bf16.mxu0 %v15045_v52  ;;  %v5289_v48 = vld [vmem:[#allocation7 + $0x1060] sm:$0xff]  ;;  %v5286_v52 = vld [vmem:[#allocation7 + $0x1048] sm:$0xff] }
 0x4a6   :  { %10056 = vmatprep.subr.bf16.mxu1 %v15047_v53  ;;  %v5290_v53 = vld [vmem:[#allocation7 + $0x1068] sm:$0xff]  ;;  %v15077_v54 = vcombine.high %v5285_v37, %v5289_v48  ;;  %v15076_v8 = vcombine.low %v5285_v37, %v5289_v48 }
 0x4a7   :  { %v15079_v27 = vcombine.high %v5286_v52, %v5290_v53  ;;  %v15078_v17 = vcombine.low %v5286_v52, %v5290_v53 }
 0x4a8   :  { %9619 = vmatpush1.bf16.msra.mxu0 %v15044_v15  ;;  %v5293_v15 = vld [vmem:[#allocation7 + $0x1080] sm:$0xff] }
 0x4a9   :  { %10057 = vmatpush1.bf16.msra.mxu1 %v15046_v7  ;;  %9620 = vmatprep.subr.bf16.mxu0 %v15053_v59  ;;  %v5297_v7 = vld [vmem:[#allocation7 + $0x10a0] sm:$0xff]  ;;  %v5294_v59 = vld [vmem:[#allocation7 + $0x1088] sm:$0xff] }
 0x4aa   :  { %10058 = vmatprep.subr.bf16.mxu1 %v15055_v55  ;;  %v5298_v55 = vld [vmem:[#allocation7 + $0x10a8] sm:$0xff]  ;;  %v15085_v23 = vcombine.high %v5293_v15, %v5297_v7  ;;  %v15084_v3 = vcombine.low %v5293_v15, %v5297_v7 }
 0x4ab   :  { %v15087_v58 = vcombine.high %v5294_v59, %v5298_v55  ;;  %v15086_v39 = vcombine.low %v5294_v59, %v5298_v55 }
 0x4ac   :  { %9621 = vmatpush1.bf16.msra.mxu0 %v15052_v32  ;;  %v5301_v32 = vld [vmem:[#allocation7 + $0x10c0] sm:$0xff] }
 0x4ad   :  { %10059 = vmatpush1.bf16.msra.mxu1 %v15054_v51  ;;  %9622 = vmatprep.subr.bf16.mxu0 %v15061_v63  ;;  %v5305_v51 = vld [vmem:[#allocation7 + $0x10e0] sm:$0xff]  ;;  %v5302_v63 = vld [vmem:[#allocation7 + $0x10c8] sm:$0xff] }
 0x4ae   :  { %10060 = vmatprep.subr.bf16.mxu1 %v15063_v45  ;;  %v5306_v45 = vld [vmem:[#allocation7 + $0x10e8] sm:$0xff]  ;;  %v15093_v20 = vcombine.high %v5301_v32, %v5305_v51  ;;  %v15092_v37 = vcombine.low %v5301_v32, %v5305_v51 }
 0x4af   :  { %v15095_v10 = vcombine.high %v5302_v63, %v5306_v45  ;;  %v15094_v48 = vcombine.low %v5302_v63, %v5306_v45 }
 0x4b0   :  { %9623 = vmatpush1.bf16.msra.mxu0 %v15060_v46  ;;  %v5309_v46 = vld [vmem:[#allocation7 + $0x1100] sm:$0xff] }
 0x4b1   :  { %10061 = vmatpush1.bf16.msra.mxu1 %v15062_v21  ;;  %9665 = vmatprep.subr.bf16.mxu0 %v15069_v36  ;;  %v5313_v21 = vld [vmem:[#allocation7 + $0x1120] sm:$0xff]  ;;  %v5310_v36 = vld [vmem:[#allocation7 + $0x1108] sm:$0xff] }
 0x4b2   :  { %10103 = vmatprep.subr.bf16.mxu1 %v15071_v47  ;;  %v5314_v47 = vld [vmem:[#allocation7 + $0x1128] sm:$0xff]  ;;  %v15101_v52 = vcombine.high %v5309_v46, %v5313_v21  ;;  %v15100_v15 = vcombine.low %v5309_v46, %v5313_v21 }
 0x4b3   :  { %9625 = vmatmul.mubr.bf16.vlgmr.msra.gmra.mrb[72].mxu0 %v18857_v43  ;;  %v15103_v53 = vcombine.high %v5310_v36, %v5314_v47  ;;  %v15102_v7 = vcombine.low %v5310_v36, %v5314_v47 }
 0x4b4   :  { %10063 = vmatmul.mubr.bf16.vlgmr.msra.gmra.mrb[88].mxu1 %v18857_v43  ;;  %9634 = vmatprep.mubr.bf16.mxu0 %v18931_v22 }
 0x4b5   :  { %9666 = vmatpush1.bf16.msra.mxu0 %v15068_v1  ;;  %10072 = vmatprep.mubr.bf16.mxu1 %v18931_v22  ;;  %v5317_v1 = vld [vmem:[#allocation7 + $0x1140] sm:$0xff] }
 0x4b6   :  { %10104 = vmatpush1.bf16.msra.mxu1 %v15070_v25  ;;  %9667 = vmatprep.subr.bf16.mxu0 %v15077_v54  ;;  %v5321_v25 = vld [vmem:[#allocation7 + $0x1160] sm:$0xff]  ;;  %v5318_v54 = vld [vmem:[#allocation7 + $0x1148] sm:$0xff] }
 0x4b7   :  { %10105 = vmatprep.subr.bf16.mxu1 %v15079_v27  ;;  %v5322_v27 = vld [vmem:[#allocation7 + $0x1168] sm:$0xff]  ;;  %v15109_v59 = vcombine.high %v5317_v1, %v5321_v25  ;;  %v15108_v32 = vcombine.low %v5317_v1, %v5321_v25 }
 0x4b8   :  { %v15111_v55 = vcombine.high %v5318_v54, %v5322_v27  ;;  %v15110_v51 = vcombine.low %v5318_v54, %v5322_v27 }
 0x4b9   :  { %9668 = vmatpush1.bf16.msra.mxu0 %v15076_v8  ;;  %v5325_v8 = vld [vmem:[#allocation7 + $0x1180] sm:$0xff] }
 0x4ba   :  { %10106 = vmatpush1.bf16.msra.mxu1 %v15078_v17  ;;  %9669 = vmatprep.subr.bf16.mxu0 %v15085_v23  ;;  %v5329_v17 = vld [vmem:[#allocation7 + $0x11a0] sm:$0xff]  ;;  %v5326_v23 = vld [vmem:[#allocation7 + $0x1188] sm:$0xff] }
 0x4bb   :  { %9635 = vmatmul.mubr.bf16.gmra.mrb[76].mxu0 %v18927_v14  ;;  %10107 = vmatprep.subr.bf16.mxu1 %v15087_v58  ;;  %v5330_v58 = vld [vmem:[#allocation7 + $0x11a8] sm:$0xff]  ;;  %v15117_v63 = vcombine.high %v5325_v8, %v5329_v17  ;;  %v15116_v46 = vcombine.low %v5325_v8, %v5329_v17 }
 0x4bc   :  { %10073 = vmatmul.mubr.bf16.gmra.mrb[92].mxu1 %v18927_v14  ;;  %9644 = vmatprep.mubr.bf16.mxu0 %v19032_v62  ;;  %v15119_v45 = vcombine.high %v5326_v23, %v5330_v58  ;;  %v15118_v21 = vcombine.low %v5326_v23, %v5330_v58 }
 0x4bd   :  { %9670 = vmatpush1.bf16.msra.mxu0 %v15084_v3  ;;  %10082 = vmatprep.mubr.bf16.mxu1 %v19032_v62  ;;  %v5333_v3 = vld [vmem:[#allocation7 + $0x11c0] sm:$0xff] }
 0x4be   :  { %10108 = vmatpush1.bf16.msra.mxu1 %v15086_v39  ;;  %9671 = vmatprep.subr.bf16.mxu0 %v15093_v20  ;;  %v5337_v39 = vld [vmem:[#allocation7 + $0x11e0] sm:$0xff]  ;;  %v5334_v20 = vld [vmem:[#allocation7 + $0x11c8] sm:$0xff] }
 0x4bf   :  { %10109 = vmatprep.subr.bf16.mxu1 %v15095_v10  ;;  %v5338_v10 = vld [vmem:[#allocation7 + $0x11e8] sm:$0xff]  ;;  %v15125_v36 = vcombine.high %v5333_v3, %v5337_v39  ;;  %v15124_v1 = vcombine.low %v5333_v3, %v5337_v39 }
 0x4c0   :  { %v15127_v47 = vcombine.high %v5334_v20, %v5338_v10  ;;  %v15126_v25 = vcombine.low %v5334_v20, %v5338_v10 }
 0x4c1   :  { %9672 = vmatpush1.bf16.msra.mxu0 %v15092_v37  ;;  %v5341_v37 = vld [vmem:[#allocation7 + $0x1200] sm:$0xff] }
 0x4c2   :  { %10110 = vmatpush1.bf16.msra.mxu1 %v15094_v48  ;;  %9673 = vmatprep.subr.bf16.mxu0 %v15101_v52  ;;  %v5345_v48 = vld [vmem:[#allocation7 + $0x1220] sm:$0xff]  ;;  %v5342_v52 = vld [vmem:[#allocation7 + $0x1208] sm:$0xff] }
 0x4c3   :  { %9645 = vmatmul.mubr.bf16.gmra.mrb[80].mxu0 %v19020_v49  ;;  %10111 = vmatprep.subr.bf16.mxu1 %v15103_v53  ;;  %v5346_v53 = vld [vmem:[#allocation7 + $0x1228] sm:$0xff]  ;;  %v15133_v54 = vcombine.high %v5341_v37, %v5345_v48  ;;  %v15132_v8 = vcombine.low %v5341_v37, %v5345_v48 }
 0x4c4   :  { %10083 = vmatmul.mubr.bf16.gmra.mrb[96].mxu1 %v19020_v49  ;;  %9654 = vmatprep.mubr.bf16.mxu0 %v19072_v56  ;;  %v15135_v27 = vcombine.high %v5342_v52, %v5346_v53  ;;  %v15134_v17 = vcombine.low %v5342_v52, %v5346_v53 }
 0x4c5   :  { %9674 = vmatpush1.bf16.msra.mxu0 %v15100_v15  ;;  %10092 = vmatprep.mubr.bf16.mxu1 %v19072_v56  ;;  %v5349_v15 = vld [vmem:[#allocation7 + $0x1240] sm:$0xff] }
 0x4c6   :  { %10112 = vmatpush1.bf16.msra.mxu1 %v15102_v7  ;;  %9675 = vmatprep.subr.bf16.mxu0 %v15109_v59  ;;  %v5353_v7 = vld [vmem:[#allocation7 + $0x1260] sm:$0xff]  ;;  %v5350_v59 = vld [vmem:[#allocation7 + $0x1248] sm:$0xff] }
 0x4c7   :  { %10113 = vmatprep.subr.bf16.mxu1 %v15111_v55  ;;  %v5354_v55 = vld [vmem:[#allocation7 + $0x1268] sm:$0xff]  ;;  %v15141_v23 = vcombine.high %v5349_v15, %v5353_v7  ;;  %v15140_v3 = vcombine.low %v5349_v15, %v5353_v7 }
 0x4c8   :  { %v15143_v58 = vcombine.high %v5350_v59, %v5354_v55  ;;  %v15142_v39 = vcombine.low %v5350_v59, %v5354_v55 }
 0x4c9   :  { %9676 = vmatpush1.bf16.msra.mxu0 %v15108_v32  ;;  %v5357_v32 = vld [vmem:[#allocation7 + $0x1280] sm:$0xff] }
 0x4ca   :  { %10114 = vmatpush1.bf16.msra.mxu1 %v15110_v51  ;;  %9677 = vmatprep.subr.bf16.mxu0 %v15117_v63  ;;  %v5361_v51 = vld [vmem:[#allocation7 + $0x12a0] sm:$0xff]  ;;  %v5358_v63 = vld [vmem:[#allocation7 + $0x1288] sm:$0xff] }
 0x4cb   :  { %9655 = vmatmul.mubr.bf16.gmra.mrb[84].mxu0 %v19068_v9  ;;  %10115 = vmatprep.subr.bf16.mxu1 %v15119_v45  ;;  %v5362_v45 = vld [vmem:[#allocation7 + $0x12a8] sm:$0xff]  ;;  %v15149_v20 = vcombine.high %v5357_v32, %v5361_v51  ;;  %v15148_v37 = vcombine.low %v5357_v32, %v5361_v51 }
 0x4cc   :  { %10093 = vmatmul.mubr.bf16.gmra.mrb[100].mxu1 %v19068_v9  ;;  %9697 = vmatprep.mubr.bf16.mxu0 %v18929_v18  ;;  %v15151_v10 = vcombine.high %v5358_v63, %v5362_v45  ;;  %v15150_v48 = vcombine.low %v5358_v63, %v5362_v45 }
 0x4cd   :  { %9678 = vmatpush1.bf16.msra.mxu0 %v15116_v46  ;;  %10135 = vmatprep.mubr.bf16.mxu1 %v18929_v18  ;;  %v5365_v46 = vld [vmem:[#allocation7 + $0x12c0] sm:$0xff] }
 0x4ce   :  { %10116 = vmatpush1.bf16.msra.mxu1 %v15118_v21  ;;  %9679 = vmatprep.subr.bf16.mxu0 %v15125_v36  ;;  %v5369_v21 = vld [vmem:[#allocation7 + $0x12e0] sm:$0xff]  ;;  %v5366_v36 = vld [vmem:[#allocation7 + $0x12c8] sm:$0xff] }
 0x4cf   :  { %10117 = vmatprep.subr.bf16.mxu1 %v15127_v47  ;;  %v5370_v47 = vld [vmem:[#allocation7 + $0x12e8] sm:$0xff]  ;;  %v15157_v52 = vcombine.high %v5365_v46, %v5369_v21  ;;  %v15156_v15 = vcombine.low %v5365_v46, %v5369_v21 }
 0x4d0   :  { %v15159_v53 = vcombine.high %v5366_v36, %v5370_v47  ;;  %v15158_v7 = vcombine.low %v5366_v36, %v5370_v47 }
 0x4d1   :  { %9680 = vmatpush1.bf16.msra.mxu0 %v15124_v1  ;;  %v5373_v1 = vld [vmem:[#allocation7 + $0x1300] sm:$0xff] }
 0x4d2   :  { %10118 = vmatpush1.bf16.msra.mxu1 %v15126_v25  ;;  %9681 = vmatprep.subr.bf16.mxu0 %v15133_v54  ;;  %v5377_v25 = vld [vmem:[#allocation7 + $0x1320] sm:$0xff]  ;;  %v5374_v54 = vld [vmem:[#allocation7 + $0x1308] sm:$0xff] }
 0x4d3   :  { %10119 = vmatprep.subr.bf16.mxu1 %v15135_v27  ;;  %v5378_v27 = vld [vmem:[#allocation7 + $0x1328] sm:$0xff]  ;;  %v15165_v59 = vcombine.high %v5373_v1, %v5377_v25  ;;  %v15164_v32 = vcombine.low %v5373_v1, %v5377_v25 }
 0x4d4   :  { %v15167_v55 = vcombine.high %v5374_v54, %v5378_v27  ;;  %v15166_v51 = vcombine.low %v5374_v54, %v5378_v27 }
 0x4d5   :  { %9682 = vmatpush1.bf16.msra.mxu0 %v15132_v8  ;;  %v5381_v8 = vld [vmem:[#allocation7 + $0x1340] sm:$0xff] }
 0x4d6   :  { %10120 = vmatpush1.bf16.msra.mxu1 %v15134_v17  ;;  %9683 = vmatprep.subr.bf16.mxu0 %v15141_v23  ;;  %v5385_v17 = vld [vmem:[#allocation7 + $0x1360] sm:$0xff]  ;;  %v5382_v23 = vld [vmem:[#allocation7 + $0x1348] sm:$0xff] }
 0x4d7   :  { %10121 = vmatprep.subr.bf16.mxu1 %v15143_v58  ;;  %v5386_v58 = vld [vmem:[#allocation7 + $0x1368] sm:$0xff]  ;;  %v15173_v63 = vcombine.high %v5381_v8, %v5385_v17  ;;  %v15172_v46 = vcombine.low %v5381_v8, %v5385_v17 }
 0x4d8   :  { %v15175_v45 = vcombine.high %v5382_v23, %v5386_v58  ;;  %v15174_v21 = vcombine.low %v5382_v23, %v5386_v58 }
 0x4d9   :  { %9684 = vmatpush1.bf16.msra.mxu0 %v15140_v3  ;;  %v5389_v3 = vld [vmem:[#allocation7 + $0x1380] sm:$0xff] }
 0x4da   :  { %10122 = vmatpush1.bf16.msra.mxu1 %v15142_v39  ;;  %9685 = vmatprep.subr.bf16.mxu0 %v15149_v20  ;;  %v5393_v39 = vld [vmem:[#allocation7 + $0x13a0] sm:$0xff]  ;;  %v5390_v20 = vld [vmem:[#allocation7 + $0x1388] sm:$0xff] }
 0x4db   :  { %10123 = vmatprep.subr.bf16.mxu1 %v15151_v10  ;;  %v5394_v10 = vld [vmem:[#allocation7 + $0x13a8] sm:$0xff]  ;;  %v15181_v36 = vcombine.high %v5389_v3, %v5393_v39  ;;  %v15180_v1 = vcombine.low %v5389_v3, %v5393_v39 }
 0x4dc   :  { %v15183_v47 = vcombine.high %v5390_v20, %v5394_v10  ;;  %v15182_v25 = vcombine.low %v5390_v20, %v5394_v10 }
 0x4dd   :  { %9686 = vmatpush1.bf16.msra.mxu0 %v15148_v37  ;;  %v5397_v37 = vld [vmem:[#allocation7 + $0x13c0] sm:$0xff] }
 0x4de   :  { %10124 = vmatpush1.bf16.msra.mxu1 %v15150_v48  ;;  %9687 = vmatprep.subr.bf16.mxu0 %v15157_v52  ;;  %v5401_v48 = vld [vmem:[#allocation7 + $0x13e0] sm:$0xff]  ;;  %v5398_v52 = vld [vmem:[#allocation7 + $0x13c8] sm:$0xff] }
 0x4df   :  { %10125 = vmatprep.subr.bf16.mxu1 %v15159_v53  ;;  %v5402_v53 = vld [vmem:[#allocation7 + $0x13e8] sm:$0xff]  ;;  %v15189_v54 = vcombine.high %v5397_v37, %v5401_v48  ;;  %v15188_v8 = vcombine.low %v5397_v37, %v5401_v48 }
 0x4e0   :  { %v15191_v27 = vcombine.high %v5398_v52, %v5402_v53  ;;  %v15190_v17 = vcombine.low %v5398_v52, %v5402_v53 }
 0x4e1   :  { %9688 = vmatpush1.bf16.msra.mxu0 %v15156_v15  ;;  %v5405_v15 = vld [vmem:[#allocation7 + $0x1400] sm:$0xff] }
 0x4e2   :  { %10126 = vmatpush1.bf16.msra.mxu1 %v15158_v7  ;;  %9689 = vmatprep.subr.bf16.mxu0 %v15165_v59  ;;  %v5409_v7 = vld [vmem:[#allocation7 + $0x1420] sm:$0xff]  ;;  %v5406_v59 = vld [vmem:[#allocation7 + $0x1408] sm:$0xff] }
 0x4e3   :  { %10127 = vmatprep.subr.bf16.mxu1 %v15167_v55  ;;  %v5410_v55 = vld [vmem:[#allocation7 + $0x1428] sm:$0xff]  ;;  %v15197_v23 = vcombine.high %v5405_v15, %v5409_v7  ;;  %v15196_v3 = vcombine.low %v5405_v15, %v5409_v7 }
 0x4e4   :  { %v15199_v58 = vcombine.high %v5406_v59, %v5410_v55  ;;  %v15198_v39 = vcombine.low %v5406_v59, %v5410_v55 }
 0x4e5   :  { %9690 = vmatpush1.bf16.msra.mxu0 %v15164_v32  ;;  %v5413_v32 = vld [vmem:[#allocation7 + $0x1440] sm:$0xff] }
 0x4e6   :  { %10128 = vmatpush1.bf16.msra.mxu1 %v15166_v51  ;;  %9691 = vmatprep.subr.bf16.mxu0 %v15173_v63  ;;  %v5417_v51 = vld [vmem:[#allocation7 + $0x1460] sm:$0xff]  ;;  %v5414_v63 = vld [vmem:[#allocation7 + $0x1448] sm:$0xff] }
 0x4e7   :  { %10129 = vmatprep.subr.bf16.mxu1 %v15175_v45  ;;  %v5418_v45 = vld [vmem:[#allocation7 + $0x1468] sm:$0xff]  ;;  %v15205_v20 = vcombine.high %v5413_v32, %v5417_v51  ;;  %v15204_v37 = vcombine.low %v5413_v32, %v5417_v51 }
 0x4e8   :  { %v15207_v10 = vcombine.high %v5414_v63, %v5418_v45  ;;  %v15206_v48 = vcombine.low %v5414_v63, %v5418_v45 }
 0x4e9   :  { %9692 = vmatpush1.bf16.msra.mxu0 %v15172_v46  ;;  %v5421_v46 = vld [vmem:[#allocation7 + $0x1480] sm:$0xff] }
 0x4ea   :  { %10130 = vmatpush1.bf16.msra.mxu1 %v15174_v21  ;;  %9693 = vmatprep.subr.bf16.mxu0 %v15181_v36  ;;  %v5425_v21 = vld [vmem:[#allocation7 + $0x14a0] sm:$0xff]  ;;  %v5422_v36 = vld [vmem:[#allocation7 + $0x1488] sm:$0xff] }
 0x4eb   :  { %10131 = vmatprep.subr.bf16.mxu1 %v15183_v47  ;;  %v5426_v47 = vld [vmem:[#allocation7 + $0x14a8] sm:$0xff]  ;;  %v15213_v52 = vcombine.high %v5421_v46, %v5425_v21  ;;  %v15212_v15 = vcombine.low %v5421_v46, %v5425_v21 }
 0x4ec   :  { %v15215_v53 = vcombine.high %v5422_v36, %v5426_v47  ;;  %v15214_v7 = vcombine.low %v5422_v36, %v5426_v47 }
 0x4ed   :  { %9694 = vmatpush1.bf16.msra.mxu0 %v15180_v1  ;;  %v5429_v1 = vld [vmem:[#allocation7 + $0x14c0] sm:$0xff] }
 0x4ee   :  { %10132 = vmatpush1.bf16.msra.mxu1 %v15182_v25  ;;  %9695 = vmatprep.subr.bf16.mxu0 %v15189_v54  ;;  %v5433_v25 = vld [vmem:[#allocation7 + $0x14e0] sm:$0xff]  ;;  %v5430_v54 = vld [vmem:[#allocation7 + $0x14c8] sm:$0xff] }
 0x4ef   :  { %10133 = vmatprep.subr.bf16.mxu1 %v15191_v27  ;;  %v5434_v27 = vld [vmem:[#allocation7 + $0x14e8] sm:$0xff]  ;;  %v15221_v59 = vcombine.high %v5429_v1, %v5433_v25  ;;  %v15220_v32 = vcombine.low %v5429_v1, %v5433_v25 }
 0x4f0   :  { %v15223_v55 = vcombine.high %v5430_v54, %v5434_v27  ;;  %v15222_v51 = vcombine.low %v5430_v54, %v5434_v27 }
 0x4f1   :  { %9696 = vmatpush1.bf16.msra.mxu0 %v15188_v8  ;;  %v5437_v8 = vld [vmem:[#allocation7 + $0x1500] sm:$0xff] }
 0x4f2   :  { %10134 = vmatpush1.bf16.msra.mxu1 %v15190_v17  ;;  %9738 = vmatprep.subr.bf16.mxu0 %v15197_v23  ;;  %v5441_v17 = vld [vmem:[#allocation7 + $0x1520] sm:$0xff]  ;;  %v5438_v23 = vld [vmem:[#allocation7 + $0x1508] sm:$0xff] }
 0x4f3   :  { %10176 = vmatprep.subr.bf16.mxu1 %v15199_v58  ;;  %v5442_v58 = vld [vmem:[#allocation7 + $0x1528] sm:$0xff]  ;;  %v15229_v63 = vcombine.high %v5437_v8, %v5441_v17  ;;  %v15228_v46 = vcombine.low %v5437_v8, %v5441_v17 }
 0x4f4   :  { %9698 = vmatmul.mubr.bf16.vlgmr.msra.gmra.mrb[72].mxu0 %v18921_v2  ;;  %v15231_v45 = vcombine.high %v5438_v23, %v5442_v58  ;;  %v15230_v21 = vcombine.low %v5438_v23, %v5442_v58 }
 0x4f5   :  { %10136 = vmatmul.mubr.bf16.vlgmr.msra.gmra.mrb[88].mxu1 %v18921_v2  ;;  %9707 = vmatprep.mubr.bf16.mxu0 %v19110_v33 }
 0x4f6   :  { %9739 = vmatpush1.bf16.msra.mxu0 %v15196_v3  ;;  %10145 = vmatprep.mubr.bf16.mxu1 %v19110_v33  ;;  %v5445_v3 = vld [vmem:[#allocation7 + $0x1540] sm:$0xff] }
 0x4f7   :  { %10177 = vmatpush1.bf16.msra.mxu1 %v15198_v39  ;;  %9740 = vmatprep.subr.bf16.mxu0 %v15205_v20  ;;  %v5449_v39 = vld [vmem:[#allocation7 + $0x1560] sm:$0xff]  ;;  %v5446_v20 = vld [vmem:[#allocation7 + $0x1548] sm:$0xff] }
 0x4f8   :  { %10178 = vmatprep.subr.bf16.mxu1 %v15207_v10  ;;  %v5450_v10 = vld [vmem:[#allocation7 + $0x1568] sm:$0xff]  ;;  %v15237_v36 = vcombine.high %v5445_v3, %v5449_v39  ;;  %v15236_v1 = vcombine.low %v5445_v3, %v5449_v39 }
 0x4f9   :  { %v15239_v47 = vcombine.high %v5446_v20, %v5450_v10  ;;  %v15238_v25 = vcombine.low %v5446_v20, %v5450_v10 }
 0x4fa   :  { %9741 = vmatpush1.bf16.msra.mxu0 %v15204_v37  ;;  %v5453_v37 = vld [vmem:[#allocation7 + $0x1580] sm:$0xff] }
 0x4fb   :  { %10179 = vmatpush1.bf16.msra.mxu1 %v15206_v48  ;;  %9742 = vmatprep.subr.bf16.mxu0 %v15213_v52  ;;  %v5457_v48 = vld [vmem:[#allocation7 + $0x15a0] sm:$0xff]  ;;  %v5454_v52 = vld [vmem:[#allocation7 + $0x1588] sm:$0xff] }
 0x4fc   :  { %9708 = vmatmul.mubr.bf16.gmra.mrb[76].mxu0 %v19108_v16  ;;  %10180 = vmatprep.subr.bf16.mxu1 %v15215_v53  ;;  %v5458_v53 = vld [vmem:[#allocation7 + $0x15a8] sm:$0xff]  ;;  %v15245_v54 = vcombine.high %v5453_v37, %v5457_v48  ;;  %v15244_v8 = vcombine.low %v5453_v37, %v5457_v48 }
 0x4fd   :  { %10146 = vmatmul.mubr.bf16.gmra.mrb[92].mxu1 %v19108_v16  ;;  %9717 = vmatprep.mubr.bf16.mxu0 %v19070_v11  ;;  %v15247_v27 = vcombine.high %v5454_v52, %v5458_v53  ;;  %v15246_v17 = vcombine.low %v5454_v52, %v5458_v53 }
 0x4fe   :  { %9743 = vmatpush1.bf16.msra.mxu0 %v15212_v15  ;;  %10155 = vmatprep.mubr.bf16.mxu1 %v19070_v11  ;;  %v5461_v15 = vld [vmem:[#allocation7 + $0x15c0] sm:$0xff] }
 0x4ff   :  { %10181 = vmatpush1.bf16.msra.mxu1 %v15214_v7  ;;  %9744 = vmatprep.subr.bf16.mxu0 %v15221_v59  ;;  %v5465_v7 = vld [vmem:[#allocation7 + $0x15e0] sm:$0xff]  ;;  %v5462_v59 = vld [vmem:[#allocation7 + $0x15c8] sm:$0xff] }
 0x500   :  { %10182 = vmatprep.subr.bf16.mxu1 %v15223_v55  ;;  %v5466_v55 = vld [vmem:[#allocation7 + $0x15e8] sm:$0xff]  ;;  %v15253_v23 = vcombine.high %v5461_v15, %v5465_v7  ;;  %v15252_v3 = vcombine.low %v5461_v15, %v5465_v7 }
 0x501   :  { %v15255_v58 = vcombine.high %v5462_v59, %v5466_v55  ;;  %v15254_v39 = vcombine.low %v5462_v59, %v5466_v55 }
 0x502   :  { %9745 = vmatpush1.bf16.msra.mxu0 %v15220_v32  ;;  %v5469_v32 = vld [vmem:[#allocation7 + $0x1600] sm:$0xff] }
 0x503   :  { %10183 = vmatpush1.bf16.msra.mxu1 %v15222_v51  ;;  %9746 = vmatprep.subr.bf16.mxu0 %v15229_v63  ;;  %v5473_v51 = vld [vmem:[#allocation7 + $0x1620] sm:$0xff]  ;;  %v5470_v63 = vld [vmem:[#allocation7 + $0x1608] sm:$0xff] }
 0x504   :  { %9718 = vmatmul.mubr.bf16.gmra.mrb[80].mxu0 %v19065_v50  ;;  %10184 = vmatprep.subr.bf16.mxu1 %v15231_v45  ;;  %v5474_v45 = vld [vmem:[#allocation7 + $0x1628] sm:$0xff]  ;;  %v15261_v20 = vcombine.high %v5469_v32, %v5473_v51  ;;  %v15260_v37 = vcombine.low %v5469_v32, %v5473_v51 }
 0x505   :  { %10156 = vmatmul.mubr.bf16.gmra.mrb[96].mxu1 %v19065_v50  ;;  %9727 = vmatprep.mubr.bf16.mxu0 %v19132_v13  ;;  %v15263_v10 = vcombine.high %v5470_v63, %v5474_v45  ;;  %v15262_v48 = vcombine.low %v5470_v63, %v5474_v45 }
 0x506   :  { %9747 = vmatpush1.bf16.msra.mxu0 %v15228_v46  ;;  %10165 = vmatprep.mubr.bf16.mxu1 %v19132_v13  ;;  %v5477_v46 = vld [vmem:[#allocation7 + $0x1640] sm:$0xff] }
 0x507   :  { %10185 = vmatpush1.bf16.msra.mxu1 %v15230_v21  ;;  %9748 = vmatprep.subr.bf16.mxu0 %v15237_v36  ;;  %v5481_v21 = vld [vmem:[#allocation7 + $0x1660] sm:$0xff]  ;;  %v5478_v36 = vld [vmem:[#allocation7 + $0x1648] sm:$0xff] }
 0x508   :  { %10186 = vmatprep.subr.bf16.mxu1 %v15239_v47  ;;  %v5482_v47 = vld [vmem:[#allocation7 + $0x1668] sm:$0xff]  ;;  %v15269_v52 = vcombine.high %v5477_v46, %v5481_v21  ;;  %v15268_v15 = vcombine.low %v5477_v46, %v5481_v21 }
 0x509   :  { %v15271_v53 = vcombine.high %v5478_v36, %v5482_v47  ;;  %v15270_v7 = vcombine.low %v5478_v36, %v5482_v47 }
 0x50a   :  { %9749 = vmatpush1.bf16.msra.mxu0 %v15236_v1  ;;  %v5485_v1 = vld [vmem:[#allocation7 + $0x1680] sm:$0xff] }
 0x50b   :  { %10187 = vmatpush1.bf16.msra.mxu1 %v15238_v25  ;;  %9750 = vmatprep.subr.bf16.mxu0 %v15245_v54  ;;  %v5489_v25 = vld [vmem:[#allocation7 + $0x16a0] sm:$0xff]  ;;  %v5486_v54 = vld [vmem:[#allocation7 + $0x1688] sm:$0xff] }
 0x50c   :  { %9728 = vmatmul.mubr.bf16.gmra.mrb[84].mxu0 %v19130_v57  ;;  %10188 = vmatprep.subr.bf16.mxu1 %v15247_v27  ;;  %v5490_v27 = vld [vmem:[#allocation7 + $0x16a8] sm:$0xff]  ;;  %v15277_v59 = vcombine.high %v5485_v1, %v5489_v25  ;;  %v15276_v32 = vcombine.low %v5485_v1, %v5489_v25 }
 0x50d   :  { %10166 = vmatmul.mubr.bf16.gmra.mrb[100].mxu1 %v19130_v57  ;;  %9770 = vmatprep.mubr.bf16.mxu0 %v18931_v22  ;;  %v15279_v55 = vcombine.high %v5486_v54, %v5490_v27  ;;  %v15278_v51 = vcombine.low %v5486_v54, %v5490_v27 }
 0x50e   :  { %9751 = vmatpush1.bf16.msra.mxu0 %v15244_v8  ;;  %10208 = vmatprep.mubr.bf16.mxu1 %v18931_v22  ;;  %v5493_v8 = vld [vmem:[#allocation7 + $0x16c0] sm:$0xff] }
 0x50f   :  { %10189 = vmatpush1.bf16.msra.mxu1 %v15246_v17  ;;  %9752 = vmatprep.subr.bf16.mxu0 %v15253_v23  ;;  %v5497_v17 = vld [vmem:[#allocation7 + $0x16e0] sm:$0xff]  ;;  %v5494_v23 = vld [vmem:[#allocation7 + $0x16c8] sm:$0xff] }
 0x510   :  { %10190 = vmatprep.subr.bf16.mxu1 %v15255_v58  ;;  %v5498_v58 = vld [vmem:[#allocation7 + $0x16e8] sm:$0xff]  ;;  %v15285_v63 = vcombine.high %v5493_v8, %v5497_v17  ;;  %v15284_v46 = vcombine.low %v5493_v8, %v5497_v17 }
 0x511   :  { %v15287_v45 = vcombine.high %v5494_v23, %v5498_v58  ;;  %v15286_v21 = vcombine.low %v5494_v23, %v5498_v58 }
 0x512   :  { %9753 = vmatpush1.bf16.msra.mxu0 %v15252_v3  ;;  %v5501_v3 = vld [vmem:[#allocation7 + $0x1700] sm:$0xff] }
 0x513   :  { %10191 = vmatpush1.bf16.msra.mxu1 %v15254_v39  ;;  %9754 = vmatprep.subr.bf16.mxu0 %v15261_v20  ;;  %v5505_v39 = vld [vmem:[#allocation7 + $0x1720] sm:$0xff]  ;;  %v5502_v20 = vld [vmem:[#allocation7 + $0x1708] sm:$0xff] }
 0x514   :  { %10192 = vmatprep.subr.bf16.mxu1 %v15263_v10  ;;  %v5506_v10 = vld [vmem:[#allocation7 + $0x1728] sm:$0xff]  ;;  %v15293_v36 = vcombine.high %v5501_v3, %v5505_v39  ;;  %v15292_v1 = vcombine.low %v5501_v3, %v5505_v39 }
 0x515   :  { %v15295_v47 = vcombine.high %v5502_v20, %v5506_v10  ;;  %v15294_v25 = vcombine.low %v5502_v20, %v5506_v10 }
 0x516   :  { %9755 = vmatpush1.bf16.msra.mxu0 %v15260_v37  ;;  %v5509_v37 = vld [vmem:[#allocation7 + $0x1740] sm:$0xff] }
 0x517   :  { %10193 = vmatpush1.bf16.msra.mxu1 %v15262_v48  ;;  %9756 = vmatprep.subr.bf16.mxu0 %v15269_v52  ;;  %v5513_v48 = vld [vmem:[#allocation7 + $0x1760] sm:$0xff]  ;;  %v5510_v52 = vld [vmem:[#allocation7 + $0x1748] sm:$0xff] }
 0x518   :  { %10194 = vmatprep.subr.bf16.mxu1 %v15271_v53  ;;  %v5514_v53 = vld [vmem:[#allocation7 + $0x1768] sm:$0xff]  ;;  %v15301_v54 = vcombine.high %v5509_v37, %v5513_v48  ;;  %v15300_v8 = vcombine.low %v5509_v37, %v5513_v48 }
 0x519   :  { %v15303_v27 = vcombine.high %v5510_v52, %v5514_v53  ;;  %v15302_v17 = vcombine.low %v5510_v52, %v5514_v53 }
 0x51a   :  { %9757 = vmatpush1.bf16.msra.mxu0 %v15268_v15  ;;  %v5517_v15 = vld [vmem:[#allocation7 + $0x1780] sm:$0xff] }
 0x51b   :  { %10195 = vmatpush1.bf16.msra.mxu1 %v15270_v7  ;;  %9758 = vmatprep.subr.bf16.mxu0 %v15277_v59  ;;  %v5521_v7 = vld [vmem:[#allocation7 + $0x17a0] sm:$0xff]  ;;  %v5518_v59 = vld [vmem:[#allocation7 + $0x1788] sm:$0xff] }
 0x51c   :  { %10196 = vmatprep.subr.bf16.mxu1 %v15279_v55  ;;  %v5522_v55 = vld [vmem:[#allocation7 + $0x17a8] sm:$0xff]  ;;  %v15309_v23 = vcombine.high %v5517_v15, %v5521_v7  ;;  %v15308_v3 = vcombine.low %v5517_v15, %v5521_v7 }
 0x51d   :  { %v15311_v58 = vcombine.high %v5518_v59, %v5522_v55  ;;  %v15310_v39 = vcombine.low %v5518_v59, %v5522_v55 }
 0x51e   :  { %9759 = vmatpush1.bf16.msra.mxu0 %v15276_v32  ;;  %v5525_v32 = vld [vmem:[#allocation7 + $0x17c0] sm:$0xff] }
 0x51f   :  { %10197 = vmatpush1.bf16.msra.mxu1 %v15278_v51  ;;  %9760 = vmatprep.subr.bf16.mxu0 %v15285_v63  ;;  %v5529_v51 = vld [vmem:[#allocation7 + $0x17e0] sm:$0xff]  ;;  %v5526_v63 = vld [vmem:[#allocation7 + $0x17c8] sm:$0xff] }
 0x520   :  { %10198 = vmatprep.subr.bf16.mxu1 %v15287_v45  ;;  %v5530_v45 = vld [vmem:[#allocation7 + $0x17e8] sm:$0xff]  ;;  %v15317_v20 = vcombine.high %v5525_v32, %v5529_v51  ;;  %v15316_v37 = vcombine.low %v5525_v32, %v5529_v51 }
 0x521   :  { %v15319_v10 = vcombine.high %v5526_v63, %v5530_v45  ;;  %v15318_v48 = vcombine.low %v5526_v63, %v5530_v45 }
 0x522   :  { %9761 = vmatpush1.bf16.msra.mxu0 %v15284_v46  ;;  %v4767_v46 = vld [vmem:[#allocation7 + $0x10] sm:$0xff] }
 0x523   :  { %10199 = vmatpush1.bf16.msra.mxu1 %v15286_v21  ;;  %9762 = vmatprep.subr.bf16.mxu0 %v15293_v36  ;;  %v4771_v21 = vld [vmem:[#allocation7 + $0x30] sm:$0xff]  ;;  %v4768_v36 = vld [vmem:[#allocation7 + $0x18] sm:$0xff] }
 0x524   :  { %10200 = vmatprep.subr.bf16.mxu1 %v15295_v47  ;;  %v4772_v47 = vld [vmem:[#allocation7 + $0x38] sm:$0xff]  ;;  %v14561_v52 = vcombine.high %v4767_v46, %v4771_v21  ;;  %v14560_v15 = vcombine.low %v4767_v46, %v4771_v21 }
 0x525   :  { %v14563_v53 = vcombine.high %v4768_v36, %v4772_v47  ;;  %v14562_v7 = vcombine.low %v4768_v36, %v4772_v47 }
 0x526   :  { %9763 = vmatpush1.bf16.msra.mxu0 %v15292_v1  ;;  %v4775_v1 = vld [vmem:[#allocation7 + $0x50] sm:$0xff] }
 0x527   :  { %10201 = vmatpush1.bf16.msra.mxu1 %v15294_v25  ;;  %9764 = vmatprep.subr.bf16.mxu0 %v15301_v54  ;;  %v4779_v25 = vld [vmem:[#allocation7 + $0x70] sm:$0xff]  ;;  %v4776_v54 = vld [vmem:[#allocation7 + $0x58] sm:$0xff] }
 0x528   :  { %10202 = vmatprep.subr.bf16.mxu1 %v15303_v27  ;;  %v4780_v27 = vld [vmem:[#allocation7 + $0x78] sm:$0xff]  ;;  %v14569_v59 = vcombine.high %v4775_v1, %v4779_v25  ;;  %v14568_v32 = vcombine.low %v4775_v1, %v4779_v25 }
 0x529   :  { %v14571_v55 = vcombine.high %v4776_v54, %v4780_v27  ;;  %v14570_v51 = vcombine.low %v4776_v54, %v4780_v27 }
 0x52a   :  { %9765 = vmatpush1.bf16.msra.mxu0 %v15300_v8  ;;  %v4783_v8 = vld [vmem:[#allocation7 + $0x90] sm:$0xff] }
 0x52b   :  { %10203 = vmatpush1.bf16.msra.mxu1 %v15302_v17  ;;  %9766 = vmatprep.subr.bf16.mxu0 %v15309_v23  ;;  %v4787_v17 = vld [vmem:[#allocation7 + $0xb0] sm:$0xff]  ;;  %v4784_v23 = vld [vmem:[#allocation7 + $0x98] sm:$0xff] }
 0x52c   :  { %10204 = vmatprep.subr.bf16.mxu1 %v15311_v58  ;;  %v4788_v58 = vld [vmem:[#allocation7 + $0xb8] sm:$0xff]  ;;  %v14577_v63 = vcombine.high %v4783_v8, %v4787_v17  ;;  %v14576_v46 = vcombine.low %v4783_v8, %v4787_v17 }
 0x52d   :  { %v14579_v45 = vcombine.high %v4784_v23, %v4788_v58  ;;  %v14578_v21 = vcombine.low %v4784_v23, %v4788_v58 }
 0x52e   :  { %9767 = vmatpush1.bf16.msra.mxu0 %v15308_v3  ;;  %v4791_v3 = vld [vmem:[#allocation7 + $0xd0] sm:$0xff] }
 0x52f   :  { %10205 = vmatpush1.bf16.msra.mxu1 %v15310_v39  ;;  %9768 = vmatprep.subr.bf16.mxu0 %v15317_v20  ;;  %v4795_v39 = vld [vmem:[#allocation7 + $0xf0] sm:$0xff]  ;;  %v4792_v20 = vld [vmem:[#allocation7 + $0xd8] sm:$0xff] }
 0x530   :  { %10206 = vmatprep.subr.bf16.mxu1 %v15319_v10  ;;  %v4796_v10 = vld [vmem:[#allocation7 + $0xf8] sm:$0xff]  ;;  %v14585_v36 = vcombine.high %v4791_v3, %v4795_v39  ;;  %v14584_v1 = vcombine.low %v4791_v3, %v4795_v39 }
 0x531   :  { %v14587_v47 = vcombine.high %v4792_v20, %v4796_v10  ;;  %v14586_v25 = vcombine.low %v4792_v20, %v4796_v10 }
 0x532   :  { %9769 = vmatpush1.bf16.msra.mxu0 %v15316_v37  ;;  %v4799_v37 = vld [vmem:[#allocation7 + $0x110] sm:$0xff] }
 0x533   :  { %10207 = vmatpush1.bf16.msra.mxu1 %v15318_v48  ;;  %10249 = vmatprep.subr.bf16.mxu0 %v14561_v52  ;;  %v4803_v48 = vld [vmem:[#allocation7 + $0x130] sm:$0xff]  ;;  %v4800_v52 = vld [vmem:[#allocation7 + $0x118] sm:$0xff] }
 0x534   :  { %10687 = vmatprep.subr.bf16.mxu1 %v14563_v53  ;;  %v4804_v53 = vld [vmem:[#allocation7 + $0x138] sm:$0xff]  ;;  %v14593_v54 = vcombine.high %v4799_v37, %v4803_v48  ;;  %v14592_v8 = vcombine.low %v4799_v37, %v4803_v48 }
 0x535   :  { %9771 = vmatmul.mubr.bf16.vlgmr.msra.gmra.mrb[72].mxu0 %v18927_v14  ;;  %v14595_v27 = vcombine.high %v4800_v52, %v4804_v53  ;;  %v14594_v17 = vcombine.low %v4800_v52, %v4804_v53 }
 0x536   :  { %10209 = vmatmul.mubr.bf16.vlgmr.msra.gmra.mrb[88].mxu1 %v18927_v14  ;;  %9780 = vmatprep.mubr.bf16.mxu0 %v19114_v4 }
 0x537   :  { %10218 = vmatprep.mubr.bf16.mxu1 %v19114_v4  ;;  %10250 = vmatpush1.bf16.msra.mxu0 %v14560_v15  ;;  %v4807_v15 = vld [vmem:[#allocation7 + $0x150] sm:$0xff] }
 0x538   :  { %10688 = vmatpush1.bf16.msra.mxu1 %v14562_v7  ;;  %10251 = vmatprep.subr.bf16.mxu0 %v14569_v59  ;;  %v4811_v7 = vld [vmem:[#allocation7 + $0x170] sm:$0xff]  ;;  %v4808_v59 = vld [vmem:[#allocation7 + $0x158] sm:$0xff] }
 0x539   :  { %10689 = vmatprep.subr.bf16.mxu1 %v14571_v55  ;;  %v4812_v55 = vld [vmem:[#allocation7 + $0x178] sm:$0xff]  ;;  %v14601_v23 = vcombine.high %v4807_v15, %v4811_v7  ;;  %v14600_v3 = vcombine.low %v4807_v15, %v4811_v7 }
 0x53a   :  { %v14603_v58 = vcombine.high %v4808_v59, %v4812_v55  ;;  %v14602_v39 = vcombine.low %v4808_v59, %v4812_v55 }
 0x53b   :  { %10252 = vmatpush1.bf16.msra.mxu0 %v14568_v32  ;;  %v4815_v32 = vld [vmem:[#allocation7 + $0x190] sm:$0xff] }
 0x53c   :  { %10690 = vmatpush1.bf16.msra.mxu1 %v14570_v51  ;;  %10253 = vmatprep.subr.bf16.mxu0 %v14577_v63  ;;  %v4819_v51 = vld [vmem:[#allocation7 + $0x1b0] sm:$0xff]  ;;  %v4816_v63 = vld [vmem:[#allocation7 + $0x198] sm:$0xff] }
 0x53d   :  { %9781 = vmatmul.mubr.bf16.gmra.mrb[76].mxu0 %v19112_v60  ;;  %10691 = vmatprep.subr.bf16.mxu1 %v14579_v45  ;;  %v4820_v45 = vld [vmem:[#allocation7 + $0x1b8] sm:$0xff]  ;;  %v14609_v20 = vcombine.high %v4815_v32, %v4819_v51  ;;  %v14608_v37 = vcombine.low %v4815_v32, %v4819_v51 }
 0x53e   :  { %10219 = vmatmul.mubr.bf16.gmra.mrb[92].mxu1 %v19112_v60  ;;  %9790 = vmatprep.mubr.bf16.mxu0 %v19072_v56  ;;  %v14611_v10 = vcombine.high %v4816_v63, %v4820_v45  ;;  %v14610_v48 = vcombine.low %v4816_v63, %v4820_v45 }
 0x53f   :  { %10228 = vmatprep.mubr.bf16.mxu1 %v19072_v56  ;;  %10254 = vmatpush1.bf16.msra.mxu0 %v14576_v46  ;;  %v4823_v46 = vld [vmem:[#allocation7 + $0x1d0] sm:$0xff] }
 0x540   :  { %10692 = vmatpush1.bf16.msra.mxu1 %v14578_v21  ;;  %10255 = vmatprep.subr.bf16.mxu0 %v14585_v36  ;;  %v4827_v21 = vld [vmem:[#allocation7 + $0x1f0] sm:$0xff]  ;;  %v4824_v36 = vld [vmem:[#allocation7 + $0x1d8] sm:$0xff] }
 0x541   :  { %10693 = vmatprep.subr.bf16.mxu1 %v14587_v47  ;;  %v4828_v47 = vld [vmem:[#allocation7 + $0x1f8] sm:$0xff]  ;;  %v14617_v52 = vcombine.high %v4823_v46, %v4827_v21  ;;  %v14616_v15 = vcombine.low %v4823_v46, %v4827_v21 }
 0x542   :  { %v14619_v53 = vcombine.high %v4824_v36, %v4828_v47  ;;  %v14618_v7 = vcombine.low %v4824_v36, %v4828_v47  ;;  %v4855_v47 = vld [vmem:[#allocation7 + $0x2d0] sm:$0xff] }
 0x543   :  { %10256 = vmatpush1.bf16.msra.mxu0 %v14584_v1  ;;  %v4831_v1 = vld [vmem:[#allocation7 + $0x210] sm:$0xff] }
 0x544   :  { %10694 = vmatpush1.bf16.msra.mxu1 %v14586_v25  ;;  %10257 = vmatprep.subr.bf16.mxu0 %v14593_v54  ;;  %v4835_v25 = vld [vmem:[#allocation7 + $0x230] sm:$0xff]  ;;  %v4832_v54 = vld [vmem:[#allocation7 + $0x218] sm:$0xff] }
 0x545   :  { %9791 = vmatmul.mubr.bf16.gmra.mrb[80].mxu0 %v19068_v9  ;;  %10695 = vmatprep.subr.bf16.mxu1 %v14595_v27  ;;  %v4836_v27 = vld [vmem:[#allocation7 + $0x238] sm:$0xff]  ;;  %v14625_v59 = vcombine.high %v4831_v1, %v4835_v25  ;;  %v14624_v32 = vcombine.low %v4831_v1, %v4835_v25 }
 0x546   :  { %10229 = vmatmul.mubr.bf16.gmra.mrb[96].mxu1 %v19068_v9  ;;  %9800 = vmatprep.mubr.bf16.mxu0 %v19156_v6  ;;  %v14627_v55 = vcombine.high %v4832_v54, %v4836_v27  ;;  %v14626_v51 = vcombine.low %v4832_v54, %v4836_v27  ;;  %v4863_v27 = vld [vmem:[#allocation7 + $0x310] sm:$0xff] }
 0x547   :  { %10238 = vmatprep.mubr.bf16.mxu1 %v19156_v6  ;;  %10258 = vmatpush1.bf16.msra.mxu0 %v14592_v8  ;;  %v4839_v8 = vld [vmem:[#allocation7 + $0x250] sm:$0xff] }
 0x548   :  { %10696 = vmatpush1.bf16.msra.mxu1 %v14594_v17  ;;  %10259 = vmatprep.subr.bf16.mxu0 %v14601_v23  ;;  %v4843_v17 = vld [vmem:[#allocation7 + $0x270] sm:$0xff]  ;;  %v4840_v23 = vld [vmem:[#allocation7 + $0x258] sm:$0xff] }
 0x549   :  { %10697 = vmatprep.subr.bf16.mxu1 %v14603_v58  ;;  %v4844_v58 = vld [vmem:[#allocation7 + $0x278] sm:$0xff]  ;;  %v14633_v63 = vcombine.high %v4839_v8, %v4843_v17 }
 0x54a   :  { %v14635_v45 = vcombine.high %v4840_v23, %v4844_v58  ;;  %v14634_v46 = vcombine.low %v4840_v23, %v4844_v58  ;;  %v4871_v58 = vld [vmem:[#allocation7 + $0x350] sm:$0xff] }
 0x54b   :  { %10260 = vmatpush1.bf16.msra.mxu0 %v14600_v3  ;;  %v4851_v3 = vld [vmem:[#allocation7 + $0x2b0] sm:$0xff] }
 0x54c   :  { %10698 = vmatpush1.bf16.msra.mxu1 %v14602_v39  ;;  %10261 = vmatprep.subr.bf16.mxu0 %v14609_v20  ;;  %v4848_v39 = vld [vmem:[#allocation7 + $0x298] sm:$0xff] }
 0x54d   :  { %9801 = vmatmul.mubr.bf16.gmra.mrb[84].mxu0 %v19153_v61  ;;  %10699 = vmatprep.subr.bf16.mxu1 %v14611_v10  ;;  %v4852_v20 = vld [vmem:[#allocation7 + $0x2b8] sm:$0xff]  ;;  %v14632_v10 = vcombine.low %v4839_v8, %v4843_v17 }
 0x54e   :  { %10239 = vmatmul.mubr.bf16.gmra.mrb[100].mxu1 %v19153_v61  ;;  %10281 = vmatprep.mubr.bf16.mxu0 %v19094_v29  ;;  %v14643_v36 = vcombine.high %v4848_v39, %v4852_v20  ;;  %v14642_v1 = vcombine.low %v4848_v39, %v4852_v20  ;;  %v4879_v20 = vld [vmem:[#allocation7 + $0x390] sm:$0xff] }
 0x54f   :  { %10262 = vmatpush1.bf16.msra.mxu0 %v14608_v37  ;;  %10719 = vmatprep.mubr.bf16.mxu1 %v19094_v29  ;;  %v4847_v29 = vld [vmem:[#allocation7 + $0x290] sm:$0xff] }
 0x550   :  { %10700 = vmatpush1.bf16.msra.mxu1 %v14610_v48  ;;  %10263 = vmatprep.subr.bf16.mxu0 %v14617_v52  ;;  %v14641_v21 = vcombine.high %v4847_v29, %v4851_v3  ;;  %v4859_v37 = vld [vmem:[#allocation7 + $0x2f0] sm:$0xff]  ;;  %v4856_v48 = vld [vmem:[#allocation7 + $0x2d8] sm:$0xff] }
 0x551   :  { %10701 = vmatprep.subr.bf16.mxu1 %v14619_v53  ;;  %v4860_v52 = vld [vmem:[#allocation7 + $0x2f8] sm:$0xff]  ;;  %v14640_v53 = vcombine.low %v4847_v29, %v4851_v3  ;;  %v14649_v25 = vcombine.high %v4855_v47, %v4859_v37 }
 0x552   :  { %v14651_v54 = vcombine.high %v4856_v48, %v4860_v52  ;;  %v14650_v8 = vcombine.low %v4856_v48, %v4860_v52  ;;  %v4887_v52 = vld [vmem:[#allocation7 + $0x3d0] sm:$0xff] }
 0x553   :  { %10264 = vmatpush1.bf16.msra.mxu0 %v14616_v15  ;;  %v4867_v15 = vld [vmem:[#allocation7 + $0x330] sm:$0xff] }
 0x554   :  { %10702 = vmatpush1.bf16.msra.mxu1 %v14618_v7  ;;  %10265 = vmatprep.subr.bf16.mxu0 %v14625_v59  ;;  %v4864_v7 = vld [vmem:[#allocation7 + $0x318] sm:$0xff]  ;;  %v14657_v17 = vcombine.high %v4863_v27, %v4867_v15 }
 0x555   :  { %10703 = vmatprep.subr.bf16.mxu1 %v14627_v55  ;;  %v4868_v59 = vld [vmem:[#allocation7 + $0x338] sm:$0xff]  ;;  %v14648_v55 = vcombine.low %v4855_v47, %v4859_v37 }
 0x556   :  { %v14659_v23 = vcombine.high %v4864_v7, %v4868_v59  ;;  %v14658_v29 = vcombine.low %v4864_v7, %v4868_v59  ;;  %v4895_v59 = vld [vmem:[#allocation7 + $0x410] sm:$0xff] }
 0x557   :  { %10266 = vmatpush1.bf16.msra.mxu0 %v14624_v32  ;;  %v4875_v32 = vld [vmem:[#allocation7 + $0x370] sm:$0xff] }
 0x558   :  { %10704 = vmatpush1.bf16.msra.mxu1 %v14626_v51  ;;  %10267 = vmatprep.subr.bf16.mxu0 %v14633_v63  ;;  %v4872_v51 = vld [vmem:[#allocation7 + $0x358] sm:$0xff]  ;;  %v14665_v3 = vcombine.high %v4871_v58, %v4875_v32 }
 0x559   :  { %10705 = vmatprep.subr.bf16.mxu1 %v14635_v45  ;;  %v4876_v63 = vld [vmem:[#allocation7 + $0x378] sm:$0xff]  ;;  %v14656_v45 = vcombine.low %v4863_v27, %v4867_v15 }
 0x55a   :  { %v14667_v39 = vcombine.high %v4872_v51, %v4876_v63  ;;  %v14666_v47 = vcombine.low %v4872_v51, %v4876_v63  ;;  %v4903_v63 = vld [vmem:[#allocation7 + $0x450] sm:$0xff] }
 0x55b   :  { %10268 = vmatpush1.bf16.msra.mxu0 %v14632_v10  ;;  %v4883_v10 = vld [vmem:[#allocation7 + $0x3b0] sm:$0xff] }
 0x55c   :  { %10706 = vmatpush1.bf16.msra.mxu1 %v14634_v46  ;;  %10269 = vmatprep.subr.bf16.mxu0 %v14641_v21  ;;  %v4880_v46 = vld [vmem:[#allocation7 + $0x398] sm:$0xff]  ;;  %v14673_v37 = vcombine.high %v4879_v20, %v4883_v10 }
 0x55d   :  { %10707 = vmatprep.subr.bf16.mxu1 %v14643_v36  ;;  %v4884_v21 = vld [vmem:[#allocation7 + $0x3b8] sm:$0xff]  ;;  %v14664_v36 = vcombine.low %v4871_v58, %v4875_v32 }
 0x55e   :  { %v14675_v48 = vcombine.high %v4880_v46, %v4884_v21  ;;  %v14674_v27 = vcombine.low %v4880_v46, %v4884_v21  ;;  %v4911_v21 = vld [vmem:[#allocation7 + $0x490] sm:$0xff] }
 0x55f   :  { %10270 = vmatpush1.bf16.msra.mxu0 %v14640_v53  ;;  %v4891_v53 = vld [vmem:[#allocation7 + $0x3f0] sm:$0xff] }
 0x560   :  { %10708 = vmatpush1.bf16.msra.mxu1 %v14642_v1  ;;  %10271 = vmatprep.subr.bf16.mxu0 %v14649_v25  ;;  %v4888_v1 = vld [vmem:[#allocation7 + $0x3d8] sm:$0xff]  ;;  %v14681_v15 = vcombine.high %v4887_v52, %v4891_v53 }
 0x561   :  { %10709 = vmatprep.subr.bf16.mxu1 %v14651_v54  ;;  %v4892_v25 = vld [vmem:[#allocation7 + $0x3f8] sm:$0xff]  ;;  %v14672_v54 = vcombine.low %v4879_v20, %v4883_v10 }
 0x562   :  { %v14683_v7 = vcombine.high %v4888_v1, %v4892_v25  ;;  %v14682_v58 = vcombine.low %v4888_v1, %v4892_v25  ;;  %v4919_v25 = vld [vmem:[#allocation7 + $0x4d0] sm:$0xff] }
 0x563   :  { %10272 = vmatpush1.bf16.msra.mxu0 %v14648_v55  ;;  %v4899_v55 = vld [vmem:[#allocation7 + $0x430] sm:$0xff] }
 0x564   :  { %10710 = vmatpush1.bf16.msra.mxu1 %v14650_v8  ;;  %10273 = vmatprep.subr.bf16.mxu0 %v14657_v17  ;;  %v4896_v8 = vld [vmem:[#allocation7 + $0x418] sm:$0xff]  ;;  %v14689_v32 = vcombine.high %v4895_v59, %v4899_v55 }
 0x565   :  { %10711 = vmatprep.subr.bf16.mxu1 %v14659_v23  ;;  %v4900_v17 = vld [vmem:[#allocation7 + $0x438] sm:$0xff]  ;;  %v14680_v23 = vcombine.low %v4887_v52, %v4891_v53 }
 0x566   :  { %v14691_v51 = vcombine.high %v4896_v8, %v4900_v17  ;;  %v14690_v20 = vcombine.low %v4896_v8, %v4900_v17  ;;  %v4927_v8 = vld [vmem:[#allocation7 + $0x510] sm:$0xff] }
 0x567   :  { %10274 = vmatpush1.bf16.msra.mxu0 %v14656_v45  ;;  %v4907_v45 = vld [vmem:[#allocation7 + $0x470] sm:$0xff] }
 0x568   :  { %10712 = vmatpush1.bf16.msra.mxu1 %v14658_v29  ;;  %10275 = vmatprep.subr.bf16.mxu0 %v14665_v3  ;;  %v4904_v29 = vld [vmem:[#allocation7 + $0x458] sm:$0xff]  ;;  %v14697_v10 = vcombine.high %v4903_v63, %v4907_v45  ;;  %v4931_v17 = vld [vmem:[#allocation7 + $0x530] sm:$0xff] }
 0x569   :  { %10713 = vmatprep.subr.bf16.mxu1 %v14667_v39  ;;  %v4908_v3 = vld [vmem:[#allocation7 + $0x478] sm:$0xff]  ;;  %v14688_v39 = vcombine.low %v4895_v59, %v4899_v55 }
 0x56a   :  { %v14699_v46 = vcombine.high %v4904_v29, %v4908_v3  ;;  %v14698_v52 = vcombine.low %v4904_v29, %v4908_v3  ;;  %v4935_v29 = vld [vmem:[#allocation7 + $0x550] sm:$0xff] }
 0x56b   :  { %10276 = vmatpush1.bf16.msra.mxu0 %v14664_v36  ;;  %v4915_v36 = vld [vmem:[#allocation7 + $0x4b0] sm:$0xff] }
 0x56c   :  { %10714 = vmatpush1.bf16.msra.mxu1 %v14666_v47  ;;  %10277 = vmatprep.subr.bf16.mxu0 %v14673_v37  ;;  %v4912_v47 = vld [vmem:[#allocation7 + $0x498] sm:$0xff]  ;;  %v14705_v53 = vcombine.high %v4911_v21, %v4915_v36  ;;  %v4939_v3 = vld [vmem:[#allocation7 + $0x570] sm:$0xff] }
 0x56d   :  { %10715 = vmatprep.subr.bf16.mxu1 %v14675_v48  ;;  %v4916_v37 = vld [vmem:[#allocation7 + $0x4b8] sm:$0xff]  ;;  %v14696_v48 = vcombine.low %v4903_v63, %v4907_v45  ;;  %v14721_v63 = vcombine.high %v4927_v8, %v4931_v17 }
 0x56e   :  { %v14707_v1 = vcombine.high %v4912_v47, %v4916_v37 }
 0x56f   :  { %10278 = vmatpush1.bf16.msra.mxu0 %v14672_v54  ;;  %v4923_v54 = vld [vmem:[#allocation7 + $0x4f0] sm:$0xff] }
 0x570   :  { %10716 = vmatpush1.bf16.msra.mxu1 %v14674_v27  ;;  %10279 = vmatprep.subr.bf16.mxu0 %v14681_v15  ;;  %v4920_v27 = vld [vmem:[#allocation7 + $0x4d8] sm:$0xff]  ;;  %v14713_v59 = vcombine.high %v4919_v25, %v4923_v54 }
 0x571   :  { %10717 = vmatprep.subr.bf16.mxu1 %v14683_v7  ;;  %v4924_v15 = vld [vmem:[#allocation7 + $0x4f8] sm:$0xff]  ;;  %v14706_v7 = vcombine.low %v4912_v47, %v4916_v37  ;;  %v4947_v47 = vld [vmem:[#allocation7 + $0x5b0] sm:$0xff] }
 0x572   :  { %v14715_v55 = vcombine.high %v4920_v27, %v4924_v15  ;;  %v4944_v37 = vld [vmem:[#allocation7 + $0x598] sm:$0xff] }
 0x573   :  { %10280 = vmatpush1.bf16.msra.mxu0 %v14680_v23  ;;  %v4928_v23 = vld [vmem:[#allocation7 + $0x518] sm:$0xff] }
 0x574   :  { %10718 = vmatpush1.bf16.msra.mxu1 %v14682_v58  ;;  %10322 = vmatprep.subr.bf16.mxu0 %v14689_v32  ;;  %v4932_v58 = vld [vmem:[#allocation7 + $0x538] sm:$0xff]  ;;  %v14712_v32 = vcombine.low %v4919_v25, %v4923_v54  ;;  %v4951_v54 = vld [vmem:[#allocation7 + $0x5d0] sm:$0xff] }
 0x575   :  { %10760 = vmatprep.subr.bf16.mxu1 %v14691_v51  ;;  %v14714_v51 = vcombine.low %v4920_v27, %v4924_v15  ;;  %v14723_v45 = vcombine.high %v4928_v23, %v4932_v58  ;;  %v4955_v27 = vld [vmem:[#allocation7 + $0x5f0] sm:$0xff]  ;;  %v4952_v15 = vld [vmem:[#allocation7 + $0x5d8] sm:$0xff] }
 0x576   :  { %10282 = vmatmul.mubr.bf16.vlgmr.msra.gmra.mrb[88].mxu0 %v19092_v28 }
 0x577   :  { %10720 = vmatmul.mubr.bf16.vlgmr.msra.gmra.mrb[104].mxu1 %v19092_v28  ;;  %10291 = vmatprep.mubr.bf16.mxu0 %v18859_v44  ;;  %v14704_v28 = vcombine.low %v4911_v21, %v4915_v36  ;;  %v14729_v21 = vcombine.high %v4935_v29, %v4939_v3  ;;  %v4943_v36 = vld [vmem:[#allocation7 + $0x590] sm:$0xff] }
 0x578   :  { %10323 = vmatpush1.bf16.msra.mxu0 %v14688_v39  ;;  %10729 = vmatprep.mubr.bf16.mxu1 %v18859_v44  ;;  %v4936_v39 = vld [vmem:[#allocation7 + $0x558] sm:$0xff] }
 0x579   :  { %10761 = vmatpush1.bf16.msra.mxu1 %v14690_v20  ;;  %10324 = vmatprep.subr.bf16.mxu0 %v14697_v10  ;;  %v4940_v20 = vld [vmem:[#allocation7 + $0x578] sm:$0xff]  ;;  %v14720_v10 = vcombine.low %v4927_v8, %v4931_v17  ;;  %v4959_v8 = vld [vmem:[#allocation7 + $0x610] sm:$0xff] }
 0x57a   :  { %10762 = vmatprep.subr.bf16.mxu1 %v14699_v46  ;;  %v14722_v46 = vcombine.low %v4928_v23, %v4932_v58  ;;  %v4963_v17 = vld [vmem:[#allocation7 + $0x630] sm:$0xff]  ;;  %v4960_v23 = vld [vmem:[#allocation7 + $0x618] sm:$0xff] }
 0x57b   :  { %v4964_v58 = vld [vmem:[#allocation7 + $0x638] sm:$0xff] }
 0x57c   :  { %10325 = vmatpush1.bf16.msra.mxu0 %v14696_v48  ;;  %v4948_v48 = vld [vmem:[#allocation7 + $0x5b8] sm:$0xff] }
 0x57d   :  { %10763 = vmatpush1.bf16.msra.mxu1 %v14698_v52  ;;  %10326 = vmatprep.subr.bf16.mxu0 %v14705_v53  ;;  %v14728_v52 = vcombine.low %v4935_v29, %v4939_v3  ;;  %v14730_v53 = vcombine.low %v4936_v39, %v4940_v20  ;;  %v14739_v25 = vcombine.high %v4944_v37, %v4948_v48  ;;  %v4967_v29 = vld [vmem:[#allocation7 + $0x650] sm:$0xff] }
 0x57e   :  { %10292 = vmatmul.mubr.bf16.gmra.mrb[92].mxu0 %v18851_v31  ;;  %10764 = vmatprep.subr.bf16.mxu1 %v14707_v1  ;;  %v14737_v1 = vcombine.high %v4943_v36, %v4947_v47  ;;  %v4971_v3 = vld [vmem:[#allocation7 + $0x670] sm:$0xff] }
 0x57f   :  { %10730 = vmatmul.mubr.bf16.gmra.mrb[108].mxu1 %v18851_v31  ;;  %10301 = vmatprep.mubr.bf16.mxu0 %v19118_v0 }
 0x580   :  { %10327 = vmatpush1.bf16.msra.mxu0 %v14704_v28  ;;  %10739 = vmatprep.mubr.bf16.mxu1 %v19118_v0  ;;  %v14731_v0 = vcombine.high %v4936_v39, %v4940_v20  ;;  %v4956_v28 = vld [vmem:[#allocation7 + $0x5f8] sm:$0xff] }
 0x581   :  { %10765 = vmatpush1.bf16.msra.mxu1 %v14706_v7  ;;  %10328 = vmatprep.subr.bf16.mxu0 %v14713_v59  ;;  %v14738_v7 = vcombine.low %v4944_v37, %v4948_v48  ;;  %v14745_v59 = vcombine.high %v4951_v54, %v4955_v27  ;;  %v4968_v39 = vld [vmem:[#allocation7 + $0x658] sm:$0xff]  ;;  %v14760_v48 = vcombine.low %v4967_v29, %v4971_v3 }
 0x582   :  { %10766 = vmatprep.subr.bf16.mxu1 %v14715_v55  ;;  %v14747_v55 = vcombine.high %v4952_v15, %v4956_v28  ;;  %v4972_v20 = vld [vmem:[#allocation7 + $0x678] sm:$0xff] }
 0x583   :  { %v4980_v37 = vld [vmem:[#allocation7 + $0x6b8] sm:$0xff] }
 0x584   :  { %10329 = vmatpush1.bf16.msra.mxu0 %v14712_v32  ;;  %v14744_v32 = vcombine.low %v4951_v54, %v4955_v27  ;;  %v4987_v54 = vld [vmem:[#allocation7 + $0x6f0] sm:$0xff]  ;;  %v4984_v27 = vld [vmem:[#allocation7 + $0x6d8] sm:$0xff] }
 0x585   :  { %10767 = vmatpush1.bf16.msra.mxu1 %v14714_v51  ;;  %10330 = vmatprep.subr.bf16.mxu0 %v14721_v63  ;;  %v14746_v51 = vcombine.low %v4952_v15, %v4956_v28  ;;  %v14753_v63 = vcombine.high %v4959_v8, %v4963_v17  ;;  %v4988_v15 = vld [vmem:[#allocation7 + $0x6f8] sm:$0xff] }
 0x586   :  { %10302 = vmatmul.mubr.bf16.gmra.mrb[96].mxu0 %v19116_v35  ;;  %10768 = vmatprep.subr.bf16.mxu1 %v14723_v45  ;;  %v14755_v45 = vcombine.high %v4960_v23, %v4964_v58 }
 0x587   :  { %10740 = vmatmul.mubr.bf16.gmra.mrb[112].mxu1 %v19116_v35  ;;  %10311 = vmatprep.mubr.bf16.mxu0 %v19022_v38  ;;  %v14736_v35 = vcombine.low %v4943_v36, %v4947_v47  ;;  %v4979_v36 = vld [vmem:[#allocation7 + $0x6b0] sm:$0xff]  ;;  %v4976_v47 = vld [vmem:[#allocation7 + $0x698] sm:$0xff] }
 0x588   :  { %10331 = vmatpush1.bf16.msra.mxu0 %v14720_v10  ;;  %10749 = vmatprep.mubr.bf16.mxu1 %v19022_v38  ;;  %v14752_v10 = vcombine.low %v4959_v8, %v4963_v17  ;;  %v4995_v8 = vld [vmem:[#allocation7 + $0x730] sm:$0xff]  ;;  %v4992_v17 = vld [vmem:[#allocation7 + $0x718] sm:$0xff] }
 0x589   :  { %10769 = vmatpush1.bf16.msra.mxu1 %v14722_v46  ;;  %10332 = vmatprep.subr.bf16.mxu0 %v14729_v21  ;;  %v14754_v46 = vcombine.low %v4960_v23, %v4964_v58  ;;  %v14761_v21 = vcombine.high %v4967_v29, %v4971_v3  ;;  %v4996_v23 = vld [vmem:[#allocation7 + $0x738] sm:$0xff]  ;;  %v5003_v29 = vld [vmem:[#allocation7 + $0x770] sm:$0xff] }
 0x58a   :  { %10770 = vmatprep.subr.bf16.mxu1 %v14731_v0  ;;  %v14763_v0 = vcombine.high %v4968_v39, %v4972_v20  ;;  %v5000_v3 = vld [vmem:[#allocation7 + $0x758] sm:$0xff] }
 0x58c   :  { %10333 = vmatpush1.bf16.msra.mxu0 %v14728_v52  ;;  %v14762_v52 = vcombine.low %v4968_v39, %v4972_v20  ;;  %v5004_v39 = vld [vmem:[#allocation7 + $0x778] sm:$0xff] }
 0x58d   :  { %10771 = vmatpush1.bf16.msra.mxu1 %v14730_v53  ;;  %10334 = vmatprep.subr.bf16.mxu0 %v14737_v1  ;;  %v14771_v1 = vcombine.high %v4976_v47, %v4980_v37 }
 0x58e   :  { %10312 = vmatmul.mubr.bf16.gmra.mrb[100].mxu0 %v19014_v41  ;;  %10772 = vmatprep.subr.bf16.mxu1 %v14739_v25  ;;  %v4983_v25 = vld [vmem:[#allocation7 + $0x6d0] sm:$0xff] }
 0x58f   :  { %10750 = vmatmul.mubr.bf16.gmra.mrb[116].mxu1 %v19014_v41  ;;  %10354 = vmatprep.mubr.bf16.mxu0 %v19104_v26  ;;  %v14776_v58 = vcombine.low %v4983_v25, %v4987_v54 }
 0x590   :  { %10335 = vmatpush1.bf16.msra.mxu0 %v14736_v35  ;;  %10792 = vmatprep.mubr.bf16.mxu1 %v19104_v26  ;;  %v4975_v26 = vld [vmem:[#allocation7 + $0x690] sm:$0xff]  ;;  %v14770_v35 = vcombine.low %v4976_v47, %v4980_v37  ;;  %v5012_v47 = vld [vmem:[#allocation7 + $0x7b8] sm:$0xff] }
 0x591   :  { %10773 = vmatpush1.bf16.msra.mxu1 %v14738_v7  ;;  %10336 = vmatprep.subr.bf16.mxu0 %v14745_v59  ;;  %v14769_v53 = vcombine.high %v4975_v26, %v4979_v36  ;;  %v14768_v28 = vcombine.low %v4975_v26, %v4979_v36  ;;  %v14777_v7 = vcombine.high %v4983_v25, %v4987_v54  ;;  %v5011_v26 = vld [vmem:[#allocation7 + $0x7b0] sm:$0xff]  ;;  %v5008_v36 = vld [vmem:[#allocation7 + $0x798] sm:$0xff] }
 0x592   :  { %10774 = vmatprep.subr.bf16.mxu1 %v14747_v55  ;;  %v14779_v59 = vcombine.high %v4984_v27, %v4988_v15  ;;  %v4991_v55 = vld [vmem:[#allocation7 + $0x710] sm:$0xff]  ;;  %v5016_v54 = vld [vmem:[#allocation7 + $0x7d8] sm:$0xff] }
 0x593   :  { %v14784_v20 = vcombine.low %v4991_v55, %v4995_v8  ;;  %v5019_v25 = vld [vmem:[#allocation7 + $0x7f0] sm:$0xff] }
 0x594   :  { %10337 = vmatpush1.bf16.msra.mxu0 %v14744_v32  ;;  %v14778_v32 = vcombine.low %v4984_v27, %v4988_v15  ;;  %v5020_v27 = vld [vmem:[#allocation7 + $0x7f8] sm:$0xff] }
 0x595   :  { %10775 = vmatpush1.bf16.msra.mxu1 %v14746_v51  ;;  %10338 = vmatprep.subr.bf16.mxu0 %v14753_v63  ;;  %v14785_v51 = vcombine.high %v4991_v55, %v4995_v8  ;;  %v14787_v63 = vcombine.high %v4992_v17, %v4996_v23  ;;  %v5027_v55 = vld [vmem:[#allocation7 + $0x830] sm:$0xff]  ;;  %v5024_v8 = vld [vmem:[#allocation7 + $0x818] sm:$0xff] }
 0x596   :  { %10776 = vmatprep.subr.bf16.mxu1 %v14755_v45  ;;  %v4999_v45 = vld [vmem:[#allocation7 + $0x750] sm:$0xff] }
 0x597   :  { %v14792_v37 = vcombine.low %v4999_v45, %v5003_v29 }
 0x598   :  { %10339 = vmatpush1.bf16.msra.mxu0 %v14752_v10  ;;  %v14786_v10 = vcombine.low %v4992_v17, %v4996_v23  ;;  %v5028_v17 = vld [vmem:[#allocation7 + $0x838] sm:$0xff] }
 0x599   :  { %10777 = vmatpush1.bf16.msra.mxu1 %v14754_v46  ;;  %10340 = vmatprep.subr.bf16.mxu0 %v14761_v21  ;;  %v14793_v46 = vcombine.high %v4999_v45, %v5003_v29  ;;  %v14795_v21 = vcombine.high %v5000_v3, %v5004_v39  ;;  %v5035_v45 = vld [vmem:[#allocation7 + $0x870] sm:$0xff]  ;;  %v5032_v29 = vld [vmem:[#allocation7 + $0x858] sm:$0xff] }
 0x59a   :  { %10778 = vmatprep.subr.bf16.mxu1 %v14763_v0  ;;  %v5007_v0 = vld [vmem:[#allocation7 + $0x790] sm:$0xff] }
 0x59b   :  { %v14800_v15 = vcombine.low %v5007_v0, %v5011_v26 }
 0x59c   :  { %10341 = vmatpush1.bf16.msra.mxu0 %v14760_v48  ;;  %v14794_v48 = vcombine.low %v5000_v3, %v5004_v39  ;;  %v5036_v3 = vld [vmem:[#allocation7 + $0x878] sm:$0xff] }
 0x59d   :  { %10779 = vmatpush1.bf16.msra.mxu1 %v14762_v52  ;;  %10342 = vmatprep.subr.bf16.mxu0 %v14769_v53  ;;  %v14801_v52 = vcombine.high %v5007_v0, %v5011_v26  ;;  %v14803_v53 = vcombine.high %v5008_v36, %v5012_v47  ;;  %v5043_v0 = vld [vmem:[#allocation7 + $0x8b0] sm:$0xff]  ;;  %v5040_v26 = vld [vmem:[#allocation7 + $0x898] sm:$0xff] }
 0x59e   :  { %10780 = vmatprep.subr.bf16.mxu1 %v14771_v1  ;;  %v5015_v1 = vld [vmem:[#allocation7 + $0x7d0] sm:$0xff] }
 0x59f   :  { %v14808_v23 = vcombine.low %v5015_v1, %v5019_v25 }
 0x5a0   :  { %10343 = vmatpush1.bf16.msra.mxu0 %v14768_v28  ;;  %v14802_v28 = vcombine.low %v5008_v36, %v5012_v47  ;;  %v5044_v36 = vld [vmem:[#allocation7 + $0x8b8] sm:$0xff] }
 0x5a1   :  { %10781 = vmatpush1.bf16.msra.mxu1 %v14770_v35  ;;  %10344 = vmatprep.subr.bf16.mxu0 %v14777_v7  ;;  %v14809_v35 = vcombine.high %v5015_v1, %v5019_v25  ;;  %v14811_v7 = vcombine.high %v5016_v54, %v5020_v27  ;;  %v5051_v1 = vld [vmem:[#allocation7 + $0x8f0] sm:$0xff]  ;;  %v5048_v25 = vld [vmem:[#allocation7 + $0x8d8] sm:$0xff] }
 0x5a2   :  { %10782 = vmatprep.subr.bf16.mxu1 %v14779_v59  ;;  %v5023_v59 = vld [vmem:[#allocation7 + $0x810] sm:$0xff] }
 0x5a3   :  { %v14816_v39 = vcombine.low %v5023_v59, %v5027_v55 }
 0x5a4   :  { %10345 = vmatpush1.bf16.msra.mxu0 %v14776_v58  ;;  %v14810_v58 = vcombine.low %v5016_v54, %v5020_v27  ;;  %v5052_v54 = vld [vmem:[#allocation7 + $0x8f8] sm:$0xff]  ;;  %v14834_v27 = vcombine.low %v5040_v26, %v5044_v36 }
 0x5a5   :  { %10783 = vmatpush1.bf16.msra.mxu1 %v14778_v32  ;;  %10346 = vmatprep.subr.bf16.mxu0 %v14785_v51  ;;  %v14817_v32 = vcombine.high %v5023_v59, %v5027_v55  ;;  %v14819_v51 = vcombine.high %v5024_v8, %v5028_v17  ;;  %v5056_v59 = vld [vmem:[#allocation7 + $0x918] sm:$0xff] }
 0x5a6   :  { %10784 = vmatprep.subr.bf16.mxu1 %v14787_v63  ;;  %v5031_v63 = vld [vmem:[#allocation7 + $0x850] sm:$0xff]  ;;  %v5060_v55 = vld [vmem:[#allocation7 + $0x938] sm:$0xff] }
 0x5a7   :  { %v14824_v47 = vcombine.low %v5031_v63, %v5035_v45 }
 0x5a8   :  { %10347 = vmatpush1.bf16.msra.mxu0 %v14784_v20  ;;  %v14818_v20 = vcombine.low %v5024_v8, %v5028_v17  ;;  %v14842_v17 = vcombine.low %v5048_v25, %v5052_v54 }
 0x5a9   :  { %10785 = vmatpush1.bf16.msra.mxu1 %v14786_v10  ;;  %10348 = vmatprep.subr.bf16.mxu0 %v14793_v46  ;;  %v14825_v10 = vcombine.high %v5031_v63, %v5035_v45  ;;  %v14827_v46 = vcombine.high %v5032_v29, %v5036_v3  ;;  %v5064_v63 = vld [vmem:[#allocation7 + $0x958] sm:$0xff] }
 0x5aa   :  { %10786 = vmatprep.subr.bf16.mxu1 %v14795_v21  ;;  %v5039_v21 = vld [vmem:[#allocation7 + $0x890] sm:$0xff]  ;;  %v5068_v45 = vld [vmem:[#allocation7 + $0x978] sm:$0xff] }
 0x5ac   :  { %10349 = vmatpush1.bf16.msra.mxu0 %v14792_v37  ;;  %v14826_v37 = vcombine.low %v5032_v29, %v5036_v3  ;;  %v14850_v3 = vcombine.low %v5056_v59, %v5060_v55 }
 0x5ad   :  { %10787 = vmatpush1.bf16.msra.mxu1 %v14794_v48  ;;  %10350 = vmatprep.subr.bf16.mxu0 %v14801_v52  ;;  %v14833_v48 = vcombine.high %v5039_v21, %v5043_v0  ;;  %v14835_v52 = vcombine.high %v5040_v26, %v5044_v36  ;;  %v14858_v26 = vcombine.low %v5064_v63, %v5068_v45 }
 0x5ae   :  { %10788 = vmatprep.subr.bf16.mxu1 %v14803_v53  ;;  %v5047_v53 = vld [vmem:[#allocation7 + $0x8d0] sm:$0xff] }
 0x5af   :  { %v14840_v8 = vcombine.low %v5047_v53, %v5051_v1 }
 0x5b0   :  { %10351 = vmatpush1.bf16.msra.mxu0 %v14800_v15  ;;  %v14841_v15 = vcombine.high %v5047_v53, %v5051_v1  ;;  %v5084_v53 = vld [vmem:[#allocation7 + $0x9f8] sm:$0xff] }
 0x5b1   :  { %10789 = vmatpush1.bf16.msra.mxu1 %v14802_v28  ;;  %10352 = vmatprep.subr.bf16.mxu0 %v14809_v35  ;;  %v14843_v28 = vcombine.high %v5048_v25, %v5052_v54  ;;  %v5055_v35 = vld [vmem:[#allocation7 + $0x910] sm:$0xff] }
 0x5b2   :  { %10790 = vmatprep.subr.bf16.mxu1 %v14811_v7  ;;  %v5059_v7 = vld [vmem:[#allocation7 + $0x930] sm:$0xff] }
 0x5b3   :  { %v14848_v29 = vcombine.low %v5055_v35, %v5059_v7 }
 0x5b4   :  { %10353 = vmatpush1.bf16.msra.mxu0 %v14808_v23  ;;  %v14849_v23 = vcombine.high %v5055_v35, %v5059_v7 }
 0x5b5   :  { %10791 = vmatpush1.bf16.msra.mxu1 %v14810_v58  ;;  %10395 = vmatprep.subr.bf16.mxu0 %v14817_v32  ;;  %v14851_v58 = vcombine.high %v5056_v59, %v5060_v55  ;;  %v5063_v32 = vld [vmem:[#allocation7 + $0x950] sm:$0xff] }
 0x5b6   :  { %10833 = vmatprep.subr.bf16.mxu1 %v14819_v51  ;;  %v5067_v51 = vld [vmem:[#allocation7 + $0x970] sm:$0xff] }
 0x5b7   :  { %10355 = vmatmul.mubr.bf16.vlgmr.msra.gmra.mrb[88].mxu0 %v19102_v5 }
 0x5b8   :  { %10793 = vmatmul.mubr.bf16.vlgmr.msra.gmra.mrb[104].mxu1 %v19102_v5  ;;  %10364 = vmatprep.mubr.bf16.mxu0 %v18867_v24  ;;  %v14832_v5 = vcombine.low %v5039_v21, %v5043_v0  ;;  %v5076_v21 = vld [vmem:[#allocation7 + $0x9b8] sm:$0xff]  ;;  %v14856_v0 = vcombine.low %v5063_v32, %v5067_v51 }
 0x5b9   :  { %10396 = vmatpush1.bf16.msra.mxu0 %v14816_v39  ;;  %10802 = vmatprep.mubr.bf16.mxu1 %v18867_v24  ;;  %v14857_v39 = vcombine.high %v5063_v32, %v5067_v51 }
 0x5ba   :  { %10834 = vmatpush1.bf16.msra.mxu1 %v14818_v20  ;;  %10397 = vmatprep.subr.bf16.mxu0 %v14825_v10  ;;  %v5071_v20 = vld [vmem:[#allocation7 + $0x990] sm:$0xff] }
 0x5bb   :  { %10835 = vmatprep.subr.bf16.mxu1 %v14827_v46  ;;  %v5075_v10 = vld [vmem:[#allocation7 + $0x9b0] sm:$0xff]  ;;  %v5072_v46 = vld [vmem:[#allocation7 + $0x998] sm:$0xff] }
 0x5bc   :  { %v14865_v36 = vcombine.high %v5071_v20, %v5075_v10  ;;  %v14866_v1 = vcombine.low %v5072_v46, %v5076_v21 }
 0x5bd   :  { %10398 = vmatpush1.bf16.msra.mxu0 %v14824_v47  ;;  %v14867_v47 = vcombine.high %v5072_v46, %v5076_v21  ;;  %v5111_v21 = vld [vmem:[#allocation7 + $0xad0] sm:$0xff] }
 0x5be   :  { %10836 = vmatpush1.bf16.msra.mxu1 %v14826_v37  ;;  %10399 = vmatprep.subr.bf16.mxu0 %v14833_v48  ;;  %v5079_v37 = vld [vmem:[#allocation7 + $0x9d0] sm:$0xff] }
 0x5bf   :  { %10365 = vmatmul.mubr.bf16.gmra.mrb[92].mxu0 %v18857_v43  ;;  %10837 = vmatprep.subr.bf16.mxu1 %v14835_v52  ;;  %v5083_v48 = vld [vmem:[#allocation7 + $0x9f0] sm:$0xff]  ;;  %v5080_v52 = vld [vmem:[#allocation7 + $0x9d8] sm:$0xff] }
 0x5c0   :  { %10803 = vmatmul.mubr.bf16.gmra.mrb[108].mxu1 %v18857_v43  ;;  %10374 = vmatprep.mubr.bf16.mxu0 %v19122_v40  ;;  %v14873_v25 = vcombine.high %v5079_v37, %v5083_v48  ;;  %v14875_v54 = vcombine.high %v5080_v52, %v5084_v53  ;;  %v14872_v35 = vcombine.low %v5079_v37, %v5083_v48 }
 0x5c1   :  { %10400 = vmatpush1.bf16.msra.mxu0 %v14832_v5  ;;  %10812 = vmatprep.mubr.bf16.mxu1 %v19122_v40  ;;  %v14859_v40 = vcombine.high %v5064_v63, %v5068_v45  ;;  %v5087_v5 = vld [vmem:[#allocation7 + $0xa10] sm:$0xff]  ;;  %v14874_v7 = vcombine.low %v5080_v52, %v5084_v53 }
 0x5c2   :  { %10838 = vmatpush1.bf16.msra.mxu1 %v14834_v27  ;;  %10401 = vmatprep.subr.bf16.mxu0 %v14841_v15  ;;  %v5091_v27 = vld [vmem:[#allocation7 + $0xa30] sm:$0xff]  ;;  %v5088_v15 = vld [vmem:[#allocation7 + $0xa18] sm:$0xff] }
 0x5c3   :  { %10839 = vmatprep.subr.bf16.mxu1 %v14843_v28  ;;  %v5092_v28 = vld [vmem:[#allocation7 + $0xa38] sm:$0xff]  ;;  %v14881_v59 = vcombine.high %v5087_v5, %v5091_v27  ;;  %v14880_v32 = vcombine.low %v5087_v5, %v5091_v27  ;;  %v5119_v53 = vld [vmem:[#allocation7 + $0xb10] sm:$0xff] }
 0x5c4   :  { %v14883_v55 = vcombine.high %v5088_v15, %v5092_v28  ;;  %v14882_v51 = vcombine.low %v5088_v15, %v5092_v28  ;;  %v5127_v28 = vld [vmem:[#allocation7 + $0xb50] sm:$0xff] }
 0x5c5   :  { %10402 = vmatpush1.bf16.msra.mxu0 %v14840_v8  ;;  %v5095_v8 = vld [vmem:[#allocation7 + $0xa50] sm:$0xff] }
 0x5c6   :  { %10840 = vmatpush1.bf16.msra.mxu1 %v14842_v17  ;;  %10403 = vmatprep.subr.bf16.mxu0 %v14849_v23  ;;  %v5099_v17 = vld [vmem:[#allocation7 + $0xa70] sm:$0xff]  ;;  %v5096_v23 = vld [vmem:[#allocation7 + $0xa58] sm:$0xff] }
 0x5c7   :  { %10375 = vmatmul.mubr.bf16.gmra.mrb[96].mxu0 %v19120_v12  ;;  %10841 = vmatprep.subr.bf16.mxu1 %v14851_v58  ;;  %v5100_v58 = vld [vmem:[#allocation7 + $0xa78] sm:$0xff]  ;;  %v14889_v63 = vcombine.high %v5095_v8, %v5099_v17 }
 0x5c8   :  { %10813 = vmatmul.mubr.bf16.gmra.mrb[112].mxu1 %v19120_v12  ;;  %10384 = vmatprep.mubr.bf16.mxu0 %v19032_v62  ;;  %v14864_v12 = vcombine.low %v5071_v20, %v5075_v10  ;;  %v14891_v45 = vcombine.high %v5096_v23, %v5100_v58  ;;  %v14890_v20 = vcombine.low %v5096_v23, %v5100_v58  ;;  %v5135_v58 = vld [vmem:[#allocation7 + $0xb90] sm:$0xff] }
 0x5c9   :  { %10404 = vmatpush1.bf16.msra.mxu0 %v14848_v29  ;;  %10822 = vmatprep.mubr.bf16.mxu1 %v19032_v62  ;;  %v5107_v29 = vld [vmem:[#allocation7 + $0xab0] sm:$0xff] }
 0x5ca   :  { %10842 = vmatpush1.bf16.msra.mxu1 %v14850_v3  ;;  %10405 = vmatprep.subr.bf16.mxu0 %v14857_v39  ;;  %v5104_v3 = vld [vmem:[#allocation7 + $0xa98] sm:$0xff] }
 0x5cb   :  { %10843 = vmatprep.subr.bf16.mxu1 %v14859_v40  ;;  %v5108_v39 = vld [vmem:[#allocation7 + $0xab8] sm:$0xff]  ;;  %v14888_v40 = vcombine.low %v5095_v8, %v5099_v17 }
 0x5cc   :  { %v14899_v46 = vcombine.high %v5104_v3, %v5108_v39  ;;  %v14898_v37 = vcombine.low %v5104_v3, %v5108_v39  ;;  %v5143_v39 = vld [vmem:[#allocation7 + $0xbd0] sm:$0xff] }
 0x5cd   :  { %10406 = vmatpush1.bf16.msra.mxu0 %v14856_v0  ;;  %v5115_v0 = vld [vmem:[#allocation7 + $0xaf0] sm:$0xff] }
 0x5ce   :  { %10844 = vmatpush1.bf16.msra.mxu1 %v14858_v26  ;;  %10407 = vmatprep.subr.bf16.mxu0 %v14865_v36  ;;  %v5112_v26 = vld [vmem:[#allocation7 + $0xad8] sm:$0xff]  ;;  %v14905_v48 = vcombine.high %v5111_v21, %v5115_v0 }
 0x5cf   :  { %10385 = vmatmul.mubr.bf16.gmra.mrb[100].mxu0 %v19020_v49  ;;  %10845 = vmatprep.subr.bf16.mxu1 %v14867_v47  ;;  %v5116_v36 = vld [vmem:[#allocation7 + $0xaf8] sm:$0xff] }
 0x5d0   :  { %10823 = vmatmul.mubr.bf16.gmra.mrb[116].mxu1 %v19020_v49  ;;  %10427 = vmatprep.mubr.bf16.mxu0 %v18859_v44  ;;  %v14907_v52 = vcombine.high %v5112_v26, %v5116_v36  ;;  %v14906_v5 = vcombine.low %v5112_v26, %v5116_v36  ;;  %v5151_v36 = vld [vmem:[#allocation7 + $0xc10] sm:$0xff] }
 0x5d1   :  { %10408 = vmatpush1.bf16.msra.mxu0 %v14864_v12  ;;  %10865 = vmatprep.mubr.bf16.mxu1 %v18859_v44  ;;  %v5103_v44 = vld [vmem:[#allocation7 + $0xa90] sm:$0xff] }
 0x5d2   :  { %10846 = vmatpush1.bf16.msra.mxu1 %v14866_v1  ;;  %10409 = vmatprep.subr.bf16.mxu0 %v14873_v25  ;;  %v14897_v10 = vcombine.high %v5103_v44, %v5107_v29  ;;  %v14896_v47 = vcombine.low %v5103_v44, %v5107_v29  ;;  %v5123_v12 = vld [vmem:[#allocation7 + $0xb30] sm:$0xff]  ;;  %v5120_v1 = vld [vmem:[#allocation7 + $0xb18] sm:$0xff] }
 0x5d3   :  { %10847 = vmatprep.subr.bf16.mxu1 %v14875_v54  ;;  %v5124_v25 = vld [vmem:[#allocation7 + $0xb38] sm:$0xff]  ;;  %v14904_v54 = vcombine.low %v5111_v21, %v5115_v0  ;;  %v14913_v27 = vcombine.high %v5119_v53, %v5123_v12 }
 0x5d4   :  { %v14915_v15 = vcombine.high %v5120_v1, %v5124_v25  ;;  %v14914_v8 = vcombine.low %v5120_v1, %v5124_v25  ;;  %v5159_v25 = vld [vmem:[#allocation7 + $0xc50] sm:$0xff] }
 0x5d5   :  { %10410 = vmatpush1.bf16.msra.mxu0 %v14872_v35  ;;  %v5131_v35 = vld [vmem:[#allocation7 + $0xb70] sm:$0xff] }
 0x5d6   :  { %10848 = vmatpush1.bf16.msra.mxu1 %v14874_v7  ;;  %10411 = vmatprep.subr.bf16.mxu0 %v14881_v59  ;;  %v5128_v7 = vld [vmem:[#allocation7 + $0xb58] sm:$0xff]  ;;  %v14921_v17 = vcombine.high %v5127_v28, %v5131_v35 }
 0x5d7   :  { %10849 = vmatprep.subr.bf16.mxu1 %v14883_v55  ;;  %v5132_v59 = vld [vmem:[#allocation7 + $0xb78] sm:$0xff]  ;;  %v14912_v55 = vcombine.low %v5119_v53, %v5123_v12 }
 0x5d8   :  { %v14923_v23 = vcombine.high %v5128_v7, %v5132_v59  ;;  %v14922_v44 = vcombine.low %v5128_v7, %v5132_v59  ;;  %v5167_v59 = vld [vmem:[#allocation7 + $0xc90] sm:$0xff] }
 0x5d9   :  { %10412 = vmatpush1.bf16.msra.mxu0 %v14880_v32  ;;  %v5139_v32 = vld [vmem:[#allocation7 + $0xbb0] sm:$0xff] }
 0x5da   :  { %10850 = vmatpush1.bf16.msra.mxu1 %v14882_v51  ;;  %10413 = vmatprep.subr.bf16.mxu0 %v14889_v63  ;;  %v5136_v51 = vld [vmem:[#allocation7 + $0xb98] sm:$0xff]  ;;  %v14929_v29 = vcombine.high %v5135_v58, %v5139_v32 }
 0x5db   :  { %10851 = vmatprep.subr.bf16.mxu1 %v14891_v45  ;;  %v5140_v63 = vld [vmem:[#allocation7 + $0xbb8] sm:$0xff]  ;;  %v14920_v45 = vcombine.low %v5127_v28, %v5131_v35 }
 0x5dc   :  { %v14931_v3 = vcombine.high %v5136_v51, %v5140_v63  ;;  %v14930_v21 = vcombine.low %v5136_v51, %v5140_v63  ;;  %v5175_v63 = vld [vmem:[#allocation7 + $0xcd0] sm:$0xff] }
 0x5dd   :  { %10414 = vmatpush1.bf16.msra.mxu0 %v14888_v40  ;;  %v5147_v40 = vld [vmem:[#allocation7 + $0xbf0] sm:$0xff] }
 0x5de   :  { %10852 = vmatpush1.bf16.msra.mxu1 %v14890_v20  ;;  %10415 = vmatprep.subr.bf16.mxu0 %v14897_v10  ;;  %v5144_v20 = vld [vmem:[#allocation7 + $0xbd8] sm:$0xff]  ;;  %v14937_v0 = vcombine.high %v5143_v39, %v5147_v40 }
 0x5df   :  { %10853 = vmatprep.subr.bf16.mxu1 %v14899_v46  ;;  %v5148_v10 = vld [vmem:[#allocation7 + $0xbf8] sm:$0xff]  ;;  %v14928_v46 = vcombine.low %v5135_v58, %v5139_v32 }
 0x5e0   :  { %v14939_v26 = vcombine.high %v5144_v20, %v5148_v10  ;;  %v14938_v53 = vcombine.low %v5144_v20, %v5148_v10  ;;  %v5183_v20 = vld [vmem:[#allocation7 + $0xd10] sm:$0xff] }
 0x5e1   :  { %10416 = vmatpush1.bf16.msra.mxu0 %v14896_v47  ;;  %v5155_v47 = vld [vmem:[#allocation7 + $0xc30] sm:$0xff] }
 0x5e2   :  { %10854 = vmatpush1.bf16.msra.mxu1 %v14898_v37  ;;  %10417 = vmatprep.subr.bf16.mxu0 %v14905_v48  ;;  %v5152_v37 = vld [vmem:[#allocation7 + $0xc18] sm:$0xff]  ;;  %v14945_v12 = vcombine.high %v5151_v36, %v5155_v47  ;;  %v5187_v10 = vld [vmem:[#allocation7 + $0xd30] sm:$0xff] }
 0x5e3   :  { %10855 = vmatprep.subr.bf16.mxu1 %v14907_v52  ;;  %v5156_v48 = vld [vmem:[#allocation7 + $0xc38] sm:$0xff]  ;;  %v14936_v52 = vcombine.low %v5143_v39, %v5147_v40 }
 0x5e4   :  { %v14947_v1 = vcombine.high %v5152_v37, %v5156_v48  ;;  %v14946_v28 = vcombine.low %v5152_v37, %v5156_v48  ;;  %v5191_v37 = vld [vmem:[#allocation7 + $0xd50] sm:$0xff] }
 0x5e5   :  { %10418 = vmatpush1.bf16.msra.mxu0 %v14904_v54  ;;  %v5163_v54 = vld [vmem:[#allocation7 + $0xc70] sm:$0xff] }
 0x5e6   :  { %10856 = vmatpush1.bf16.msra.mxu1 %v14906_v5  ;;  %10419 = vmatprep.subr.bf16.mxu0 %v14913_v27  ;;  %v5160_v5 = vld [vmem:[#allocation7 + $0xc58] sm:$0xff]  ;;  %v14953_v35 = vcombine.high %v5159_v25, %v5163_v54  ;;  %v5195_v48 = vld [vmem:[#allocation7 + $0xd70] sm:$0xff] }
 0x5e7   :  { %10857 = vmatprep.subr.bf16.mxu1 %v14915_v15  ;;  %v5164_v27 = vld [vmem:[#allocation7 + $0xc78] sm:$0xff]  ;;  %v14944_v15 = vcombine.low %v5151_v36, %v5155_v47  ;;  %v14977_v36 = vcombine.high %v5183_v20, %v5187_v10 }
 0x5e8   :  { %v14955_v7 = vcombine.high %v5160_v5, %v5164_v27  ;;  %v14954_v58 = vcombine.low %v5160_v5, %v5164_v27  ;;  %v5199_v5 = vld [vmem:[#allocation7 + $0xd90] sm:$0xff] }
 0x5e9   :  { %10420 = vmatpush1.bf16.msra.mxu0 %v14912_v55  ;;  %v5171_v55 = vld [vmem:[#allocation7 + $0xcb0] sm:$0xff] }
 0x5ea   :  { %10858 = vmatpush1.bf16.msra.mxu1 %v14914_v8  ;;  %10421 = vmatprep.subr.bf16.mxu0 %v14921_v17  ;;  %v5168_v8 = vld [vmem:[#allocation7 + $0xc98] sm:$0xff]  ;;  %v14961_v32 = vcombine.high %v5167_v59, %v5171_v55  ;;  %v5203_v27 = vld [vmem:[#allocation7 + $0xdb0] sm:$0xff] }
 0x5eb   :  { %10859 = vmatprep.subr.bf16.mxu1 %v14923_v23  ;;  %v5172_v17 = vld [vmem:[#allocation7 + $0xcb8] sm:$0xff]  ;;  %v14952_v23 = vcombine.low %v5159_v25, %v5163_v54  ;;  %v14985_v25 = vcombine.high %v5191_v37, %v5195_v48 }
 0x5ec   :  { %v14963_v51 = vcombine.high %v5168_v8, %v5172_v17 }
 0x5ed   :  { %10422 = vmatpush1.bf16.msra.mxu0 %v14920_v45  ;;  %v5179_v45 = vld [vmem:[#allocation7 + $0xcf0] sm:$0xff] }
 0x5ee   :  { %10860 = vmatpush1.bf16.msra.mxu1 %v14922_v44  ;;  %10423 = vmatprep.subr.bf16.mxu0 %v14929_v29  ;;  %v5176_v44 = vld [vmem:[#allocation7 + $0xcd8] sm:$0xff]  ;;  %v14969_v39 = vcombine.high %v5175_v63, %v5179_v45 }
 0x5ef   :  { %10861 = vmatprep.subr.bf16.mxu1 %v14931_v3  ;;  %v5180_v29 = vld [vmem:[#allocation7 + $0xcf8] sm:$0xff]  ;;  %v14962_v3 = vcombine.low %v5168_v8, %v5172_v17 }
 0x5f0   :  { %v14971_v40 = vcombine.high %v5176_v44, %v5180_v29 }
 0x5f1   :  { %10424 = vmatpush1.bf16.msra.mxu0 %v14928_v46  ;;  %v5184_v46 = vld [vmem:[#allocation7 + $0xd18] sm:$0xff] }
 0x5f2   :  { %10862 = vmatpush1.bf16.msra.mxu1 %v14930_v21  ;;  %10425 = vmatprep.subr.bf16.mxu0 %v14937_v0  ;;  %v5188_v21 = vld [vmem:[#allocation7 + $0xd38] sm:$0xff]  ;;  %v14968_v0 = vcombine.low %v5175_v63, %v5179_v45  ;;  %v5207_v63 = vld [vmem:[#allocation7 + $0xdd0] sm:$0xff] }
 0x5f3   :  { %10863 = vmatprep.subr.bf16.mxu1 %v14939_v26  ;;  %v14970_v26 = vcombine.low %v5176_v44, %v5180_v29  ;;  %v14979_v47 = vcombine.high %v5184_v46, %v5188_v21  ;;  %v5211_v45 = vld [vmem:[#allocation7 + $0xdf0] sm:$0xff]  ;;  %v5208_v44 = vld [vmem:[#allocation7 + $0xdd8] sm:$0xff] }
 0x5f4   :  { %v5212_v29 = vld [vmem:[#allocation7 + $0xdf8] sm:$0xff] }
 0x5f5   :  { %10426 = vmatpush1.bf16.msra.mxu0 %v14936_v52  ;;  %v5192_v52 = vld [vmem:[#allocation7 + $0xd58] sm:$0xff] }
 0x5f6   :  { %10864 = vmatpush1.bf16.msra.mxu1 %v14938_v53  ;;  %10468 = vmatprep.subr.bf16.mxu0 %v14945_v12  ;;  %v5196_v53 = vld [vmem:[#allocation7 + $0xd78] sm:$0xff]  ;;  %v14976_v12 = vcombine.low %v5183_v20, %v5187_v10  ;;  %v15003_v20 = vcombine.high %v5208_v44, %v5212_v29  ;;  %v5215_v10 = vld [vmem:[#allocation7 + $0xe10] sm:$0xff] }
 0x5f7   :  { %10906 = vmatprep.subr.bf16.mxu1 %v14947_v1  ;;  %v14978_v1 = vcombine.low %v5184_v46, %v5188_v21  ;;  %v14987_v54 = vcombine.high %v5192_v52, %v5196_v53  ;;  %v14986_v17 = vcombine.low %v5192_v52, %v5196_v53  ;;  %v5219_v46 = vld [vmem:[#allocation7 + $0xe30] sm:$0xff] }
 0x5f8   :  { %10428 = vmatmul.mubr.bf16.vlgmr.msra.gmra.mrb[88].mxu0 %v18851_v31  ;;  %v5243_v21 = vld [vmem:[#allocation7 + $0xef0] sm:$0xff] }
 0x5f9   :  { %10866 = vmatmul.mubr.bf16.vlgmr.msra.gmra.mrb[104].mxu1 %v18851_v31  ;;  %10437 = vmatprep.mubr.bf16.mxu0 %v18929_v18  ;;  %v14960_v31 = vcombine.low %v5167_v59, %v5171_v55  ;;  %v14984_v55 = vcombine.low %v5191_v37, %v5195_v48  ;;  %v5220_v37 = vld [vmem:[#allocation7 + $0xe38] sm:$0xff]  ;;  %v5239_v48 = vld [vmem:[#allocation7 + $0xed0] sm:$0xff] }
 0x5fa   :  { %10469 = vmatpush1.bf16.msra.mxu0 %v14944_v15  ;;  %10875 = vmatprep.mubr.bf16.mxu1 %v18929_v18 }
 0x5fb   :  { %10907 = vmatpush1.bf16.msra.mxu1 %v14946_v28  ;;  %10470 = vmatprep.subr.bf16.mxu0 %v14953_v35  ;;  %v5200_v35 = vld [vmem:[#allocation7 + $0xd98] sm:$0xff] }
 0x5fc   :  { %10908 = vmatprep.subr.bf16.mxu1 %v14955_v7  ;;  %v5204_v7 = vld [vmem:[#allocation7 + $0xdb8] sm:$0xff] }
 0x5fe   :  { %10471 = vmatpush1.bf16.msra.mxu0 %v14952_v23 }
 0x5ff   :  { %10909 = vmatpush1.bf16.msra.mxu1 %v14954_v58  ;;  %10472 = vmatprep.subr.bf16.mxu0 %v14961_v32  ;;  %v14993_v58 = vcombine.high %v5199_v5, %v5203_v27 }
 0x600   :  { %10438 = vmatmul.mubr.bf16.gmra.mrb[92].mxu0 %v18921_v2  ;;  %10910 = vmatprep.subr.bf16.mxu1 %v14963_v51  ;;  %v14995_v51 = vcombine.high %v5200_v35, %v5204_v7 }
 0x601   :  { %10876 = vmatmul.mubr.bf16.gmra.mrb[108].mxu1 %v18921_v2  ;;  %10447 = vmatprep.mubr.bf16.mxu0 %v19022_v38 }
 0x602   :  { %10473 = vmatpush1.bf16.msra.mxu0 %v14960_v31  ;;  %10885 = vmatprep.mubr.bf16.mxu1 %v19022_v38  ;;  %v14992_v31 = vcombine.low %v5199_v5, %v5203_v27  ;;  %v15009_v27 = vcombine.high %v5215_v10, %v5219_v46 }
 0x603   :  { %10911 = vmatpush1.bf16.msra.mxu1 %v14962_v3  ;;  %10474 = vmatprep.subr.bf16.mxu0 %v14969_v39  ;;  %v14994_v3 = vcombine.low %v5200_v35, %v5204_v7  ;;  %v15001_v39 = vcombine.high %v5207_v63, %v5211_v45  ;;  %v5235_v7 = vld [vmem:[#allocation7 + $0xeb0] sm:$0xff] }
 0x604   :  { %10912 = vmatprep.subr.bf16.mxu1 %v14971_v40 }
 0x606   :  { %10475 = vmatpush1.bf16.msra.mxu0 %v14968_v0 }
 0x607   :  { %10913 = vmatpush1.bf16.msra.mxu1 %v14970_v26  ;;  %10476 = vmatprep.subr.bf16.mxu0 %v14977_v36  ;;  %v15000_v36 = vcombine.low %v5207_v63, %v5211_v45  ;;  %v5224_v45 = vld [vmem:[#allocation7 + $0xe58] sm:$0xff] }
 0x608   :  { %10448 = vmatmul.mubr.bf16.gmra.mrb[96].mxu0 %v19014_v41  ;;  %10914 = vmatprep.subr.bf16.mxu1 %v14979_v47  ;;  %v19263_v38 = vpop.f32.mrb[72].mxu0  ;;  %v5216_v47 = vld [vmem:[#allocation7 + $0xe18] sm:$0xff] }
 0x609   :  { %10886 = vmatmul.mubr.bf16.gmra.mrb[112].mxu1 %v19014_v41  ;;  %10457 = vmatprep.mubr.bf16.mxu0 %v19070_v11  ;;  %v19267_v15 = vpop.f32.mrb[88].mxu1  ;;  %v19269_v28 = vpop.f32.mrb[73].mxu0  ;;  %v5236_v63 = vld [vmem:[#allocation7 + $0xeb8] sm:$0xff] }
 0x60a   :  { %10477 = vmatpush1.bf16.msra.mxu0 %v14976_v12  ;;  %10895 = vmatprep.mubr.bf16.mxu1 %v19070_v11  ;;  %v19272_v59 = vpop.f32.mrb[89].mxu1  ;;  %v19274_v8 = vpop.f32.mrb[74].mxu0  ;;  %v15002_v12 = vcombine.low %v5208_v44, %v5212_v29  ;;  %v5228_v44 = vld [vmem:[#allocation7 + $0xe78] sm:$0xff]  ;;  %v15008_v29 = vcombine.low %v5215_v10, %v5219_v46 }
 0x60b   :  { %10915 = vmatpush1.bf16.msra.mxu1 %v14978_v1  ;;  %10478 = vmatprep.subr.bf16.mxu0 %v14985_v25  ;;  %v19276_v41 = vpop.f32.mrb[90].mxu1  ;;  %v19278_v23 = vpop.f32.mrb[75].mxu0  ;;  %v5232_v25 = vld [vmem:[#allocation7 + $0xe98] sm:$0xff] }
 0x60c   :  { %10916 = vmatprep.subr.bf16.mxu1 %v14987_v54  ;;  %v19280_v32 = vpop.f32.mrb[91].mxu1 }
 0x60d   :  { %19905 = vst [vmem:[#allocation25_spill] sm:$0xff] %v19280_v32 }
 0x60e   :  { %10479 = vmatpush1.bf16.msra.mxu0 %v14984_v55 }
 0x60f   :  { %10917 = vmatpush1.bf16.msra.mxu1 %v14986_v17  ;;  %10480 = vmatprep.subr.bf16.mxu0 %v14993_v58  ;;  %v15011_v17 = vcombine.high %v5216_v47, %v5220_v37  ;;  %v5223_v58 = vld [vmem:[#allocation7 + $0xe50] sm:$0xff] }
 0x610   :  { %10458 = vmatmul.mubr.bf16.gmra.mrb[100].mxu0 %v19065_v50  ;;  %10918 = vmatprep.subr.bf16.mxu1 %v14995_v51  ;;  %v19283_v40 = vpop.f32.mrb[76].mxu0  ;;  %v5227_v51 = vld [vmem:[#allocation7 + $0xe70] sm:$0xff] }
 0x611   :  { %10896 = vmatmul.mubr.bf16.gmra.mrb[116].mxu1 %v19065_v50  ;;  %10500 = vmatprep.mubr.bf16.mxu0 %v18867_v24  ;;  %v19289_v0 = vpop.f32.mrb[92].mxu1  ;;  %v19291_v26 = vpop.f32.mrb[77].mxu0  ;;  %v15016_v10 = vcombine.low %v5223_v58, %v5227_v51 }
 0x612   :  { %10481 = vmatpush1.bf16.msra.mxu0 %v14992_v31  ;;  %10938 = vmatprep.mubr.bf16.mxu1 %v18867_v24  ;;  %v19298_v53 = vpop.f32.mrb[93].mxu1  ;;  %v19300_v1 = vpop.f32.mrb[78].mxu0  ;;  %v15010_v31 = vcombine.low %v5216_v47, %v5220_v37 }
 0x613   :  { %10919 = vmatpush1.bf16.msra.mxu1 %v14994_v3  ;;  %10482 = vmatprep.subr.bf16.mxu0 %v15001_v39  ;;  %v19306_v24 = vpop.f32.mrb[94].mxu1  ;;  %v19308_v5 = vpop.f32.mrb[79].mxu0  ;;  %v15017_v3 = vcombine.high %v5223_v58, %v5227_v51  ;;  %v15024_v58 = vcombine.low %v5231_v30, %v5235_v7  ;;  %v15026_v51 = vcombine.low %v5232_v25, %v5236_v63 }
 0x614   :  { %19906 = vst [vmem:[#allocation28_spill] sm:$0xff] %v19308_v5  ;;  %10920 = vmatprep.subr.bf16.mxu1 %v15003_v20  ;;  %v19314_v55 = vpop.f32.mrb[95].mxu1  ;;  %v15019_v20 = vcombine.high %v5224_v45, %v5228_v44  ;;  %v5248_v5 = vld [vmem:[#allocation7 + $0xf18] sm:$0xff] }
 0x615   :  { %19907 = vst [vmem:[#allocation26_spill] sm:$0xff] %v19314_v55 }
 0x616   :  { %10483 = vmatpush1.bf16.msra.mxu0 %v15000_v36  ;;  %v15018_v36 = vcombine.low %v5224_v45, %v5228_v44 }
 0x617   :  { %10921 = vmatpush1.bf16.msra.mxu1 %v15002_v12  ;;  %10484 = vmatprep.subr.bf16.mxu0 %v15009_v27  ;;  %v15025_v12 = vcombine.high %v5231_v30, %v5235_v7 }
 0x618   :  { %10922 = vmatprep.subr.bf16.mxu1 %v15011_v17  ;;  %v19318_v39 = vpop.f32.mrb[80].mxu0  ;;  %v15027_v17 = vcombine.high %v5232_v25, %v5236_v63  ;;  %v15032_v63 = vcombine.low %v5239_v48, %v5243_v21  ;;  %v5260_v25 = vld [vmem:[#allocation7 + $0xf78] sm:$0xff] }
 0x619   :  { %v19320_v35 = vpop.f32.mrb[96].mxu1  ;;  %v19322_v54 = vpop.f32.mrb[81].mxu0 }
 0x61a   :  { %10485 = vmatpush1.bf16.msra.mxu0 %v15008_v29  ;;  %v19324_v52 = vpop.f32.mrb[97].mxu1  ;;  %v19326_v46 = vpop.f32.mrb[82].mxu0  ;;  %v5240_v29 = vld [vmem:[#allocation7 + $0xed8] sm:$0xff] }
 0x61b   :  { %19908 = vst [vmem:[#allocation29_spill] sm:$0xff] %v19326_v46  ;;  %10923 = vmatpush1.bf16.msra.mxu1 %v15010_v31  ;;  %10486 = vmatprep.subr.bf16.mxu0 %v15017_v3  ;;  %v19328_v47 = vpop.f32.mrb[98].mxu1  ;;  %v19330_v37 = vpop.f32.mrb[83].mxu0  ;;  %v15033_v31 = vcombine.high %v5239_v48, %v5243_v21  ;;  %v15035_v44 = vcombine.high %v5240_v29, %v5244_v34  ;;  %v5247_v3 = vld [vmem:[#allocation7 + $0xf10] sm:$0xff] }
 0x61c   :  { %19909 = vst [vmem:[#allocation27_spill] sm:$0xff] %v19328_v47  ;;  %19910 = vst [vmem:[#allocation30_spill] sm:$0xff] %v19330_v37  ;;  %10924 = vmatprep.subr.bf16.mxu1 %v15019_v20  ;;  %v19332_v27 = vpop.f32.mrb[99].mxu1  ;;  %v5268_v37 = vld [vmem:[#allocation7 + $0xfb8] sm:$0xff] }
 0x61e   :  { %10487 = vmatpush1.bf16.msra.mxu0 %v15016_v10  ;;  %v5252_v10 = vld [vmem:[#allocation7 + $0xf38] sm:$0xff] }
 0x61f   :  { %10925 = vmatpush1.bf16.msra.mxu1 %v15018_v36  ;;  %10488 = vmatprep.subr.bf16.mxu0 %v15025_v12  ;;  %v15034_v36 = vcombine.low %v5240_v29, %v5244_v34  ;;  %v15043_v29 = vcombine.high %v5248_v5, %v5252_v10  ;;  %v5267_v34 = vld [vmem:[#allocation7 + $0xfb0] sm:$0xff] }
 0x620   :  { %10926 = vmatprep.subr.bf16.mxu1 %v15027_v17  ;;  %v19334_v45 = vpop.f32.mrb[84].mxu0  ;;  %v5256_v17 = vld [vmem:[#allocation7 + $0xf58] sm:$0xff] }
 0x621   :  { %v19338_v55 = vpop.f32.mrb[100].mxu1  ;;  %v19340_v32 = vpop.f32.mrb[85].mxu0  ;;  %v15051_v21 = vcombine.high %v5256_v17, %v5260_v25 }
 0x622   :  { %19911 = vst [vmem:[#allocation31_spill] sm:$0xff] %v19338_v55  ;;  %10489 = vmatpush1.bf16.msra.mxu0 %v15024_v58  ;;  %v19346_v7 = vpop.f32.mrb[101].mxu1  ;;  %v19348_v12 = vpop.f32.mrb[86].mxu0  ;;  %v15041_v55 = vcombine.high %v5247_v3, %v5251_v19 }
 0x623   :  { %19912 = vst [vmem:[#allocation47_spill] sm:$0xff] %v19346_v7  ;;  %19913 = vst [vmem:[#allocation32_spill] sm:$0xff] %v19348_v12  ;;  %10927 = vmatpush1.bf16.msra.mxu1 %v15026_v51  ;;  %10490 = vmatprep.subr.bf16.mxu0 %v15033_v31  ;;  %v19354_v20 = vpop.f32.mrb[102].mxu1  ;;  %v19356_v30 = vpop.f32.mrb[87].mxu0  ;;  %v5255_v51 = vld [vmem:[#allocation7 + $0xf50] sm:$0xff]  ;;  %v15040_v12 = vcombine.low %v5247_v3, %v5251_v19  ;;  %v15050_v7 = vcombine.low %v5256_v17, %v5260_v25  ;;  %v5272_v3 = vld [vmem:[#allocation7 + $0xfd8] sm:$0xff] }
 0x624   :  { %19914 = vst [vmem:[#allocation48_spill] sm:$0xff] %v19354_v20  ;;  %19915 = vst [vmem:[#allocation33_spill] sm:$0xff] %v19356_v30  ;;  %10928 = vmatprep.subr.bf16.mxu1 %v15035_v44  ;;  %v19362_v48 = vpop.f32.mrb[103].mxu1  ;;  %v5259_v31 = vld [vmem:[#allocation7 + $0xf70] sm:$0xff]  ;;  %v15042_v44 = vcombine.low %v5248_v5, %v5252_v10  ;;  %v5264_v30 = vld [vmem:[#allocation7 + $0xf98] sm:$0xff] }
 0x625   :  { %19916 = vst [vmem:[#allocation49_spill] sm:$0xff] %v19362_v48  ;;  %v15049_v46 = vcombine.high %v5255_v51, %v5259_v31  ;;  %v5263_v20 = vld [vmem:[#allocation7 + $0xf90] sm:$0xff]  ;;  %v15048_v47 = vcombine.low %v5255_v51, %v5259_v31  ;;  %v15059_v48 = vcombine.high %v5264_v30, %v5268_v37  ;;  %v15058_v10 = vcombine.low %v5264_v30, %v5268_v37  ;;  %v5280_v31 = vld [vmem:[#allocation7 + $0x1018] sm:$0xff] }
 0x626   :  { %10491 = vmatpush1.bf16.msra.mxu0 %v15032_v63  ;;  %v15057_v58 = vcombine.high %v5263_v20, %v5267_v34  ;;  %v5271_v63 = vld [vmem:[#allocation7 + $0xfd0] sm:$0xff]  ;;  %v15056_v5 = vcombine.low %v5263_v20, %v5267_v34  ;;  %v5292_v37 = vld [vmem:[#allocation7 + $0x1078] sm:$0xff] }
 0x627   :  { %10929 = vmatpush1.bf16.msra.mxu1 %v15034_v36  ;;  %10492 = vmatprep.subr.bf16.mxu0 %v15041_v55  ;;  %v5275_v19 = vld [vmem:[#allocation7 + $0xff0] sm:$0xff]  ;;  %v5276_v55 = vld [vmem:[#allocation7 + $0xff8] sm:$0xff] }
 0x628   :  { %10930 = vmatprep.subr.bf16.mxu1 %v15043_v29  ;;  %v15065_v36 = vcombine.high %v5271_v63, %v5275_v19  ;;  %v15067_v29 = vcombine.high %v5272_v3, %v5276_v55  ;;  %v5283_v51 = vld [vmem:[#allocation7 + $0x1030] sm:$0xff]  ;;  %v15064_v25 = vcombine.low %v5271_v63, %v5275_v19  ;;  %v15066_v17 = vcombine.low %v5272_v3, %v5276_v55  ;;  %v5296_v3 = vld [vmem:[#allocation7 + $0x1098] sm:$0xff] }
 0x629   :  { %v5291_v20 = vld [vmem:[#allocation7 + $0x1070] sm:$0xff]  ;;  %v5300_v55 = vld [vmem:[#allocation7 + $0x10b8] sm:$0xff] }
 0x62a   :  { %10493 = vmatpush1.bf16.msra.mxu0 %v15040_v12  ;;  %v5279_v12 = vld [vmem:[#allocation7 + $0x1010] sm:$0xff] }
 0x62b   :  { %10931 = vmatpush1.bf16.msra.mxu1 %v15042_v44  ;;  %10494 = vmatprep.subr.bf16.mxu0 %v15049_v46  ;;  %v5284_v46 = vld [vmem:[#allocation7 + $0x1038] sm:$0xff]  ;;  %v15072_v30 = vcombine.low %v5279_v12, %v5283_v51  ;;  %v5295_v63 = vld [vmem:[#allocation7 + $0x1090] sm:$0xff] }
 0x62c   :  { %10932 = vmatprep.subr.bf16.mxu1 %v15051_v21  ;;  %v15073_v21 = vcombine.high %v5279_v12, %v5283_v51  ;;  %v15075_v44 = vcombine.high %v5280_v31, %v5284_v46  ;;  %v5299_v19 = vld [vmem:[#allocation7 + $0x10b0] sm:$0xff] }
 0x62d   :  { %v5303_v12 = vld [vmem:[#allocation7 + $0x10d0] sm:$0xff] }
 0x62e   :  { %10495 = vmatpush1.bf16.msra.mxu0 %v15048_v47  ;;  %v5287_v47 = vld [vmem:[#allocation7 + $0x1050] sm:$0xff] }
 0x62f   :  { %10933 = vmatpush1.bf16.msra.mxu1 %v15050_v7  ;;  %10496 = vmatprep.subr.bf16.mxu0 %v15057_v58  ;;  %v5288_v7 = vld [vmem:[#allocation7 + $0x1058] sm:$0xff]  ;;  %v15074_v58 = vcombine.low %v5280_v31, %v5284_v46  ;;  %v15081_v34 = vcombine.high %v5287_v47, %v5291_v20  ;;  %v5307_v51 = vld [vmem:[#allocation7 + $0x10f0] sm:$0xff] }
 0x630   :  { %10934 = vmatprep.subr.bf16.mxu1 %v15059_v48  ;;  %v15083_v48 = vcombine.high %v5288_v7, %v5292_v37  ;;  %v5304_v31 = vld [vmem:[#allocation7 + $0x10d8] sm:$0xff] }
 0x631   :  { %v5308_v46 = vld [vmem:[#allocation7 + $0x10f8] sm:$0xff] }
 0x632   :  { %10497 = vmatpush1.bf16.msra.mxu0 %v15056_v5  ;;  %v15080_v5 = vcombine.low %v5287_v47, %v5291_v20  ;;  %v5315_v47 = vld [vmem:[#allocation7 + $0x1130] sm:$0xff]  ;;  %v5312_v20 = vld [vmem:[#allocation7 + $0x1118] sm:$0xff] }
 0x633   :  { %10935 = vmatpush1.bf16.msra.mxu1 %v15058_v10  ;;  %10498 = vmatprep.subr.bf16.mxu0 %v15065_v36  ;;  %v15082_v10 = vcombine.low %v5288_v7, %v5292_v37  ;;  %v15089_v36 = vcombine.high %v5295_v63, %v5299_v19  ;;  %v5316_v7 = vld [vmem:[#allocation7 + $0x1138] sm:$0xff]  ;;  %v15096_v37 = vcombine.low %v5303_v12, %v5307_v51 }
 0x634   :  { %10936 = vmatprep.subr.bf16.mxu1 %v15067_v29  ;;  %v15091_v29 = vcombine.high %v5296_v3, %v5300_v55 }
 0x636   :  { %10499 = vmatpush1.bf16.msra.mxu0 %v15064_v25  ;;  %v15090_v25 = vcombine.low %v5296_v3, %v5300_v55  ;;  %v5324_v3 = vld [vmem:[#allocation7 + $0x1178] sm:$0xff] }
 0x637   :  { %10937 = vmatpush1.bf16.msra.mxu1 %v15066_v17  ;;  %10541 = vmatprep.subr.bf16.mxu0 %v15073_v21  ;;  %v15097_v17 = vcombine.high %v5303_v12, %v5307_v51  ;;  %v15099_v21 = vcombine.high %v5304_v31, %v5308_v46  ;;  %v5328_v12 = vld [vmem:[#allocation7 + $0x1198] sm:$0xff] }
 0x638   :  { %10979 = vmatprep.subr.bf16.mxu1 %v15075_v44  ;;  %v5311_v44 = vld [vmem:[#allocation7 + $0x1110] sm:$0xff]  ;;  %v5332_v51 = vld [vmem:[#allocation7 + $0x11b8] sm:$0xff] }
 0x639   :  { %10501 = vmatmul.mubr.bf16.vlgmr.msra.gmra.mrb[88].mxu0 %v18857_v43  ;;  %v15104_v55 = vcombine.low %v5311_v44, %v5315_v47 }
 0x63a   :  { %10939 = vmatmul.mubr.bf16.vlgmr.msra.gmra.mrb[104].mxu1 %v18857_v43  ;;  %10510 = vmatprep.mubr.bf16.mxu0 %v18931_v22  ;;  %v15088_v43 = vcombine.low %v5295_v63, %v5299_v19  ;;  %v5323_v63 = vld [vmem:[#allocation7 + $0x1170] sm:$0xff]  ;;  %v5320_v19 = vld [vmem:[#allocation7 + $0x1158] sm:$0xff] }
 0x63b   :  { %10542 = vmatpush1.bf16.msra.mxu0 %v15072_v30  ;;  %10948 = vmatprep.mubr.bf16.mxu1 %v18931_v22  ;;  %v15098_v30 = vcombine.low %v5304_v31, %v5308_v46  ;;  %v15114_v46 = vcombine.low %v5320_v19, %v5324_v3 }
 0x63c   :  { %10980 = vmatpush1.bf16.msra.mxu1 %v15074_v58  ;;  %10543 = vmatprep.subr.bf16.mxu0 %v15081_v34  ;;  %v15105_v58 = vcombine.high %v5311_v44, %v5315_v47  ;;  %v15107_v34 = vcombine.high %v5312_v20, %v5316_v7  ;;  %v5336_v44 = vld [vmem:[#allocation7 + $0x11d8] sm:$0xff] }
 0x63d   :  { %10981 = vmatprep.subr.bf16.mxu1 %v15083_v48  ;;  %v5319_v48 = vld [vmem:[#allocation7 + $0x1150] sm:$0xff]  ;;  %v5340_v47 = vld [vmem:[#allocation7 + $0x11f8] sm:$0xff] }
 0x63e   :  { %v15112_v31 = vcombine.low %v5319_v48, %v5323_v63 }
 0x63f   :  { %10544 = vmatpush1.bf16.msra.mxu0 %v15080_v5  ;;  %v15106_v5 = vcombine.low %v5312_v20, %v5316_v7  ;;  %v15122_v20 = vcombine.low %v5328_v12, %v5332_v51 }
 0x640   :  { %10982 = vmatpush1.bf16.msra.mxu1 %v15082_v10  ;;  %10545 = vmatprep.subr.bf16.mxu0 %v15089_v36  ;;  %v15113_v10 = vcombine.high %v5319_v48, %v5323_v63  ;;  %v5327_v36 = vld [vmem:[#allocation7 + $0x1190] sm:$0xff]  ;;  %v5348_v48 = vld [vmem:[#allocation7 + $0x1238] sm:$0xff] }
 0x641   :  { %10511 = vmatmul.mubr.bf16.gmra.mrb[92].mxu0 %v18927_v14  ;;  %10983 = vmatprep.subr.bf16.mxu1 %v15091_v29  ;;  %v5331_v29 = vld [vmem:[#allocation7 + $0x11b0] sm:$0xff] }
 0x642   :  { %10949 = vmatmul.mubr.bf16.gmra.mrb[108].mxu1 %v18927_v14  ;;  %10520 = vmatprep.mubr.bf16.mxu0 %v19032_v62 }
 0x643   :  { %10546 = vmatpush1.bf16.msra.mxu0 %v15088_v43  ;;  %10958 = vmatprep.mubr.bf16.mxu1 %v19032_v62  ;;  %v15115_v62 = vcombine.high %v5320_v19, %v5324_v3  ;;  %v15121_v43 = vcombine.high %v5327_v36, %v5331_v29  ;;  %v15130_v19 = vcombine.low %v5336_v44, %v5340_v47 }
 0x644   :  { %10984 = vmatpush1.bf16.msra.mxu1 %v15090_v25  ;;  %10547 = vmatprep.subr.bf16.mxu0 %v15097_v17  ;;  %v15123_v25 = vcombine.high %v5328_v12, %v5332_v51  ;;  %v5335_v17 = vld [vmem:[#allocation7 + $0x11d0] sm:$0xff] }
 0x645   :  { %10985 = vmatprep.subr.bf16.mxu1 %v15099_v21  ;;  %v5339_v21 = vld [vmem:[#allocation7 + $0x11f0] sm:$0xff] }
 0x646   :  { %v15129_v7 = vcombine.high %v5335_v17, %v5339_v21  ;;  %v15128_v63 = vcombine.low %v5335_v17, %v5339_v21 }
 0x647   :  { %10548 = vmatpush1.bf16.msra.mxu0 %v15096_v37  ;;  %v15131_v37 = vcombine.high %v5336_v44, %v5340_v47 }
 0x648   :  { %10986 = vmatpush1.bf16.msra.mxu1 %v15098_v30  ;;  %10549 = vmatprep.subr.bf16.mxu0 %v15105_v58  ;;  %v5343_v30 = vld [vmem:[#allocation7 + $0x1210] sm:$0xff] }
 0x649   :  { %10521 = vmatmul.mubr.bf16.gmra.mrb[96].mxu0 %v19020_v49  ;;  %10987 = vmatprep.subr.bf16.mxu1 %v15107_v34  ;;  %v5347_v58 = vld [vmem:[#allocation7 + $0x1230] sm:$0xff]  ;;  %v5344_v34 = vld [vmem:[#allocation7 + $0x1218] sm:$0xff] }
 0x64a   :  { %10959 = vmatmul.mubr.bf16.gmra.mrb[112].mxu1 %v19020_v49  ;;  %10530 = vmatprep.mubr.bf16.mxu0 %v19072_v56  ;;  %v15120_v49 = vcombine.low %v5327_v36, %v5331_v29  ;;  %v15137_v3 = vcombine.high %v5343_v30, %v5347_v58  ;;  %v5356_v36 = vld [vmem:[#allocation7 + $0x1278] sm:$0xff]  ;;  %v15136_v29 = vcombine.low %v5343_v30, %v5347_v58 }
 0x64b   :  { %10550 = vmatpush1.bf16.msra.mxu0 %v15104_v55  ;;  %10968 = vmatprep.mubr.bf16.mxu1 %v19072_v56  ;;  %v15139_v55 = vcombine.high %v5344_v34, %v5348_v48  ;;  %v15138_v12 = vcombine.low %v5344_v34, %v5348_v48 }
 0x64c   :  { %10988 = vmatpush1.bf16.msra.mxu1 %v15106_v5  ;;  %10551 = vmatprep.subr.bf16.mxu0 %v15113_v10  ;;  %v5351_v5 = vld [vmem:[#allocation7 + $0x1250] sm:$0xff] }
 0x64d   :  { %10989 = vmatprep.subr.bf16.mxu1 %v15115_v62  ;;  %v5355_v10 = vld [vmem:[#allocation7 + $0x1270] sm:$0xff]  ;;  %v5352_v62 = vld [vmem:[#allocation7 + $0x1258] sm:$0xff] }
 0x64e   :  { %v15145_v51 = vcombine.high %v5351_v5, %v5355_v10  ;;  %v15144_v17 = vcombine.low %v5351_v5, %v5355_v10  ;;  %v15146_v21 = vcombine.low %v5352_v62, %v5356_v36 }
 0x64f   :  { %10552 = vmatpush1.bf16.msra.mxu0 %v15112_v31  ;;  %v15147_v31 = vcombine.high %v5352_v62, %v5356_v36 }
 0x650   :  { %10990 = vmatpush1.bf16.msra.mxu1 %v15114_v46  ;;  %10553 = vmatprep.subr.bf16.mxu0 %v15121_v43  ;;  %v5363_v46 = vld [vmem:[#allocation7 + $0x12b0] sm:$0xff]  ;;  %v5360_v43 = vld [vmem:[#allocation7 + $0x1298] sm:$0xff] }
 0x651   :  { %10531 = vmatmul.mubr.bf16.gmra.mrb[100].mxu0 %v19068_v9  ;;  %10991 = vmatprep.subr.bf16.mxu1 %v15123_v25  ;;  %v5364_v25 = vld [vmem:[#allocation7 + $0x12b8] sm:$0xff] }
 0x652   :  { %10969 = vmatmul.mubr.bf16.gmra.mrb[116].mxu1 %v19068_v9  ;;  %10573 = vmatprep.mubr.bf16.mxu0 %v18929_v18  ;;  %v15155_v47 = vcombine.high %v5360_v43, %v5364_v25  ;;  %v15154_v58 = vcombine.low %v5360_v43, %v5364_v25 }
 0x653   :  { %10554 = vmatpush1.bf16.msra.mxu0 %v15120_v49  ;;  %11011 = vmatprep.mubr.bf16.mxu1 %v18929_v18  ;;  %v5359_v18 = vld [vmem:[#allocation7 + $0x1290] sm:$0xff] }
 0x654   :  { %10992 = vmatpush1.bf16.msra.mxu1 %v15122_v20  ;;  %10555 = vmatprep.subr.bf16.mxu0 %v15129_v7  ;;  %v15153_v44 = vcombine.high %v5359_v18, %v5363_v46  ;;  %v5367_v49 = vld [vmem:[#allocation7 + $0x12d0] sm:$0xff]  ;;  %v5368_v7 = vld [vmem:[#allocation7 + $0x12d8] sm:$0xff]  ;;  %v15152_v30 = vcombine.low %v5359_v18, %v5363_v46 }
 0x655   :  { %10993 = vmatprep.subr.bf16.mxu1 %v15131_v37  ;;  %v5371_v20 = vld [vmem:[#allocation7 + $0x12f0] sm:$0xff]  ;;  %v5372_v37 = vld [vmem:[#allocation7 + $0x12f8] sm:$0xff] }
 0x656   :  { %v15161_v34 = vcombine.high %v5367_v49, %v5371_v20  ;;  %v15163_v48 = vcombine.high %v5368_v7, %v5372_v37  ;;  %v15160_v5 = vcombine.low %v5367_v49, %v5371_v20  ;;  %v15162_v10 = vcombine.low %v5368_v7, %v5372_v37 }
 0x657   :  { %10556 = vmatpush1.bf16.msra.mxu0 %v15128_v63  ;;  %v5375_v63 = vld [vmem:[#allocation7 + $0x1310] sm:$0xff] }
 0x658   :  { %10994 = vmatpush1.bf16.msra.mxu1 %v15130_v19  ;;  %10557 = vmatprep.subr.bf16.mxu0 %v15137_v3  ;;  %v5379_v19 = vld [vmem:[#allocation7 + $0x1330] sm:$0xff]  ;;  %v5376_v3 = vld [vmem:[#allocation7 + $0x1318] sm:$0xff] }
 0x659   :  { %10995 = vmatprep.subr.bf16.mxu1 %v15139_v55  ;;  %v5380_v55 = vld [vmem:[#allocation7 + $0x1338] sm:$0xff]  ;;  %v15169_v62 = vcombine.high %v5375_v63, %v5379_v19  ;;  %v15168_v18 = vcombine.low %v5375_v63, %v5379_v19 }
 0x65a   :  { %v15171_v36 = vcombine.high %v5376_v3, %v5380_v55  ;;  %v15170_v46 = vcombine.low %v5376_v3, %v5380_v55 }
 0x65b   :  { %10558 = vmatpush1.bf16.msra.mxu0 %v15136_v29  ;;  %v5383_v29 = vld [vmem:[#allocation7 + $0x1350] sm:$0xff] }
 0x65c   :  { %10996 = vmatpush1.bf16.msra.mxu1 %v15138_v12  ;;  %10559 = vmatprep.subr.bf16.mxu0 %v15145_v51  ;;  %v5387_v12 = vld [vmem:[#allocation7 + $0x1370] sm:$0xff]  ;;  %v5384_v51 = vld [vmem:[#allocation7 + $0x1358] sm:$0xff] }
 0x65d   :  { %10997 = vmatprep.subr.bf16.mxu1 %v15147_v31  ;;  %v5388_v31 = vld [vmem:[#allocation7 + $0x1378] sm:$0xff]  ;;  %v15177_v43 = vcombine.high %v5383_v29, %v5387_v12  ;;  %v15176_v49 = vcombine.low %v5383_v29, %v5387_v12 }
 0x65e   :  { %v15179_v25 = vcombine.high %v5384_v51, %v5388_v31  ;;  %v15178_v20 = vcombine.low %v5384_v51, %v5388_v31 }
 0x65f   :  { %10560 = vmatpush1.bf16.msra.mxu0 %v15144_v17  ;;  %v5391_v17 = vld [vmem:[#allocation7 + $0x1390] sm:$0xff] }
 0x660   :  { %10998 = vmatpush1.bf16.msra.mxu1 %v15146_v21  ;;  %10561 = vmatprep.subr.bf16.mxu0 %v15153_v44  ;;  %v5395_v21 = vld [vmem:[#allocation7 + $0x13b0] sm:$0xff]  ;;  %v5392_v44 = vld [vmem:[#allocation7 + $0x1398] sm:$0xff] }
 0x661   :  { %10999 = vmatprep.subr.bf16.mxu1 %v15155_v47  ;;  %v5396_v47 = vld [vmem:[#allocation7 + $0x13b8] sm:$0xff]  ;;  %v15185_v7 = vcombine.high %v5391_v17, %v5395_v21  ;;  %v15184_v63 = vcombine.low %v5391_v17, %v5395_v21 }
 0x662   :  { %v15187_v37 = vcombine.high %v5392_v44, %v5396_v47  ;;  %v15186_v19 = vcombine.low %v5392_v44, %v5396_v47 }
 0x663   :  { %10562 = vmatpush1.bf16.msra.mxu0 %v15152_v30  ;;  %v5399_v30 = vld [vmem:[#allocation7 + $0x13d0] sm:$0xff] }
 0x664   :  { %11000 = vmatpush1.bf16.msra.mxu1 %v15154_v58  ;;  %10563 = vmatprep.subr.bf16.mxu0 %v15161_v34  ;;  %v5403_v58 = vld [vmem:[#allocation7 + $0x13f0] sm:$0xff]  ;;  %v5400_v34 = vld [vmem:[#allocation7 + $0x13d8] sm:$0xff] }
 0x665   :  { %11001 = vmatprep.subr.bf16.mxu1 %v15163_v48  ;;  %v5404_v48 = vld [vmem:[#allocation7 + $0x13f8] sm:$0xff]  ;;  %v15193_v3 = vcombine.high %v5399_v30, %v5403_v58  ;;  %v15192_v29 = vcombine.low %v5399_v30, %v5403_v58 }
 0x666   :  { %v15195_v55 = vcombine.high %v5400_v34, %v5404_v48  ;;  %v15194_v12 = vcombine.low %v5400_v34, %v5404_v48 }
 0x667   :  { %10564 = vmatpush1.bf16.msra.mxu0 %v15160_v5  ;;  %v5407_v5 = vld [vmem:[#allocation7 + $0x1410] sm:$0xff] }
 0x668   :  { %11002 = vmatpush1.bf16.msra.mxu1 %v15162_v10  ;;  %10565 = vmatprep.subr.bf16.mxu0 %v15169_v62  ;;  %v5411_v10 = vld [vmem:[#allocation7 + $0x1430] sm:$0xff]  ;;  %v5408_v62 = vld [vmem:[#allocation7 + $0x1418] sm:$0xff] }
 0x669   :  { %11003 = vmatprep.subr.bf16.mxu1 %v15171_v36  ;;  %v5412_v36 = vld [vmem:[#allocation7 + $0x1438] sm:$0xff]  ;;  %v15201_v51 = vcombine.high %v5407_v5, %v5411_v10  ;;  %v15200_v17 = vcombine.low %v5407_v5, %v5411_v10 }
 0x66a   :  { %v15203_v31 = vcombine.high %v5408_v62, %v5412_v36  ;;  %v15202_v21 = vcombine.low %v5408_v62, %v5412_v36  ;;  %v5439_v62 = vld [vmem:[#allocation7 + $0x1510] sm:$0xff] }
 0x66b   :  { %10566 = vmatpush1.bf16.msra.mxu0 %v15168_v18  ;;  %v5415_v18 = vld [vmem:[#allocation7 + $0x1450] sm:$0xff] }
 0x66c   :  { %11004 = vmatpush1.bf16.msra.mxu1 %v15170_v46  ;;  %10567 = vmatprep.subr.bf16.mxu0 %v15177_v43  ;;  %v5419_v46 = vld [vmem:[#allocation7 + $0x1470] sm:$0xff]  ;;  %v5416_v43 = vld [vmem:[#allocation7 + $0x1458] sm:$0xff] }
 0x66d   :  { %11005 = vmatprep.subr.bf16.mxu1 %v15179_v25  ;;  %v5420_v25 = vld [vmem:[#allocation7 + $0x1478] sm:$0xff]  ;;  %v15209_v44 = vcombine.high %v5415_v18, %v5419_v46  ;;  %v15208_v30 = vcombine.low %v5415_v18, %v5419_v46  ;;  %v5443_v36 = vld [vmem:[#allocation7 + $0x1530] sm:$0xff] }
 0x66e   :  { %v15211_v47 = vcombine.high %v5416_v43, %v5420_v25  ;;  %v15210_v58 = vcombine.low %v5416_v43, %v5420_v25  ;;  %v15233_v18 = vcombine.high %v5439_v62, %v5443_v36  ;;  %v5447_v43 = vld [vmem:[#allocation7 + $0x1550] sm:$0xff] }
 0x66f   :  { %10568 = vmatpush1.bf16.msra.mxu0 %v15176_v49  ;;  %v5423_v49 = vld [vmem:[#allocation7 + $0x1490] sm:$0xff] }
 0x670   :  { %11006 = vmatpush1.bf16.msra.mxu1 %v15178_v20  ;;  %10569 = vmatprep.subr.bf16.mxu0 %v15185_v7  ;;  %v5427_v20 = vld [vmem:[#allocation7 + $0x14b0] sm:$0xff]  ;;  %v5424_v7 = vld [vmem:[#allocation7 + $0x1498] sm:$0xff] }
 0x671   :  { %11007 = vmatprep.subr.bf16.mxu1 %v15187_v37  ;;  %v5428_v37 = vld [vmem:[#allocation7 + $0x14b8] sm:$0xff]  ;;  %v15217_v34 = vcombine.high %v5423_v49, %v5427_v20  ;;  %v5451_v25 = vld [vmem:[#allocation7 + $0x1570] sm:$0xff] }
 0x672   :  { %v15219_v48 = vcombine.high %v5424_v7, %v5428_v37  ;;  %v15218_v5 = vcombine.low %v5424_v7, %v5428_v37  ;;  %v5456_v7 = vld [vmem:[#allocation7 + $0x1598] sm:$0xff] }
 0x673   :  { %10570 = vmatpush1.bf16.msra.mxu0 %v15184_v63  ;;  %v5431_v63 = vld [vmem:[#allocation7 + $0x14d0] sm:$0xff]  ;;  %v5460_v37 = vld [vmem:[#allocation7 + $0x15b8] sm:$0xff] }
 0x674   :  { %11008 = vmatpush1.bf16.msra.mxu1 %v15186_v19  ;;  %10571 = vmatprep.subr.bf16.mxu0 %v15193_v3  ;;  %v5435_v19 = vld [vmem:[#allocation7 + $0x14f0] sm:$0xff]  ;;  %v5432_v3 = vld [vmem:[#allocation7 + $0x14d8] sm:$0xff] }
 0x675   :  { %11009 = vmatprep.subr.bf16.mxu1 %v15195_v55  ;;  %v5436_v55 = vld [vmem:[#allocation7 + $0x14f8] sm:$0xff]  ;;  %v15225_v10 = vcombine.high %v5431_v63, %v5435_v19 }
 0x677   :  { %10572 = vmatpush1.bf16.msra.mxu0 %v15192_v29  ;;  %v5440_v29 = vld [vmem:[#allocation7 + $0x1518] sm:$0xff] }
 0x678   :  { %11010 = vmatpush1.bf16.msra.mxu1 %v15194_v12  ;;  %10614 = vmatprep.subr.bf16.mxu0 %v15201_v51  ;;  %v5444_v12 = vld [vmem:[#allocation7 + $0x1538] sm:$0xff]  ;;  %v15224_v51 = vcombine.low %v5431_v63, %v5435_v19  ;;  %v5463_v63 = vld [vmem:[#allocation7 + $0x15d0] sm:$0xff] }
 0x679   :  { %11052 = vmatprep.subr.bf16.mxu1 %v15203_v31  ;;  %v15226_v31 = vcombine.low %v5432_v3, %v5436_v55  ;;  %v15235_v46 = vcombine.high %v5440_v29, %v5444_v12  ;;  %v5467_v19 = vld [vmem:[#allocation7 + $0x15f0] sm:$0xff] }
 0x67a   :  { %10574 = vmatmul.mubr.bf16.vlgmr.msra.gmra.mrb[88].mxu0 %v18921_v2 }
 0x67b   :  { %11012 = vmatmul.mubr.bf16.vlgmr.msra.gmra.mrb[104].mxu1 %v18921_v2  ;;  %10583 = vmatprep.mubr.bf16.mxu0 %v19110_v33  ;;  %v15216_v2 = vcombine.low %v5423_v49, %v5427_v20  ;;  %v5455_v49 = vld [vmem:[#allocation7 + $0x1590] sm:$0xff] }
 0x67c   :  { %10615 = vmatpush1.bf16.msra.mxu0 %v15200_v17  ;;  %11021 = vmatprep.mubr.bf16.mxu1 %v19110_v33  ;;  %v15227_v33 = vcombine.high %v5432_v3, %v5436_v55  ;;  %v5448_v17 = vld [vmem:[#allocation7 + $0x1558] sm:$0xff]  ;;  %v5459_v20 = vld [vmem:[#allocation7 + $0x15b0] sm:$0xff] }
 0x67d   :  { %11053 = vmatpush1.bf16.msra.mxu1 %v15202_v21  ;;  %10616 = vmatprep.subr.bf16.mxu0 %v15209_v44  ;;  %v5452_v21 = vld [vmem:[#allocation7 + $0x1578] sm:$0xff]  ;;  %v15234_v44 = vcombine.low %v5440_v29, %v5444_v12  ;;  %v15256_v29 = vcombine.low %v5463_v63, %v5467_v19 }
 0x67e   :  { %11054 = vmatprep.subr.bf16.mxu1 %v15211_v47  ;;  %v15241_v47 = vcombine.high %v5447_v43, %v5451_v25  ;;  %v5464_v3 = vld [vmem:[#allocation7 + $0x15d8] sm:$0xff] }
 0x67f   :  { %v5468_v55 = vld [vmem:[#allocation7 + $0x15f8] sm:$0xff] }
 0x680   :  { %10617 = vmatpush1.bf16.msra.mxu0 %v15208_v30  ;;  %v15240_v30 = vcombine.low %v5447_v43, %v5451_v25  ;;  %v15258_v12 = vcombine.low %v5464_v3, %v5468_v55  ;;  %v5480_v43 = vld [vmem:[#allocation7 + $0x1658] sm:$0xff] }
 0x681   :  { %11055 = vmatpush1.bf16.msra.mxu1 %v15210_v58  ;;  %10618 = vmatprep.subr.bf16.mxu0 %v15217_v34  ;;  %v15242_v58 = vcombine.low %v5448_v17, %v5452_v21  ;;  %v15249_v34 = vcombine.high %v5455_v49, %v5459_v20  ;;  %v5484_v25 = vld [vmem:[#allocation7 + $0x1678] sm:$0xff] }
 0x682   :  { %10584 = vmatmul.mubr.bf16.gmra.mrb[92].mxu0 %v19108_v16  ;;  %11056 = vmatprep.subr.bf16.mxu1 %v15219_v48  ;;  %v15251_v48 = vcombine.high %v5456_v7, %v5460_v37 }
 0x683   :  { %11022 = vmatmul.mubr.bf16.gmra.mrb[108].mxu1 %v19108_v16  ;;  %10593 = vmatprep.mubr.bf16.mxu0 %v19070_v11  ;;  %v15232_v16 = vcombine.low %v5439_v62, %v5443_v36  ;;  %v5472_v62 = vld [vmem:[#allocation7 + $0x1618] sm:$0xff] }
 0x684   :  { %10619 = vmatpush1.bf16.msra.mxu0 %v15216_v2  ;;  %11031 = vmatprep.mubr.bf16.mxu1 %v19070_v11  ;;  %v15243_v11 = vcombine.high %v5448_v17, %v5452_v21  ;;  %v15250_v2 = vcombine.low %v5456_v7, %v5460_v37  ;;  %v5476_v36 = vld [vmem:[#allocation7 + $0x1638] sm:$0xff] }
 0x685   :  { %11057 = vmatpush1.bf16.msra.mxu1 %v15218_v5  ;;  %10620 = vmatprep.subr.bf16.mxu0 %v15225_v10  ;;  %v15257_v5 = vcombine.high %v5463_v63, %v5467_v19  ;;  %v5471_v10 = vld [vmem:[#allocation7 + $0x1610] sm:$0xff]  ;;  %v15266_v17 = vcombine.low %v5472_v62, %v5476_v36 }
 0x686   :  { %11058 = vmatprep.subr.bf16.mxu1 %v15227_v33  ;;  %v5475_v33 = vld [vmem:[#allocation7 + $0x1630] sm:$0xff] }
 0x688   :  { %10621 = vmatpush1.bf16.msra.mxu0 %v15224_v51  ;;  %v15265_v51 = vcombine.high %v5471_v10, %v5475_v33 }
 0x689   :  { %11059 = vmatpush1.bf16.msra.mxu1 %v15226_v31  ;;  %10622 = vmatprep.subr.bf16.mxu0 %v15233_v18  ;;  %v15267_v31 = vcombine.high %v5472_v62, %v5476_v36  ;;  %v5479_v18 = vld [vmem:[#allocation7 + $0x1650] sm:$0xff] }
 0x68a   :  { %10594 = vmatmul.mubr.bf16.gmra.mrb[96].mxu0 %v19065_v50  ;;  %11060 = vmatprep.subr.bf16.mxu1 %v15235_v46  ;;  %v5483_v46 = vld [vmem:[#allocation7 + $0x1670] sm:$0xff] }
 0x68b   :  { %11032 = vmatmul.mubr.bf16.gmra.mrb[112].mxu1 %v19065_v50  ;;  %10603 = vmatprep.mubr.bf16.mxu0 %v19132_v13  ;;  %v15248_v50 = vcombine.low %v5455_v49, %v5459_v20  ;;  %v15273_v21 = vcombine.high %v5479_v18, %v5483_v46  ;;  %v15272_v49 = vcombine.low %v5479_v18, %v5483_v46 }
 0x68c   :  { %10623 = vmatpush1.bf16.msra.mxu0 %v15232_v16  ;;  %11041 = vmatprep.mubr.bf16.mxu1 %v19132_v13  ;;  %v15259_v13 = vcombine.high %v5464_v3, %v5468_v55  ;;  %v15275_v16 = vcombine.high %v5480_v43, %v5484_v25  ;;  %v15274_v20 = vcombine.low %v5480_v43, %v5484_v25 }
 0x68d   :  { %11061 = vmatpush1.bf16.msra.mxu1 %v15234_v44  ;;  %10624 = vmatprep.subr.bf16.mxu0 %v15241_v47  ;;  %v5491_v44 = vld [vmem:[#allocation7 + $0x16b0] sm:$0xff]  ;;  %v5488_v47 = vld [vmem:[#allocation7 + $0x1698] sm:$0xff] }
 0x68e   :  { %11062 = vmatprep.subr.bf16.mxu1 %v15243_v11  ;;  %v5492_v11 = vld [vmem:[#allocation7 + $0x16b8] sm:$0xff] }
 0x68f   :  { %v15283_v37 = vcombine.high %v5488_v47, %v5492_v11  ;;  %v15282_v19 = vcombine.low %v5488_v47, %v5492_v11 }
 0x690   :  { %10625 = vmatpush1.bf16.msra.mxu0 %v15240_v30  ;;  %v5495_v30 = vld [vmem:[#allocation7 + $0x16d0] sm:$0xff] }
 0x691   :  { %11063 = vmatpush1.bf16.msra.mxu1 %v15242_v58  ;;  %10626 = vmatprep.subr.bf16.mxu0 %v15249_v34  ;;  %v5499_v58 = vld [vmem:[#allocation7 + $0x16f0] sm:$0xff]  ;;  %v5496_v34 = vld [vmem:[#allocation7 + $0x16d8] sm:$0xff] }
 0x692   :  { %10604 = vmatmul.mubr.bf16.gmra.mrb[100].mxu0 %v19130_v57  ;;  %11064 = vmatprep.subr.bf16.mxu1 %v15251_v48  ;;  %v5500_v48 = vld [vmem:[#allocation7 + $0x16f8] sm:$0xff]  ;;  %v15289_v3 = vcombine.high %v5495_v30, %v5499_v58 }
 0x693   :  { %11042 = vmatmul.mubr.bf16.gmra.mrb[116].mxu1 %v19130_v57  ;;  %10646 = vmatprep.mubr.bf16.mxu0 %v18931_v22  ;;  %v15264_v57 = vcombine.low %v5471_v10, %v5475_v33  ;;  %v15291_v55 = vcombine.high %v5496_v34, %v5500_v48  ;;  %v15288_v10 = vcombine.low %v5495_v30, %v5499_v58 }
 0x694   :  { %10627 = vmatpush1.bf16.msra.mxu0 %v15248_v50  ;;  %11084 = vmatprep.mubr.bf16.mxu1 %v18931_v22  ;;  %v5487_v22 = vld [vmem:[#allocation7 + $0x1690] sm:$0xff]  ;;  %v15290_v33 = vcombine.low %v5496_v34, %v5500_v48 }
 0x695   :  { %11065 = vmatpush1.bf16.msra.mxu1 %v15250_v2  ;;  %10628 = vmatprep.subr.bf16.mxu0 %v15257_v5  ;;  %v15281_v7 = vcombine.high %v5487_v22, %v5491_v44  ;;  %v15280_v63 = vcombine.low %v5487_v22, %v5491_v44  ;;  %v5503_v50 = vld [vmem:[#allocation7 + $0x1710] sm:$0xff]  ;;  %v5504_v5 = vld [vmem:[#allocation7 + $0x1718] sm:$0xff] }
 0x696   :  { %11066 = vmatprep.subr.bf16.mxu1 %v15259_v13  ;;  %v5507_v2 = vld [vmem:[#allocation7 + $0x1730] sm:$0xff]  ;;  %v5508_v13 = vld [vmem:[#allocation7 + $0x1738] sm:$0xff] }
 0x697   :  { %v15297_v62 = vcombine.high %v5503_v50, %v5507_v2  ;;  %v15299_v36 = vcombine.high %v5504_v5, %v5508_v13  ;;  %v15296_v18 = vcombine.low %v5503_v50, %v5507_v2  ;;  %v15298_v46 = vcombine.low %v5504_v5, %v5508_v13 }
 0x698   :  { %10629 = vmatpush1.bf16.msra.mxu0 %v15256_v29  ;;  %v5511_v29 = vld [vmem:[#allocation7 + $0x1750] sm:$0xff] }
 0x699   :  { %11067 = vmatpush1.bf16.msra.mxu1 %v15258_v12  ;;  %10630 = vmatprep.subr.bf16.mxu0 %v15265_v51  ;;  %v5515_v12 = vld [vmem:[#allocation7 + $0x1770] sm:$0xff]  ;;  %v5512_v51 = vld [vmem:[#allocation7 + $0x1758] sm:$0xff] }
 0x69a   :  { %11068 = vmatprep.subr.bf16.mxu1 %v15267_v31  ;;  %v5516_v31 = vld [vmem:[#allocation7 + $0x1778] sm:$0xff]  ;;  %v15305_v43 = vcombine.high %v5511_v29, %v5515_v12  ;;  %v15304_v22 = vcombine.low %v5511_v29, %v5515_v12 }
 0x69b   :  { %v15307_v25 = vcombine.high %v5512_v51, %v5516_v31  ;;  %v15306_v44 = vcombine.low %v5512_v51, %v5516_v31 }
 0x69c   :  { %10631 = vmatpush1.bf16.msra.mxu0 %v15264_v57  ;;  %v5519_v57 = vld [vmem:[#allocation7 + $0x1790] sm:$0xff] }
 0x69d   :  { %11069 = vmatpush1.bf16.msra.mxu1 %v15266_v17  ;;  %10632 = vmatprep.subr.bf16.mxu0 %v15273_v21  ;;  %v5523_v17 = vld [vmem:[#allocation7 + $0x17b0] sm:$0xff]  ;;  %v5520_v21 = vld [vmem:[#allocation7 + $0x1798] sm:$0xff] }
 0x69e   :  { %11070 = vmatprep.subr.bf16.mxu1 %v15275_v16  ;;  %v5524_v16 = vld [vmem:[#allocation7 + $0x17b8] sm:$0xff]  ;;  %v15313_v47 = vcombine.high %v5519_v57, %v5523_v17  ;;  %v15312_v30 = vcombine.low %v5519_v57, %v5523_v17 }
 0x69f   :  { %v15315_v11 = vcombine.high %v5520_v21, %v5524_v16  ;;  %v15314_v58 = vcombine.low %v5520_v21, %v5524_v16 }
 0x6a0   :  { %10633 = vmatpush1.bf16.msra.mxu0 %v15272_v49  ;;  %v5527_v49 = vld [vmem:[#allocation7 + $0x17d0] sm:$0xff] }
 0x6a1   :  { %11071 = vmatpush1.bf16.msra.mxu1 %v15274_v20  ;;  %10634 = vmatprep.subr.bf16.mxu0 %v15281_v7  ;;  %v5531_v20 = vld [vmem:[#allocation7 + $0x17f0] sm:$0xff]  ;;  %v5528_v7 = vld [vmem:[#allocation7 + $0x17d8] sm:$0xff] }
 0x6a2   :  { %11072 = vmatprep.subr.bf16.mxu1 %v15283_v37  ;;  %v5532_v37 = vld [vmem:[#allocation7 + $0x17f8] sm:$0xff]  ;;  %v15321_v34 = vcombine.high %v5527_v49, %v5531_v20  ;;  %v15320_v50 = vcombine.low %v5527_v49, %v5531_v20 }
 0x6a3   :  { %v15323_v48 = vcombine.high %v5528_v7, %v5532_v37  ;;  %v15322_v2 = vcombine.low %v5528_v7, %v5532_v37  ;;  %v11283_v7 = vld [vmem:[#allocation10 + $0x100] sm:$0xff] }
 0x6a4   :  { %10635 = vmatpush1.bf16.msra.mxu0 %v15280_v63  ;;  %v11251_v63 = vld [vmem:[#allocation10] sm:$0xff] }
 0x6a5   :  { %11073 = vmatpush1.bf16.msra.mxu1 %v15282_v19  ;;  %10636 = vmatprep.subr.bf16.mxu0 %v15289_v3  ;;  %v11255_v19 = vld [vmem:[#allocation10 + $0x20] sm:$0xff]  ;;  %v11252_v3 = vld [vmem:[#allocation10 + $0x8] sm:$0xff] }
 0x6a6   :  { %11074 = vmatprep.subr.bf16.mxu1 %v15291_v55  ;;  %v11256_v55 = vld [vmem:[#allocation10 + $0x28] sm:$0xff]  ;;  %v15325_v5 = vcombine.high %v11251_v63, %v11255_v19  ;;  %v15324_v29 = vcombine.low %v11251_v63, %v11255_v19  ;;  %v11287_v37 = vld [vmem:[#allocation10 + $0x120] sm:$0xff] }
 0x6a7   :  { %v15327_v13 = vcombine.high %v11252_v3, %v11256_v55  ;;  %v15326_v12 = vcombine.low %v11252_v3, %v11256_v55  ;;  %v15357_v63 = vcombine.high %v11283_v7, %v11287_v37  ;;  %v11291_v3 = vld [vmem:[#allocation10 + $0x140] sm:$0xff] }
 0x6a8   :  { %10637 = vmatpush1.bf16.msra.mxu0 %v15288_v10  ;;  %v11259_v10 = vld [vmem:[#allocation10 + $0x40] sm:$0xff] }
 0x6a9   :  { %11075 = vmatpush1.bf16.msra.mxu1 %v15290_v33  ;;  %10638 = vmatprep.subr.bf16.mxu0 %v15297_v62  ;;  %v11263_v33 = vld [vmem:[#allocation10 + $0x60] sm:$0xff]  ;;  %v11260_v62 = vld [vmem:[#allocation10 + $0x48] sm:$0xff] }
 0x6aa   :  { %11076 = vmatprep.subr.bf16.mxu1 %v15299_v36  ;;  %v11264_v36 = vld [vmem:[#allocation10 + $0x68] sm:$0xff]  ;;  %v15333_v51 = vcombine.high %v11259_v10, %v11263_v33  ;;  %v15332_v57 = vcombine.low %v11259_v10, %v11263_v33  ;;  %v11295_v55 = vld [vmem:[#allocation10 + $0x160] sm:$0xff] }
 0x6ab   :  { %v15335_v31 = vcombine.high %v11260_v62, %v11264_v36  ;;  %v15334_v17 = vcombine.low %v11260_v62, %v11264_v36  ;;  %v11299_v10 = vld [vmem:[#allocation10 + $0x180] sm:$0xff]  ;;  %v11300_v62 = vld [vmem:[#allocation10 + $0x188] sm:$0xff] }
 0x6ac   :  { %10639 = vmatpush1.bf16.msra.mxu0 %v15296_v18  ;;  %v11267_v18 = vld [vmem:[#allocation10 + $0x80] sm:$0xff]  ;;  %v11304_v36 = vld [vmem:[#allocation10 + $0x1a8] sm:$0xff] }
 0x6ad   :  { %11077 = vmatpush1.bf16.msra.mxu1 %v15298_v46  ;;  %10640 = vmatprep.subr.bf16.mxu0 %v15305_v43  ;;  %v11271_v46 = vld [vmem:[#allocation10 + $0xa0] sm:$0xff]  ;;  %v11268_v43 = vld [vmem:[#allocation10 + $0x88] sm:$0xff] }
 0x6ae   :  { %11078 = vmatprep.subr.bf16.mxu1 %v15307_v25  ;;  %v11272_v25 = vld [vmem:[#allocation10 + $0xa8] sm:$0xff]  ;;  %v15341_v21 = vcombine.high %v11267_v18, %v11271_v46  ;;  %v11303_v33 = vld [vmem:[#allocation10 + $0x1a0] sm:$0xff] }
 0x6af   :  { %v15343_v16 = vcombine.high %v11268_v43, %v11272_v25  ;;  %v15342_v49 = vcombine.low %v11268_v43, %v11272_v25  ;;  %v11308_v43 = vld [vmem:[#allocation10 + $0x1c8] sm:$0xff] }
 0x6b0   :  { %10641 = vmatpush1.bf16.msra.mxu0 %v15304_v22  ;;  %v11275_v22 = vld [vmem:[#allocation10 + $0xc0] sm:$0xff]  ;;  %v11312_v25 = vld [vmem:[#allocation10 + $0x1e8] sm:$0xff] }
 0x6b1   :  { %11079 = vmatpush1.bf16.msra.mxu1 %v15306_v44  ;;  %10642 = vmatprep.subr.bf16.mxu0 %v15313_v47  ;;  %v11279_v44 = vld [vmem:[#allocation10 + $0xe0] sm:$0xff]  ;;  %v11276_v47 = vld [vmem:[#allocation10 + $0xc8] sm:$0xff] }
 0x6b2   :  { %11080 = vmatprep.subr.bf16.mxu1 %v15315_v11  ;;  %v11280_v11 = vld [vmem:[#allocation10 + $0xe8] sm:$0xff]  ;;  %v15349_v20 = vcombine.high %v11275_v22, %v11279_v44 }
 0x6b4   :  { %10643 = vmatpush1.bf16.msra.mxu0 %v15312_v30  ;;  %v11284_v30 = vld [vmem:[#allocation10 + $0x108] sm:$0xff] }
 0x6b5   :  { %11081 = vmatpush1.bf16.msra.mxu1 %v15314_v58  ;;  %10644 = vmatprep.subr.bf16.mxu0 %v15321_v34  ;;  %v11288_v58 = vld [vmem:[#allocation10 + $0x128] sm:$0xff]  ;;  %v15348_v34 = vcombine.low %v11275_v22, %v11279_v44 }
 0x6b6   :  { %11082 = vmatprep.subr.bf16.mxu1 %v15323_v48  ;;  %v15350_v48 = vcombine.low %v11276_v47, %v11280_v11  ;;  %v15359_v19 = vcombine.high %v11284_v30, %v11288_v58  ;;  %v11316_v22 = vld [vmem:[#allocation10 + $0x208] sm:$0xff] }
 0x6b7   :  { %v11320_v44 = vld [vmem:[#allocation10 + $0x228] sm:$0xff] }
 0x6b8   :  { %10645 = vmatpush1.bf16.msra.mxu0 %v15320_v50  ;;  %v11292_v50 = vld [vmem:[#allocation10 + $0x148] sm:$0xff] }
 0x6b9   :  { %11083 = vmatpush1.bf16.msra.mxu1 %v15322_v2  ;;  %12787 = vmatprep.subr.bf16.mxu0 %v15325_v5  ;;  %v11296_v2 = vld [vmem:[#allocation10 + $0x168] sm:$0xff]  ;;  %v15358_v5 = vcombine.low %v11284_v30, %v11288_v58  ;;  %v15390_v58 = vcombine.low %v11316_v22, %v11320_v44 }
 0x6ba   :  { %12893 = vmatprep.subr.bf16.mxu1 %v15327_v13  ;;  %v15365_v13 = vcombine.high %v11291_v3, %v11295_v55 }
 0x6bb   :  { %10647 = vmatmul.mubr.bf16.vlgmr.msra.gmra.mrb[88].mxu0 %v18927_v14 }
 0x6bc   :  { %11085 = vmatmul.mubr.bf16.vlgmr.msra.gmra.mrb[104].mxu1 %v18927_v14  ;;  %10656 = vmatprep.mubr.bf16.mxu0 %v19114_v4  ;;  %v15340_v14 = vcombine.low %v11267_v18, %v11271_v46  ;;  %v11307_v18 = vld [vmem:[#allocation10 + $0x1c0] sm:$0xff] }
 0x6bd   :  { %11094 = vmatprep.mubr.bf16.mxu1 %v19114_v4  ;;  %12788 = vmatpush1.bf16.msra.mxu0 %v15324_v29  ;;  %v15351_v4 = vcombine.high %v11276_v47, %v11280_v11  ;;  %v15364_v29 = vcombine.low %v11291_v3, %v11295_v55  ;;  %v11311_v46 = vld [vmem:[#allocation10 + $0x1e0] sm:$0xff]  ;;  %v15382_v11 = vcombine.low %v11308_v43, %v11312_v25  ;;  %v11336_v3 = vld [vmem:[#allocation10 + $0x2a8] sm:$0xff] }
 0x6be   :  { %12894 = vmatpush1.bf16.msra.mxu1 %v15326_v12  ;;  %12789 = vmatprep.subr.bf16.mxu0 %v15333_v51  ;;  %v15366_v12 = vcombine.low %v11292_v50, %v11296_v2  ;;  %v15373_v51 = vcombine.high %v11299_v10, %v11303_v33  ;;  %v15380_v47 = vcombine.low %v11307_v18, %v11311_v46 }
 0x6bf   :  { %12895 = vmatprep.subr.bf16.mxu1 %v15335_v31  ;;  %v15375_v31 = vcombine.high %v11300_v62, %v11304_v36 }
 0x6c1   :  { %12790 = vmatpush1.bf16.msra.mxu0 %v15332_v57  ;;  %v15374_v57 = vcombine.low %v11300_v62, %v11304_v36  ;;  %v11344_v36 = vld [vmem:[#allocation10 + $0x2e8] sm:$0xff] }
 0x6c2   :  { %12896 = vmatpush1.bf16.msra.mxu1 %v15334_v17  ;;  %12791 = vmatprep.subr.bf16.mxu0 %v15341_v21  ;;  %v15381_v17 = vcombine.high %v11307_v18, %v11311_v46  ;;  %v11315_v21 = vld [vmem:[#allocation10 + $0x200] sm:$0xff]  ;;  %v11348_v46 = vld [vmem:[#allocation10 + $0x308] sm:$0xff] }
 0x6c3   :  { %10657 = vmatmul.mubr.bf16.gmra.mrb[92].mxu0 %v19112_v60  ;;  %12897 = vmatprep.subr.bf16.mxu1 %v15343_v16  ;;  %v11319_v16 = vld [vmem:[#allocation10 + $0x220] sm:$0xff] }
 0x6c4   :  { %11095 = vmatmul.mubr.bf16.gmra.mrb[108].mxu1 %v19112_v60  ;;  %10666 = vmatprep.mubr.bf16.mxu0 %v19072_v56  ;;  %v15356_v60 = vcombine.low %v11283_v7, %v11287_v37  ;;  %v11324_v7 = vld [vmem:[#allocation10 + $0x248] sm:$0xff]  ;;  %v15388_v30 = vcombine.low %v11315_v21, %v11319_v16  ;;  %v11351_v18 = vld [vmem:[#allocation10 + $0x320] sm:$0xff] }
 0x6c5   :  { %11104 = vmatprep.mubr.bf16.mxu1 %v19072_v56  ;;  %12792 = vmatpush1.bf16.msra.mxu0 %v15340_v14  ;;  %v15367_v56 = vcombine.high %v11292_v50, %v11296_v2  ;;  %v15389_v14 = vcombine.high %v11315_v21, %v11319_v16  ;;  %v11328_v37 = vld [vmem:[#allocation10 + $0x268] sm:$0xff]  ;;  %v11359_v21 = vld [vmem:[#allocation10 + $0x360] sm:$0xff] }
 0x6c6   :  { %12898 = vmatpush1.bf16.msra.mxu1 %v15342_v49  ;;  %12793 = vmatprep.subr.bf16.mxu0 %v15349_v20  ;;  %v15391_v49 = vcombine.high %v11316_v22, %v11320_v44  ;;  %v11323_v20 = vld [vmem:[#allocation10 + $0x240] sm:$0xff]  ;;  %v15398_v50 = vcombine.low %v11324_v7, %v11328_v37  ;;  %v11356_v22 = vld [vmem:[#allocation10 + $0x348] sm:$0xff] }
 0x6c7   :  { %12899 = vmatprep.subr.bf16.mxu1 %v15351_v4  ;;  %v11327_v4 = vld [vmem:[#allocation10 + $0x260] sm:$0xff]  ;;  %v11360_v44 = vld [vmem:[#allocation10 + $0x368] sm:$0xff] }
 0x6c8   :  { %v15396_v55 = vcombine.low %v11323_v20, %v11327_v4 }
 0x6c9   :  { %12794 = vmatpush1.bf16.msra.mxu0 %v15348_v34  ;;  %v15399_v34 = vcombine.high %v11324_v7, %v11328_v37  ;;  %v11368_v37 = vld [vmem:[#allocation10 + $0x3a8] sm:$0xff] }
 0x6ca   :  { %12900 = vmatpush1.bf16.msra.mxu1 %v15350_v48  ;;  %12795 = vmatprep.subr.bf16.mxu0 %v15357_v63  ;;  %v11331_v48 = vld [vmem:[#allocation10 + $0x280] sm:$0xff] }
 0x6cb   :  { %10667 = vmatmul.mubr.bf16.gmra.mrb[96].mxu0 %v19068_v9  ;;  %12901 = vmatprep.subr.bf16.mxu1 %v15359_v19  ;;  %v11335_v63 = vld [vmem:[#allocation10 + $0x2a0] sm:$0xff]  ;;  %v11332_v19 = vld [vmem:[#allocation10 + $0x288] sm:$0xff] }
 0x6cc   :  { %11105 = vmatmul.mubr.bf16.gmra.mrb[112].mxu1 %v19068_v9  ;;  %10676 = vmatprep.mubr.bf16.mxu0 %v19156_v6  ;;  %v15372_v9 = vcombine.low %v11299_v10, %v11303_v33  ;;  %v15405_v2 = vcombine.high %v11331_v48, %v11335_v63  ;;  %v11343_v10 = vld [vmem:[#allocation10 + $0x2e0] sm:$0xff]  ;;  %v11340_v33 = vld [vmem:[#allocation10 + $0x2c8] sm:$0xff] }
 0x6cd   :  { %11114 = vmatprep.mubr.bf16.mxu1 %v19156_v6  ;;  %12796 = vmatpush1.bf16.msra.mxu0 %v15356_v60  ;;  %v15383_v6 = vcombine.high %v11308_v43, %v11312_v25  ;;  %v15407_v60 = vcombine.high %v11332_v19, %v11336_v3 }
 0x6ce   :  { %12902 = vmatpush1.bf16.msra.mxu1 %v15358_v5  ;;  %12797 = vmatprep.subr.bf16.mxu0 %v15365_v13  ;;  %v15404_v5 = vcombine.low %v11331_v48, %v11335_v63  ;;  %v15406_v13 = vcombine.low %v11332_v19, %v11336_v3  ;;  %v11375_v48 = vld [vmem:[#allocation10 + $0x3e0] sm:$0xff]  ;;  %v11372_v63 = vld [vmem:[#allocation10 + $0x3c8] sm:$0xff] }
 0x6cf   :  { %12903 = vmatprep.subr.bf16.mxu1 %v15367_v56  ;;  %v11339_v56 = vld [vmem:[#allocation10 + $0x2c0] sm:$0xff]  ;;  %v11376_v3 = vld [vmem:[#allocation10 + $0x3e8] sm:$0xff] }
 0x6d0   :  { %v15413_v62 = vcombine.high %v11339_v56, %v11343_v10 }
 0x6d1   :  { %12798 = vmatpush1.bf16.msra.mxu0 %v15364_v29  ;;  %v15412_v29 = vcombine.low %v11339_v56, %v11343_v10  ;;  %v19420_v10 = vld [vmem:[#allocation10 + $0x428] sm:$0xff] }
 0x6d2   :  { %12904 = vmatpush1.bf16.msra.mxu1 %v15366_v12  ;;  %12799 = vmatprep.subr.bf16.mxu0 %v15373_v51  ;;  %v15414_v12 = vcombine.low %v11340_v33, %v11344_v36  ;;  %v15415_v51 = vcombine.high %v11340_v33, %v11344_v36 }
 0x6d3   :  { %10677 = vmatmul.mubr.bf16.gmra.mrb[100].mxu0 %v19153_v61  ;;  %12905 = vmatprep.subr.bf16.mxu1 %v15375_v31  ;;  %v11347_v31 = vld [vmem:[#allocation10 + $0x300] sm:$0xff] }
 0x6d4   :  { %11115 = vmatmul.mubr.bf16.gmra.mrb[116].mxu1 %v19153_v61  ;;  %v15397_v61 = vcombine.high %v11323_v20, %v11327_v4  ;;  %v15420_v43 = vcombine.low %v11347_v31, %v11351_v18  ;;  %v15421_v25 = vcombine.high %v11347_v31, %v11351_v18  ;;  %v11367_v20 = vld [vmem:[#allocation10 + $0x3a0] sm:$0xff]  ;;  %v11364_v4 = vld [vmem:[#allocation10 + $0x388] sm:$0xff] }
 0x6d5   :  { %12800 = vmatpush1.bf16.msra.mxu0 %v15372_v9  ;;  %v11352_v9 = vld [vmem:[#allocation10 + $0x328] sm:$0xff] }
 0x6d6   :  { %12906 = vmatpush1.bf16.msra.mxu1 %v15374_v57  ;;  %12801 = vmatprep.subr.bf16.mxu0 %v15381_v17  ;;  %v15422_v57 = vcombine.low %v11348_v46, %v11352_v9  ;;  %v15423_v17 = vcombine.high %v11348_v46, %v11352_v9  ;;  %v11125_v9 = vld [vmem:[#allocation9] sm:$0xf] }
 0x6d7   :  { %12907 = vmatprep.subr.bf16.mxu1 %v15383_v6  ;;  %v11355_v6 = vld [vmem:[#allocation10 + $0x340] sm:$0xff] }
 0x6d8   :  { %v15429_v16 = vcombine.high %v11355_v6, %v11359_v21 }
 0x6d9   :  { %12802 = vmatpush1.bf16.msra.mxu0 %v15380_v47  ;;  %v15428_v47 = vcombine.low %v11355_v6, %v11359_v21  ;;  %v19917_v6 = vsub.s32 0, %v18779_v42 }
 0x6da   :  { %12908 = vmatpush1.bf16.msra.mxu1 %v15382_v11  ;;  %12803 = vmatprep.subr.bf16.mxu0 %v15389_v14  ;;  %v15430_v11 = vcombine.low %v11356_v22, %v11360_v44  ;;  %v15431_v14 = vcombine.high %v11356_v22, %v11360_v44 }
 0x6db   :  { %12909 = vmatprep.subr.bf16.mxu1 %v15391_v49  ;;  %v11363_v49 = vld [vmem:[#allocation10 + $0x380] sm:$0xff]  ;;  %v19430_v21 = vrot.slane %v11125_v9, %v19917_v6 }
 0x6dc   :  { %v15437_v7 = vcombine.high %v11363_v49, %v11367_v20 }
 0x6dd   :  { %12804 = vmatpush1.bf16.msra.mxu0 %v15388_v30  ;;  %v15436_v30 = vcombine.low %v11363_v49, %v11367_v20  ;;  %v19919_v49 = vsub.s32 1, %v18779_v42 }
 0x6de   :  { %12910 = vmatpush1.bf16.msra.mxu1 %v15390_v58  ;;  %12805 = vmatprep.subr.bf16.mxu0 %v15397_v61  ;;  %v15438_v58 = vcombine.low %v11364_v4, %v11368_v37  ;;  %v15439_v61 = vcombine.high %v11364_v4, %v11368_v37  ;;  %v19920_v37 = vmax.f32 %v19263_v38, %v19283_v40 }
 0x6df   :  { %12911 = vmatprep.subr.bf16.mxu1 %v15399_v34  ;;  %v11371_v34 = vld [vmem:[#allocation10 + $0x3c0] sm:$0xff]  ;;  %v19438_v20 = vrot.slane %v11125_v9, %v19919_v49  ;;  %v19480_v49 = vld [vmem:[#allocation10 + $0x448] sm:$0xff] }
 0x6e0   :  { %v15445_v19 = vcombine.high %v11371_v34, %v11375_v48 }
 0x6e1   :  { %12806 = vmatpush1.bf16.msra.mxu0 %v15396_v55  ;;  %v15444_v55 = vcombine.low %v11371_v34, %v11375_v48 }
 0x6e2   :  { %12912 = vmatpush1.bf16.msra.mxu1 %v15398_v50  ;;  %12807 = vmatprep.subr.bf16.mxu0 %v15405_v2  ;;  %v15446_v50 = vcombine.low %v11372_v63, %v11376_v3  ;;  %v15447_v2 = vcombine.high %v11372_v63, %v11376_v3  ;;  %v19922_v3 = vmax.f32 %v19267_v15, %v19289_v0 }
 0x6e3   :  { %12913 = vmatprep.subr.bf16.mxu1 %v15407_v60  ;;  %v19412_v60 = vld [vmem:[#allocation10 + $0x400] sm:$0xff] }
 0x6e5   :  { %12808 = vmatpush1.bf16.msra.mxu0 %v15404_v5  ;;  %v19414_v5 = vld [vmem:[#allocation10 + $0x420] sm:$0xff] }
 0x6e6   :  { %12914 = vmatpush1.bf16.msra.mxu1 %v15406_v13  ;;  %12809 = vmatprep.subr.bf16.mxu0 %v15413_v62  ;;  %v19416_v13 = vld [vmem:[#allocation10 + $0x408] sm:$0xff]  ;;  %v15453_v56 = vcombine.high %v19412_v60, %v19414_v5  ;;  %v15452_v33 = vcombine.low %v19412_v60, %v19414_v5 }
 0x6e7   :  { %12915 = vmatprep.subr.bf16.mxu1 %v15415_v51  ;;  %v15454_v62 = vcombine.low %v19416_v13, %v19420_v10  ;;  %v15455_v36 = vcombine.high %v19416_v13, %v19420_v10 }
 0x6e9   :  { %12810 = vmatpush1.bf16.msra.mxu0 %v15412_v29 }
 0x6ea   :  { %12916 = vmatpush1.bf16.msra.mxu1 %v15414_v12  ;;  %12811 = vmatprep.subr.bf16.mxu0 %v15421_v25 }
 0x6eb   :  { %12917 = vmatprep.subr.bf16.mxu1 %v15423_v17 }
 0x6ed   :  { %12812 = vmatpush1.bf16.msra.mxu0 %v15420_v43 }
 0x6ee   :  { %12918 = vmatpush1.bf16.msra.mxu1 %v15422_v57  ;;  %12813 = vmatprep.subr.bf16.mxu0 %v15429_v16 }
 0x6ef   :  { %12919 = vmatprep.subr.bf16.mxu1 %v15431_v14 }
 0x6f1   :  { %12814 = vmatpush1.bf16.msra.mxu0 %v15428_v47  ;;  %v19918_v47 = vsub.s32 2, %v18779_v42 }
 0x6f2   :  { %12920 = vmatpush1.bf16.msra.mxu1 %v15430_v11  ;;  %12815 = vmatprep.subr.bf16.mxu0 %v15437_v7 }
 0x6f3   :  { %12921 = vmatprep.subr.bf16.mxu1 %v15439_v61  ;;  %v19434_v11 = vrot.slane %v11125_v9, %v19918_v47  ;;  %v19921_v61 = vsub.s32 3, %v18779_v42 }
 0x6f5   :  { %12816 = vmatpush1.bf16.msra.mxu0 %v15436_v30  ;;  %v19445_v34 = vrot.slane %v11125_v9, %v19921_v61 }
 0x6f6   :  { %12922 = vmatpush1.bf16.msra.mxu1 %v15438_v58  ;;  %12817 = vmatprep.subr.bf16.mxu0 %v15445_v19 }
 0x6f7   :  { %12923 = vmatprep.subr.bf16.mxu1 %v15447_v2 }
 0x6f9   :  { %12818 = vmatpush1.bf16.msra.mxu0 %v15444_v55 }
 0x6fa   :  { %12924 = vmatpush1.bf16.msra.mxu1 %v15446_v50  ;;  %12840 = vmatprep.subr.bf16.mxu0 %v15453_v56  ;;  %v19923_v50 = vmax.f32 %v19269_v28, %v19291_v26  ;;  %v19926_v28 = vmax.f32 %v19276_v41, %v19306_v24  ;;  %v19477_v41 = vld [vmem:[#allocation10 + $0x460] sm:$0xff] }
 0x6fb   :  { %12946 = vmatprep.subr.bf16.mxu1 %v15455_v36 }
 0x78e   :  { %v10648_v29 = vpop.f32.mrb[88].mxu0 }
 0x78f   :  { %v11086_v12 = vpop.f32.mrb[104].mxu1  ;;  %v10650_v51 = vpop.f32.mrb[89].mxu0 }
 0x790   :  { %v11088_v31 = vpop.f32.mrb[105].mxu1  ;;  %v10652_v18 = vpop.f32.mrb[90].mxu0 }
 0x791   :  { %v11090_v46 = vpop.f32.mrb[106].mxu1  ;;  %v10654_v43 = vpop.f32.mrb[91].mxu0 }
 0x792   :  { %v11092_v25 = vpop.f32.mrb[107].mxu1 }
 0x796   :  { %v10658_v57 = vpop.f32.mrb[92].mxu0 }
 0x797   :  { %v11130_v17 = vmax.f32 %v10648_v29, %v10658_v57  ;;  %v11096_v16 = vpop.f32.mrb[108].mxu1  ;;  %v10660_v22 = vpop.f32.mrb[93].mxu0  ;;  %v19924_v29 = vmax.f32 %v19272_v59, %v19298_v53  ;;  %v19929_v57 = vld [vmem:[#allocation25_spill] sm:$0xff] }
 0x798   :  { %v11132_v44 = vmax.f32 %v11086_v12, %v11096_v16  ;;  %v11131_v14 = vmax.f32 %v10650_v51, %v10660_v22  ;;  %v11098_v4 = vpop.f32.mrb[109].mxu1  ;;  %v10662_v7 = vpop.f32.mrb[94].mxu0  ;;  %v19925_v51 = vmax.f32 %v19274_v8, %v19300_v1  ;;  %v19930_v8 = vld [vmem:[#allocation26_spill] sm:$0xff]  ;;  %v19475_v22 = vld [vmem:[#allocation10 + $0x440] sm:$0xff] }
 0x799   :  { %v11142_v30 = vmax.f32 %v19920_v37, %v11130_v17  ;;  %v11133_v58 = vmax.f32 %v11088_v31, %v11098_v4  ;;  %v11138_v48 = vmax.f32 %v10652_v18, %v10662_v7  ;;  %v11100_v63 = vpop.f32.mrb[110].mxu1  ;;  %v10664_v19 = vpop.f32.mrb[95].mxu0  ;;  %v19931_v1 = vmax.f32 %v19929_v57, %v19930_v8  ;;  %v19482_v4 = vld [vmem:[#allocation10 + $0x468] sm:$0xff] }
 0x79a   :  { %v11144_v55 = vmax.f32 %v19922_v3, %v11132_v44  ;;  %v11143_v2 = vmax.f32 %v19923_v50, %v11131_v14  ;;  %v11140_v56 = vmax.f32 %v11090_v46, %v11100_v63  ;;  %v11139_v36 = vmax.f32 %v10654_v43, %v10664_v19  ;;  %v11102_v38 = vpop.f32.mrb[111].mxu1  ;;  %v19927_v46 = vld [vmem:[#allocation28_spill] sm:$0xff] }
 0x79b   :  { %v11171_v40 = vadd.f32 %v19430_v21, %v11142_v30  ;;  %v11145_v12 = vmax.f32 %v19924_v29, %v11133_v58  ;;  %v11146_v31 = vmax.f32 %v19925_v51, %v11138_v48  ;;  %v11141_v18 = vmax.f32 %v11092_v25, %v11102_v38  ;;  %v11399_v51 = vld [vmem:[#allocation10 + $0x4a0] sm:$0xff] }
 0x79c   :  { %v11173_v15 = vadd.f32 %v19434_v11, %v11144_v55  ;;  %v11172_v0 = vadd.f32 %v19438_v20, %v11143_v2  ;;  %v11148_v26 = vmax.f32 %v19926_v28, %v11140_v56  ;;  %v19928_v43 = vmax.f32 %v19278_v23, %v19927_v46 }
 0x79d   :  { %v11174_v59 = vadd.f32 %v19445_v34, %v11145_v12  ;;  %v11175_v53 = vadd.f32 %v19430_v21, %v11146_v31  ;;  %v11149_v25 = vmax.f32 %v19931_v1, %v11141_v18  ;;  %v11179_v24 = vmax.f32 %v11171_v40, 0.0  ;;  %v11395_v12 = vld [vmem:[#allocation10 + $0x480] sm:$0xff]  ;;  %v19498_v31 = vld [vmem:[#allocation10 + $0x488] sm:$0xff] }
 0x79e   :  { %v11147_v9 = vmax.f32 %v19928_v43, %v11139_v36  ;;  %v11177_v17 = vadd.f32 %v19434_v11, %v11148_v26  ;;  %v10668_v16 = vpop.f32.mrb[96].mxu0  ;;  %v11181_v7 = vmax.f32 %v11173_v15, 0.0  ;;  %v11180_v37 = vmax.f32 %v11172_v0, 0.0  ;;  %v19500_v18 = vld [vmem:[#allocation10 + $0x4a8] sm:$0xff]  ;;  %v19504_v15 = vld [vmem:[#allocation10 + $0x4c0] sm:$0xff] }
 0x79f   :  { %v11183_v23 = vmax.f32 %v11175_v53, 0.0  ;;  %v11178_v44 = vadd.f32 %v19445_v34, %v11149_v25  ;;  %v11106_v47 = vpop.f32.mrb[112].mxu1  ;;  %v10670_v14 = vpop.f32.mrb[97].mxu0  ;;  %v11182_v63 = vmax.f32 %v11174_v59, 0.0  ;;  %v15461_v40 = vcombine.high %v19475_v22, %v19477_v41  ;;  %v19506_v0 = vld [vmem:[#allocation10 + $0x4e0] sm:$0xff]  ;;  %v19520_v59 = vld [vmem:[#allocation10 + $0x4e8] sm:$0xff] }
 0x7a0   :  { %v11176_v6 = vadd.f32 %v19438_v20, %v11147_v9  ;;  %v11185_v30 = vmax.f32 %v11177_v17, 0.0  ;;  %v11108_v61 = vpop.f32.mrb[113].mxu1  ;;  %v10672_v48 = vpop.f32.mrb[98].mxu0  ;;  %v15463_v29 = vcombine.high %v19480_v49, %v19482_v4  ;;  %v15460_v26 = vcombine.low %v19475_v22, %v19477_v41  ;;  %v19518_v9 = vld [vmem:[#allocation10 + $0x4c8] sm:$0xff] }
 0x7a1   :  { %v19484_v19 = vpack.c.bf16 %v11183_v23, %v11179_v24  ;;  %v11186_v3 = vmax.f32 %v11178_v44, 0.0  ;;  %v11110_v55 = vpop.f32.mrb[114].mxu1  ;;  %v10674_v50 = vpop.f32.mrb[99].mxu0  ;;  %v15462_v46 = vcombine.low %v19480_v49, %v19482_v4  ;;  %v15469_v43 = vcombine.high %v11395_v12, %v11399_v51  ;;  %v19933_v44 = vld [vmem:[#allocation31_spill] sm:$0xff] }
 0x7a2   :  { %v11184_v58 = vmax.f32 %v11176_v6, 0.0  ;;  %v19486_v2 = vpack.c.bf16 %v11185_v30, %v11181_v7  ;;  %v11112_v36 = vpop.f32.mrb[115].mxu1  ;;  %v15468_v5 = vcombine.low %v11395_v12, %v11399_v51  ;;  %v15470_v13 = vcombine.low %v19498_v31, %v19500_v18  ;;  %v19944_v51 = vld [vmem:[#allocation30_spill] sm:$0xff] }
 0x7a3   :  { %v19490_v38 = vpack.c.bf16 %v11186_v3, %v11182_v63  ;;  %v15471_v1 = vcombine.high %v19498_v31, %v19500_v18  ;;  %v15477_v25 = vcombine.high %v19504_v15, %v19506_v0  ;;  %v19932_v17 = vmax.f32 %v19318_v39, %v19334_v45  ;;  %v19936_v45 = vld [vmem:[#allocation47_spill] sm:$0xff]  ;;  %v19939_v63 = vld [vmem:[#allocation32_spill] sm:$0xff]  ;;  %v19945_v31 = vld [vmem:[#allocation33_spill] sm:$0xff] }
 0x7a4   :  { %v19488_v56 = vpack.c.bf16 %v11184_v58, %v11180_v37  ;;  %v15479_v23 = vcombine.high %v19518_v9, %v19520_v59  ;;  %v19935_v49 = vmax.f32 %v19322_v54, %v19340_v32  ;;  %v19937_v58 = vmax.f32 %v19324_v52, %v19936_v45  ;;  %v19941_v54 = vld [vmem:[#allocation27_spill] sm:$0xff]  ;;  %v11411_v52 = vld [vmem:[#allocation10 + $0x500] sm:$0xff] }
 0x7a5   :  { %v19946_v18 = vmax.f32 %v19944_v51, %v19945_v31  ;;  %v11448_v51 = vld [vmem:[#allocation10 + $0x628] sm:$0xff] }
 0x7a6   :  { %12819 = vmatprep.mubr.bf16.mxu0 %v19488_v56  ;;  %12925 = vmatprep.mubr.bf16.mxu1 %v19488_v56  ;;  %v10678_v28 = vpop.f32.mrb[100].mxu0 }
 0x7a7   :  { %12820 = vmatmul.mubr.bf16.vlgmr.msra.gmra.mrb[104].mxu0 %v19484_v19  ;;  %12926 = vmatmul.mubr.bf16.vlgmr.msra.gmra.mrb[120].mxu1 %v19484_v19  ;;  %v11199_v53 = vmax.f32 %v10668_v16, %v10678_v28  ;;  %v11116_v57 = vpop.f32.mrb[116].mxu1  ;;  %v10680_v60 = vpop.f32.mrb[101].mxu0 }
 0x7a8   :  { %12841 = vmatpush1.bf16.msra.mxu0 %v15452_v33  ;;  %12947 = vmatpush1.bf16.msra.mxu1 %v15454_v62  ;;  %v11201_v10 = vmax.f32 %v11106_v47, %v11116_v57  ;;  %v11200_v33 = vmax.f32 %v10670_v14, %v10680_v60  ;;  %v11118_v62 = vpop.f32.mrb[117].mxu1  ;;  %v10682_v8 = vpop.f32.mrb[102].mxu0  ;;  %v19934_v47 = vmax.f32 %v19320_v35, %v19933_v44 }
 0x7a9   :  { %12842 = vmatprep.subr.bf16.mxu0 %v15461_v40  ;;  %12948 = vmatprep.subr.bf16.mxu1 %v15463_v29  ;;  %v11211_v6 = vmax.f32 %v19932_v17, %v11199_v53  ;;  %v11202_v16 = vmax.f32 %v11108_v61, %v11118_v62  ;;  %v11207_v22 = vmax.f32 %v10672_v48, %v10682_v8  ;;  %v11120_v41 = vpop.f32.mrb[118].mxu1  ;;  %v10684_v24 = vpop.f32.mrb[103].mxu0  ;;  %v19938_v48 = vld [vmem:[#allocation29_spill] sm:$0xff] }
 0x7aa   :  { %v11213_v14 = vmax.f32 %v19934_v47, %v11201_v10  ;;  %v11212_v4 = vmax.f32 %v19935_v49, %v11200_v33  ;;  %v11209_v7 = vmax.f32 %v11110_v55, %v11120_v41  ;;  %v11208_v37 = vmax.f32 %v10674_v50, %v10684_v24  ;;  %v11122_v30 = vpop.f32.mrb[119].mxu1  ;;  %v19942_v55 = vld [vmem:[#allocation48_spill] sm:$0xff]  ;;  %v11412_v8 = vld [vmem:[#allocation10 + $0x508] sm:$0xff] }
 0x7ab   :  { %v11219_v39 = vadd.f32 %v11211_v6, %v19430_v21  ;;  %v11214_v61 = vmax.f32 %v19937_v58, %v11202_v16  ;;  %v19940_v3 = vmax.f32 %v19938_v48, %v19939_v63  ;;  %v11210_v35 = vmax.f32 %v11112_v36, %v11122_v30  ;;  %v11416_v17 = vld [vmem:[#allocation10 + $0x528] sm:$0xff]  ;;  %v11427_v49 = vld [vmem:[#allocation10 + $0x580] sm:$0xff] }
 0x7ac   :  { %12843 = vmatpush1.bf16.msra.mxu0 %v15460_v26  ;;  %12949 = vmatpush1.bf16.msra.mxu1 %v15462_v46  ;;  %v11221_v29 = vadd.f32 %v11213_v14, %v19434_v11  ;;  %v11220_v32 = vadd.f32 %v11212_v4, %v19438_v20  ;;  %v19943_v50 = vmax.f32 %v19941_v54, %v19942_v55  ;;  %v11415_v26 = vld [vmem:[#allocation10 + $0x520] sm:$0xff]  ;;  %v11432_v30 = vld [vmem:[#allocation10 + $0x5a8] sm:$0xff] }
 0x7ad   :  { %v11215_v40 = vmax.f32 %v19940_v3, %v11207_v22  ;;  %v11216_v28 = vmax.f32 %v19946_v18, %v11208_v37  ;;  %12844 = vmatprep.subr.bf16.mxu0 %v15469_v43  ;;  %v11222_v53 = vadd.f32 %v11214_v61, %v19445_v34  ;;  %v19947_v46 = vld [vmem:[#allocation49_spill] sm:$0xff]  ;;  %12950 = vmatprep.subr.bf16.mxu1 %v15471_v1  ;;  %v11227_v6 = vmax.f32 %v11219_v39, 0.0 }
 0x7ae   :  { %v11217_v12 = vmax.f32 %v19943_v50, %v11209_v7  ;;  %v19948_v57 = vmax.f32 %v19332_v27, %v19947_v46  ;;  %v15476_v62 = vcombine.low %v19504_v15, %v19506_v0  ;;  %v15478_v43 = vcombine.low %v19518_v9, %v19520_v59  ;;  %v11419_v9 = vld [vmem:[#allocation10 + $0x540] sm:$0xff]  ;;  %v11428_v37 = vld [vmem:[#allocation10 + $0x588] sm:$0xff] }
 0x7af   :  { %v11223_v36 = vadd.f32 %v11215_v40, %v19430_v21  ;;  %v11224_v33 = vadd.f32 %v11216_v28, %v19438_v20  ;;  %v15485_v27 = vcombine.high %v11411_v52, %v11415_v26  ;;  %v11229_v1 = vmax.f32 %v11221_v29, 0.0  ;;  %v11423_v59 = vld [vmem:[#allocation10 + $0x560] sm:$0xff]  ;;  %v11436_v3 = vld [vmem:[#allocation10 + $0x5c8] sm:$0xff] }
 0x7b0   :  { %v11218_v60 = vmax.f32 %v19948_v57, %v11210_v35  ;;  %v11225_v10 = vadd.f32 %v11217_v12, %v19434_v11  ;;  %12845 = vmatpush1.bf16.msra.mxu0 %v15468_v5  ;;  %12951 = vmatpush1.bf16.msra.mxu1 %v15470_v13  ;;  %v11228_v11 = vmax.f32 %v11220_v32, 0.0  ;;  %v11230_v5 = vmax.f32 %v11222_v53, 0.0  ;;  %v11420_v13 = vld [vmem:[#allocation10 + $0x548] sm:$0xff]  ;;  %v11431_v4 = vld [vmem:[#allocation10 + $0x5a0] sm:$0xff] }
 0x7b1   :  { %v11231_v21 = vmax.f32 %v11223_v36, 0.0  ;;  %12846 = vmatprep.subr.bf16.mxu0 %v15477_v25  ;;  %v11232_v20 = vmax.f32 %v11224_v33, 0.0  ;;  %12952 = vmatprep.subr.bf16.mxu1 %v15479_v23  ;;  %v15487_v0 = vcombine.high %v11412_v8, %v11416_v17  ;;  %v11424_v25 = vld [vmem:[#allocation10 + $0x568] sm:$0xff]  ;;  %v15486_v23 = vcombine.low %v11412_v8, %v11416_v17  ;;  %v11435_v48 = vld [vmem:[#allocation10 + $0x5c0] sm:$0xff] }
 0x7b2   :  { %v11226_v16 = vadd.f32 %v11218_v60, %v19445_v34  ;;  %v11233_v22 = vmax.f32 %v11225_v10, 0.0  ;;  %v15484_v34 = vcombine.low %v11411_v52, %v11415_v26  ;;  %v15493_v14 = vcombine.high %v11419_v9, %v11423_v59  ;;  %v11439_v63 = vld [vmem:[#allocation10 + $0x5e0] sm:$0xff]  ;;  %v11440_v40 = vld [vmem:[#allocation10 + $0x5e8] sm:$0xff] }
 0x7b3   :  { %v19566_v41 = vpack.c.bf16 %v11231_v21, %v11227_v6  ;;  %v19570_v44 = vpack.c.bf16 %v11232_v20, %v11228_v11  ;;  %v15495_v7 = vcombine.high %v11420_v13, %v11424_v25  ;;  %v15492_v39 = vcombine.low %v11419_v9, %v11423_v59  ;;  %v11443_v55 = vld [vmem:[#allocation10 + $0x600] sm:$0xff]  ;;  %v11444_v12 = vld [vmem:[#allocation10 + $0x608] sm:$0xff] }
 0x7b4   :  { %v11234_v15 = vmax.f32 %v11226_v16, 0.0  ;;  %v19568_v24 = vpack.c.bf16 %v11233_v22, %v11229_v1  ;;  %12847 = vmatpush1.bf16.msra.mxu0 %v15476_v62  ;;  %12953 = vmatpush1.bf16.msra.mxu1 %v15478_v43  ;;  %v15494_v45 = vcombine.low %v11420_v13, %v11424_v25  ;;  %v15501_v58 = vcombine.high %v11427_v49, %v11431_v4  ;;  %v11447_v50 = vld [vmem:[#allocation10 + $0x620] sm:$0xff]  ;;  %v11452_v36 = vld [vmem:[#allocation10 + $0x648] sm:$0xff] }
 0x7b5   :  { %12848 = vmatprep.subr.bf16.mxu0 %v15485_v27  ;;  %12829 = vmatprep.mubr.bf16.mxu0 %v19570_v44  ;;  %v15503_v61 = vcombine.high %v11428_v37, %v11432_v30  ;;  %v15500_v35 = vcombine.low %v11427_v49, %v11431_v4  ;;  %v15502_v29 = vcombine.low %v11428_v37, %v11432_v30  ;;  %v11451_v26 = vld [vmem:[#allocation10 + $0x640] sm:$0xff]  ;;  %v11456_v46 = vld [vmem:[#allocation10 + $0x668] sm:$0xff] }
 0x7b6   :  { %v19572_v47 = vpack.c.bf16 %v11234_v15, %v11230_v5  ;;  %12935 = vmatprep.mubr.bf16.mxu1 %v19570_v44  ;;  %12954 = vmatprep.subr.bf16.mxu1 %v15487_v0  ;;  %v15509_v32 = vcombine.high %v11435_v48, %v11439_v63  ;;  %v15511_v54 = vcombine.high %v11436_v3, %v11440_v40  ;;  %v11455_v53 = vld [vmem:[#allocation10 + $0x660] sm:$0xff]  ;;  %v11460_v8 = vld [vmem:[#allocation10 + $0x688] sm:$0xff] }
 0x7b7   :  { %12830 = vmatmul.mubr.bf16.gmra.mrb[108].mxu0 %v19566_v41  ;;  %12936 = vmatmul.mubr.bf16.gmra.mrb[124].mxu1 %v19566_v41  ;;  %v15508_v31 = vcombine.low %v11435_v48, %v11439_v63  ;;  %v15510_v18 = vcombine.low %v11436_v3, %v11440_v40  ;;  %v15517_v28 = vcombine.high %v11443_v55, %v11447_v50  ;;  %v11459_v62 = vld [vmem:[#allocation10 + $0x680] sm:$0xff]  ;;  %v11464_v17 = vld [vmem:[#allocation10 + $0x6a8] sm:$0xff] }
 0x7b8   :  { %12849 = vmatpush1.bf16.msra.mxu0 %v15484_v34  ;;  %12955 = vmatpush1.bf16.msra.mxu1 %v15486_v23  ;;  %v15519_v52 = vcombine.high %v11444_v12, %v11448_v51  ;;  %v15516_v57 = vcombine.low %v11443_v55, %v11447_v50  ;;  %v15518_v60 = vcombine.low %v11444_v12, %v11448_v51  ;;  %v11463_v43 = vld [vmem:[#allocation10 + $0x6a0] sm:$0xff]  ;;  %v11468_v22 = vld [vmem:[#allocation10 + $0x6c8] sm:$0xff] }
 0x7b9   :  { %12872 = vmatprep.mubr.bf16.mxu0 %v19490_v38  ;;  %12978 = vmatprep.mubr.bf16.mxu1 %v19490_v38  ;;  %v15525_v10 = vcombine.high %v11451_v26, %v11455_v53  ;;  %v15527_v33 = vcombine.high %v11452_v36, %v11456_v46  ;;  %v15524_v6 = vcombine.low %v11451_v26, %v11455_v53  ;;  %v11467_v1 = vld [vmem:[#allocation10 + $0x6c0] sm:$0xff]  ;;  %v11472_v20 = vld [vmem:[#allocation10 + $0x6e8] sm:$0xff]  ;;  %v11253_v53 = vld [vmem:[#allocation10 + $0x10] sm:$0xff] }
 0x7ba   :  { %12850 = vmatprep.subr.bf16.mxu0 %v15493_v14  ;;  %12956 = vmatprep.subr.bf16.mxu1 %v15495_v7  ;;  %v15526_v21 = vcombine.low %v11452_v36, %v11456_v46  ;;  %v15533_v16 = vcombine.high %v11459_v62, %v11463_v43  ;;  %v15535_v27 = vcombine.high %v11460_v8, %v11464_v17  ;;  %v11471_v11 = vld [vmem:[#allocation10 + $0x6e0] sm:$0xff]  ;;  %v11476_v13 = vld [vmem:[#allocation10 + $0x708] sm:$0xff]  ;;  %v11257_v36 = vld [vmem:[#allocation10 + $0x30] sm:$0xff] }
 0x7bb   :  { %v15532_v5 = vcombine.low %v11459_v62, %v11463_v43  ;;  %v15534_v15 = vcombine.low %v11460_v8, %v11464_v17  ;;  %v15541_v0 = vcombine.high %v11467_v1, %v11471_v11  ;;  %v15543_v9 = vcombine.high %v11468_v22, %v11472_v20  ;;  %v11475_v59 = vld [vmem:[#allocation10 + $0x700] sm:$0xff]  ;;  %v11480_v25 = vld [vmem:[#allocation10 + $0x728] sm:$0xff]  ;;  %v11254_v46 = vld [vmem:[#allocation10 + $0x18] sm:$0xff] }
 0x7bc   :  { %12851 = vmatpush1.bf16.msra.mxu0 %v15492_v39  ;;  %12957 = vmatpush1.bf16.msra.mxu1 %v15494_v45  ;;  %v11479_v34 = vld [vmem:[#allocation10 + $0x720] sm:$0xff]  ;;  %v15540_v23 = vcombine.low %v11467_v1, %v11471_v11  ;;  %v15542_v14 = vcombine.low %v11468_v22, %v11472_v20  ;;  %v15551_v4 = vcombine.high %v11476_v13, %v11480_v25  ;;  %v11484_v30 = vld [vmem:[#allocation10 + $0x748] sm:$0xff]  ;;  %v11261_v43 = vld [vmem:[#allocation10 + $0x50] sm:$0xff] }
 0x7bd   :  { %12852 = vmatprep.subr.bf16.mxu0 %v15501_v58  ;;  %12958 = vmatprep.subr.bf16.mxu1 %v15503_v61  ;;  %v15549_v49 = vcombine.high %v11475_v59, %v11479_v34  ;;  %v11483_v7 = vld [vmem:[#allocation10 + $0x740] sm:$0xff]  ;;  %v11488_v39 = vld [vmem:[#allocation10 + $0x768] sm:$0xff]  ;;  %v15548_v45 = vcombine.low %v11475_v59, %v11479_v34  ;;  %v15550_v58 = vcombine.low %v11476_v13, %v11480_v25  ;;  %v11265_v8 = vld [vmem:[#allocation10 + $0x70] sm:$0xff] }
 0x7be   :  { %v11487_v37 = vld [vmem:[#allocation10 + $0x760] sm:$0xff]  ;;  %v15559_v48 = vcombine.high %v11484_v30, %v11488_v39  ;;  %v11492_v40 = vld [vmem:[#allocation10 + $0x788] sm:$0xff]  ;;  %v11262_v17 = vld [vmem:[#allocation10 + $0x58] sm:$0xff] }
 0x7bf   :  { %v15557_v61 = vcombine.high %v11483_v7, %v11487_v37  ;;  %v11491_v63 = vld [vmem:[#allocation10 + $0x780] sm:$0xff]  ;;  %v11500_v51 = vld [vmem:[#allocation10 + $0x7c8] sm:$0xff]  ;;  %v11269_v11 = vld [vmem:[#allocation10 + $0x90] sm:$0xff] }
 0x7c0   :  { %12853 = vmatpush1.bf16.msra.mxu0 %v15500_v35  ;;  %12959 = vmatpush1.bf16.msra.mxu1 %v15502_v29  ;;  %v11495_v3 = vld [vmem:[#allocation10 + $0x7a0] sm:$0xff]  ;;  %v11496_v35 = vld [vmem:[#allocation10 + $0x7a8] sm:$0xff]  ;;  %v15556_v29 = vcombine.low %v11483_v7, %v11487_v37  ;;  %v11273_v22 = vld [vmem:[#allocation10 + $0xb0] sm:$0xff] }
 0x7c1   :  { %12854 = vmatprep.subr.bf16.mxu0 %v15509_v32  ;;  %12960 = vmatprep.subr.bf16.mxu1 %v15511_v54  ;;  %v15558_v32 = vcombine.low %v11484_v30, %v11488_v39  ;;  %v15565_v54 = vcombine.high %v11491_v63, %v11495_v3  ;;  %v15567_v55 = vcombine.high %v11492_v40, %v11496_v35  ;;  %v11499_v50 = vld [vmem:[#allocation10 + $0x7c0] sm:$0xff]  ;;  %v11270_v20 = vld [vmem:[#allocation10 + $0x98] sm:$0xff]  ;;  %v11277_v34 = vld [vmem:[#allocation10 + $0xd0] sm:$0xff] }
 0x7c2   :  { %v11503_v12 = vld [vmem:[#allocation10 + $0x7e0] sm:$0xff]  ;;  %v11281_v13 = vld [vmem:[#allocation10 + $0xf0] sm:$0xff]  ;;  %v11278_v25 = vld [vmem:[#allocation10 + $0xd8] sm:$0xff] }
 0x7c3   :  { %v11285_v37 = vld [vmem:[#allocation10 + $0x110] sm:$0xff]  ;;  %v11286_v39 = vld [vmem:[#allocation10 + $0x118] sm:$0xff] }
 0x7c4   :  { %12855 = vmatpush1.bf16.msra.mxu0 %v15508_v31  ;;  %12961 = vmatpush1.bf16.msra.mxu1 %v15510_v18  ;;  %v11504_v31 = vld [vmem:[#allocation10 + $0x7e8] sm:$0xff]  ;;  %v15564_v18 = vcombine.low %v11491_v63, %v11495_v3  ;;  %v11289_v30 = vld [vmem:[#allocation10 + $0x130] sm:$0xff] }
 0x7c5   :  { %12856 = vmatprep.subr.bf16.mxu0 %v15517_v28  ;;  %12962 = vmatprep.subr.bf16.mxu1 %v15519_v52  ;;  %v15566_v28 = vcombine.low %v11492_v40, %v11496_v35  ;;  %v15573_v52 = vcombine.high %v11499_v50, %v11503_v12  ;;  %v15575_v26 = vcombine.high %v11500_v51, %v11504_v31  ;;  %v11293_v3 = vld [vmem:[#allocation10 + $0x150] sm:$0xff]  ;;  %v11294_v35 = vld [vmem:[#allocation10 + $0x158] sm:$0xff] }
 0x7c6   :  { %v11297_v40 = vld [vmem:[#allocation10 + $0x170] sm:$0xff] }
 0x7c8   :  { %12857 = vmatpush1.bf16.msra.mxu0 %v15516_v57  ;;  %12963 = vmatpush1.bf16.msra.mxu1 %v15518_v60  ;;  %v11258_v57 = vld [vmem:[#allocation10 + $0x38] sm:$0xff]  ;;  %v15572_v60 = vcombine.low %v11499_v50, %v11503_v12  ;;  %v11305_v12 = vld [vmem:[#allocation10 + $0x1b0] sm:$0xff] }
 0x7c9   :  { %12858 = vmatprep.subr.bf16.mxu0 %v15525_v10  ;;  %12964 = vmatprep.subr.bf16.mxu1 %v15527_v33  ;;  %v15574_v10 = vcombine.low %v11500_v51, %v11504_v31  ;;  %v15329_v33 = vcombine.high %v11253_v53, %v11257_v36  ;;  %v15331_v62 = vcombine.high %v11254_v46, %v11258_v57  ;;  %v11302_v51 = vld [vmem:[#allocation10 + $0x198] sm:$0xff] }
 0x7ca   :  { %v11306_v31 = vld [vmem:[#allocation10 + $0x1b8] sm:$0xff] }
 0x7cc   :  { %12859 = vmatpush1.bf16.msra.mxu0 %v15524_v6  ;;  %12965 = vmatpush1.bf16.msra.mxu1 %v15526_v21  ;;  %v11266_v6 = vld [vmem:[#allocation10 + $0x78] sm:$0xff]  ;;  %v15328_v21 = vcombine.low %v11253_v53, %v11257_v36  ;;  %v11309_v53 = vld [vmem:[#allocation10 + $0x1d0] sm:$0xff] }
 0x7cd   :  { %12860 = vmatprep.subr.bf16.mxu0 %v15533_v16  ;;  %12966 = vmatprep.subr.bf16.mxu1 %v15535_v27  ;;  %v15330_v16 = vcombine.low %v11254_v46, %v11258_v57  ;;  %v15337_v27 = vcombine.high %v11261_v43, %v11265_v8  ;;  %v15339_v1 = vcombine.high %v11262_v17, %v11266_v6  ;;  %v11313_v36 = vld [vmem:[#allocation10 + $0x1f0] sm:$0xff]  ;;  %v11310_v46 = vld [vmem:[#allocation10 + $0x1d8] sm:$0xff] }
 0x7ce   :  { %v11314_v57 = vld [vmem:[#allocation10 + $0x1f8] sm:$0xff] }
 0x7d0   :  { %12861 = vmatpush1.bf16.msra.mxu0 %v15532_v5  ;;  %12967 = vmatpush1.bf16.msra.mxu1 %v15534_v15  ;;  %v11274_v5 = vld [vmem:[#allocation10 + $0xb8] sm:$0xff]  ;;  %v15336_v15 = vcombine.low %v11261_v43, %v11265_v8  ;;  %v11317_v43 = vld [vmem:[#allocation10 + $0x210] sm:$0xff] }
 0x7d1   :  { %12862 = vmatprep.subr.bf16.mxu0 %v15541_v0  ;;  %12968 = vmatprep.subr.bf16.mxu1 %v15543_v9  ;;  %v15338_v0 = vcombine.low %v11262_v17, %v11266_v6  ;;  %v15345_v9 = vcombine.high %v11269_v11, %v11273_v22  ;;  %v15347_v59 = vcombine.high %v11270_v20, %v11274_v5  ;;  %v11321_v8 = vld [vmem:[#allocation10 + $0x230] sm:$0xff]  ;;  %v11318_v17 = vld [vmem:[#allocation10 + $0x218] sm:$0xff] }
 0x7d2   :  { %v11322_v6 = vld [vmem:[#allocation10 + $0x238] sm:$0xff] }
 0x7d4   :  { %12863 = vmatpush1.bf16.msra.mxu0 %v15540_v23  ;;  %12969 = vmatpush1.bf16.msra.mxu1 %v15542_v14  ;;  %v11282_v23 = vld [vmem:[#allocation10 + $0xf8] sm:$0xff]  ;;  %v15344_v14 = vcombine.low %v11269_v11, %v11273_v22  ;;  %v11325_v11 = vld [vmem:[#allocation10 + $0x250] sm:$0xff] }
 0x7d5   :  { %12864 = vmatprep.subr.bf16.mxu0 %v15549_v49  ;;  %12970 = vmatprep.subr.bf16.mxu1 %v15551_v4  ;;  %v15346_v49 = vcombine.low %v11270_v20, %v11274_v5  ;;  %v15353_v4 = vcombine.high %v11277_v34, %v11281_v13  ;;  %v15355_v7 = vcombine.high %v11278_v25, %v11282_v23  ;;  %v11329_v22 = vld [vmem:[#allocation10 + $0x270] sm:$0xff]  ;;  %v11326_v20 = vld [vmem:[#allocation10 + $0x258] sm:$0xff] }
 0x7d6   :  { %v11330_v5 = vld [vmem:[#allocation10 + $0x278] sm:$0xff] }
 0x7d8   :  { %12865 = vmatpush1.bf16.msra.mxu0 %v15548_v45  ;;  %12971 = vmatpush1.bf16.msra.mxu1 %v15550_v58  ;;  %v11290_v45 = vld [vmem:[#allocation10 + $0x138] sm:$0xff]  ;;  %v15352_v58 = vcombine.low %v11277_v34, %v11281_v13  ;;  %v11333_v34 = vld [vmem:[#allocation10 + $0x290] sm:$0xff] }
 0x7d9   :  { %12866 = vmatprep.subr.bf16.mxu0 %v15557_v61  ;;  %12972 = vmatprep.subr.bf16.mxu1 %v15559_v48  ;;  %v15354_v61 = vcombine.low %v11278_v25, %v11282_v23  ;;  %v15361_v48 = vcombine.high %v11285_v37, %v11289_v30  ;;  %v15363_v63 = vcombine.high %v11286_v39, %v11290_v45  ;;  %v11337_v13 = vld [vmem:[#allocation10 + $0x2b0] sm:$0xff]  ;;  %v11334_v25 = vld [vmem:[#allocation10 + $0x298] sm:$0xff] }
 0x7da   :  { %v11338_v23 = vld [vmem:[#allocation10 + $0x2b8] sm:$0xff] }
 0x7dc   :  { %12867 = vmatpush1.bf16.msra.mxu0 %v15556_v29  ;;  %12973 = vmatpush1.bf16.msra.mxu1 %v15558_v32  ;;  %v11298_v29 = vld [vmem:[#allocation10 + $0x178] sm:$0xff]  ;;  %v15360_v32 = vcombine.low %v11285_v37, %v11289_v30  ;;  %v11341_v37 = vld [vmem:[#allocation10 + $0x2d0] sm:$0xff] }
 0x7dd   :  { %12868 = vmatprep.subr.bf16.mxu0 %v15565_v54  ;;  %12974 = vmatprep.subr.bf16.mxu1 %v15567_v55  ;;  %v15362_v54 = vcombine.low %v11286_v39, %v11290_v45  ;;  %v15369_v55 = vcombine.high %v11293_v3, %v11297_v40  ;;  %v15371_v50 = vcombine.high %v11294_v35, %v11298_v29  ;;  %v11345_v30 = vld [vmem:[#allocation10 + $0x2f0] sm:$0xff]  ;;  %v11342_v39 = vld [vmem:[#allocation10 + $0x2d8] sm:$0xff] }
 0x7de   :  { %v11346_v45 = vld [vmem:[#allocation10 + $0x2f8] sm:$0xff] }
 0x7e0   :  { %12869 = vmatpush1.bf16.msra.mxu0 %v15564_v18  ;;  %12975 = vmatpush1.bf16.msra.mxu1 %v15566_v28  ;;  %v15368_v18 = vcombine.low %v11293_v3, %v11297_v40  ;;  %v15370_v28 = vcombine.low %v11294_v35, %v11298_v29  ;;  %v11349_v3 = vld [vmem:[#allocation10 + $0x310] sm:$0xff]  ;;  %v11350_v35 = vld [vmem:[#allocation10 + $0x318] sm:$0xff] }
 0x7e1   :  { %12870 = vmatprep.subr.bf16.mxu0 %v15573_v52  ;;  %12976 = vmatprep.subr.bf16.mxu1 %v15575_v26  ;;  %v15379_v26 = vcombine.high %v11302_v51, %v11306_v31  ;;  %v11353_v40 = vld [vmem:[#allocation10 + $0x330] sm:$0xff]  ;;  %v11354_v29 = vld [vmem:[#allocation10 + $0x338] sm:$0xff] }
 0x7e4   :  { %12871 = vmatpush1.bf16.msra.mxu0 %v15572_v60  ;;  %12977 = vmatpush1.bf16.msra.mxu1 %v15574_v10  ;;  %v15378_v10 = vcombine.low %v11302_v51, %v11306_v31  ;;  %v11358_v51 = vld [vmem:[#allocation10 + $0x358] sm:$0xff] }
 0x7e5   :  { %12999 = vmatprep.subr.bf16.mxu0 %v15329_v33  ;;  %13105 = vmatprep.subr.bf16.mxu1 %v15331_v62  ;;  %v15385_v33 = vcombine.high %v11309_v53, %v11313_v36  ;;  %v15387_v62 = vcombine.high %v11310_v46, %v11314_v57  ;;  %v11362_v31 = vld [vmem:[#allocation10 + $0x378] sm:$0xff] }
 0x7e7   :  { %12873 = vmatmul.mubr.bf16.vlgmr.msra.gmra.mrb[104].mxu0 %v19486_v2  ;;  %12979 = vmatmul.mubr.bf16.vlgmr.msra.gmra.mrb[120].mxu1 %v19486_v2 }
 0x7e8   :  { %12882 = vmatprep.mubr.bf16.mxu0 %v19572_v47  ;;  %12988 = vmatprep.mubr.bf16.mxu1 %v19572_v47 }
 0x7e9   :  { %13000 = vmatpush1.bf16.msra.mxu0 %v15328_v21  ;;  %13106 = vmatpush1.bf16.msra.mxu1 %v15330_v16  ;;  %v15384_v21 = vcombine.low %v11309_v53, %v11313_v36  ;;  %v15386_v16 = vcombine.low %v11310_v46, %v11314_v57  ;;  %v11365_v53 = vld [vmem:[#allocation10 + $0x390] sm:$0xff]  ;;  %v11366_v46 = vld [vmem:[#allocation10 + $0x398] sm:$0xff] }
 0x7ea   :  { %13001 = vmatprep.subr.bf16.mxu0 %v15337_v27  ;;  %13107 = vmatprep.subr.bf16.mxu1 %v15339_v1  ;;  %v15393_v27 = vcombine.high %v11317_v43, %v11321_v8  ;;  %v15395_v1 = vcombine.high %v11318_v17, %v11322_v6  ;;  %v11369_v36 = vld [vmem:[#allocation10 + $0x3b0] sm:$0xff]  ;;  %v11370_v57 = vld [vmem:[#allocation10 + $0x3b8] sm:$0xff] }
 0x7ed   :  { %13002 = vmatpush1.bf16.msra.mxu0 %v15336_v15  ;;  %13108 = vmatpush1.bf16.msra.mxu1 %v15338_v0  ;;  %v15392_v15 = vcombine.low %v11317_v43, %v11321_v8  ;;  %v15394_v0 = vcombine.low %v11318_v17, %v11322_v6  ;;  %v11373_v43 = vld [vmem:[#allocation10 + $0x3d0] sm:$0xff]  ;;  %v11374_v17 = vld [vmem:[#allocation10 + $0x3d8] sm:$0xff] }
 0x7ee   :  { %13003 = vmatprep.subr.bf16.mxu0 %v15345_v9  ;;  %13109 = vmatprep.subr.bf16.mxu1 %v15347_v59  ;;  %v15401_v9 = vcombine.high %v11325_v11, %v11329_v22  ;;  %v15403_v59 = vcombine.high %v11326_v20, %v11330_v5  ;;  %v11377_v8 = vld [vmem:[#allocation10 + $0x3f0] sm:$0xff]  ;;  %v11378_v6 = vld [vmem:[#allocation10 + $0x3f8] sm:$0xff] }
 0x7ef   :  { %12883 = vmatmul.mubr.bf16.gmra.mrb[108].mxu0 %v19568_v24  ;;  %12989 = vmatmul.mubr.bf16.gmra.mrb[124].mxu1 %v19568_v24 }
 0x7f0   :  { %13031 = vmatprep.mubr.bf16.mxu0 %v19488_v56  ;;  %13137 = vmatprep.mubr.bf16.mxu1 %v19488_v56  ;;  %v11301_v56 = vld [vmem:[#allocation10 + $0x190] sm:$0xff] }
 0x7f1   :  { %13004 = vmatpush1.bf16.msra.mxu0 %v15344_v14  ;;  %13110 = vmatpush1.bf16.msra.mxu1 %v15346_v49  ;;  %v15377_v52 = vcombine.high %v11301_v56, %v11305_v12  ;;  %v15376_v60 = vcombine.low %v11301_v56, %v11305_v12  ;;  %v15400_v14 = vcombine.low %v11325_v11, %v11329_v22  ;;  %v11357_v56 = vld [vmem:[#allocation10 + $0x350] sm:$0xff] }
 0x7f2   :  { %13005 = vmatprep.subr.bf16.mxu0 %v15353_v4  ;;  %13111 = vmatprep.subr.bf16.mxu1 %v15355_v7  ;;  %v15402_v49 = vcombine.low %v11326_v20, %v11330_v5  ;;  %v15409_v4 = vcombine.high %v11333_v34, %v11337_v13  ;;  %v15411_v7 = vcombine.high %v11334_v25, %v11338_v23  ;;  %v11361_v12 = vld [vmem:[#allocation10 + $0x370] sm:$0xff]  ;;  %v11382_v20 = vld [vmem:[#allocation10 + $0x418] sm:$0xff] }
 0x7f3   :  { %v11381_v11 = vld [vmem:[#allocation10 + $0x410] sm:$0xff]  ;;  %v11386_v5 = vld [vmem:[#allocation10 + $0x438] sm:$0xff] }
 0x7f4   :  { %v11385_v22 = vld [vmem:[#allocation10 + $0x430] sm:$0xff] }
 0x7f5   :  { %13006 = vmatpush1.bf16.msra.mxu0 %v15352_v58  ;;  %13112 = vmatpush1.bf16.msra.mxu1 %v15354_v61  ;;  %v15408_v58 = vcombine.low %v11333_v34, %v11337_v13  ;;  %v15410_v61 = vcombine.low %v11334_v25, %v11338_v23  ;;  %v11389_v34 = vld [vmem:[#allocation10 + $0x450] sm:$0xff]  ;;  %v11390_v25 = vld [vmem:[#allocation10 + $0x458] sm:$0xff] }
 0x7f6   :  { %13007 = vmatprep.subr.bf16.mxu0 %v15361_v48  ;;  %13113 = vmatprep.subr.bf16.mxu1 %v15363_v63  ;;  %v15417_v48 = vcombine.high %v11341_v37, %v11345_v30  ;;  %v15419_v63 = vcombine.high %v11342_v39, %v11346_v45  ;;  %v11393_v13 = vld [vmem:[#allocation10 + $0x470] sm:$0xff]  ;;  %v11394_v23 = vld [vmem:[#allocation10 + $0x478] sm:$0xff] }
 0x7f9   :  { %13008 = vmatpush1.bf16.msra.mxu0 %v15360_v32  ;;  %13114 = vmatpush1.bf16.msra.mxu1 %v15362_v54  ;;  %v15416_v32 = vcombine.low %v11341_v37, %v11345_v30  ;;  %v15418_v54 = vcombine.low %v11342_v39, %v11346_v45  ;;  %v11397_v37 = vld [vmem:[#allocation10 + $0x490] sm:$0xff]  ;;  %v11398_v39 = vld [vmem:[#allocation10 + $0x498] sm:$0xff] }
 0x7fa   :  { %13009 = vmatprep.subr.bf16.mxu0 %v15369_v55  ;;  %13115 = vmatprep.subr.bf16.mxu1 %v15371_v50  ;;  %v15425_v55 = vcombine.high %v11349_v3, %v11353_v40  ;;  %v15427_v50 = vcombine.high %v11350_v35, %v11354_v29  ;;  %v11401_v30 = vld [vmem:[#allocation10 + $0x4b0] sm:$0xff]  ;;  %v11402_v45 = vld [vmem:[#allocation10 + $0x4b8] sm:$0xff] }
 0x7fd   :  { %13010 = vmatpush1.bf16.msra.mxu0 %v15368_v18  ;;  %13116 = vmatpush1.bf16.msra.mxu1 %v15370_v28  ;;  %v15424_v18 = vcombine.low %v11349_v3, %v11353_v40  ;;  %v15426_v28 = vcombine.low %v11350_v35, %v11354_v29  ;;  %v11405_v3 = vld [vmem:[#allocation10 + $0x4d0] sm:$0xff]  ;;  %v11406_v35 = vld [vmem:[#allocation10 + $0x4d8] sm:$0xff] }
 0x7fe   :  { %13011 = vmatprep.subr.bf16.mxu0 %v15377_v52  ;;  %13117 = vmatprep.subr.bf16.mxu1 %v15379_v26  ;;  %v15433_v52 = vcombine.high %v11357_v56, %v11361_v12  ;;  %v15435_v26 = vcombine.high %v11358_v51, %v11362_v31  ;;  %v11409_v40 = vld [vmem:[#allocation10 + $0x4f0] sm:$0xff]  ;;  %v11410_v29 = vld [vmem:[#allocation10 + $0x4f8] sm:$0xff] }
 0x801   :  { %13012 = vmatpush1.bf16.msra.mxu0 %v15376_v60  ;;  %13118 = vmatpush1.bf16.msra.mxu1 %v15378_v10  ;;  %v15432_v60 = vcombine.low %v11357_v56, %v11361_v12  ;;  %v15434_v10 = vcombine.low %v11358_v51, %v11362_v31  ;;  %v11414_v56 = vld [vmem:[#allocation10 + $0x518] sm:$0xff]  ;;  %v15480_v51 = vcombine.low %v11405_v3, %v11409_v40 }
 0x802   :  { %13013 = vmatprep.subr.bf16.mxu0 %v15385_v33  ;;  %13119 = vmatprep.subr.bf16.mxu1 %v15387_v62  ;;  %v15441_v33 = vcombine.high %v11365_v53, %v11369_v36  ;;  %v15443_v62 = vcombine.high %v11366_v46, %v11370_v57  ;;  %v11418_v12 = vld [vmem:[#allocation10 + $0x538] sm:$0xff]  ;;  %v15482_v31 = vcombine.low %v11406_v35, %v11410_v29 }
 0x805   :  { %13014 = vmatpush1.bf16.msra.mxu0 %v15384_v21  ;;  %13120 = vmatpush1.bf16.msra.mxu1 %v15386_v16  ;;  %v15440_v21 = vcombine.low %v11365_v53, %v11369_v36  ;;  %v15442_v16 = vcombine.low %v11366_v46, %v11370_v57  ;;  %v11422_v53 = vld [vmem:[#allocation10 + $0x558] sm:$0xff]  ;;  %v15490_v46 = vcombine.low %v11414_v56, %v11418_v12 }
 0x806   :  { %13015 = vmatprep.subr.bf16.mxu0 %v15393_v27  ;;  %13121 = vmatprep.subr.bf16.mxu1 %v15395_v1  ;;  %v15449_v27 = vcombine.high %v11373_v43, %v11377_v8  ;;  %v15451_v1 = vcombine.high %v11374_v17, %v11378_v6  ;;  %v11426_v36 = vld [vmem:[#allocation10 + $0x578] sm:$0xff] }
 0x809   :  { %13016 = vmatpush1.bf16.msra.mxu0 %v15392_v15  ;;  %13122 = vmatpush1.bf16.msra.mxu1 %v15394_v0  ;;  %v15448_v15 = vcombine.low %v11373_v43, %v11377_v8  ;;  %v15450_v0 = vcombine.low %v11374_v17, %v11378_v6  ;;  %v15498_v8 = vcombine.low %v11422_v53, %v11426_v36 }
 0x80a   :  { %13017 = vmatprep.subr.bf16.mxu0 %v15401_v9  ;;  %13123 = vmatprep.subr.bf16.mxu1 %v15403_v59  ;;  %v15457_v9 = vcombine.high %v11381_v11, %v11385_v22  ;;  %v15459_v59 = vcombine.high %v11382_v20, %v11386_v5 }
 0x80d   :  { %13018 = vmatpush1.bf16.msra.mxu0 %v15400_v14  ;;  %13124 = vmatpush1.bf16.msra.mxu1 %v15402_v49  ;;  %v15456_v14 = vcombine.low %v11381_v11, %v11385_v22  ;;  %v15458_v49 = vcombine.low %v11382_v20, %v11386_v5 }
 0x80e   :  { %13019 = vmatprep.subr.bf16.mxu0 %v15409_v4  ;;  %13125 = vmatprep.subr.bf16.mxu1 %v15411_v7  ;;  %v15465_v4 = vcombine.high %v11389_v34, %v11393_v13  ;;  %v15467_v7 = vcombine.high %v11390_v25, %v11394_v23 }
 0x811   :  { %13020 = vmatpush1.bf16.msra.mxu0 %v15408_v58  ;;  %13126 = vmatpush1.bf16.msra.mxu1 %v15410_v61  ;;  %v15464_v58 = vcombine.low %v11389_v34, %v11393_v13  ;;  %v15466_v61 = vcombine.low %v11390_v25, %v11394_v23 }
 0x812   :  { %13021 = vmatprep.subr.bf16.mxu0 %v15417_v48  ;;  %13127 = vmatprep.subr.bf16.mxu1 %v15419_v63  ;;  %v15473_v48 = vcombine.high %v11397_v37, %v11401_v30  ;;  %v15475_v63 = vcombine.high %v11398_v39, %v11402_v45 }
 0x815   :  { %13022 = vmatpush1.bf16.msra.mxu0 %v15416_v32  ;;  %13128 = vmatpush1.bf16.msra.mxu1 %v15418_v54  ;;  %v15474_v32 = vcombine.low %v11398_v39, %v11402_v45  ;;  %v15481_v54 = vcombine.high %v11405_v3, %v11409_v40 }
 0x816   :  { %13023 = vmatprep.subr.bf16.mxu0 %v15425_v55  ;;  %13129 = vmatprep.subr.bf16.mxu1 %v15427_v50  ;;  %v11413_v55 = vld [vmem:[#allocation10 + $0x510] sm:$0xff] }
 0x817   :  { %v11417_v50 = vld [vmem:[#allocation10 + $0x530] sm:$0xff] }
 0x819   :  { %13024 = vmatpush1.bf16.msra.mxu0 %v15424_v18  ;;  %13130 = vmatpush1.bf16.msra.mxu1 %v15426_v28  ;;  %v15489_v18 = vcombine.high %v11413_v55, %v11417_v50  ;;  %v15491_v28 = vcombine.high %v11414_v56, %v11418_v12 }
 0x81a   :  { %13025 = vmatprep.subr.bf16.mxu0 %v15433_v52  ;;  %13131 = vmatprep.subr.bf16.mxu1 %v15435_v26  ;;  %v11421_v52 = vld [vmem:[#allocation10 + $0x550] sm:$0xff] }
 0x81b   :  { %v11425_v26 = vld [vmem:[#allocation10 + $0x570] sm:$0xff] }
 0x81c   :  { %v15497_v57 = vcombine.high %v11421_v52, %v11425_v26  ;;  %v15496_v43 = vcombine.low %v11421_v52, %v11425_v26 }
 0x81d   :  { %13026 = vmatpush1.bf16.msra.mxu0 %v15432_v60  ;;  %13132 = vmatpush1.bf16.msra.mxu1 %v15434_v10  ;;  %v15499_v60 = vcombine.high %v11422_v53, %v11426_v36  ;;  %v11433_v10 = vld [vmem:[#allocation10 + $0x5b0] sm:$0xff] }
 0x81e   :  { %13027 = vmatprep.subr.bf16.mxu0 %v15441_v33  ;;  %13133 = vmatprep.subr.bf16.mxu1 %v15443_v62  ;;  %v11430_v33 = vld [vmem:[#allocation10 + $0x598] sm:$0xff] }
 0x81f   :  { %v11434_v62 = vld [vmem:[#allocation10 + $0x5b8] sm:$0xff] }
 0x820   :  { %v15507_v6 = vcombine.high %v11430_v33, %v11434_v62  ;;  %v15506_v22 = vcombine.low %v11430_v33, %v11434_v62 }
 0x821   :  { %13028 = vmatpush1.bf16.msra.mxu0 %v15440_v21  ;;  %13134 = vmatpush1.bf16.msra.mxu1 %v15442_v16  ;;  %v11437_v21 = vld [vmem:[#allocation10 + $0x5d0] sm:$0xff] }
 0x822   :  { %13029 = vmatprep.subr.bf16.mxu0 %v15449_v27  ;;  %13135 = vmatprep.subr.bf16.mxu1 %v15451_v1  ;;  %v11441_v16 = vld [vmem:[#allocation10 + $0x5f0] sm:$0xff]  ;;  %v11438_v27 = vld [vmem:[#allocation10 + $0x5d8] sm:$0xff] }
 0x823   :  { %v11442_v1 = vld [vmem:[#allocation10 + $0x5f8] sm:$0xff]  ;;  %v15513_v20 = vcombine.high %v11437_v21, %v11441_v16  ;;  %v15512_v34 = vcombine.low %v11437_v21, %v11441_v16 }
 0x824   :  { %v15515_v5 = vcombine.high %v11438_v27, %v11442_v1  ;;  %v15514_v13 = vcombine.low %v11438_v27, %v11442_v1 }
 0x825   :  { %13030 = vmatpush1.bf16.msra.mxu0 %v15448_v15  ;;  %13136 = vmatpush1.bf16.msra.mxu1 %v15450_v0  ;;  %v11445_v15 = vld [vmem:[#allocation10 + $0x610] sm:$0xff] }
 0x826   :  { %13052 = vmatprep.subr.bf16.mxu0 %v15457_v9  ;;  %13158 = vmatprep.subr.bf16.mxu1 %v15459_v59  ;;  %v11449_v0 = vld [vmem:[#allocation10 + $0x630] sm:$0xff]  ;;  %v11446_v9 = vld [vmem:[#allocation10 + $0x618] sm:$0xff] }
 0x827   :  { %v11450_v59 = vld [vmem:[#allocation10 + $0x638] sm:$0xff]  ;;  %v15521_v25 = vcombine.high %v11445_v15, %v11449_v0 }
 0x828   :  { %13032 = vmatmul.mubr.bf16.vlgmr.msra.gmra.mrb[112].mxu0 %v19484_v19  ;;  %13138 = vmatmul.mubr.bf16.vlgmr.msra.gmra.mrb[128].mxu1 %v19484_v19  ;;  %v15472_v19 = vcombine.low %v11397_v37, %v11401_v30  ;;  %v15523_v23 = vcombine.high %v11446_v9, %v11450_v59  ;;  %v15520_v37 = vcombine.low %v11445_v15, %v11449_v0 }
 0x829   :  { %13041 = vmatprep.mubr.bf16.mxu0 %v19570_v44  ;;  %13053 = vmatpush1.bf16.msra.mxu0 %v15456_v14  ;;  %v11453_v14 = vld [vmem:[#allocation10 + $0x650] sm:$0xff]  ;;  %v15522_v30 = vcombine.low %v11446_v9, %v11450_v59 }
 0x82a   :  { %13147 = vmatprep.mubr.bf16.mxu1 %v19570_v44  ;;  %13159 = vmatpush1.bf16.msra.mxu1 %v15458_v49  ;;  %v15483_v44 = vcombine.high %v11406_v35, %v11410_v29  ;;  %v11457_v49 = vld [vmem:[#allocation10 + $0x670] sm:$0xff] }
 0x82b   :  { %13054 = vmatprep.subr.bf16.mxu0 %v15465_v4  ;;  %13160 = vmatprep.subr.bf16.mxu1 %v15467_v7  ;;  %v11454_v4 = vld [vmem:[#allocation10 + $0x658] sm:$0xff]  ;;  %v15529_v39 = vcombine.high %v11453_v14, %v11457_v49  ;;  %v15528_v3 = vcombine.low %v11453_v14, %v11457_v49 }
 0x82c   :  { %v11458_v7 = vld [vmem:[#allocation10 + $0x678] sm:$0xff] }
 0x82d   :  { %13055 = vmatpush1.bf16.msra.mxu0 %v15464_v58  ;;  %v15531_v45 = vcombine.high %v11454_v4, %v11458_v7  ;;  %v11461_v58 = vld [vmem:[#allocation10 + $0x690] sm:$0xff]  ;;  %v15530_v40 = vcombine.low %v11454_v4, %v11458_v7  ;;  %v19951_v7 = vld [vmem:[#allocation64_spill] sm:$0xff] }
 0x82e   :  { %13161 = vmatpush1.bf16.msra.mxu1 %v15466_v61  ;;  %13056 = vmatprep.subr.bf16.mxu0 %v15473_v48  ;;  %v11465_v61 = vld [vmem:[#allocation10 + $0x6b0] sm:$0xff]  ;;  %v11462_v48 = vld [vmem:[#allocation10 + $0x698] sm:$0xff] }
 0x82f   :  { %13162 = vmatprep.subr.bf16.mxu1 %v15475_v63  ;;  %v11466_v63 = vld [vmem:[#allocation10 + $0x6b8] sm:$0xff]  ;;  %v15537_v35 = vcombine.high %v11461_v58, %v11465_v61 }
 0x830   :  { %13042 = vmatmul.mubr.bf16.gmra.mrb[116].mxu0 %v19566_v41  ;;  %13148 = vmatmul.mubr.bf16.gmra.mrb[132].mxu1 %v19566_v41  ;;  %v15488_v41 = vcombine.low %v11413_v55, %v11417_v50  ;;  %v15539_v29 = vcombine.high %v11462_v48, %v11466_v63  ;;  %v15536_v55 = vcombine.low %v11461_v58, %v11465_v61  ;;  %v13212_v58 = vadd.s32 24, %v18779_v42 }
 0x831   :  { %13084 = vmatprep.mubr.bf16.mxu0 %v19490_v38  ;;  %13057 = vmatpush1.bf16.msra.mxu0 %v15472_v19  ;;  %v11469_v19 = vld [vmem:[#allocation10 + $0x6d0] sm:$0xff]  ;;  %v15538_v50 = vcombine.low %v11462_v48, %v11466_v63 }
 0x832   :  { %13190 = vmatprep.mubr.bf16.mxu1 %v19490_v38  ;;  %13163 = vmatpush1.bf16.msra.mxu1 %v15474_v32  ;;  %v11429_v38 = vld [vmem:[#allocation10 + $0x590] sm:$0xff] }
 0x833   :  { %13058 = vmatprep.subr.bf16.mxu0 %v15481_v54  ;;  %13164 = vmatprep.subr.bf16.mxu1 %v15483_v44  ;;  %v15505_v17 = vcombine.high %v11429_v38, %v11433_v10  ;;  %v15504_v11 = vcombine.low %v11429_v38, %v11433_v10  ;;  %v11473_v32 = vld [vmem:[#allocation10 + $0x6f0] sm:$0xff]  ;;  %v11470_v54 = vld [vmem:[#allocation10 + $0x6d8] sm:$0xff] }
 0x834   :  { %v11474_v44 = vld [vmem:[#allocation10 + $0x6f8] sm:$0xff]  ;;  %v15545_v56 = vcombine.high %v11469_v19, %v11473_v32  ;;  %v15544_v52 = vcombine.low %v11469_v19, %v11473_v32 }
 0x835   :  { %13059 = vmatpush1.bf16.msra.mxu0 %v15480_v51  ;;  %v15547_v12 = vcombine.high %v11470_v54, %v11474_v44  ;;  %v11477_v51 = vld [vmem:[#allocation10 + $0x710] sm:$0xff]  ;;  %v15546_v26 = vcombine.low %v11470_v54, %v11474_v44  ;;  %v19630_v44 = vand.u32 15, %v13212_v58 }
 0x836   :  { %13165 = vmatpush1.bf16.msra.mxu1 %v15482_v31  ;;  %13060 = vmatprep.subr.bf16.mxu0 %v15489_v18  ;;  %v11481_v31 = vld [vmem:[#allocation10 + $0x730] sm:$0xff]  ;;  %v11478_v18 = vld [vmem:[#allocation10 + $0x718] sm:$0xff] }
 0x837   :  { %13166 = vmatprep.subr.bf16.mxu1 %v15491_v28  ;;  %v11482_v28 = vld [vmem:[#allocation10 + $0x738] sm:$0xff]  ;;  %v15553_v53 = vcombine.high %v11477_v51, %v11481_v31  ;;  %v15552_v38 = vcombine.low %v11477_v51, %v11481_v31 }
 0x838   :  { %v15555_v36 = vcombine.high %v11478_v18, %v11482_v28  ;;  %v15554_v10 = vcombine.low %v11478_v18, %v11482_v28 }
 0x839   :  { %13061 = vmatpush1.bf16.msra.mxu0 %v15488_v41  ;;  %v11485_v41 = vld [vmem:[#allocation10 + $0x750] sm:$0xff] }
 0x83a   :  { %13167 = vmatpush1.bf16.msra.mxu1 %v15490_v46  ;;  %13062 = vmatprep.subr.bf16.mxu0 %v15497_v57  ;;  %v11489_v46 = vld [vmem:[#allocation10 + $0x770] sm:$0xff]  ;;  %v11486_v57 = vld [vmem:[#allocation10 + $0x758] sm:$0xff] }
 0x83b   :  { %13168 = vmatprep.subr.bf16.mxu1 %v15499_v60  ;;  %v11490_v60 = vld [vmem:[#allocation10 + $0x778] sm:$0xff]  ;;  %v15561_v33 = vcombine.high %v11485_v41, %v11489_v46  ;;  %v15560_v21 = vcombine.low %v11485_v41, %v11489_v46 }
 0x83c   :  { %v15563_v62 = vcombine.high %v11486_v57, %v11490_v60  ;;  %v15562_v16 = vcombine.low %v11486_v57, %v11490_v60 }
 0x83d   :  { %13063 = vmatpush1.bf16.msra.mxu0 %v15496_v43  ;;  %v11493_v43 = vld [vmem:[#allocation10 + $0x790] sm:$0xff] }
 0x83e   :  { %13169 = vmatpush1.bf16.msra.mxu1 %v15498_v8  ;;  %13064 = vmatprep.subr.bf16.mxu0 %v15505_v17  ;;  %v11497_v8 = vld [vmem:[#allocation10 + $0x7b0] sm:$0xff]  ;;  %v11494_v17 = vld [vmem:[#allocation10 + $0x798] sm:$0xff] }
 0x83f   :  { %13170 = vmatprep.subr.bf16.mxu1 %v15507_v6  ;;  %v11498_v6 = vld [vmem:[#allocation10 + $0x7b8] sm:$0xff]  ;;  %v15569_v27 = vcombine.high %v11493_v43, %v11497_v8  ;;  %v15568_v15 = vcombine.low %v11493_v43, %v11497_v8 }
 0x840   :  { %v15571_v1 = vcombine.high %v11494_v17, %v11498_v6  ;;  %v15570_v0 = vcombine.low %v11494_v17, %v11498_v6 }
 0x841   :  { %13065 = vmatpush1.bf16.msra.mxu0 %v15504_v11  ;;  %v11501_v11 = vld [vmem:[#allocation10 + $0x7d0] sm:$0xff] }
 0x842   :  { %13171 = vmatpush1.bf16.msra.mxu1 %v15506_v22  ;;  %13066 = vmatprep.subr.bf16.mxu0 %v15513_v20  ;;  %v11505_v22 = vld [vmem:[#allocation10 + $0x7f0] sm:$0xff]  ;;  %v11502_v20 = vld [vmem:[#allocation10 + $0x7d8] sm:$0xff] }
 0x843   :  { %13172 = vmatprep.subr.bf16.mxu1 %v15515_v5  ;;  %v11506_v5 = vld [vmem:[#allocation10 + $0x7f8] sm:$0xff]  ;;  %v15577_v9 = vcombine.high %v11501_v11, %v11505_v22 }
 0x844   :  { %v15579_v59 = vcombine.high %v11502_v20, %v11506_v5 }
 0x845   :  { %13067 = vmatpush1.bf16.msra.mxu0 %v15512_v34  ;;  %v15576_v34 = vcombine.low %v11501_v11, %v11505_v22 }
 0x846   :  { %13173 = vmatpush1.bf16.msra.mxu1 %v15514_v13  ;;  %13068 = vmatprep.subr.bf16.mxu0 %v15521_v25  ;;  %v15578_v13 = vcombine.low %v11502_v20, %v11506_v5  ;;  %v19949_v25 = vmov 0.0  }
 0x847   :  { %13174 = vmatprep.subr.bf16.mxu1 %v15523_v23  ;;  %v19950_v23 = vld [vmem:[#allocation63_spill] sm:$0xff] }
 0x848   :  { %v13213_v14 = vadd.s32 128, %v19950_v23  ;;  %v13215_v49 = vadd.s32 384, %v19950_v23  ;;  %v13214_v4 = vadd.s32 256, %v19950_v23  ;;  %v13296_v31 = vshra.s32 %v19950_v23, 4 }
 0x849   :  { %13069 = vmatpush1.bf16.msra.mxu0 %v15520_v37  ;;  %v13218_v43 = vadd.s32 768, %v19950_v23 }
 0x84a   :  { %13175 = vmatpush1.bf16.msra.mxu1 %v15522_v30  ;;  %13070 = vmatprep.subr.bf16.mxu0 %v15529_v39  ;;  %v13221_v37 = vshra.s32 %v13213_v14, 6  ;;  %v13223_v30 = vshra.s32 %v13215_v49, 6  ;;  %v13222_v39 = vshra.s32 %v13214_v4, 6 }
 0x84b   :  { %13176 = vmatprep.subr.bf16.mxu1 %v15531_v45  ;;  %v13211_v45 = vadd.s32 16, %v18779_v42 }
 0x84c   :  { %vm13257_vm2 = vcmp.eq.s32.totalorder %v13221_v37, %v19630_v44  ;;  %vm13259_vm4 = vcmp.eq.s32.totalorder %v13223_v30, %v19630_v44 }
 0x84d   :  { %13071 = vmatpush1.bf16.msra.mxu0 %v15528_v3  ;;  %v19628_v54 = vand.u32 15, %v13211_v45 }
 0x84e   :  { %13177 = vmatpush1.bf16.msra.mxu1 %v15530_v40  ;;  %13072 = vmatprep.subr.bf16.mxu0 %v15537_v35 }
 0x84f   :  { %13178 = vmatprep.subr.bf16.mxu1 %v15539_v29  ;;  %vm13249_vm1 = vcmp.eq.s32.totalorder %v13221_v37, %v19628_v54  ;;  %vm13251_vm3 = vcmp.eq.s32.totalorder %v13223_v30, %v19628_v54 }
 0x851   :  { %13073 = vmatpush1.bf16.msra.mxu0 %v15536_v55 }
 0x852   :  { %13179 = vmatpush1.bf16.msra.mxu1 %v15538_v50  ;;  %13074 = vmatprep.subr.bf16.mxu0 %v15545_v56 }
 0x853   :  { %13180 = vmatprep.subr.bf16.mxu1 %v15547_v12 }
 0x855   :  { %13075 = vmatpush1.bf16.msra.mxu0 %v15544_v52 }
 0x856   :  { %13181 = vmatpush1.bf16.msra.mxu1 %v15546_v26  ;;  %13076 = vmatprep.subr.bf16.mxu0 %v15553_v53 }
 0x857   :  { %13182 = vmatprep.subr.bf16.mxu1 %v15555_v36 }
 0x859   :  { %13077 = vmatpush1.bf16.msra.mxu0 %v15552_v38 }
 0x85a   :  { %13183 = vmatpush1.bf16.msra.mxu1 %v15554_v10  ;;  %13078 = vmatprep.subr.bf16.mxu0 %v15561_v33  ;;  %v13219_v33 = vadd.s32 896, %v19950_v23 }
 0x85b   :  { %13184 = vmatprep.subr.bf16.mxu1 %v15563_v62  ;;  %v13216_v62 = vadd.s32 512, %v19950_v23 }
 0x85c   :  { %v13227_v17 = vshra.s32 %v13219_v33, 6 }
 0x85d   :  { %13079 = vmatpush1.bf16.msra.mxu0 %v15560_v21  ;;  %v13224_v6 = vshra.s32 %v13216_v62, 6  ;;  %v13226_v21 = vshra.s32 %v13218_v43, 6  ;;  %v13591_v43 = vld [vmem:[#allocation13 + $0x20] sm:$0xff] }
 0x85e   :  { %13185 = vmatpush1.bf16.msra.mxu1 %v15562_v16  ;;  %13080 = vmatprep.subr.bf16.mxu0 %v15569_v27 }
 0x85f   :  { %13186 = vmatprep.subr.bf16.mxu1 %v15571_v1 }
 0x861   :  { %13081 = vmatpush1.bf16.msra.mxu0 %v15568_v15 }
 0x862   :  { %13187 = vmatpush1.bf16.msra.mxu1 %v15570_v0  ;;  %13082 = vmatprep.subr.bf16.mxu0 %v15577_v9 }
 0x863   :  { %13188 = vmatprep.subr.bf16.mxu1 %v15579_v59 }
 0x865   :  { %13083 = vmatpush1.bf16.msra.mxu0 %v15576_v34 }
 0x866   :  { %13189 = vmatpush1.bf16.msra.mxu1 %v15578_v13 }
 0x868   :  { %13085 = vmatmul.mubr.bf16.vlgmr.msra.gmra.mrb[112].mxu0 %v19486_v2 }
 0x869   :  { %13191 = vmatmul.mubr.bf16.vlgmr.msra.gmra.mrb[128].mxu1 %v19486_v2  ;;  %13094 = vmatprep.mubr.bf16.mxu0 %v19572_v47  ;;  %v19608_v2 = vand.u32 15, %v19951_v7  ;;  %v13603_v7 = vld [vmem:[#allocation13 + $0x80] sm:$0xff] }
 0x86a   :  { %13200 = vmatprep.mubr.bf16.mxu1 %v19572_v47  ;;  %v19611_v47 = vand.u32 15, %v18779_v42 }
 0x86b   :  { %vm13241_vm6 = vcmp.eq.s32.totalorder %v13221_v37, %v19608_v2  ;;  %vm13243_vm8 = vcmp.eq.s32.totalorder %v13223_v30, %v19608_v2  ;;  %vm13242_vm13 = vcmp.eq.s32.totalorder %v13222_v39, %v19608_v2 }
 0x86c   :  { %vm13233_vm5 = vcmp.eq.s32.totalorder %v13221_v37, %v19611_v47  ;;  %vm13235_vm7 = vcmp.eq.s32.totalorder %v13223_v30, %v19611_v47  ;;  %vm13234_vm12 = vcmp.eq.s32.totalorder %v13222_v39, %v19611_v47 }
 0x86d   :  { %vm19622_vm11 = vmpackc.low %vm13241_vm6, %vm13233_vm5 }
 0x86e   :  { %vm15823_vm14 = vmpackc.low %vm13243_vm8, %vm13235_vm7  ;;  %vm13250_vm8 = vcmp.eq.s32.totalorder %v13222_v39, %v19628_v54 }
 0x86f   :  { %vm15826_vm0 = vmpackc.low %vm13242_vm13, %vm13234_vm12  ;;  %vm13297_vm12 = vcmp.eq.s32.totalorder %v13296_v31, %v18779_v42  ;;  %v13217_v42 = vadd.s32 640, %v19950_v23 }
 0x870   :  { %13095 = vmatmul.mubr.bf16.gmra.mrb[116].mxu0 %v19568_v24  ;;  %vm15817_vm7 = vmpackc.low %vm13257_vm2, %vm13249_vm1  ;;  %v19651_v10 = vsel %vm13297_vm12, 1.0, %v19949_v25  ;;  %vm13239_vm1 = vcmp.eq.s32.totalorder %v13227_v17, %v19611_v47  ;;  %vm13247_vm2 = vcmp.eq.s32.totalorder %v13227_v17, %v19608_v2 }
 0x871   :  { %13201 = vmatmul.mubr.bf16.gmra.mrb[132].mxu1 %v19568_v24  ;;  %13367 = vmatprep.mubr.f32.mxu0 %v19949_v25  ;;  %v13220_v24 = vshra.s32 %v19950_v23, 6  ;;  %v13225_v8 = vshra.s32 %v13217_v42, 6  ;;  %v13643_v23 = vld [vmem:[#allocation13 + $0x1c0] sm:$0xff] }
 0x872   :  { %13438 = vmatprep.mubr.f32.mxu1 %v19949_v25 }
 0x873   :  { %vm13232_vm9 = vcmp.eq.s32.totalorder %v13220_v24, %v19611_v47  ;;  %vm13240_vm10 = vcmp.eq.s32.totalorder %v13220_v24, %v19608_v2  ;;  %vm13248_vm5 = vcmp.eq.s32.totalorder %v13220_v24, %v19628_v54  ;;  %vm13256_vm6 = vcmp.eq.s32.totalorder %v13220_v24, %v19630_v44  ;;  %v13635_v24 = vld [vmem:[#allocation13 + $0x180] sm:$0xff] }
 0x874   :  { %vm15814_vm15 = vmpackc.low %vm13240_vm10, %vm13232_vm9  ;;  %vm13258_vm9 = vcmp.eq.s32.totalorder %v13222_v39, %v19630_v44  ;;  %vm13261_vm12 = vcmp.eq.s32.totalorder %v13225_v8, %v19630_v44  ;;  %v13636_v39 = vld [vmem:[#allocation13 + $0x188] sm:$0xff] }
 0x875   :  { %vm15829_vm10 = vmpackc.low %vm13259_vm4, %vm13251_vm3  ;;  %vm13236_vm3 = vcmp.eq.s32.totalorder %v13224_v6, %v19611_v47  ;;  %vm13244_vm4 = vcmp.eq.s32.totalorder %v13224_v6, %v19608_v2 }
 0x876   :  { %vm15832_vm13 = vmpackc.low %vm13258_vm9, %vm13250_vm8 }
 0x877   :  { %vm15847_vm8 = vmpackc.low %vm13247_vm2, %vm13239_vm1  ;;  %vm13260_vm1 = vcmp.eq.s32.totalorder %v13224_v6, %v19630_v44 }
 0x878   :  { %vm15838_vm9 = vmpackc.low %vm13244_vm4, %vm13236_vm3  ;;  %vm13254_vm3 = vcmp.eq.s32.totalorder %v13226_v21, %v19628_v54  ;;  %vm13262_vm4 = vcmp.eq.s32.totalorder %v13226_v21, %v19630_v44 }
 0x8ba   :  { %v12874_v61 = vpop.f32.mrb[104].mxu0  ;;  %v12980_v48 = vpop.f32.mrb[120].mxu1 }
 0x8bb   :  { %v12876_v63 = vpop.f32.mrb[105].mxu0  ;;  %v12982_v3 = vpop.f32.mrb[121].mxu1 }
 0x8bc   :  { %v12878_v40 = vpop.f32.mrb[106].mxu0  ;;  %v12984_v19 = vpop.f32.mrb[122].mxu1 }
 0x8bd   :  { %v15813_v29 = vpack.c.bf16 %v12878_v40, %v12874_v61  ;;  %v12880_v32 = vpop.f32.mrb[107].mxu0  ;;  %v15825_v55 = vpack.c.bf16 %v12984_v19, %v12980_v48  ;;  %v12986_v56 = vpop.f32.mrb[123].mxu1  ;;  %v13588_v19 = vld [vmem:[#allocation13 + $0x8] sm:$0xff] }
 0x8be   :  { %v15810_v50 = vpack.c.bf16 %v12880_v32, %v12876_v63  ;;  %v15822_v12 = vpack.c.bf16 %v12986_v56, %v12982_v3  ;;  %v13619_v32 = vld [vmem:[#allocation13 + $0x100] sm:$0xff]  ;;  %v13605_v56 = vld [vmem:[#allocation13 + $0x90] sm:$0xff] }
 0x8c0   :  { %15812 = vmatprep.subr.msk.bf16.mxu0 %vm19622_vm11, %v15810_v50  ;;  %15824 = vmatprep.subr.msk.bf16.mxu1 %vm15823_vm14, %v15822_v12  ;;  %vm15820_vm11 = vmpackc.low %vm13256_vm6, %vm13248_vm5  ;;  %vm13299_vm14 = vcmask 261120   ;;  %vm13238_vm6 = vcmp.eq.s32.totalorder %v13226_v21, %v19611_v47  ;;  %v13620_v50 = vld [vmem:[#allocation13 + $0x108] sm:$0xff]  ;;  %v13606_v12 = vld [vmem:[#allocation13 + $0x98] sm:$0xff] }
 0x8c1   :  { %15815 = vmatpush1.bf16.msk.msra.mxu0 %vm15814_vm15, %v15813_v29  ;;  %15827 = vmatpush1.bf16.msk.msra.mxu1 %vm15826_vm0, %v15825_v55  ;;  %vm13237_vm15 = vcmp.eq.s32.totalorder %v13225_v8, %v19611_v47  ;;  %vm13245_vm0 = vcmp.eq.s32.totalorder %v13225_v8, %v19608_v2  ;;  %v13587_v29 = vld [vmem:[#allocation13] sm:$0xff]  ;;  %v15890_v55 = vpack.c.bf16 %v13636_v39, %v13635_v24  ;;  %v13628_v24 = vld [vmem:[#allocation13 + $0x148] sm:$0xff]  ;;  %v13613_v39 = vld [vmem:[#allocation13 + $0xd0] sm:$0xff] }
 0x8c2   :  { %v12884_v51 = vpop.f32.mrb[108].mxu0  ;;  %v12990_v18 = vpop.f32.mrb[124].mxu1  ;;  %vm15835_vm5 = vmpackc.low %vm13245_vm0, %vm13237_vm15  ;;  %vm13263_vm15 = vcmp.eq.s32.totalorder %v13227_v17, %v19630_v44  ;;  %vm13252_vm0 = vcmp.eq.s32.totalorder %v13224_v6, %v19628_v54  ;;  %v15860_v31 = vpack.c.bf16 %v13588_v19, %v13587_v29  ;;  %v13629_v29 = vld [vmem:[#allocation13 + $0x150] sm:$0xff] }
 0x8c3   :  { %v12886_v28 = vpop.f32.mrb[109].mxu0  ;;  %v12992_v52 = vpop.f32.mrb[125].mxu1 }
 0x8c4   :  { %v12888_v26 = vpop.f32.mrb[110].mxu0  ;;  %v12994_v36 = vpop.f32.mrb[126].mxu1 }
 0x8c5   :  { %v15819_v53 = vpack.c.bf16 %v12888_v26, %v12884_v51  ;;  %v12890_v41 = vpop.f32.mrb[111].mxu0  ;;  %v15831_v46 = vpack.c.bf16 %v12994_v36, %v12990_v18  ;;  %v12996_v60 = vpop.f32.mrb[127].mxu1  ;;  %v13638_v51 = vld [vmem:[#allocation13 + $0x198] sm:$0xff]  ;;  %v15892_v18 = vpack.c.bf16 %v13620_v50, %v13619_v32  ;;  %v13647_v50 = vld [vmem:[#allocation13 + $0x1e0] sm:$0xff] }
 0x8c6   :  { %v15816_v57 = vpack.c.bf16 %v12890_v41, %v12886_v28  ;;  %v15828_v38 = vpack.c.bf16 %v12996_v60, %v12992_v52  ;;  %v15862_v28 = vpack.c.bf16 %v13606_v12, %v13605_v56  ;;  %v13589_v52 = vld [vmem:[#allocation13 + $0x10] sm:$0xff]  ;;  %v13590_v26 = vld [vmem:[#allocation13 + $0x18] sm:$0xff]  ;;  %v13639_v60 = vld [vmem:[#allocation13 + $0x1a0] sm:$0xff] }
 0x8c7   :  { %v13622_v41 = vld [vmem:[#allocation13 + $0x118] sm:$0xff]  ;;  %v15864_v42 = vpack.c.bf16 %v13590_v26, %v13589_v52  ;;  %v13648_v56 = vld [vmem:[#allocation13 + $0x1e8] sm:$0xff] }
 0x8c8   :  { %15818 = vmatprep.subr.msk.bf16.mxu0 %vm15817_vm7, %v15816_v57  ;;  %15830 = vmatprep.subr.msk.bf16.mxu1 %vm15829_vm10, %v15828_v38  ;;  %vm13246_vm7 = vcmp.eq.s32.totalorder %v13226_v21, %v19608_v2  ;;  %v13604_v2 = vld [vmem:[#allocation13 + $0x88] sm:$0xff]  ;;  %v13630_v32 = vld [vmem:[#allocation13 + $0x158] sm:$0xff]  ;;  %v15914_v52 = vpack.c.bf16 %v13648_v56, %v13647_v50  ;;  %v13705_v56 = vld [vmem:[#allocation13 + $0x3b0] sm:$0xff] }
 0x8c9   :  { %15821 = vmatpush1.bf16.msk.msra.mxu0 %vm15820_vm11, %v15819_v53  ;;  %15833 = vmatpush1.bf16.msk.msra.mxu1 %vm15832_vm13, %v15831_v46  ;;  %vm15850_vm10 = vmpackc.low %vm13246_vm7, %vm13238_vm6  ;;  %vm13253_vm11 = vcmp.eq.s32.totalorder %v13225_v8, %v19628_v54  ;;  %vm13255_vm13 = vcmp.eq.s32.totalorder %v13227_v17, %v19628_v54  ;;  %v15858_v35 = vpack.c.bf16 %v13604_v2, %v13603_v7  ;;  %v13637_v54 = vld [vmem:[#allocation13 + $0x190] sm:$0xff]  ;;  %v13607_v46 = vld [vmem:[#allocation13 + $0xa0] sm:$0xff] }
 0x8ca   :  { %vm19677_vm2 = vmpackc.low %vm13261_vm12, %vm13253_vm11  ;;  %v13621_v53 = vld [vmem:[#allocation13 + $0x110] sm:$0xff]  ;;  %v15894_v36 = vpack.c.bf16 %v13638_v51, %v13637_v54  ;;  %v13608_v57 = vld [vmem:[#allocation13 + $0xa8] sm:$0xff]  ;;  %v15912_v54 = vpack.c.bf16 %v13630_v32, %v13629_v29 }
 0x8cb   :  { %vm19687_vm6 = vmpackc.low %vm13260_vm1, %vm13252_vm0  ;;  %v13640_v38 = vld [vmem:[#allocation13 + $0x1a8] sm:$0xff]  ;;  %v15896_v33 = vpack.c.bf16 %v13622_v41, %v13621_v53  ;;  %v15866_v62 = vpack.c.bf16 %v13608_v57, %v13607_v46  ;;  %v13623_v17 = vld [vmem:[#allocation13 + $0x120] sm:$0xff] }
 0x8cc   :  { %15588 = vmatmul.mubr.msk.f32.vlgmr.msra.gmra.mrb[120].mxu0 %vm13299_vm14, %v19651_v10  ;;  %15597 = vmatmul.mubr.msk.f32.vlgmr.msra.gmra.mrb[136].mxu1 %vm13299_vm14, %v19651_v10  ;;  %vm19693_vm7 = vmpackc.low %vm13262_vm4, %vm13254_vm3  ;;  %v13592_v8 = vld [vmem:[#allocation13 + $0x28] sm:$0xff]  ;;  %v15898_v6 = vpack.c.bf16 %v13640_v38, %v13639_v60  ;;  %v13595_v2 = vld [vmem:[#allocation13 + $0x40] sm:$0xff] }
 0x8cd   :  { %13509 = vmatprep.mubr.f32.mxu0 %v19949_v25  ;;  %13580 = vmatprep.mubr.f32.mxu1 %v19949_v25  ;;  %v13624_v21 = vld [vmem:[#allocation13 + $0x128] sm:$0xff]  ;;  %v13617_v53 = vld [vmem:[#allocation13 + $0xf0] sm:$0xff]  ;;  %v13650_v46 = vld [vmem:[#allocation13 + $0x1f8] sm:$0xff] }
 0x8ce   :  { %v13632_v26 = vld [vmem:[#allocation13 + $0x168] sm:$0xff]  ;;  %v13649_v41 = vld [vmem:[#allocation13 + $0x1f0] sm:$0xff]  ;;  %v13674_v50 = vld [vmem:[#allocation13 + $0x2b8] sm:$0xff] }
 0x8cf   :  { %v13656_v29 = vld [vmem:[#allocation13 + $0x228] sm:$0xff] }
 0x93b   :  { %v13086_v16 = vpop.f32.mrb[112].mxu0 }
 0x93c   :  { %v13192_v27 = vpop.f32.mrb[128].mxu1  ;;  %v13088_v1 = vpop.f32.mrb[113].mxu0 }
 0x93d   :  { %v13194_v11 = vpop.f32.mrb[129].mxu1  ;;  %v13090_v22 = vpop.f32.mrb[114].mxu0 }
 0x93e   :  { %v15837_v20 = vpack.c.bf16 %v13090_v22, %v13086_v16  ;;  %v13196_v5 = vpop.f32.mrb[130].mxu1  ;;  %v13092_v15 = vpop.f32.mrb[115].mxu0  ;;  %v13609_v16 = vld [vmem:[#allocation13 + $0xb0] sm:$0xff]  ;;  %v15868_v22 = vpack.c.bf16 %v13592_v8, %v13591_v43  ;;  %v15918_v43 = vpack.c.bf16 %v13650_v46, %v13649_v41  ;;  %v13634_v8 = vld [vmem:[#allocation13 + $0x178] sm:$0xff]  ;;  %v13676_v41 = vld [vmem:[#allocation13 + $0x2c8] sm:$0xff] }
 0x93f   :  { %v15849_v0 = vpack.c.bf16 %v13196_v5, %v13192_v27  ;;  %v15834_v9 = vpack.c.bf16 %v13092_v15, %v13088_v1  ;;  %v13198_v59 = vpop.f32.mrb[131].mxu1  ;;  %v13610_v27 = vld [vmem:[#allocation13 + $0xb8] sm:$0xff]  ;;  %v13641_v1 = vld [vmem:[#allocation13 + $0x1b0] sm:$0xff]  ;;  %v13707_v46 = vld [vmem:[#allocation13 + $0x3c0] sm:$0xff] }
 0x940   :  { %v15846_v34 = vpack.c.bf16 %v13198_v59, %v13194_v11  ;;  %v13642_v11 = vld [vmem:[#allocation13 + $0x1b8] sm:$0xff]  ;;  %v13593_v5 = vld [vmem:[#allocation13 + $0x30] sm:$0xff] }
 0x941   :  { %15836 = vmatprep.subr.msk.bf16.mxu0 %vm15835_vm5, %v15834_v9  ;;  %vm19683_vm5 = vmpackc.low %vm13263_vm15, %vm13255_vm13  ;;  %v13594_v15 = vld [vmem:[#allocation13 + $0x38] sm:$0xff]  ;;  %v15902_v9 = vpack.c.bf16 %v13642_v11, %v13641_v1 }
 0x942   :  { %15848 = vmatprep.subr.msk.bf16.mxu1 %vm15847_vm8, %v15846_v34  ;;  %15839 = vmatpush1.bf16.msk.msra.mxu0 %vm15838_vm9, %v15837_v20  ;;  %v15870_v20 = vpack.c.bf16 %v13610_v27, %v13609_v16  ;;  %v13626_v59 = vld [vmem:[#allocation13 + $0x138] sm:$0xff]  ;;  %v13611_v34 = vld [vmem:[#allocation13 + $0xc0] sm:$0xff]  ;;  %v13700_v16 = vld [vmem:[#allocation13 + $0x388] sm:$0xff] }
 0x943   :  { %15851 = vmatpush1.bf16.msk.msra.mxu1 %vm15850_vm10, %v15849_v0  ;;  %v13096_v13 = vpop.f32.mrb[116].mxu0  ;;  %v13625_v0 = vld [vmem:[#allocation13 + $0x130] sm:$0xff] }
 0x944   :  { %v13202_v14 = vpop.f32.mrb[132].mxu1  ;;  %v13098_v49 = vpop.f32.mrb[117].mxu0  ;;  %v15904_v4 = vpack.c.bf16 %v13626_v59, %v13625_v0  ;;  %v13669_v0 = vld [vmem:[#allocation13 + $0x290] sm:$0xff] }
 0x945   :  { %v13204_v37 = vpop.f32.mrb[133].mxu1  ;;  %v13100_v47 = vpop.f32.mrb[118].mxu0  ;;  %v13701_v59 = vld [vmem:[#allocation13 + $0x390] sm:$0xff] }
 0x946   :  { %v15843_v45 = vpack.c.bf16 %v13100_v47, %v13096_v13  ;;  %v13206_v58 = vpop.f32.mrb[134].mxu1  ;;  %v13102_v61 = vpop.f32.mrb[119].mxu0  ;;  %v13612_v13 = vld [vmem:[#allocation13 + $0xc8] sm:$0xff]  ;;  %v13627_v47 = vld [vmem:[#allocation13 + $0x140] sm:$0xff] }
 0x947   :  { %v15855_v63 = vpack.c.bf16 %v13206_v58, %v13202_v14  ;;  %v15840_v3 = vpack.c.bf16 %v13102_v61, %v13098_v49  ;;  %v13208_v40 = vpop.f32.mrb[135].mxu1  ;;  %v13644_v14 = vld [vmem:[#allocation13 + $0x1c8] sm:$0xff]  ;;  %v15872_v49 = vpack.c.bf16 %v13594_v15, %v13593_v5  ;;  %v15874_v7 = vpack.c.bf16 %v13612_v13, %v13611_v34  ;;  %v13645_v58 = vld [vmem:[#allocation13 + $0x1d0] sm:$0xff]  ;;  %v13646_v61 = vld [vmem:[#allocation13 + $0x1d8] sm:$0xff] }
 0x948   :  { %v15852_v44 = vpack.c.bf16 %v13208_v40, %v13204_v37  ;;  %v13596_v37 = vld [vmem:[#allocation13 + $0x48] sm:$0xff]  ;;  %v15906_v30 = vpack.c.bf16 %v13644_v14, %v13643_v23  ;;  %v13597_v40 = vld [vmem:[#allocation13 + $0x50] sm:$0xff]  ;;  %v15910_v19 = vpack.c.bf16 %v13646_v61, %v13645_v58  ;;  %v13683_v5 = vld [vmem:[#allocation13 + $0x300] sm:$0xff] }
 0x949   :  { %15842 = vmatprep.subr.msk.bf16.mxu0 %vm19677_vm2, %v15840_v3  ;;  %v15876_v48 = vpack.c.bf16 %v13596_v37, %v13595_v2  ;;  %v13684_v15 = vld [vmem:[#allocation13 + $0x308] sm:$0xff]  ;;  %v13702_v34 = vld [vmem:[#allocation13 + $0x398] sm:$0xff]  ;;  %v13653_v2 = vld [vmem:[#allocation13 + $0x210] sm:$0xff] }
 0x94a   :  { %15854 = vmatprep.subr.msk.bf16.mxu1 %vm19683_vm5, %v15852_v44  ;;  %15845 = vmatpush1.bf16.msk.msra.mxu0 %vm19687_vm6, %v15843_v45  ;;  %v13614_v45 = vld [vmem:[#allocation13 + $0xd8] sm:$0xff]  ;;  %v13615_v44 = vld [vmem:[#allocation13 + $0xe0] sm:$0xff]  ;;  %v13672_v58 = vld [vmem:[#allocation13 + $0x2a8] sm:$0xff] }
 0x94b   :  { %15857 = vmatpush1.bf16.msk.msra.mxu1 %vm19693_vm7, %v15855_v63  ;;  %15859 = vmatprep.subr.bf16.mxu0 %v15858_v35  ;;  %v15908_v63 = vpack.c.bf16 %v13628_v24, %v13627_v47  ;;  %v15878_v3 = vpack.c.bf16 %v13614_v45, %v13613_v39  ;;  %v13598_v35 = vld [vmem:[#allocation13 + $0x58] sm:$0xff]  ;;  %v13685_v47 = vld [vmem:[#allocation13 + $0x310] sm:$0xff]  ;;  %v15958_v24 = vpack.c.bf16 %v13702_v34, %v13701_v59  ;;  %v13671_v45 = vld [vmem:[#allocation13 + $0x2a0] sm:$0xff] }
 0x94c   :  { %15891 = vmatprep.subr.bf16.mxu1 %v15890_v55  ;;  %v13616_v55 = vld [vmem:[#allocation13 + $0xe8] sm:$0xff]  ;;  %v15880_v12 = vpack.c.bf16 %v13598_v35, %v13597_v40  ;;  %v13654_v37 = vld [vmem:[#allocation13 + $0x218] sm:$0xff]  ;;  %v13703_v61 = vld [vmem:[#allocation13 + $0x3a0] sm:$0xff]  ;;  %v15930_v40 = vpack.c.bf16 %v13672_v58, %v13671_v45 }
 0x94d   :  { %15606 = vmatmul.mubr.msk.f32.vlgmr.msra.gmra.mrb[122].mxu0 %vm13299_vm14, %v19651_v10  ;;  %v15882_v51 = vpack.c.bf16 %v13616_v55, %v13615_v44  ;;  %v13686_v39 = vld [vmem:[#allocation13 + $0x318] sm:$0xff]  ;;  %v13655_v35 = vld [vmem:[#allocation13 + $0x220] sm:$0xff]  ;;  %v13688_v44 = vld [vmem:[#allocation13 + $0x328] sm:$0xff] }
 0x94e   :  { %15615 = vmatmul.mubr.msk.f32.vlgmr.msra.gmra.mrb[138].mxu1 %vm13299_vm14, %v19651_v10  ;;  %15861 = vmatpush3.bf16.msra.mxu0 %v15860_v31  ;;  %v15900_v10 = vpack.c.bf16 %v13624_v21, %v13623_v17  ;;  %v13599_v31 = vld [vmem:[#allocation13 + $0x60] sm:$0xff]  ;;  %v13673_v55 = vld [vmem:[#allocation13 + $0x2b0] sm:$0xff]  ;;  %v13680_v59 = vld [vmem:[#allocation13 + $0x2e8] sm:$0xff]  ;;  %vm16980_vm14 = vmmov 0  }
 0x94f   :  { %15893 = vmatpush3.bf16.msra.mxu1 %v15892_v18  ;;  %15863 = vmatprep.subr.bf16.mxu0 %v15862_v28  ;;  %v13600_v18 = vld [vmem:[#allocation13 + $0x68] sm:$0xff]  ;;  %v13631_v28 = vld [vmem:[#allocation13 + $0x160] sm:$0xff]  ;;  %v13714_v45 = vld [vmem:[#allocation13 + $0x3f8] sm:$0xff] }
 0x950   :  { %15895 = vmatprep.subr.bf16.mxu1 %v15894_v36  ;;  %v13618_v36 = vld [vmem:[#allocation13 + $0xf8] sm:$0xff]  ;;  %v15884_v57 = vpack.c.bf16 %v13600_v18, %v13599_v31  ;;  %v15916_v60 = vpack.c.bf16 %v13632_v26, %v13631_v28  ;;  %v13667_v17 = vld [vmem:[#allocation13 + $0x280] sm:$0xff]  ;;  %v15934_v31 = vpack.c.bf16 %v13674_v50, %v13673_v55  ;;  %v13657_v18 = vld [vmem:[#allocation13 + $0x230] sm:$0xff] }
 0x951   :  { %v15886_v38 = vpack.c.bf16 %v13618_v36, %v13617_v53  ;;  %v13699_v21 = vld [vmem:[#allocation13 + $0x380] sm:$0xff]  ;;  %v13658_v28 = vld [vmem:[#allocation13 + $0x238] sm:$0xff]  ;;  %v14004_v50 = vld [vmem:[#allocation15 + $0x8] sm:$0xff] }
 0x952   :  { %15865 = vmatpush3.bf16.msra.mxu0 %v15864_v42  ;;  %v13601_v42 = vld [vmem:[#allocation13 + $0x70] sm:$0xff]  ;;  %v13690_v53 = vld [vmem:[#allocation13 + $0x338] sm:$0xff]  ;;  %v13675_v36 = vld [vmem:[#allocation13 + $0x2c0] sm:$0xff] }
 0x953   :  { %15897 = vmatpush3.bf16.msra.mxu1 %v15896_v33  ;;  %15867 = vmatprep.subr.bf16.mxu0 %v15866_v62  ;;  %v13602_v33 = vld [vmem:[#allocation13 + $0x78] sm:$0xff]  ;;  %v13633_v62 = vld [vmem:[#allocation13 + $0x170] sm:$0xff]  ;;  %v13711_v34 = vld [vmem:[#allocation13 + $0x3e0] sm:$0xff] }
 0x954   :  { %15899 = vmatprep.subr.bf16.mxu1 %v15898_v6  ;;  %v13668_v6 = vld [vmem:[#allocation13 + $0x288] sm:$0xff]  ;;  %v15888_v27 = vpack.c.bf16 %v13602_v33, %v13601_v42  ;;  %v15920_v1 = vpack.c.bf16 %v13634_v8, %v13633_v62  ;;  %v15938_v42 = vpack.c.bf16 %v13676_v41, %v13675_v36  ;;  %v13659_v33 = vld [vmem:[#allocation13 + $0x240] sm:$0xff]  ;;  %v14009_v41 = vld [vmem:[#allocation15 + $0x30] sm:$0xff] }
 0x955   :  { %v15922_v11 = vpack.c.bf16 %v13668_v6, %v13667_v17  ;;  %v13660_v62 = vld [vmem:[#allocation13 + $0x248] sm:$0xff]  ;;  %v13677_v6 = vld [vmem:[#allocation13 + $0x2d0] sm:$0xff]  ;;  %v14003_v55 = vld [vmem:[#allocation15] sm:$0xff] }
 0x956   :  { %15869 = vmatpush3.bf16.msra.mxu0 %v15868_v22  ;;  %v15954_v22 = vpack.c.bf16 %v13700_v16, %v13699_v21  ;;  %v13692_v17 = vld [vmem:[#allocation13 + $0x348] sm:$0xff]  ;;  %v13678_v21 = vld [vmem:[#allocation13 + $0x2d8] sm:$0xff]  ;;  %v13709_v16 = vld [vmem:[#allocation13 + $0x3d0] sm:$0xff] }
 0x957   :  { %15901 = vmatpush3.bf16.msra.mxu1 %v15900_v10  ;;  %15871 = vmatprep.subr.bf16.mxu0 %v15870_v20  ;;  %v13651_v10 = vld [vmem:[#allocation13 + $0x200] sm:$0xff]  ;;  %v13652_v20 = vld [vmem:[#allocation13 + $0x208] sm:$0xff] }
 0x958   :  { %15903 = vmatprep.subr.bf16.mxu1 %v15902_v9  ;;  %v13670_v9 = vld [vmem:[#allocation13 + $0x298] sm:$0xff]  ;;  %v15924_v23 = vpack.c.bf16 %v13652_v20, %v13651_v10  ;;  %v13661_v10 = vld [vmem:[#allocation13 + $0x250] sm:$0xff] }
 0x959   :  { %v13662_v20 = vld [vmem:[#allocation13 + $0x258] sm:$0xff] }
 0x95a   :  { %15873 = vmatpush3.bf16.msra.mxu0 %v15872_v49 }
 0x95b   :  { %15905 = vmatpush3.bf16.msra.mxu1 %v15904_v4  ;;  %15875 = vmatprep.subr.bf16.mxu0 %v15874_v7  ;;  %v15956_v4 = vpack.c.bf16 %v13684_v15, %v13683_v5  ;;  %v15926_v7 = vpack.c.bf16 %v13670_v9, %v13669_v0  ;;  %v13693_v5 = vld [vmem:[#allocation13 + $0x350] sm:$0xff]  ;;  %v13694_v0 = vld [vmem:[#allocation13 + $0x358] sm:$0xff]  ;;  %v13679_v9 = vld [vmem:[#allocation13 + $0x2e0] sm:$0xff] }
 0x95c   :  { %15907 = vmatprep.subr.bf16.mxu1 %v15906_v30 }
 0x95e   :  { %15877 = vmatpush3.bf16.msra.mxu0 %v15876_v48  ;;  %v13704_v48 = vld [vmem:[#allocation13 + $0x3a8] sm:$0xff] }
 0x95f   :  { %15909 = vmatpush3.bf16.msra.mxu1 %v15908_v63  ;;  %15879 = vmatprep.subr.bf16.mxu0 %v15878_v3  ;;  %v15928_v63 = vpack.c.bf16 %v13654_v37, %v13653_v2  ;;  %v15960_v3 = vpack.c.bf16 %v13686_v39, %v13685_v47  ;;  %v15962_v32 = vpack.c.bf16 %v13704_v48, %v13703_v61  ;;  %v13695_v2 = vld [vmem:[#allocation13 + $0x360] sm:$0xff]  ;;  %v13696_v47 = vld [vmem:[#allocation13 + $0x368] sm:$0xff]  ;;  %v13713_v39 = vld [vmem:[#allocation13 + $0x3f0] sm:$0xff] }
 0x960   :  { %15911 = vmatprep.subr.bf16.mxu1 %v15910_v19  ;;  %v13687_v19 = vld [vmem:[#allocation13 + $0x320] sm:$0xff]  ;;  %v15980_v61 = vpack.c.bf16 %v13696_v47, %v13695_v2 }
 0x962   :  { %15881 = vmatpush3.bf16.msra.mxu0 %v15880_v12  ;;  %v13706_v12 = vld [vmem:[#allocation13 + $0x3b8] sm:$0xff] }
 0x963   :  { %15913 = vmatpush3.bf16.msra.mxu1 %v15912_v54  ;;  %15883 = vmatprep.subr.bf16.mxu0 %v15882_v51  ;;  %v15932_v54 = vpack.c.bf16 %v13656_v29, %v13655_v35  ;;  %v15964_v51 = vpack.c.bf16 %v13688_v44, %v13687_v19  ;;  %v15966_v26 = vpack.c.bf16 %v13706_v12, %v13705_v56  ;;  %v13697_v35 = vld [vmem:[#allocation13 + $0x370] sm:$0xff]  ;;  %v13698_v29 = vld [vmem:[#allocation13 + $0x378] sm:$0xff]  ;;  %v16979_v44 = vmov 0.0|0.0  }
 0x964   :  { %15915 = vmatprep.subr.bf16.mxu1 %v15914_v52  ;;  %v13689_v52 = vld [vmem:[#allocation13 + $0x330] sm:$0xff]  ;;  %v15987_v12 = vpack.c.bf16 %v14004_v50, %v14003_v55 }
 0x966   :  { %15885 = vmatpush3.bf16.msra.mxu0 %v15884_v57  ;;  %v13708_v57 = vld [vmem:[#allocation13 + $0x3c8] sm:$0xff] }
 0x967   :  { %15917 = vmatpush3.bf16.msra.mxu1 %v15916_v60  ;;  %15887 = vmatprep.subr.bf16.mxu0 %v15886_v38  ;;  %v15936_v60 = vpack.c.bf16 %v13658_v28, %v13657_v18  ;;  %v15968_v38 = vpack.c.bf16 %v13690_v53, %v13689_v52  ;;  %v15970_v8 = vpack.c.bf16 %v13708_v57, %v13707_v46  ;;  %v14006_v18 = vld [vmem:[#allocation15 + $0x18] sm:$0xff]  ;;  %v14008_v53 = vld [vmem:[#allocation15 + $0x28] sm:$0xff] }
 0x968   :  { %15919 = vmatprep.subr.bf16.mxu1 %v15918_v43  ;;  %v13691_v43 = vld [vmem:[#allocation13 + $0x340] sm:$0xff]  ;;  %v14010_v46 = vld [vmem:[#allocation15 + $0x38] sm:$0xff] }
 0x969   :  { %v15996_v57 = vpack.c.bf16 %v14010_v46, %v14009_v41 }
 0x96a   :  { %15889 = vmatpush3.bf16.msra.mxu0 %v15888_v27  ;;  %v13710_v27 = vld [vmem:[#allocation13 + $0x3d8] sm:$0xff] }
 0x96b   :  { %15921 = vmatpush3.bf16.msra.mxu1 %v15920_v1  ;;  %15923 = vmatprep.subr.bf16.mxu0 %v15922_v11  ;;  %v15940_v1 = vpack.c.bf16 %v13660_v62, %v13659_v33  ;;  %v15972_v11 = vpack.c.bf16 %v13692_v17, %v13691_v43  ;;  %v15974_v15 = vpack.c.bf16 %v13710_v27, %v13709_v16  ;;  %v14013_v33 = vld [vmem:[#allocation15 + $0x50] sm:$0xff]  ;;  %v14014_v62 = vld [vmem:[#allocation15 + $0x58] sm:$0xff] }
 0x96c   :  { %15955 = vmatprep.subr.bf16.mxu1 %v15954_v22  ;;  %v15942_v22 = vpack.c.bf16 %v13678_v21, %v13677_v6  ;;  %v16002_v43 = vpack.c.bf16 %v14014_v62, %v14013_v33  ;;  %v15616_v17 = vld [vmem:[#allocation12] ss:$0 sm:$0xff] }
 0x99f   :  { %v13369_v13 = vpop.f32.mrb[120].mxu0  ;;  %v13440_v49 = vpop.f32.mrb[136].mxu1 }
 0x9a0   :  { %v13371_v14 = vpop.f32.mrb[121].mxu0  ;;  %v13442_v30 = vpop.f32.mrb[137].mxu1 }
 0x9a1   :  { %13786 = vmatprep.mubr.f32.mxu0 %v13371_v14  ;;  %13856 = vmatprep.mubr.f32.mxu1 %v13442_v30  ;;  %v15976_v14 = vpack.c.bf16 %v13694_v0, %v13693_v5  ;;  %v13681_v30 = vld [vmem:[#allocation13 + $0x2f0] sm:$0xff]  ;;  %v14018_v0 = vld [vmem:[#allocation15 + $0x78] sm:$0xff] }
 0x9a2   :  { %13787 = vmatmul.mubr.f32.vlgmr.msra.gmra.mrb[124].mxu0 %v13369_v13  ;;  %13857 = vmatmul.mubr.f32.vlgmr.msra.gmra.mrb[140].mxu1 %v13440_v49  ;;  %v13712_v13 = vld [vmem:[#allocation13 + $0x3e8] sm:$0xff]  ;;  %v15946_v49 = vpack.c.bf16 %v13680_v59, %v13679_v9 }
 0x9a3   :  { %15925 = vmatpush3.bf16.msra.mxu0 %v15924_v23  ;;  %15957 = vmatpush3.bf16.msra.mxu1 %v15956_v4  ;;  %v15944_v23 = vpack.c.bf16 %v13662_v20, %v13661_v10  ;;  %v13663_v4 = vld [vmem:[#allocation13 + $0x260] sm:$0xff]  ;;  %v15978_v37 = vpack.c.bf16 %v13712_v13, %v13711_v34 }
 0x9a4   :  { %15927 = vmatprep.subr.bf16.mxu0 %v15926_v7  ;;  %15959 = vmatprep.subr.bf16.mxu1 %v15958_v24  ;;  %v13664_v7 = vld [vmem:[#allocation13 + $0x268] sm:$0xff]  ;;  %v13682_v24 = vld [vmem:[#allocation13 + $0x2f8] sm:$0xff] }
 0x9a5   :  { %v15948_v58 = vpack.c.bf16 %v13664_v7, %v13663_v4  ;;  %v15950_v48 = vpack.c.bf16 %v13682_v24, %v13681_v30 }
 0x9a7   :  { %15929 = vmatpush3.bf16.msra.mxu0 %v15928_v63  ;;  %15961 = vmatpush3.bf16.msra.mxu1 %v15960_v3  ;;  %v13665_v63 = vld [vmem:[#allocation13 + $0x270] sm:$0xff]  ;;  %v13666_v3 = vld [vmem:[#allocation13 + $0x278] sm:$0xff] }
 0x9a8   :  { %15931 = vmatprep.subr.bf16.mxu0 %v15930_v40  ;;  %15963 = vmatprep.subr.bf16.mxu1 %v15962_v32  ;;  %v15982_v40 = vpack.c.bf16 %v13714_v45, %v13713_v39  ;;  %v15952_v19 = vpack.c.bf16 %v13666_v3, %v13665_v63  ;;  %v15984_v32 = vpack.c.bf16 %v13698_v29, %v13697_v35 }
 0x9ab   :  { %15933 = vmatpush3.bf16.msra.mxu0 %v15932_v54  ;;  %15965 = vmatpush3.bf16.msra.mxu1 %v15964_v51 }
 0x9ac   :  { %15935 = vmatprep.subr.bf16.mxu0 %v15934_v31  ;;  %15967 = vmatprep.subr.bf16.mxu1 %v15966_v26  ;;  %v14005_v31 = vld [vmem:[#allocation15 + $0x10] sm:$0xff]  ;;  %v14007_v26 = vld [vmem:[#allocation15 + $0x20] sm:$0xff] }
 0x9ad   :  { %v15990_v52 = vpack.c.bf16 %v14006_v18, %v14005_v31  ;;  %v15993_v36 = vpack.c.bf16 %v14008_v53, %v14007_v26 }
 0x9af   :  { %15937 = vmatpush3.bf16.msra.mxu0 %v15936_v60  ;;  %15969 = vmatpush3.bf16.msra.mxu1 %v15968_v38  ;;  %v14011_v60 = vld [vmem:[#allocation15 + $0x40] sm:$0xff]  ;;  %v14012_v38 = vld [vmem:[#allocation15 + $0x48] sm:$0xff] }
 0x9b0   :  { %15939 = vmatprep.subr.bf16.mxu0 %v15938_v42  ;;  %15971 = vmatprep.subr.bf16.mxu1 %v15970_v8  ;;  %v15999_v42 = vpack.c.bf16 %v14012_v38, %v14011_v60 }
 0x9b3   :  { %15941 = vmatpush3.bf16.msra.mxu0 %v15940_v1  ;;  %15973 = vmatpush3.bf16.msra.mxu1 %v15972_v11  ;;  %v14015_v11 = vld [vmem:[#allocation15 + $0x60] sm:$0xff] }
 0x9b4   :  { %15943 = vmatprep.subr.bf16.mxu0 %v15942_v22  ;;  %15975 = vmatprep.subr.bf16.mxu1 %v15974_v15  ;;  %v14016_v22 = vld [vmem:[#allocation15 + $0x68] sm:$0xff]  ;;  %v14017_v15 = vld [vmem:[#allocation15 + $0x70] sm:$0xff] }
 0x9b5   :  { %v16005_v20 = vpack.c.bf16 %v14016_v22, %v14015_v11  ;;  %v16008_v9 = vpack.c.bf16 %v14018_v0, %v14017_v15 }
 0x9b7   :  { %15945 = vmatpush3.bf16.msra.mxu0 %v15944_v23  ;;  %15977 = vmatpush3.bf16.msra.mxu1 %v15976_v14 }
 0x9b8   :  { %15947 = vmatprep.subr.bf16.mxu0 %v15946_v49  ;;  %15979 = vmatprep.subr.bf16.mxu1 %v15978_v37  ;;  %v15617_v37 = vld [vmem:[#allocation16] ss:$0 sm:$0xff] }
 0x9bb   :  { %15949 = vmatpush3.bf16.msra.mxu0 %v15948_v58  ;;  %15981 = vmatpush3.bf16.msra.mxu1 %v15980_v61 }
 0x9bc   :  { %15951 = vmatprep.subr.bf16.mxu0 %v15950_v48  ;;  %15983 = vmatprep.subr.bf16.mxu1 %v15982_v40 }
 0x9bf   :  { %15953 = vmatpush3.bf16.msra.mxu0 %v15952_v19  ;;  %15985 = vmatpush3.bf16.msra.mxu1 %v15984_v32 }
 0x9c0   :  { %15986 = vmatprep.subr.bf16.mxu0 %v16979_v44 }
 0xa20   :  { %v13511_v56 = vpop.f32.mrb[122].mxu0 }
 0xa21   :  { %v13513_v54 = vpop.f32.mrb[123].mxu0  ;;  %v13582_v51 = vpop.f32.mrb[138].mxu1 }
 0xa22   :  { %13926 = vmatprep.mubr.f32.mxu0 %v13513_v54  ;;  %v13584_v28 = vpop.f32.mrb[139].mxu1 }
 0xa23   :  { %13927 = vmatmul.mubr.f32.vlgmr.msra.gmra.mrb[126].mxu0 %v13511_v56  ;;  %13996 = vmatprep.mubr.f32.mxu1 %v13584_v28 }
 0xa24   :  { %13997 = vmatmul.mubr.f32.vlgmr.msra.gmra.mrb[142].mxu1 %v13582_v51  ;;  %15988 = vmatpush3.bf16.msra.mxu0 %v15987_v12 }
 0xa25   :  { %15989 = vmatprep.subr.bf16.mxu0 %v16979_v44  ;;  %15807 = vmatprep.mubr.msk.f32.mxu0 %vm16980_vm14, %v19949_v25 }
 0xa28   :  { %15991 = vmatpush3.bf16.msra.mxu0 %v15990_v52 }
 0xa29   :  { %15992 = vmatprep.subr.bf16.mxu0 %v16979_v44 }
 0xa2c   :  { %15994 = vmatpush3.bf16.msra.mxu0 %v15993_v36 }
 0xa2d   :  { %15995 = vmatprep.subr.bf16.mxu0 %v16979_v44 }
 0xa30   :  { %15997 = vmatpush3.bf16.msra.mxu0 %v15996_v57 }
 0xa31   :  { %15998 = vmatprep.subr.bf16.mxu0 %v16979_v44 }
 0xa34   :  { %16000 = vmatpush3.bf16.msra.mxu0 %v15999_v42 }
 0xa35   :  { %16001 = vmatprep.subr.bf16.mxu0 %v16979_v44 }
 0xa38   :  { %16003 = vmatpush3.bf16.msra.mxu0 %v16002_v43 }
 0xa39   :  { %16004 = vmatprep.subr.bf16.mxu0 %v16979_v44 }
 0xa3c   :  { %16006 = vmatpush3.bf16.msra.mxu0 %v16005_v20 }
 0xa3d   :  { %16007 = vmatprep.subr.bf16.mxu0 %v16979_v44 }
 0xa40   :  { %16009 = vmatpush3.bf16.msra.mxu0 %v16008_v9 }
 0xa75   :  { %v15650_v8 = vpop.f32.mrb[124].mxu0  ;;  %v15685_v21 = vpop.f32.mrb[140].mxu1 }
 0xa76   :  { %v15651_v6 = vpop.f32.mrb[125].mxu0  ;;  %v15686_v27 = vpop.f32.mrb[141].mxu1 }
 0xa77   :  { %v15652_v16 = vadd.f32 %v15651_v6, %v15650_v8  ;;  %v15687_v1 = vadd.f32 %v15686_v27, %v15685_v21 }
 0xa79   :  { %v13789_v10 = vadd.f32 %v15652_v16, %v15616_v17 }
 0xa7b   :  { %v13859_v5 = vadd.f32 %v15687_v1, %v13789_v10 }
 0xaf6   :  { %v15720_v59 = vpop.f32.mrb[126].mxu0 }
 0xaf7   :  { %v15721_v34 = vpop.f32.mrb[127].mxu0  ;;  %v15755_v13 = vpop.f32.mrb[142].mxu1 }
 0xaf8   :  { %v15722_v23 = vadd.f32 %v15721_v34, %v15720_v59  ;;  %v15756_v14 = vpop.f32.mrb[143].mxu1 }
 0xaf9   :  { %v15757_v49 = vadd.f32 %v15756_v14, %v15755_v13 }
 0xafa   :  { %v13929_v4 = vadd.f32 %v15722_v23, %v13859_v5 }
 0xafc   :  { %v13999_v7 = vadd.f32 %v15757_v49, %v13929_v4 }
 0xafe   :  { %v14002_v2 = vmax.f32 %v13999_v7, 0.0 }
 0xb00   :  { %15808 = vmatmul.mubr.f32.vlgmr.msra.gmra.mrb[128].mxu0 %v14002_v2 }
 0xbd3   :  { %v14092_v47 = vpop.f32.mrb[128].mxu0 }
 0xbd4   :  { %v14093_v30 = vadd.f32 %v15617_v37, %v14092_v47  ;;  %v15809_v24 = vpop.f32.mrb[129].mxu0 }
 0xbd6   :  { %14096 = vst [vmem:[#allocation18] sm:$0x3] %v14093_v30 }
 0xbd7   :  { %16942 = shalt.err (!%p16939_p12)
}
 0xbd8   :  { %s16943_s12 = scalar_lea.hbm %s19732_s10, 32 }
 0xbd9   :  { %p16944_p13 = scmp.ne.s32.totalorder %s19732_s10, %s16943_s12  ;;  %p16947_p0 = scmp.lt.u32.totalorder %s16943_s12, %s19732_s10 }
 0xbdb   :  { %p16949_p1 = pnand %p16947_p0, %p16944_p13 }
 0xbdd   :  { %16952 = shalt.err (!%p16949_p1)
}
 0xbde   :  { %14106 = dma.vmem_to_hbm [thread:$0]  %s14104_s29, 32, %s19732_s10, [#allocation6]  }
 0xbdf   :  { %16963 = dma.done.wait [#allocation6], 32  }
 0xbe0   :  { %16964 = vsyncadd [#allocation6], 4294967264 }
 0xbe1   :  { %14110 = vsyncpa [#allocation5], 1 }
 0xbe2   :  { %14111 = vsyncpa [#allocation8], 1 }
 0xbe3   :  { %14112 = vsyncpa [#allocation11], 1 }
 0xbe4   :  { %14113 = vsyncpa [#allocation14], 1 }
 0xbe5   :  { %14114 = vsyncpa [#allocation17], 1 }
 0xbe6   :  { %14115 = vsyncpa [#allocation6], 1 }

</bundles_post_ra>
